<compile_context>
chip_gen: v7x
topology: tpu7x:2x2x1
jax: 0.10.0
libtpu: 0.0.40
codegen_flags: <defaults>
</compile_context>

<pallas_src>
import functools

import jax
import jax.numpy as jnp
from jax import lax
from jax.experimental import pallas as pl
from jax.experimental.pallas import tpu as pltpu


def _conv3d_kernel(x_ref, w_ref, b_ref, o_ref, *,
                   kd, kh, kw, cin, cout, do, wo, th):
    # x_ref : (Dp, Hp, Wp, Cin)        full padded volume of one batch element
    #                                  (resident across all H tiles of this n)
    # w_ref : (K, Cout)  K = kd*kh*kw*Cin   resident (constant index_map)
    # b_ref : (1, Cout)                resident
    # o_ref : (Do, TH, Wo, Cout)       output H tile
    thh = th + kh - 1
    h0 = pl.multiple_of(pl.program_id(1) * th, th)

    # Halo window of TH + kh - 1 input rows for this output H tile.
    xs = x_ref[:, pl.ds(h0, thh), :, :]            # (Dp, THh, Wp, Cin)

    # im2col built as a value: kd*kh*kw shifted patches concatenated along the
    # channel axis -> one big MXU matmul with K = kd*kh*kw*Cin.
    patches = []
    for zd in range(kd):
        for zh in range(kh):
            for zw in range(kw):
                patches.append(xs[zd:zd + do, zh:zh + th, zw:zw + wo, :])
    cols = jnp.concatenate(patches, axis=-1)        # (Do, TH, Wo, K)

    m = do * th * wo
    k = kd * kh * kw * cin
    cols = cols.reshape(m, k)

    acc = jnp.dot(cols, w_ref[...], preferred_element_type=jnp.float32)
    acc = acc + b_ref[...].astype(jnp.float32)      # (M, Cout) + (1, Cout)
    o_ref[...] = acc.reshape(do, th, wo, cout).astype(o_ref.dtype)


def _pick_th(ho, do, wo, k):
    """Largest divisor of Ho whose f32 im2col slab stays under ~6 MiB."""
    budget = 6 * 1024 * 1024
    th = 1
    for cand in range(1, ho + 1):
        if ho % cand == 0 and do * cand * wo * k * 4 <= budget:
            th = cand
    return th


def conv3d_pallas(x_ncdhw, weight_oidhw, bias, *, stride=1, padding=0):
    """3-D convolution matching nn.Conv3d (stride=1 only), bias included."""
    if isinstance(stride, int):
        stride = (stride,) * 3
    if isinstance(padding, int):
        padding = (padding,) * 3
    assert stride == (1, 1, 1), "Pallas kernel implemented for stride=1 (module default)"

    N, Cin, D, H, W = x_ncdhw.shape
    Cout, Cin_w, kd, kh, kw = weight_oidhw.shape
    assert Cin == Cin_w
    pd, ph, pw = padding

    # Glue: channels-last layout + zero padding in plain JAX.
    x_ndhwc = jnp.transpose(x_ncdhw, (0, 2, 3, 4, 1))
    x_pad = jnp.pad(x_ndhwc, ((0, 0), (pd, pd), (ph, ph), (pw, pw), (0, 0)))
    Dp, Hp, Wp = D + 2 * pd, H + 2 * ph, W + 2 * pw
    Do, Ho, Wo = Dp - kd + 1, Hp - kh + 1, Wp - kw + 1

    # Weights: (Cout, Cin, kd, kh, kw) -> (kd*kh*kw*Cin, Cout); K order
    # (zd, zh, zw, cin) matches the im2col concatenation order.  No Cout padding.
    K = kd * kh * kw * Cin
    w_2d = jnp.transpose(weight_oidhw, (2, 3, 4, 1, 0)).reshape(K, Cout)

    if bias is None:
        bias = jnp.zeros((Cout,), x_ncdhw.dtype)
    b_2d = bias.reshape(1, Cout).astype(x_ncdhw.dtype)

    TH = _pick_th(Ho, Do, Wo, K)
    n_h = Ho // TH
    M = Do * TH * Wo

    itemsize = jnp.dtype(x_ncdhw.dtype).itemsize
    in_blk_bytes = Dp * Hp * Wp * Cin * itemsize
    out_blk_bytes = Do * TH * Wo * Cout * itemsize
    w_bytes = (K + 1) * Cout * itemsize
    work_bytes = M * K * 4 + M * Cout * 4 + Dp * (TH + kh - 1) * Wp * Cin * 4
    vmem_needed = 2 * in_blk_bytes + 2 * out_blk_bytes + 2 * w_bytes + 2 * work_bytes
    vmem_limit = int(min(56 * (1 << 20), max(vmem_needed + (4 << 20), 16 << 20)))

    cost = pl.CostEstimate(
        flops=2 * N * Do * Ho * Wo * Cout * kd * kh * kw * Cin,
        transcendentals=0,
        bytes_accessed=(x_pad.size * itemsize + w_2d.size * itemsize
                        + b_2d.size * itemsize
                        + N * Do * Ho * Wo * Cout * itemsize),
    )

    kernel = functools.partial(_conv3d_kernel, kd=kd, kh=kh, kw=kw, cin=Cin,
                               cout=Cout, do=Do, wo=Wo, th=TH)

    out = pl.pallas_call(
        kernel,
        out_shape=jax.ShapeDtypeStruct((N, Do, Ho, Wo, Cout), x_ncdhw.dtype),
        grid_spec=pltpu.PrefetchScalarGridSpec(
            num_scalar_prefetch=0,
            grid=(N, n_h),
            in_specs=[
                # Full padded volume of batch element n; block index constant
                # along the H-tile axis -> DMA'd once per n, then resident.
                pl.BlockSpec((None, Dp, Hp, Wp, Cin),
                             lambda n, h: (n, 0, 0, 0, 0)),
                # Weights / bias: constant block index -> fetched once, resident.
                pl.BlockSpec((K, Cout), lambda n, h: (0, 0)),
                pl.BlockSpec((1, Cout), lambda n, h: (0, 0)),
            ],
            out_specs=pl.BlockSpec((None, Do, TH, Wo, Cout),
                                   lambda n, h: (n, 0, h, 0, 0)),
        ),
        compiler_params=pltpu.CompilerParams(
            dimension_semantics=("parallel", "parallel"),
            vmem_limit_bytes=vmem_limit,
        ),
        cost_estimate=cost,
    )(x_pad, w_2d, b_2d)

    return jnp.transpose(out, (0, 4, 1, 2, 3))      # back to NCDHW


if __name__ == "__main__":
    # Module config (defaults: stride=1, bias=True, batchnorm=False)
    in_ch, out_ch = 4, 8
    kernel_size = (3, 3, 3)
    stride, padding = 1, 1

    # Small input consistent with Conv3d: NCDHW
    N, D, H, W = 2, 4, 8, 8
    key = jax.random.PRNGKey(0)
    kx, kw_, kb = jax.random.split(key, 3)

    x = jax.random.normal(kx, (N, in_ch, D, H, W), dtype=jnp.float32)

    # Deterministic parameter init (uniform in +/- 1/sqrt(fan_in), like PyTorch)
    fan_in = in_ch * kernel_size[0] * kernel_size[1] * kernel_size[2]
    bound = 1.0 / (fan_in ** 0.5)
    weight = jax.random.uniform(
        kw_, (out_ch, in_ch) + kernel_size, minval=-bound, maxval=bound,
        dtype=jnp.float32)
    bias = jax.random.uniform(
        kb, (out_ch,), minval=-bound, maxval=bound, dtype=jnp.float32)

    out = conv3d_pallas(x, weight, bias, stride=stride, padding=padding)
    out = jax.block_until_ready(out)

    # Reference with XLA's conv to confirm exact semantics
    ref = lax.conv_general_dilated(
        x, weight,
        window_strides=(1, 1, 1),
        padding=[(padding, padding)] * 3,
        dimension_numbers=("NCDHW", "OIDHW", "NCDHW"),
    ) + bias[None, :, None, None, None]

    assert out.shape == ref.shape, (out.shape, ref.shape)
    assert jnp.allclose(out, ref, atol=1e-4, rtol=1e-4), float(
        jnp.max(jnp.abs(out - ref)))

    print("KERNEL_OK")
</pallas_src>

<mosaic_0001>
module attributes {stable_mosaic.version = 11 : i64} {
  func.func @_conv3d_kernel(%arg0: i32, %arg1: i32, %arg2: memref<1x6x10x10x4xf32, #tpu.memory_space<vmem>>, %arg3: memref<108x8xf32, #tpu.memory_space<vmem>>, %arg4: memref<1x8xf32, #tpu.memory_space<vmem>>, %arg5: memref<1x4x8x8x8xf32, #tpu.memory_space<vmem>>) attributes {dimension_semantics = [#tpu.dimension_semantics<parallel>, #tpu.dimension_semantics<parallel>], iteration_bounds = array<i64: 2, 1>, scalar_prefetch = 0 : i64, scratch_operands = 0 : i64, tpu.core_type = #tpu.core_type<tc>, window_params = [{transform_indices = @transform_0, window_bounds = array<i64: 1, 6, 10, 10, 4>}, {pipeline_mode = #tpu.pipeline_mode<synchronous>, transform_indices = @transform_1, window_bounds = array<i64: 108, 8>}, {pipeline_mode = #tpu.pipeline_mode<synchronous>, transform_indices = @transform_2, window_bounds = array<i64: 1, 8>}, {transform_indices = @transform_3, window_bounds = array<i64: 1, 4, 8, 8, 8>}]} {
    %c8_i32 = arith.constant 8 : i32
    %0 = arith.muli %arg1, %c8_i32 : i32
    %1 = tpu.assume_multiple %0, 8 : i32
    %c0 = arith.constant 0 : index
    %c0_0 = arith.constant 0 : index
    %2 = arith.index_cast %1 : i32 to index
    %c0_1 = arith.constant 0 : index
    %c0_2 = arith.constant 0 : index
    %3 = vector.load %arg2[%c0, %c0_0, %2, %c0_1, %c0_2] : memref<1x6x10x10x4xf32, #tpu.memory_space<vmem>>, vector<1x6x10x10x4xf32>
    %4 = vector.shape_cast %3 : vector<1x6x10x10x4xf32> to vector<6x10x10x4xf32>
    %5 = vector.extract_strided_slice %4 {offsets = [0, 0, 0, 0], sizes = [4, 8, 8, 4], strides = [1, 1, 1, 1]} : vector<6x10x10x4xf32> to vector<4x8x8x4xf32>
    %6 = vector.extract_strided_slice %4 {offsets = [0, 0, 1, 0], sizes = [4, 8, 8, 4], strides = [1, 1, 1, 1]} : vector<6x10x10x4xf32> to vector<4x8x8x4xf32>
    %7 = vector.extract_strided_slice %4 {offsets = [0, 0, 2, 0], sizes = [4, 8, 8, 4], strides = [1, 1, 1, 1]} : vector<6x10x10x4xf32> to vector<4x8x8x4xf32>
    %8 = vector.extract_strided_slice %4 {offsets = [0, 1, 0, 0], sizes = [4, 8, 8, 4], strides = [1, 1, 1, 1]} : vector<6x10x10x4xf32> to vector<4x8x8x4xf32>
    %9 = vector.extract_strided_slice %4 {offsets = [0, 1, 1, 0], sizes = [4, 8, 8, 4], strides = [1, 1, 1, 1]} : vector<6x10x10x4xf32> to vector<4x8x8x4xf32>
    %10 = vector.extract_strided_slice %4 {offsets = [0, 1, 2, 0], sizes = [4, 8, 8, 4], strides = [1, 1, 1, 1]} : vector<6x10x10x4xf32> to vector<4x8x8x4xf32>
    %11 = vector.extract_strided_slice %4 {offsets = [0, 2, 0, 0], sizes = [4, 8, 8, 4], strides = [1, 1, 1, 1]} : vector<6x10x10x4xf32> to vector<4x8x8x4xf32>
    %12 = vector.extract_strided_slice %4 {offsets = [0, 2, 1, 0], sizes = [4, 8, 8, 4], strides = [1, 1, 1, 1]} : vector<6x10x10x4xf32> to vector<4x8x8x4xf32>
    %13 = vector.extract_strided_slice %4 {offsets = [0, 2, 2, 0], sizes = [4, 8, 8, 4], strides = [1, 1, 1, 1]} : vector<6x10x10x4xf32> to vector<4x8x8x4xf32>
    %14 = vector.extract_strided_slice %4 {offsets = [1, 0, 0, 0], sizes = [4, 8, 8, 4], strides = [1, 1, 1, 1]} : vector<6x10x10x4xf32> to vector<4x8x8x4xf32>
    %15 = vector.extract_strided_slice %4 {offsets = [1, 0, 1, 0], sizes = [4, 8, 8, 4], strides = [1, 1, 1, 1]} : vector<6x10x10x4xf32> to vector<4x8x8x4xf32>
    %16 = vector.extract_strided_slice %4 {offsets = [1, 0, 2, 0], sizes = [4, 8, 8, 4], strides = [1, 1, 1, 1]} : vector<6x10x10x4xf32> to vector<4x8x8x4xf32>
    %17 = vector.extract_strided_slice %4 {offsets = [1, 1, 0, 0], sizes = [4, 8, 8, 4], strides = [1, 1, 1, 1]} : vector<6x10x10x4xf32> to vector<4x8x8x4xf32>
    %18 = vector.extract_strided_slice %4 {offsets = [1, 1, 1, 0], sizes = [4, 8, 8, 4], strides = [1, 1, 1, 1]} : vector<6x10x10x4xf32> to vector<4x8x8x4xf32>
    %19 = vector.extract_strided_slice %4 {offsets = [1, 1, 2, 0], sizes = [4, 8, 8, 4], strides = [1, 1, 1, 1]} : vector<6x10x10x4xf32> to vector<4x8x8x4xf32>
    %20 = vector.extract_strided_slice %4 {offsets = [1, 2, 0, 0], sizes = [4, 8, 8, 4], strides = [1, 1, 1, 1]} : vector<6x10x10x4xf32> to vector<4x8x8x4xf32>
    %21 = vector.extract_strided_slice %4 {offsets = [1, 2, 1, 0], sizes = [4, 8, 8, 4], strides = [1, 1, 1, 1]} : vector<6x10x10x4xf32> to vector<4x8x8x4xf32>
    %22 = vector.extract_strided_slice %4 {offsets = [1, 2, 2, 0], sizes = [4, 8, 8, 4], strides = [1, 1, 1, 1]} : vector<6x10x10x4xf32> to vector<4x8x8x4xf32>
    %23 = vector.extract_strided_slice %4 {offsets = [2, 0, 0, 0], sizes = [4, 8, 8, 4], strides = [1, 1, 1, 1]} : vector<6x10x10x4xf32> to vector<4x8x8x4xf32>
    %24 = vector.extract_strided_slice %4 {offsets = [2, 0, 1, 0], sizes = [4, 8, 8, 4], strides = [1, 1, 1, 1]} : vector<6x10x10x4xf32> to vector<4x8x8x4xf32>
    %25 = vector.extract_strided_slice %4 {offsets = [2, 0, 2, 0], sizes = [4, 8, 8, 4], strides = [1, 1, 1, 1]} : vector<6x10x10x4xf32> to vector<4x8x8x4xf32>
    %26 = vector.extract_strided_slice %4 {offsets = [2, 1, 0, 0], sizes = [4, 8, 8, 4], strides = [1, 1, 1, 1]} : vector<6x10x10x4xf32> to vector<4x8x8x4xf32>
    %27 = vector.extract_strided_slice %4 {offsets = [2, 1, 1, 0], sizes = [4, 8, 8, 4], strides = [1, 1, 1, 1]} : vector<6x10x10x4xf32> to vector<4x8x8x4xf32>
    %28 = vector.extract_strided_slice %4 {offsets = [2, 1, 2, 0], sizes = [4, 8, 8, 4], strides = [1, 1, 1, 1]} : vector<6x10x10x4xf32> to vector<4x8x8x4xf32>
    %29 = vector.extract_strided_slice %4 {offsets = [2, 2, 0, 0], sizes = [4, 8, 8, 4], strides = [1, 1, 1, 1]} : vector<6x10x10x4xf32> to vector<4x8x8x4xf32>
    %30 = vector.extract_strided_slice %4 {offsets = [2, 2, 1, 0], sizes = [4, 8, 8, 4], strides = [1, 1, 1, 1]} : vector<6x10x10x4xf32> to vector<4x8x8x4xf32>
    %31 = vector.extract_strided_slice %4 {offsets = [2, 2, 2, 0], sizes = [4, 8, 8, 4], strides = [1, 1, 1, 1]} : vector<6x10x10x4xf32> to vector<4x8x8x4xf32>
    %32 = tpu.concatenate %5, %6, %7, %8, %9, %10, %11, %12, %13, %14, %15, %16, %17, %18, %19, %20 in 3 : vector<4x8x8x4xf32>, vector<4x8x8x4xf32>, vector<4x8x8x4xf32>, vector<4x8x8x4xf32>, vector<4x8x8x4xf32>, vector<4x8x8x4xf32>, vector<4x8x8x4xf32>, vector<4x8x8x4xf32>, vector<4x8x8x4xf32>, vector<4x8x8x4xf32>, vector<4x8x8x4xf32>, vector<4x8x8x4xf32>, vector<4x8x8x4xf32>, vector<4x8x8x4xf32>, vector<4x8x8x4xf32>, vector<4x8x8x4xf32> -> vector<4x8x8x64xf32>
    %33 = tpu.concatenate %21, %22, %23, %24, %25, %26, %27, %28, %29, %30, %31 in 3 : vector<4x8x8x4xf32>, vector<4x8x8x4xf32>, vector<4x8x8x4xf32>, vector<4x8x8x4xf32>, vector<4x8x8x4xf32>, vector<4x8x8x4xf32>, vector<4x8x8x4xf32>, vector<4x8x8x4xf32>, vector<4x8x8x4xf32>, vector<4x8x8x4xf32>, vector<4x8x8x4xf32> -> vector<4x8x8x44xf32>
    %34 = tpu.concatenate %32, %33 in 3 : vector<4x8x8x64xf32>, vector<4x8x8x44xf32> -> vector<4x8x8x108xf32>
    %35 = vector.shape_cast %34 : vector<4x8x8x108xf32> to vector<256x108xf32>
    %c0_3 = arith.constant 0 : index
    %c0_4 = arith.constant 0 : index
    %36 = vector.load %arg3[%c0_3, %c0_4] : memref<108x8xf32, #tpu.memory_space<vmem>>, vector<108x8xf32>
    %cst = arith.constant dense<0.000000e+00> : vector<256x8xf32>
    %37 = tpu.matmul %35, %36, %cst {dimension_numbers = #tpu.dot_dimension_numbers<[1], [0], [0], [1], [0, 0, 1, 1], [], []>} : vector<256x108xf32>, vector<108x8xf32>, vector<256x8xf32> -> vector<256x8xf32>
    %c0_5 = arith.constant 0 : index
    %c0_6 = arith.constant 0 : index
    %38 = vector.load %arg4[%c0_5, %c0_6] : memref<1x8xf32, #tpu.memory_space<vmem>>, vector<1x8xf32>
    %39 = vector.broadcast %38 : vector<1x8xf32> to vector<256x8xf32>
    %40 = arith.addf %37, %39 : vector<256x8xf32>
    %41 = vector.shape_cast %40 : vector<256x8xf32> to vector<4x8x8x8xf32>
    %c0_7 = arith.constant 0 : index
    %c0_8 = arith.constant 0 : index
    %c0_9 = arith.constant 0 : index
    %c0_10 = arith.constant 0 : index
    %c0_11 = arith.constant 0 : index
    %42 = vector.load %arg5[%c0_7, %c0_8, %c0_9, %c0_10, %c0_11] : memref<1x4x8x8x8xf32, #tpu.memory_space<vmem>>, vector<1x4x8x8x8xf32>
    %43 = vector.shape_cast %42 : vector<1x4x8x8x8xf32> to vector<4x8x8x8xf32>
    %44 = vector.shape_cast %41 : vector<4x8x8x8xf32> to vector<1x4x8x8x8xf32>
    tpu.vector_store %arg5[%c0_7, %c0_8, %c0_9, %c0_10, %c0_11], %44 {strides = array<i32>} : memref<1x4x8x8x8xf32, #tpu.memory_space<vmem>>, vector<1x4x8x8x8xf32>,
    return
  }
  func.func @transform_0(%arg0: i32, %arg1: i32) -> (i32, i32, i32, i32, i32) {
    %c0_i32 = arith.constant 0 : i32
    %c0_i32_0 = arith.constant 0 : i32
    %c0_i32_1 = arith.constant 0 : i32
    %c0_i32_2 = arith.constant 0 : i32
    %c0_i32_3 = arith.constant 0 : i32
    return %arg0, %c0_i32, %c0_i32_0, %c0_i32_1, %c0_i32_2 : i32, i32, i32, i32, i32
  }
  func.func @transform_1(%arg0: i32, %arg1: i32) -> (i32, i32) {
    %c0_i32 = arith.constant 0 : i32
    %c0_i32_0 = arith.constant 0 : i32
    %c0_i32_1 = arith.constant 0 : i32
    return %c0_i32, %c0_i32_0 : i32, i32
  }
  func.func @transform_2(%arg0: i32, %arg1: i32) -> (i32, i32) {
    %c0_i32 = arith.constant 0 : i32
    %c0_i32_0 = arith.constant 0 : i32
    %c0_i32_1 = arith.constant 0 : i32
    return %c0_i32, %c0_i32_0 : i32, i32
  }
  func.func @transform_3(%arg0: i32, %arg1: i32) -> (i32, i32, i32, i32, i32) {
    %c0_i32 = arith.constant 0 : i32
    %c0_i32_0 = arith.constant 0 : i32
    %c0_i32_1 = arith.constant 0 : i32
    %c0_i32_2 = arith.constant 0 : i32
    return %arg0, %c0_i32, %arg1, %c0_i32_0, %c0_i32_1 : i32, i32, i32, i32, i32
  }
}

</mosaic_0001>

<bundles_post_ra>
// kernel: tpu_custom_call.1
= control target key start
LH: loop header
LB: loop body
LE: loop exit
PB: predicated region body
PF: predicated region fallthrough
CT: control target
= control target key end

     0   :  { %8 = vsyncpa [#allocation3], 0  ;;  %s14460_s0 = inlined_call_operand.vmem [shape: f32[2,6,10,10,4], index: 0, kind: input, shape index: {}]   ;;  %s14461_s1 = inlined_call_operand.vmem [shape: f32[108,8], index: 1, kind: input, shape index: {}]   ;;  %s14462_s2 = inlined_call_operand.vmem [shape: f32[1,8], index: 2, kind: input, shape index: {}]   ;;  %s14463_s3 = inlined_call_operand.hbm [shape: f32[2,4,8,8,8], index: 3, kind: output, shape index: {}]  }
   0x1   :  { %10 = vsyncpa [#allocation3 + $0x1], 0  ;;  %s6007_s12 = smov 0   ;;  %s6009_s13 = smov 0  }
   0x2   :  { %s6011_s14 = smov 0   ;;  %s6013_s15 = smov 0  }
   0x3   :  { %s6015_s16 = smov 0   ;;  %s6017_s17 = smov 0  }
   0x4 LB: > { %s5414_s18 = sadd.s32 4294967295, %s5966_s17   ;;  %s5415_s19 = sadd.s32 4294967294, %s5966_s17   ;;  %s5966_s17 = sphi %s6017_s17, %s16_s17   ;;  %s5962_s16 = sphi %s6015_s16, %s17359_s16   ;;  %s5958_s15 = sphi %s6013_s15, %s17358_s15   ;;  %s5954_s14 = sphi %s6011_s14, %s17357_s14   ;;  %s5950_s13 = sphi %s6009_s13, %s17356_s13   ;;  %s5946_s12 = sphi %s6007_s12, %s17355_s12  }
   0x5   : > { %s28_s20 = sadd.s32 1, %s5962_s16  ;;  %s105_s21 = sadd.s32 1, %s5954_s14 }
   0x6   : > { %p30_p0 = scmp.ge.s32.totalorder %s28_s20, 2  ;;  %p115_p1 = scmp.ne.s32.totalorder %s5954_s14, %s5950_s13 }
   0x7   : > { %p116_p2 = scmp.eq.s32.totalorder %s5414_s18, 1  ;;  %p121_p3 = scmp.ne.s32.totalorder %s5950_s13, %s5946_s12 }
   0x8   : > { %s17361_s20 = smov (%p30_p0, %s28_s20), 0  ;;  %p122_p5 = scmp.eq.s32.totalorder %s5415_s19, 1 }
   0x9   : > { %p6047_p4 = por %p116_p2, %p115_p1  ;;  %s100_s23 = ssub.s32 %s5962_s16, %s17361_s20 }
   0xa   : > { %p5418_p6 = scmp.ge.s32.totalorder %s5966_s17, 1  ;;  %p103_p7 = scmp.eq.s32.totalorder %s100_s23, 0 }
   0xb   : > { %p6054_p8 = por %p122_p5, %p121_p3  ;;  %p154_p9 = scmp.lt.s32.totalorder %s5966_s17, 3 }
   0xc   : > { %s6060_s25 = scalar_select %p103_p7, %s5954_s14, %s105_s21  }
   0xd   : > { %p155_p10 = pnand %p5418_p6, %p154_p9 }
   0xf   : > { %158 = sbr.rel (%p155_p10) target bundleno = 2385 (0x951), region = 32 }
  0x16   : > { %p178_p11 = scmp.lt.s32.totalorder %s5958_s15, 1  ;;  %vm371_vm0 = vcmask 1046528   ;;  %s5968_s4 = smov 4   ;;  %vm564_vm1 = vcmask 1045504   ;;  %vm2142_vm2 = vcmask 31744   ;;  %vm2175_vm3 = vcmask 64512  }
  0x17   : > { %s5969_s5 = smov 8   ;;  %s5970_s6 = smov 12   ;;  %vm2208_vm4 = vcmask 97280   ;;  %vm2241_vm5 = vcmask 130048   ;;  %vm2274_vm6 = vcmask 162816   ;;  %vm2307_vm7 = vcmask 195584  }
  0x18   : > { %s179_s26 = scalar_select %p178_p11, %s5958_s15, 1  ;;  %vm15008_vm8 = vcmask 228352   ;;  %vm15007_vm9 = vcmask 261120   ;;  %vm2406_vm10 = vcmask 293888   ;;  %vm2439_vm11 = vcmask 326656  }
  0x19   : > { %s5971_s7 = smov 16   ;;  %s5972_s8 = smov 20   ;;  %vm2472_vm12 = vcmask 359424   ;;  %vm2505_vm13 = vcmask 392192   ;;  %vm15006_vm14 = vcmask 424960   ;;  %vm15005_vm15 = vcmask 457728  }
  0x1a   : > { %s5627_s27 = smul.u32 960, %s179_s26  ;;  %s5973_s9 = smov 24  }
  0x1b   : > { %s5974_s10 = smov 28   ;;  %s5975_s11 = smov 32  }
  0x1c   : > { %s6067_s30 = scalar_lea.vmem %s14460_s0, %s5627_s27  ;;  %s5976_s18 = smov 36  }
  0x1d   : > { %v6070_v0 = vld [vmem:[%s6067_s30 + $0x20] sm:$0xff]  ;;  %v6073_v1 = vld [vmem:[%s6067_s30 + $0x28] sm:$0x3]  ;;  %v6085_v7 = vld [vmem:[%s6067_s30 + $0x30] sm:$0xff]  ;;  %s5977_s19 = smov 40   ;;  %s5978_s21 = smov 44  }
  0x1e   : > { %v6076_v2 = vld [vmem:[%s6067_s30] sm:$0xff]  ;;  %v378_v3 = vrot.slane %v6070_v0, 1  ;;  %v379_v4 = vrot.slane %v6073_v1, 1  ;;  %v6081_v5 = vld [vmem:[%s6067_s30 + $0x8] sm:$0x3]  ;;  %v381_v10 = vrot.slane %v6085_v7, 1 }
  0x1f   : > { %v372_v6 = vrot.slane %v6076_v2, 1  ;;  %v373_v8 = vrot.slane %v6081_v5, 1  ;;  %v6089_v9 = vld [vmem:[%s6067_s30 + $0x38] sm:$0x3]  ;;  %v6093_v11 = vld [vmem:[%s6067_s30 + $0x10] sm:$0xff]  ;;  %v6114_v20 = vld [vmem:[%s6067_s30 + $0x40] sm:$0xff] }
  0x20   : > { %v6096_v12 = vld [vmem:[%s6067_s30 + $0x50] sm:$0xff]  ;;  %v6099_v13 = vsel %vm371_vm0, %v378_v3, %v379_v4  ;;  %v382_v14 = vrot.slane %v6089_v9, 1  ;;  %v6103_v15 = vld [vmem:[%s6067_s30 + $0x18] sm:$0x3]  ;;  %v375_v16 = vrot.slane %v6093_v11, 1  ;;  %v384_v26 = vrot.slane %v6114_v20, 1 }
  0x21   : > { %15011 = vst [vmem:[#allocation5_spill] sm:$0xff] %v6099_v13  ;;  %v6107_v17 = vld [vmem:[%s6067_s30 + $0x58] sm:$0x3]  ;;  %472 = vrot.lane.b32.xlu1 %v6099_v13, %s5968_s4  ;;  %v374_v18 = vsel %vm371_vm0, %v372_v6, %v373_v8  ;;  %v376_v19 = vrot.slane %v6103_v15, 1  ;;  %v6117_v21 = vld [vmem:[%s6067_s30 + $0x48] sm:$0x3] }
  0x22   : > { %468 = vrot.lane.b32.xlu0 %v374_v18, %s5968_s4  ;;  %v6121_v22 = vsel %vm371_vm0, %v381_v10, %v382_v14  ;;  %v387_v23 = vrot.slane %v6096_v12, 1  ;;  %v388_v24 = vrot.slane %v6107_v17, 1  ;;  %v385_v27 = vrot.slane %v6117_v21, 1  ;;  %v6131_v28 = vld [vmem:[%s6067_s30 + $0x70] sm:$0xff]  ;;  %v6134_v29 = vld [vmem:[%s6067_s30 + $0x78] sm:$0x3] }
  0x23   : > { %15012 = vst [vmem:[#allocation6_spill] sm:$0xff] %v6121_v22  ;;  %v6126_v25 = vsel %vm371_vm0, %v375_v16, %v376_v19  ;;  %v6137_v30 = vld [vmem:[%s6067_s30 + $0x60] sm:$0xff]  ;;  %v6140_v31 = vld [vmem:[%s6067_s30 + $0x68] sm:$0x3]  ;;  %v393_v33 = vrot.slane %v6131_v28, 1  ;;  %v394_v34 = vrot.slane %v6134_v29, 1 }
  0x24   : > { %15013 = vst [vmem:[#allocation7_spill] sm:$0xff] %v6126_v25  ;;  %v6147_v32 = vsel %vm371_vm0, %v387_v23, %v388_v24  ;;  %v6152_v35 = vsel %vm371_vm0, %v384_v26, %v385_v27  ;;  %v390_v36 = vrot.slane %v6137_v30, 1  ;;  %v391_v37 = vrot.slane %v6140_v31, 1  ;;  %v6157_v38 = vld [vmem:[%s6067_s30 + $0xb0] sm:$0xff]  ;;  %v6160_v39 = vld [vmem:[%s6067_s30 + $0xb8] sm:$0x3] }
  0x25   : > { %474 = vrot.lane.b32.xlu1 %v6121_v22, %s5968_s4  ;;  %15014 = vst [vmem:[#allocation8_spill] sm:$0xff] %v6147_v32  ;;  %15015 = vst [vmem:[#allocation9_spill] sm:$0xff] %v6152_v35  ;;  %v6163_v40 = vld [vmem:[%s6067_s30 + $0xa0] sm:$0xff]  ;;  %v6166_v41 = vld [vmem:[%s6067_s30 + $0xa8] sm:$0x3]  ;;  %v6173_v42 = vsel %vm371_vm0, %v393_v33, %v394_v34  ;;  %v399_v43 = vrot.slane %v6157_v38, 1 }
  0x26   : > { %470 = vrot.lane.b32.xlu0 %v6126_v25, %s5968_s4  ;;  %15016 = vst [vmem:[#allocation10_spill] sm:$0xff] %v6173_v42  ;;  %v400_v44 = vrot.slane %v6160_v39, 1  ;;  %v6178_v45 = vsel %vm371_vm0, %v390_v36, %v391_v37  ;;  %v396_v46 = vrot.slane %v6163_v40, 1  ;;  %v397_v47 = vrot.slane %v6166_v41, 1  ;;  %v6183_v48 = vld [vmem:[%s6067_s30 + $0xd0] sm:$0xff]  ;;  %v6189_v50 = vld [vmem:[%s6067_s30 + $0xc0] sm:$0xff] }
  0x27   : > { %15017 = vst [vmem:[#allocation11_spill] sm:$0xff] %v6178_v45  ;;  %v6186_v49 = vld [vmem:[%s6067_s30 + $0xd8] sm:$0x3]  ;;  %v6192_v51 = vld [vmem:[%s6067_s30 + $0xc8] sm:$0x3]  ;;  %v405_v53 = vrot.slane %v6183_v48, 1 }
  0x28   : > { %15018 = vst [vmem:[#allocation12_spill] sm:$0xff] %v6186_v49  ;;  %15019 = vst [vmem:[#allocation13_spill] sm:$0xff] %v6192_v51  ;;  %v6199_v52 = vsel %vm371_vm0, %v399_v43, %v400_v44  ;;  %v14469_v54 = vrot.slane %v6186_v49, 1  ;;  %v6204_v55 = vsel %vm371_vm0, %v396_v46, %v397_v47  ;;  %v402_v56 = vrot.slane %v6189_v50, 1  ;;  %v6209_v58 = vld [vmem:[%s6067_s30 + $0xf0] sm:$0xff]  ;;  %v6215_v60 = vld [vmem:[%s6067_s30 + $0xe0] sm:$0xff] }
  0x29   : > { %478 = vrot.lane.b32.xlu1 %v6147_v32, %s5968_s4  ;;  %15020 = vst [vmem:[#allocation14_spill] sm:$0xff] %v6199_v52  ;;  %15021 = vst [vmem:[#allocation15_spill] sm:$0xff] %v6204_v55  ;;  %v14468_v57 = vrot.slane %v6192_v51, 1  ;;  %v6212_v59 = vld [vmem:[%s6067_s30 + $0xf8] sm:$0x3]  ;;  %v411_v63 = vrot.slane %v6209_v58, 1 }
  0x2a   : > { %476 = vrot.lane.b32.xlu0 %v6152_v35, %s5968_s4  ;;  %15022 = vst [vmem:[#allocation16_spill] sm:$0xff] %v6212_v59  ;;  %v6218_v61 = vld [vmem:[%s6067_s30 + $0xe8] sm:$0x3]  ;;  %v6227_v62 = vsel %vm371_vm0, %v405_v53, %v14469_v54  ;;  %v14467_v3 = vrot.slane %v6212_v59, 1  ;;  %v408_v6 = vrot.slane %v6215_v60, 1  ;;  %v6239_v10 = vld [vmem:[%s6067_s30 + $0x110] sm:$0xff] }
  0x2b   : > { %15023 = vst [vmem:[#allocation17_spill] sm:$0xff] %v6218_v61  ;;  %15024 = vst [vmem:[#allocation18_spill] sm:$0xff] %v6227_v62  ;;  %v6234_v4 = vsel %vm371_vm0, %v402_v56, %v14468_v57  ;;  %v14465_v8 = vrot.slane %v6218_v61, 1  ;;  %v6242_v14 = vld [vmem:[%s6067_s30 + $0x118] sm:$0x3]  ;;  %v6245_v16 = vld [vmem:[%s6067_s30 + $0x100] sm:$0xff] }
  0x2c   : > { %15025 = vst [vmem:[#allocation19_spill] sm:$0xff] %v6234_v4  ;;  %15026 = vst [vmem:[#allocation20_spill] sm:$0xff] %v6242_v14  ;;  %v6248_v18 = vld [vmem:[%s6067_s30 + $0x108] sm:$0x3]  ;;  %v6257_v19 = vsel %vm371_vm0, %v411_v63, %v14467_v3  ;;  %v417_v23 = vrot.slane %v6239_v10, 1  ;;  %v14464_v24 = vrot.slane %v6242_v14, 1 }
  0x2d   : > { %482 = vrot.lane.b32.xlu1 %v6173_v42, %s5968_s4  ;;  %15027 = vst [vmem:[#allocation21_spill] sm:$0xff] %v6248_v18  ;;  %15028 = vst [vmem:[#allocation22_spill] sm:$0xff] %v6257_v19  ;;  %v6264_v26 = vsel %vm371_vm0, %v408_v6, %v14465_v8  ;;  %v414_v27 = vrot.slane %v6245_v16, 1  ;;  %v14466_v33 = vrot.slane %v6248_v18, 1  ;;  %v6269_v34 = vld [vmem:[%s6067_s30 + $0x150] sm:$0xff]  ;;  %v6275_v37 = vld [vmem:[%s6067_s30 + $0x140] sm:$0xff] }
  0x2e   : > { %480 = vrot.lane.b32.xlu0 %v6178_v45, %s5968_s4  ;;  %15029 = vst [vmem:[#allocation23_spill] sm:$0xff] %v6264_v26  ;;  %v6272_v36 = vld [vmem:[%s6067_s30 + $0x158] sm:$0x3]  ;;  %v6278_v43 = vld [vmem:[%s6067_s30 + $0x148] sm:$0x3]  ;;  %v6287_v44 = vsel %vm371_vm0, %v417_v23, %v14464_v24  ;;  %v423_v46 = vrot.slane %v6269_v34, 1 }
  0x2f   : > { %15030 = vst [vmem:[#allocation24_spill] sm:$0xff] %v6278_v43  ;;  %15031 = vst [vmem:[#allocation25_spill] sm:$0xff] %v6287_v44  ;;  %v6291_v47 = vrot.slane %v6272_v36, 1  ;;  %v6296_v53 = vsel %vm371_vm0, %v414_v27, %v14466_v33  ;;  %v420_v56 = vrot.slane %v6275_v37, 1  ;;  %v14477_v63 = vrot.slane %v6278_v43, 1  ;;  %v6301_v6 = vld [vmem:[%s6067_s30 + $0x170] sm:$0xff] }
  0x30   : > { %15033 = vst [vmem:[#allocation27_spill] sm:$0xff] %v6296_v53  ;;  %v6304_v23 = vld [vmem:[%s6067_s30 + $0x178] sm:$0x3]  ;;  %v6307_v24 = vld [vmem:[%s6067_s30 + $0x160] sm:$0xff]  ;;  %v6310_v8 = vld [vmem:[%s6067_s30 + $0x168] sm:$0x3] }
  0x31   : > { %486 = vrot.lane.b32.xlu1 %v6199_v52, %s5968_s4  ;;  %15032 = vst [vmem:[#allocation26_spill] sm:$0xff] %v6291_v47  ;;  %v6318_v27 = vsel %vm371_vm0, %v423_v46, %v6291_v47  ;;  %v429_v33 = vrot.slane %v6301_v6, 1  ;;  %v6322_v3 = vrot.slane %v6304_v23, 1  ;;  %v6327_v57 = vsel %vm371_vm0, %v420_v56, %v14477_v63  ;;  %v6334_v46 = vld [vmem:[%s6067_s30 + $0x190] sm:$0xff]  ;;  %v6337_v47 = vld [vmem:[%s6067_s30 + $0x198] sm:$0x3] }
  0x32   : > { %484 = vrot.lane.b32.xlu0 %v6204_v55, %s5968_s4  ;;  %15034 = vst [vmem:[#allocation28_spill] sm:$0xff] %v6318_v27  ;;  %15036 = vst [vmem:[#allocation30_spill] sm:$0xff] %v6327_v57  ;;  %v426_v54 = vrot.slane %v6307_v24, 1  ;;  %v6331_v55 = vrot.slane %v6310_v8, 1  ;;  %v435_v63 = vrot.slane %v6334_v46, 1  ;;  %v6404_v32 = vld [vmem:[%s6067_s30 + $0x1e0] sm:$0xff] }
  0x33   : > { %15035 = vst [vmem:[#allocation29_spill] sm:$0xff] %v6322_v3  ;;  %v6351_v56 = vsel %vm371_vm0, %v429_v33, %v6322_v3  ;;  %v6366_v33 = vld [vmem:[%s6067_s30 + $0x1b0] sm:$0xff]  ;;  %v6369_v3 = vld [vmem:[%s6067_s30 + $0x1b8] sm:$0x3]  ;;  %v6375_v52 = vld [vmem:[%s6067_s30 + $0x1a8] sm:$0x3] }
  0x34   : > { %15037 = vst [vmem:[#allocation31_spill] sm:$0xff] %v6331_v55  ;;  %15038 = vst [vmem:[#allocation32_spill] sm:$0xff] %v6351_v56  ;;  %v6407_v45 = vld [vmem:[%s6067_s30 + $0x1e8] sm:$0x3]  ;;  %v6428_v25 = vld [vmem:[%s6067_s30 + $0x210] sm:$0xff]  ;;  %s5979_s23 = smov 48  }
  0x35   : > { %490 = vrot.lane.b32.xlu1 %v6227_v62, %s5968_s4  ;;  %v6359_v62 = vsel %vm371_vm0, %v426_v54, %v6331_v55  ;;  %v441_v55 = vrot.slane %v6366_v33, 1  ;;  %15048 = vst [vmem:[#allocation42_spill] sm:$0xff] %v6404_v32  ;;  %15049 = vst [vmem:[#allocation43_spill] sm:$0xff] %v6407_v45  ;;  %v6437_v13 = vld [vmem:[%s6067_s30 + $0x208] sm:$0x3]  ;;  %s5980_s26 = smov 52  }
  0x36   : > { %488 = vrot.lane.b32.xlu0 %v6234_v4, %s5968_s4  ;;  %15040 = vst [vmem:[#allocation34_spill] sm:$0xff] %v6359_v62  ;;  %v6387_v4 = vrot.slane %v6369_v3, 1  ;;  %15053 = vst [vmem:[#allocation47_spill] sm:$0xff] %v6428_v25  ;;  %s5981_s27 = smov 56   ;;  %s5982_s28 = smov 60  }
  0x37   : > { %15056 = vst [vmem:[#allocation50_spill] sm:$0xff] %v6437_v13 }
  0x38   : > { %15043 = vst [vmem:[#allocation37_spill] sm:$0xff] %v6387_v4 }
  0x39   : > { %494 = vrot.lane.b32.xlu1 %v6257_v19, %s5968_s4  ;;  %v6343_v19 = vld [vmem:[%s6067_s30 + $0x188] sm:$0x3] }
  0x3a   : > { %492 = vrot.lane.b32.xlu0 %v6264_v26, %s5968_s4  ;;  %v6372_v26 = vld [vmem:[%s6067_s30 + $0x1a0] sm:$0xff] }
  0x3d   : > { %498 = vrot.lane.b32.xlu1 %v6287_v44, %s5968_s4  ;;  %v6340_v44 = vld [vmem:[%s6067_s30 + $0x180] sm:$0xff] }
  0x3e   : > { %496 = vrot.lane.b32.xlu0 %v6296_v53, %s5968_s4  ;;  %v6355_v53 = vrot.slane %v6337_v47, 1 }
  0x40   : > { %15039 = vst [vmem:[#allocation33_spill] sm:$0xff] %v6355_v53  ;;  %v6383_v54 = vsel %vm371_vm0, %v435_v63, %v6355_v53  ;;  %v6398_v63 = vld [vmem:[%s6067_s30 + $0x1f0] sm:$0xff]  ;;  %v6401_v53 = vld [vmem:[%s6067_s30 + $0x1f8] sm:$0x3] }
  0x41   : > { %502 = vrot.lane.b32.xlu1 %v6318_v27, %s5968_s4  ;;  %v432_v27 = vrot.slane %v6340_v44, 1  ;;  %15042 = vst [vmem:[#allocation36_spill] sm:$0xff] %v6383_v54  ;;  %15046 = vst [vmem:[#allocation40_spill] sm:$0xff] %v6398_v63  ;;  %v6419_v22 = vrot.slane %v6401_v53, 1 }
  0x42   : > { %500 = vrot.lane.b32.xlu0 %v6327_v57, %s5968_s4  ;;  %v6363_v57 = vrot.slane %v6343_v19, 1  ;;  %15047 = vst [vmem:[#allocation41_spill] sm:$0xff] %v6401_v53 }
  0x43   : > { %15051 = vst [vmem:[#allocation45_spill] sm:$0xff] %v6419_v22 }
  0x44   : > { %15041 = vst [vmem:[#allocation35_spill] sm:$0xff] %v6363_v57  ;;  %v6391_v42 = vsel %vm371_vm0, %v432_v27, %v6363_v57  ;;  %v6415_v27 = vsel %vm371_vm0, %v441_v55, %v6387_v4  ;;  %v447_v57 = vrot.slane %v6398_v63, 1  ;;  %v6431_v55 = vld [vmem:[%s6067_s30 + $0x218] sm:$0x3]  ;;  %v6434_v4 = vld [vmem:[%s6067_s30 + $0x200] sm:$0xff]  ;;  %v6493_v63 = vld [vmem:[%s6067_s30 + $0x250] sm:$0xff] }
  0x45   : > { %506 = vrot.lane.b32.xlu1 %v6351_v56, %s5968_s4  ;;  %15044 = vst [vmem:[#allocation38_spill] sm:$0xff] %v6391_v42  ;;  %v438_v56 = vrot.slane %v6372_v26, 1  ;;  %15050 = vst [vmem:[#allocation44_spill] sm:$0xff] %v6415_v27 }
  0x46   : > { %504 = vrot.lane.b32.xlu0 %v6359_v62, %s5968_s4  ;;  %v6395_v62 = vrot.slane %v6375_v52, 1  ;;  %15054 = vst [vmem:[#allocation48_spill] sm:$0xff] %v6431_v55  ;;  %15055 = vst [vmem:[#allocation49_spill] sm:$0xff] %v6434_v4 }
  0x48   : > { %15045 = vst [vmem:[#allocation39_spill] sm:$0xff] %v6395_v62  ;;  %v6423_v35 = vsel %vm371_vm0, %v438_v56, %v6395_v62  ;;  %v6445_v56 = vsel %vm371_vm0, %v447_v57, %v6419_v22  ;;  %v6449_v62 = vrot.slane %v6431_v55, 1  ;;  %v6461_v57 = vld [vmem:[%s6067_s30 + $0x230] sm:$0xff]  ;;  %v6464_v22 = vld [vmem:[%s6067_s30 + $0x238] sm:$0x3]  ;;  %v6467_v55 = vld [vmem:[%s6067_s30 + $0x220] sm:$0xff] }
  0x49   : > { %510 = vrot.lane.b32.xlu1 %v6383_v54, %s5968_s4  ;;  %15052 = vst [vmem:[#allocation46_spill] sm:$0xff] %v6423_v35  ;;  %v444_v54 = vrot.slane %v6404_v32, 1  ;;  %15057 = vst [vmem:[#allocation51_spill] sm:$0xff] %v6445_v56  ;;  %v15059_v32 = vrot.slane %v6407_v45, 1  ;;  %v456_v45 = vrot.slane %v6467_v55, 1 }
  0x4a   : > { %508 = vrot.lane.b32.xlu0 %v6391_v42, %s5968_s4  ;;  %v453_v42 = vrot.slane %v6428_v25, 1  ;;  %15058 = vst [vmem:[#allocation52_spill] sm:$0xff] %v6449_v62  ;;  %15062 = vst [vmem:[#allocation55_spill] sm:$0xff] %v6464_v22  ;;  %v6470_v25 = vld [vmem:[%s6067_s30 + $0x228] sm:$0x3] }
  0x4b   : > { %v6454_v53 = vsel %vm371_vm0, %v444_v54, %v15059_v32  ;;  %15063 = vst [vmem:[#allocation56_spill] sm:$0xff] %v6467_v55  ;;  %15064 = vst [vmem:[#allocation57_spill] sm:$0xff] %v6470_v25  ;;  %v459_v54 = vrot.slane %v6461_v57, 1 }
  0x4c   : > { %15060 = vst [vmem:[#allocation53_spill] sm:$0xff] %v6454_v53  ;;  %v6478_v32 = vsel %vm371_vm0, %v453_v42, %v6449_v62  ;;  %v6499_v42 = vld [vmem:[%s6067_s30 + $0x240] sm:$0xff]  ;;  %v6502_v62 = vld [vmem:[%s6067_s30 + $0x248] sm:$0x3] }
  0x4d   : > { %514 = vrot.lane.b32.xlu1 %v6415_v27, %s5968_s4  ;;  %v450_v27 = vrot.slane %v6434_v4, 1  ;;  %15065 = vst [vmem:[#allocation58_spill] sm:$0xff] %v6478_v32 }
  0x4e   : > { %512 = vrot.lane.b32.xlu0 %v6423_v35, %s5968_s4  ;;  %v6458_v35 = vrot.slane %v6437_v13, 1  ;;  %v6482_v13 = vrot.slane %v6464_v22, 1  ;;  %v462_v22 = vrot.slane %v6499_v42, 1 }
  0x50   : > { %15061 = vst [vmem:[#allocation54_spill] sm:$0xff] %v6458_v35  ;;  %15066 = vst [vmem:[#allocation59_spill] sm:$0xff] %v6482_v13  ;;  %v6486_v4 = vsel %vm371_vm0, %v450_v27, %v6458_v35  ;;  %v6510_v27 = vsel %vm371_vm0, %v459_v54, %v6482_v13  ;;  %v465_v35 = vrot.slane %v6493_v63, 1  ;;  %v568_v13 = vrot.slane %v6093_v11, 2 }
  0x51   : > { %518 = vrot.lane.b32.xlu1 %v6445_v56, %s5968_s4  ;;  %15067 = vst [vmem:[#allocation60_spill] sm:$0xff] %v6486_v4  ;;  %v6490_v56 = vrot.slane %v6470_v25, 1  ;;  %15069 = vst [vmem:[#allocation62_spill] sm:$0xff] %v6510_v27 }
  0x52   : > { %516 = vrot.lane.b32.xlu0 %v6454_v53, %s5968_s4  ;;  %v6496_v53 = vld [vmem:[%s6067_s30 + $0x258] sm:$0x3] }
  0x53   : > { %15068 = vst [vmem:[#allocation61_spill] sm:$0xff] %v6490_v56  ;;  %v6514_v25 = vrot.slane %v6496_v53, 1  ;;  %v6518_v55 = vsel %vm371_vm0, %v456_v45, %v6490_v56  ;;  %v569_v45 = vrot.slane %v6103_v15, 2  ;;  %v574_v15 = vrot.slane %v6085_v7, 2 }
  0x54   : > { %15071 = vst [vmem:[#allocation64_spill] sm:$0xff] %v6518_v55 }
  0x55   : > { %522 = vrot.lane.b32.xlu1 %v6478_v32, %s5968_s4  ;;  %15070 = vst [vmem:[#allocation63_spill] sm:$0xff] %v6514_v25  ;;  %v6522_v32 = vrot.slane %v6502_v62, 1  ;;  %v6530_v54 = vsel %vm371_vm0, %v465_v35, %v6514_v25  ;;  %v6545_v35 = vsel %vm564_vm1, %v568_v13, %v569_v45  ;;  %v575_v25 = vrot.slane %v6089_v9, 2 }
  0x56   : > { %520 = vrot.lane.b32.xlu0 %v6486_v4, %s5968_s4  ;;  %15073 = vst [vmem:[#allocation66_spill] sm:$0xff] %v6530_v54  ;;  %v565_v4 = vrot.slane %v6076_v2, 2  ;;  %v572_v2 = vrot.slane %v6073_v1, 2  ;;  %v580_v13 = vrot.slane %v6096_v12, 2  ;;  %v581_v45 = vrot.slane %v6107_v17, 2 }
  0x57   : > { %15072 = vst [vmem:[#allocation65_spill] sm:$0xff] %v6522_v32  ;;  %v6536_v56 = vsel %vm371_vm0, %v462_v22, %v6522_v32  ;;  %v571_v32 = vrot.slane %v6070_v0, 2  ;;  %v578_v1 = vrot.slane %v6117_v21, 2  ;;  %v587_v17 = vrot.slane %v6134_v29, 2 }
  0x58   : > { %15074 = vst [vmem:[#allocation67_spill] sm:$0xff] %v6536_v56  ;;  %v584_v21 = vrot.slane %v6140_v31, 2  ;;  %v593_v29 = vrot.slane %v6160_v39, 2  ;;  %v590_v31 = vrot.slane %v6166_v41, 2  ;;  %v599_v39 = vrot.slane %v6186_v49, 2  ;;  %v15090_v49 = vld [vmem:[#allocation43_spill] sm:$0xff] }
  0x59   : > { %526 = vrot.lane.b32.xlu1 %v6510_v27, %s5968_s4  ;;  %v566_v27 = vrot.slane %v6081_v5, 2  ;;  %v6556_v5 = vsel %vm564_vm1, %v574_v15, %v575_v25  ;;  %v6561_v9 = vsel %vm564_vm1, %v571_v32, %v572_v2  ;;  %v6570_v25 = vsel %vm564_vm1, %v580_v13, %v581_v45 }
  0x5a   : > { %524 = vrot.lane.b32.xlu0 %v6518_v55, %s5968_s4  ;;  %v583_v15 = vrot.slane %v6137_v30, 2  ;;  %v592_v2 = vrot.slane %v6157_v38, 2  ;;  %v589_v45 = vrot.slane %v6163_v40, 2  ;;  %v595_v40 = vrot.slane %v6189_v50, 2 }
  0x5b   : > { %v567_v22 = vsel %vm564_vm1, %v565_v4, %v566_v27  ;;  %v577_v4 = vrot.slane %v6114_v20, 2  ;;  %v586_v27 = vrot.slane %v6131_v28, 2  ;;  %v596_v41 = vrot.slane %v6192_v51, 2 }
  0x5c   : > { %v6589_v13 = vsel %vm564_vm1, %v583_v15, %v584_v21  ;;  %v604_v15 = vrot.slane %v6209_v58, 2  ;;  %v605_v21 = vrot.slane %v6212_v59, 2  ;;  %v15087_v59 = vld [vmem:[#allocation41_spill] sm:$0xff] }
  0x5d   : > { %530 = vrot.lane.b32.xlu1 %v6530_v54, %s5968_s4  ;;  %v6575_v32 = vsel %vm564_vm1, %v577_v4, %v578_v1  ;;  %v6598_v4 = vsel %vm564_vm1, %v592_v2, %v593_v29  ;;  %v598_v1 = vrot.slane %v6183_v48, 2  ;;  %v6617_v2 = vsel %vm564_vm1, %v595_v40, %v596_v41 }
  0x5e   : > { %528 = vrot.lane.b32.xlu0 %v6536_v56, %s5968_s4  ;;  %15075 = vst [vmem:[#allocation68_spill] sm:$0xff] %v6598_v4  ;;  %v601_v29 = vrot.slane %v6215_v60, 2  ;;  %v607_v41 = vrot.slane %v6245_v16, 2 }
  0x61   : > { %663 = vrot.lane.b32.xlu1 %v6545_v35, %s5969_s5 }
  0x62   : > { %661 = vrot.lane.b32.xlu0 %v567_v22, %s5969_s5  ;;  %v6584_v22 = vsel %vm564_vm1, %v586_v27, %v587_v17  ;;  %v6603_v27 = vsel %vm564_vm1, %v589_v45, %v590_v31  ;;  %v6612_v17 = vsel %vm564_vm1, %v598_v1, %v599_v39  ;;  %v602_v45 = vrot.slane %v6218_v61, 2 }
  0x63   : > { %15076 = vst [vmem:[#allocation69_spill] sm:$0xff] %v6603_v27  ;;  %v6626_v31 = vsel %vm564_vm1, %v604_v15, %v605_v21  ;;  %v610_v1 = vrot.slane %v6239_v10, 2  ;;  %v611_v39 = vrot.slane %v6242_v14, 2  ;;  %v608_v61 = vrot.slane %v6248_v18, 2 }
  0x64   : > { %15077 = vst [vmem:[#allocation70_spill] sm:$0xff] %v6626_v31  ;;  %v6631_v40 = vsel %vm564_vm1, %v601_v29, %v602_v45  ;;  %v616_v21 = vrot.slane %v6269_v34, 2  ;;  %v617_v14 = vrot.slane %v6272_v36, 2  ;;  %v613_v45 = vrot.slane %v6275_v37, 2 }
  0x65   : > { %667 = vrot.lane.b32.xlu1 %v6556_v5, %s5969_s5  ;;  %v6640_v15 = vsel %vm564_vm1, %v610_v1, %v611_v39  ;;  %v6645_v29 = vsel %vm564_vm1, %v607_v41, %v608_v61  ;;  %v614_v18 = vrot.slane %v6278_v43, 2  ;;  %v622_v39 = vrot.slane %v6301_v6, 2 }
  0x66   : > { %665 = vrot.lane.b32.xlu0 %v6561_v9, %s5969_s5  ;;  %15078 = vst [vmem:[#allocation71_spill] sm:$0xff] %v6640_v15  ;;  %v6654_v1 = vsel %vm564_vm1, %v616_v21, %v617_v14  ;;  %v623_v36 = vrot.slane %v6304_v23, 2  ;;  %v619_v37 = vrot.slane %v6307_v24, 2  ;;  %v620_v41 = vrot.slane %v6310_v8, 2 }
  0x67   : > { %15079 = vst [vmem:[#allocation72_spill] sm:$0xff] %v6654_v1  ;;  %v6659_v61 = vsel %vm564_vm1, %v613_v45, %v614_v18  ;;  %v628_v21 = vrot.slane %v6334_v46, 2  ;;  %v629_v23 = vrot.slane %v6337_v47, 2  ;;  %v625_v45 = vrot.slane %v6340_v44, 2 }
  0x68   : > { %15080 = vst [vmem:[#allocation73_spill] sm:$0xff] %v6659_v61  ;;  %v6668_v14 = vsel %vm564_vm1, %v622_v39, %v623_v36  ;;  %v6673_v18 = vsel %vm564_vm1, %v619_v37, %v620_v41  ;;  %v626_v8 = vrot.slane %v6343_v19, 2  ;;  %v634_v36 = vrot.slane %v6366_v33, 2 }
  0x69   : > { %671 = vrot.lane.b32.xlu1 %v6570_v25, %s5969_s5  ;;  %15081 = vst [vmem:[#allocation74_spill] sm:$0xff] %v6668_v14  ;;  %15082 = vst [vmem:[#allocation75_spill] sm:$0xff] %v6673_v18  ;;  %v6682_v39 = vsel %vm564_vm1, %v628_v21, %v629_v23  ;;  %v635_v47 = vrot.slane %v6369_v3, 2  ;;  %v631_v41 = vrot.slane %v6372_v26, 2  ;;  %v632_v19 = vrot.slane %v6375_v52, 2  ;;  %v15086_v23 = vld [vmem:[#allocation40_spill] sm:$0xff] }
  0x6a   : > { %669 = vrot.lane.b32.xlu0 %v6575_v32, %s5969_s5  ;;  %15083 = vst [vmem:[#allocation76_spill] sm:$0xff] %v6682_v39  ;;  %v6687_v37 = vsel %vm564_vm1, %v625_v45, %v626_v8  ;;  %v640_v43 = vrot.slane %v15086_v23, 2  ;;  %v641_v3 = vrot.slane %v15087_v59, 2  ;;  %v15089_v8 = vld [vmem:[#allocation42_spill] sm:$0xff]  ;;  %v638_v52 = vrot.slane %v15090_v49, 2 }
  0x6b   : > { %15084 = vst [vmem:[#allocation77_spill] sm:$0xff] %v6687_v37  ;;  %v6696_v21 = vsel %vm564_vm1, %v634_v36, %v635_v47  ;;  %v6701_v45 = vsel %vm564_vm1, %v631_v41, %v632_v19  ;;  %v637_v51 = vrot.slane %v15089_v8, 2  ;;  %v15092_v47 = vld [vmem:[#allocation47_spill] sm:$0xff]  ;;  %v15095_v19 = vld [vmem:[#allocation49_spill] sm:$0xff] }
  0x6c   : > { %15085 = vst [vmem:[#allocation78_spill] sm:$0xff] %v6696_v21  ;;  %15088 = vst [vmem:[#allocation40_spill] sm:$0xff] %v6701_v45  ;;  %v6710_v36 = vsel %vm564_vm1, %v640_v43, %v641_v3  ;;  %v643_v8 = vrot.slane %v15095_v19, 2  ;;  %v652_v3 = vrot.slane %v6461_v57, 2 }
  0x6d   : > { %675 = vrot.lane.b32.xlu1 %v6584_v22, %s5969_s5  ;;  %15091 = vst [vmem:[#allocation41_spill] sm:$0xff] %v6710_v36  ;;  %v6715_v41 = vsel %vm564_vm1, %v637_v51, %v638_v52  ;;  %v15101_v52 = vld [vmem:[#allocation56_spill] sm:$0xff] }
  0x6e   : > { %673 = vrot.lane.b32.xlu0 %v6589_v13, %s5969_s5  ;;  %15094 = vst [vmem:[#allocation42_spill] sm:$0xff] %v6715_v41 }
  0x71   : > { %679 = vrot.lane.b32.xlu1 %v6598_v4, %s5969_s5 }
  0x72   : > { %677 = vrot.lane.b32.xlu0 %v6603_v27, %s5969_s5  ;;  %v15093_v27 = vld [vmem:[#allocation48_spill] sm:$0xff] }
  0x73   : > { %v647_v59 = vrot.slane %v15093_v27, 2 }
  0x75   : > { %683 = vrot.lane.b32.xlu1 %v6612_v17, %s5969_s5 }
  0x76   : > { %681 = vrot.lane.b32.xlu0 %v6617_v2, %s5969_s5 }
  0x79   : > { %687 = vrot.lane.b32.xlu1 %v6626_v31, %s5969_s5 }
  0x7a   : > { %685 = vrot.lane.b32.xlu0 %v6631_v40, %s5969_s5 }
  0x7d   : > { %691 = vrot.lane.b32.xlu1 %v6640_v15, %s5969_s5 }
  0x7e   : > { %689 = vrot.lane.b32.xlu0 %v6645_v29, %s5969_s5 }
  0x81   : > { %695 = vrot.lane.b32.xlu1 %v6654_v1, %s5969_s5 }
  0x82   : > { %693 = vrot.lane.b32.xlu0 %v6659_v61, %s5969_s5  ;;  %v646_v61 = vrot.slane %v15092_v47, 2 }
  0x84   : > { %v6724_v43 = vsel %vm564_vm1, %v646_v61, %v647_v59 }
  0x85   : > { %699 = vrot.lane.b32.xlu1 %v6668_v14, %s5969_s5  ;;  %15097 = vst [vmem:[#allocation47_spill] sm:$0xff] %v6724_v43  ;;  %v15102_v14 = vld [vmem:[#allocation57_spill] sm:$0xff] }
  0x86   : > { %697 = vrot.lane.b32.xlu0 %v6673_v18, %s5969_s5 }
  0x89   : > { %703 = vrot.lane.b32.xlu1 %v6682_v39, %s5969_s5  ;;  %v15096_v39 = vld [vmem:[#allocation50_spill] sm:$0xff] }
  0x8a   : > { %701 = vrot.lane.b32.xlu0 %v6687_v37, %s5969_s5  ;;  %v644_v49 = vrot.slane %v15096_v39, 2  ;;  %v649_v39 = vrot.slane %v15101_v52, 2  ;;  %v650_v37 = vrot.slane %v15102_v14, 2  ;;  %v655_v14 = vrot.slane %v6499_v42, 2 }
  0x8c   : > { %v6731_v51 = vsel %vm564_vm1, %v643_v8, %v644_v49  ;;  %v659_v49 = vrot.slane %v6496_v53, 2  ;;  %v6749_v8 = vsel %vm564_vm1, %v649_v39, %v650_v37 }
  0x8d   : > { %707 = vrot.lane.b32.xlu1 %v6696_v21, %s5969_s5  ;;  %v15098_v21 = vld [vmem:[#allocation55_spill] sm:$0xff]  ;;  %15100 = vst [vmem:[#allocation49_spill] sm:$0xff] %v6731_v51 }
  0x8e   : > { %705 = vrot.lane.b32.xlu0 %v6701_v45, %s5969_s5  ;;  %v653_v27 = vrot.slane %v15098_v21, 2  ;;  %v658_v21 = vrot.slane %v6493_v63, 2 }
  0x90   : > { %v6742_v61 = vsel %vm564_vm1, %v652_v3, %v653_v27  ;;  %v6760_v3 = vsel %vm564_vm1, %v658_v21, %v659_v49 }
  0x91   : > { %711 = vrot.lane.b32.xlu1 %v6710_v36, %s5969_s5  ;;  %15104 = vst [vmem:[#allocation55_spill] sm:$0xff] %v6742_v61  ;;  %15107 = vst [vmem:[#allocation79_spill] sm:$0xff] %v6760_v3 }
  0x92   : > { %709 = vrot.lane.b32.xlu0 %v6715_v41, %s5969_s5 }
  0x93   : > { %v6728_v45 = vpop.permute.xlu1 %472 }
  0x94   : > { %15099 = vst [vmem:[#allocation48_spill] sm:$0xff] %v6728_v45  ;;  %v6735_v36 = vpop.permute.xlu0 %468 }
  0x95   : > { %15103 = vst [vmem:[#allocation50_spill] sm:$0xff] %v6735_v36  ;;  %715 = vrot.lane.b32.xlu1 %v6724_v43, %s5969_s5  ;;  %v656_v36 = vrot.slane %v6502_v62, 2 }
  0x96   : > { %713 = vrot.lane.b32.xlu0 %v6731_v51, %s5969_s5 }
  0x97   : > { %v6746_v59 = vpop.permute.xlu1 %474  ;;  %v6765_v37 = vsel %vm564_vm1, %v655_v14, %v656_v36 }
  0x98   : > { %15105 = vst [vmem:[#allocation56_spill] sm:$0xff] %v6746_v59  ;;  %v6753_v45 = vpop.permute.xlu0 %470 }
  0x99   : > { %15106 = vst [vmem:[#allocation57_spill] sm:$0xff] %v6753_v45  ;;  %719 = vrot.lane.b32.xlu1 %v6742_v61, %s5969_s5 }
  0x9a   : > { %717 = vrot.lane.b32.xlu0 %v6749_v8, %s5969_s5 }
  0x9b   : > { %v6762_v53 = vpop.permute.xlu1 %478 }
  0x9c   : > { %15108 = vst [vmem:[#allocation80_spill] sm:$0xff] %v6762_v53  ;;  %v6767_v27 = vpop.permute.xlu0 %476 }
  0x9d   : > { %15109 = vst [vmem:[#allocation81_spill] sm:$0xff] %v6767_v27  ;;  %723 = vrot.lane.b32.xlu1 %v6760_v3, %s5969_s5 }
  0x9e   : > { %721 = vrot.lane.b32.xlu0 %v6765_v37, %s5969_s5 }
  0x9f   : > { %v6773_v62 = vpop.permute.xlu1 %482 }
  0xa0   : > { %15110 = vst [vmem:[#allocation82_spill] sm:$0xff] %v6773_v62  ;;  %v6775_v39 = vpop.permute.xlu0 %480 }
  0xa1   : > { %15111 = vst [vmem:[#allocation83_spill] sm:$0xff] %v6775_v39  ;;  %763 = vrot.lane.b32.xlu1 %v6070_v0, %s5970_s6  ;;  %v6798_v0 = vld [vmem:[%s6067_s30 + $0x80] sm:$0xff] }
  0xa2   : > { %761 = vrot.lane.b32.xlu0 %v6093_v11, %s5970_s6  ;;  %v15148_v39 = vld [vmem:[#allocation9_spill] sm:$0xff] }
  0xa3   : > { %v6781_v36 = vpop.permute.xlu1 %486 }
  0xa4   : > { %15112 = vst [vmem:[#allocation84_spill] sm:$0xff] %v6781_v36  ;;  %v6783_v21 = vpop.permute.xlu0 %484 }
  0xa5   : > { %15113 = vst [vmem:[#allocation85_spill] sm:$0xff] %v6783_v21  ;;  %767 = vrot.lane.b32.xlu1 %v6114_v20, %s5970_s6 }
  0xa6   : > { %765 = vrot.lane.b32.xlu0 %v6085_v7, %s5970_s6 }
  0xa7   : > { %v6789_v49 = vpop.permute.xlu1 %490 }
  0xa8   : > { %15114 = vst [vmem:[#allocation86_spill] sm:$0xff] %v6789_v49  ;;  %v6791_v14 = vpop.permute.xlu0 %488  ;;  %v15145_v49 = vld [vmem:[#allocation7_spill] sm:$0xff] }
  0xa9   : > { %15115 = vst [vmem:[#allocation87_spill] sm:$0xff] %v6791_v14  ;;  %771 = vrot.lane.b32.xlu1 %v6137_v30, %s5970_s6  ;;  %v15144_v14 = vld [vmem:[#allocation5_spill] sm:$0xff] }
  0xaa   : > { %769 = vrot.lane.b32.xlu0 %v6096_v12, %s5970_s6 }
  0xab   : > { %v6800_v11 = vpop.permute.xlu1 %494 }
  0xac   : > { %15116 = vst [vmem:[#allocation88_spill] sm:$0xff] %v6800_v11  ;;  %v6802_v21 = vpop.permute.xlu0 %492 }
  0xad   : > { %15117 = vst [vmem:[#allocation89_spill] sm:$0xff] %v6802_v21  ;;  %775 = vrot.lane.b32.xlu1 %v6798_v0, %s5970_s6 }
  0xae   : > { %773 = vrot.lane.b32.xlu0 %v6131_v28, %s5970_s6 }
  0xaf   : > { %v6808_v7 = vpop.permute.xlu1 %498 }
  0xb0   : > { %15118 = vst [vmem:[#allocation90_spill] sm:$0xff] %v6808_v7  ;;  %v6810_v20 = vpop.permute.xlu0 %496 }
  0xb1   : > { %15119 = vst [vmem:[#allocation91_spill] sm:$0xff] %v6810_v20  ;;  %779 = vrot.lane.b32.xlu1 %v6189_v50, %s5970_s6  ;;  %v15165_v20 = vld [vmem:[#allocation18_spill] sm:$0xff] }
  0xb2   : > { %777 = vrot.lane.b32.xlu0 %v6157_v38, %s5970_s6  ;;  %v6833_v38 = vld [vmem:[%s6067_s30 + $0x120] sm:$0xff] }
  0xb3   : > { %v6816_v12 = vpop.permute.xlu1 %502 }
  0xb4   : > { %15120 = vst [vmem:[#allocation92_spill] sm:$0xff] %v6816_v12  ;;  %v6818_v30 = vpop.permute.xlu0 %500 }
  0xb5   : > { %15121 = vst [vmem:[#allocation93_spill] sm:$0xff] %v6818_v30  ;;  %783 = vrot.lane.b32.xlu1 %v6215_v60, %s5970_s6 }
  0xb6   : > { %781 = vrot.lane.b32.xlu0 %v6183_v48, %s5970_s6 }
  0xb7   : > { %v6824_v28 = vpop.permute.xlu1 %506 }
  0xb8   : > { %15122 = vst [vmem:[#allocation94_spill] sm:$0xff] %v6824_v28  ;;  %v6826_v21 = vpop.permute.xlu0 %504 }
  0xb9   : > { %15123 = vst [vmem:[#allocation95_spill] sm:$0xff] %v6826_v21  ;;  %787 = vrot.lane.b32.xlu1 %v6245_v16, %s5970_s6 }
  0xba   : > { %785 = vrot.lane.b32.xlu0 %v6209_v58, %s5970_s6 }
  0xbb   : > { %v6835_v50 = vpop.permute.xlu1 %510 }
  0xbc   : > { %15124 = vst [vmem:[#allocation96_spill] sm:$0xff] %v6835_v50  ;;  %v6837_v30 = vpop.permute.xlu0 %508 }
  0xbd   : > { %15125 = vst [vmem:[#allocation97_spill] sm:$0xff] %v6837_v30  ;;  %791 = vrot.lane.b32.xlu1 %v6833_v38, %s5970_s6 }
  0xbe   : > { %789 = vrot.lane.b32.xlu0 %v6239_v10, %s5970_s6 }
  0xbf   : > { %v6843_v48 = vpop.permute.xlu1 %514 }
  0xc0   : > { %15126 = vst [vmem:[#allocation98_spill] sm:$0xff] %v6843_v48  ;;  %v6845_v60 = vpop.permute.xlu0 %512 }
  0xc1   : > { %15127 = vst [vmem:[#allocation99_spill] sm:$0xff] %v6845_v60  ;;  %795 = vrot.lane.b32.xlu1 %v6307_v24, %s5970_s6 }
  0xc2   : > { %793 = vrot.lane.b32.xlu0 %v6269_v34, %s5970_s6  ;;  %v6868_v34 = vld [vmem:[%s6067_s30 + $0x1c0] sm:$0xff] }
  0xc3   : > { %v6851_v58 = vpop.permute.xlu1 %518 }
  0xc4   : > { %15128 = vst [vmem:[#allocation100_spill] sm:$0xff] %v6851_v58  ;;  %v6853_v50 = vpop.permute.xlu0 %516 }
  0xc5   : > { %15129 = vst [vmem:[#allocation101_spill] sm:$0xff] %v6853_v50  ;;  %799 = vrot.lane.b32.xlu1 %v6340_v44, %s5970_s6 }
  0xc6   : > { %797 = vrot.lane.b32.xlu0 %v6301_v6, %s5970_s6 }
  0xc7   : > { %v6859_v30 = vpop.permute.xlu1 %522 }
  0xc8   : > { %15130 = vst [vmem:[#allocation102_spill] sm:$0xff] %v6859_v30  ;;  %v6861_v48 = vpop.permute.xlu0 %520 }
  0xc9   : > { %15131 = vst [vmem:[#allocation103_spill] sm:$0xff] %v6861_v48  ;;  %803 = vrot.lane.b32.xlu1 %v6372_v26, %s5970_s6 }
  0xca   : > { %801 = vrot.lane.b32.xlu0 %v6334_v46, %s5970_s6 }
  0xcb   : > { %v6870_v58 = vpop.permute.xlu1 %526 }
  0xcc   : > { %15132 = vst [vmem:[#allocation104_spill] sm:$0xff] %v6870_v58  ;;  %v6872_v50 = vpop.permute.xlu0 %524  ;;  %v15164_v58 = vld [vmem:[#allocation23_spill] sm:$0xff] }
  0xcd   : > { %15133 = vst [vmem:[#allocation105_spill] sm:$0xff] %v6872_v50  ;;  %807 = vrot.lane.b32.xlu1 %v6868_v34, %s5970_s6  ;;  %v6964_v50 = vld [vmem:[%s6067_s30 + $0x128] sm:$0x3] }
  0xce   : > { %805 = vrot.lane.b32.xlu0 %v6366_v33, %s5970_s6  ;;  %15162 = vst [vmem:[#allocation117_spill] sm:$0xff] %v6964_v50 }
  0xcf   : > { %v6878_v48 = vpop.permute.xlu1 %530 }
  0xd0   : > { %15134 = vst [vmem:[#allocation106_spill] sm:$0xff] %v6878_v48  ;;  %v6880_v30 = vpop.permute.xlu0 %528  ;;  %v15159_v48 = vld [vmem:[#allocation19_spill] sm:$0xff] }
  0xd1   : > { %15135 = vst [vmem:[#allocation107_spill] sm:$0xff] %v6880_v30  ;;  %811 = vrot.lane.b32.xlu1 %v15095_v19, %s5970_s6 }
  0xd2   : > { %809 = vrot.lane.b32.xlu0 %v15086_v23, %s5970_s6  ;;  %v6903_v23 = vld [vmem:[%s6067_s30 + $0x260] sm:$0xff] }
  0xd3   : > { %v6886_v60 = vpop.permute.xlu1 %663 }
  0xd4   : > { %15136 = vst [vmem:[#allocation108_spill] sm:$0xff] %v6886_v60  ;;  %v6888_v21 = vpop.permute.xlu0 %661 }
  0xd5   : > { %15137 = vst [vmem:[#allocation109_spill] sm:$0xff] %v6888_v21  ;;  %815 = vrot.lane.b32.xlu1 %v15101_v52, %s5970_s6 }
  0xd6   : > { %813 = vrot.lane.b32.xlu0 %v15092_v47, %s5970_s6 }
  0xd7   : > { %v6894_v28 = vpop.permute.xlu1 %667 }
  0xd8   : > { %15138 = vst [vmem:[#allocation110_spill] sm:$0xff] %v6894_v28  ;;  %v6896_v12 = vpop.permute.xlu0 %665 }
  0xd9   : > { %15139 = vst [vmem:[#allocation111_spill] sm:$0xff] %v6896_v12  ;;  %819 = vrot.lane.b32.xlu1 %v6499_v42, %s5970_s6 }
  0xda   : > { %817 = vrot.lane.b32.xlu0 %v6461_v57, %s5970_s6 }
  0xdb   : > { %v6905_v21 = vpop.permute.xlu1 %671 }
  0xdc   : > { %15140 = vst [vmem:[#allocation112_spill] sm:$0xff] %v6905_v21  ;;  %v6907_v60 = vpop.permute.xlu0 %669 }
  0xdd   : > { %15141 = vst [vmem:[#allocation113_spill] sm:$0xff] %v6907_v60  ;;  %823 = vrot.lane.b32.xlu1 %v6903_v23, %s5970_s6  ;;  %v6924_v60 = vld [vmem:[%s6067_s30 + $0x88] sm:$0x3] }
  0xde   : > { %821 = vrot.lane.b32.xlu0 %v6493_v63, %s5970_s6  ;;  %v862_v62 = vrot.slane %v6924_v60, 1 }
  0xdf   : > { %v6913_v28 = vpop.permute.xlu1 %675 }
  0xe0   : > { %15142 = vst [vmem:[#allocation114_spill] sm:$0xff] %v6913_v28  ;;  %v6915_v12 = vpop.permute.xlu0 %673  ;;  %v861_v28 = vrot.slane %v6798_v0, 1 }
  0xe1   : > { %15143 = vst [vmem:[#allocation115_spill] sm:$0xff] %v6915_v12  ;;  %875 = vrot.lane.b32.xlu1 %v15144_v14, %s5971_s7  ;;  %v15149_v12 = vld [vmem:[#allocation6_spill] sm:$0xff] }
  0xe2   : > { %873 = vrot.lane.b32.xlu0 %v15145_v49, %s5971_s7  ;;  %v6943_v53 = vsel %vm371_vm0, %v861_v28, %v862_v62  ;;  %v15160_v62 = vld [vmem:[#allocation14_spill] sm:$0xff] }
  0xe3   : > { %v6921_v21 = vpop.permute.xlu1 %679 }
  0xe4   : > { %15146 = vst [vmem:[#allocation5_spill] sm:$0xff] %v6921_v21  ;;  %v6926_v36 = vpop.permute.xlu0 %677  ;;  %v15152_v21 = vld [vmem:[#allocation11_spill] sm:$0xff] }
  0xe5   : > { %15147 = vst [vmem:[#allocation7_spill] sm:$0xff] %v6926_v36  ;;  %879 = vrot.lane.b32.xlu1 %v15148_v39, %s5971_s7  ;;  %v15153_v36 = vld [vmem:[#allocation8_spill] sm:$0xff] }
  0xe6   : > { %877 = vrot.lane.b32.xlu0 %v15149_v12, %s5971_s7 }
  0xe7   : > { %v6934_v27 = vpop.permute.xlu1 %683 }
  0xe8   : > { %15150 = vst [vmem:[#allocation9_spill] sm:$0xff] %v6934_v27  ;;  %v6936_v49 = vpop.permute.xlu0 %681  ;;  %v15156_v27 = vld [vmem:[#allocation10_spill] sm:$0xff] }
  0xe9   : > { %15151 = vst [vmem:[#allocation6_spill] sm:$0xff] %v6936_v49  ;;  %883 = vrot.lane.b32.xlu1 %v15152_v21, %s5971_s7 }
  0xea   : > { %881 = vrot.lane.b32.xlu0 %v15153_v36, %s5971_s7 }
  0xeb   : > { %v6945_v45 = vpop.permute.xlu1 %687 }
  0xec   : > { %15154 = vst [vmem:[#allocation11_spill] sm:$0xff] %v6945_v45  ;;  %v6947_v59 = vpop.permute.xlu0 %685 }
  0xed   : > { %15155 = vst [vmem:[#allocation8_spill] sm:$0xff] %v6947_v59  ;;  %887 = vrot.lane.b32.xlu1 %v6943_v53, %s5971_s7 }
  0xee   : > { %885 = vrot.lane.b32.xlu0 %v15156_v27, %s5971_s7 }
  0xef   : > { %v6953_v49 = vpop.permute.xlu1 %691 }
  0xf0   : > { %15157 = vst [vmem:[#allocation10_spill] sm:$0xff] %v6953_v49  ;;  %v6955_v30 = vpop.permute.xlu0 %689  ;;  %v14591_v49 = vrot.slane %v6964_v50, 1 }
  0xf1   : > { %15158 = vst [vmem:[#allocation116_spill] sm:$0xff] %v6955_v30  ;;  %891 = vrot.lane.b32.xlu1 %v15159_v48, %s5971_s7  ;;  %v864_v30 = vrot.slane %v6833_v38, 1 }
  0xf2   : > { %889 = vrot.lane.b32.xlu0 %v15160_v62, %s5971_s7 }
  0xf3   : > { %v6961_v28 = vpop.permute.xlu1 %695  ;;  %v6985_v11 = vsel %vm371_vm0, %v864_v30, %v14591_v49  ;;  %v15177_v30 = vld [vmem:[#allocation28_spill] sm:$0xff] }
  0xf4   : > { %15161 = vst [vmem:[#allocation19_spill] sm:$0xff] %v6961_v28  ;;  %v6966_v59 = vpop.permute.xlu0 %693  ;;  %v15168_v28 = vld [vmem:[#allocation27_spill] sm:$0xff]  ;;  %15170 = vst [vmem:[#allocation121_spill] sm:$0xff] %v6985_v11 }
  0xf5   : > { %15163 = vst [vmem:[#allocation118_spill] sm:$0xff] %v6966_v59  ;;  %895 = vrot.lane.b32.xlu1 %v15164_v58, %s5971_s7  ;;  %v15169_v59 = vld [vmem:[#allocation22_spill] sm:$0xff] }
  0xf6   : > { %893 = vrot.lane.b32.xlu0 %v15165_v20, %s5971_s7  ;;  %v15176_v58 = vld [vmem:[#allocation34_spill] sm:$0xff] }
  0xf7   : > { %v6974_v7 = vpop.permute.xlu1 %699 }
  0xf8   : > { %15166 = vst [vmem:[#allocation119_spill] sm:$0xff] %v6974_v7  ;;  %v6976_v45 = vpop.permute.xlu0 %697 }
  0xf9   : > { %15167 = vst [vmem:[#allocation120_spill] sm:$0xff] %v6976_v45  ;;  %899 = vrot.lane.b32.xlu1 %v15168_v28, %s5971_s7  ;;  %v15173_v45 = vld [vmem:[#allocation25_spill] sm:$0xff] }
  0xfa   : > { %897 = vrot.lane.b32.xlu0 %v15169_v59, %s5971_s7 }
  0xfb   : > { %v6987_v41 = vpop.permute.xlu1 %703 }
  0xfc   : > { %15171 = vst [vmem:[#allocation122_spill] sm:$0xff] %v6987_v41  ;;  %v6989_v62 = vpop.permute.xlu0 %701  ;;  %v7006_v41 = vld [vmem:[%s6067_s30 + $0x1c8] sm:$0x3] }
  0xfd   : > { %15172 = vst [vmem:[#allocation123_spill] sm:$0xff] %v6989_v62  ;;  %903 = vrot.lane.b32.xlu1 %v6985_v11, %s5971_s7  ;;  %v15180_v11 = vld [vmem:[#allocation38_spill] sm:$0xff] }
  0xfe   : > { %901 = vrot.lane.b32.xlu0 %v15173_v45, %s5971_s7  ;;  %v15181_v45 = vld [vmem:[#allocation32_spill] sm:$0xff] }
  0xff   : > { %v6995_v7 = vpop.permute.xlu1 %707 }
 0x100   : > { %15174 = vst [vmem:[#allocation124_spill] sm:$0xff] %v6995_v7  ;;  %v6997_v28 = vpop.permute.xlu0 %705  ;;  %v7016_v7 = vrot.slane %v7006_v41, 1 }
 0x101   : > { %15175 = vst [vmem:[#allocation125_spill] sm:$0xff] %v6997_v28  ;;  %907 = vrot.lane.b32.xlu1 %v15176_v58, %s5971_s7  ;;  %v867_v28 = vrot.slane %v6868_v34, 1 }
 0x102   : > { %905 = vrot.lane.b32.xlu0 %v15177_v30, %s5971_s7  ;;  %15182 = vst [vmem:[#allocation128_spill] sm:$0xff] %v7016_v7 }
 0x103   : > { %v7003_v49 = vpop.permute.xlu1 %711 }
 0x104   : > { %15178 = vst [vmem:[#allocation126_spill] sm:$0xff] %v7003_v49  ;;  %v7008_v62 = vpop.permute.xlu0 %709  ;;  %v15185_v49 = vld [vmem:[#allocation46_spill] sm:$0xff] }
 0x105   : > { %15179 = vst [vmem:[#allocation127_spill] sm:$0xff] %v7008_v62  ;;  %911 = vrot.lane.b32.xlu1 %v15180_v11, %s5971_s7  ;;  %v15186_v62 = vld [vmem:[#allocation36_spill] sm:$0xff]  ;;  %v7028_v11 = vsel %vm371_vm0, %v867_v28, %v7016_v7  ;;  %v15194_v28 = vld [vmem:[#allocation51_spill] sm:$0xff] }
 0x106   : > { %909 = vrot.lane.b32.xlu0 %v15181_v45, %s5971_s7  ;;  %15187 = vst [vmem:[#allocation131_spill] sm:$0xff] %v7028_v11 }
 0x107   : > { %v7018_v58 = vpop.permute.xlu1 %715 }
 0x108   : > { %15183 = vst [vmem:[#allocation129_spill] sm:$0xff] %v7018_v58  ;;  %v7020_v30 = vpop.permute.xlu0 %713  ;;  %v15190_v58 = vld [vmem:[#allocation44_spill] sm:$0xff] }
 0x109   : > { %15184 = vst [vmem:[#allocation130_spill] sm:$0xff] %v7020_v30  ;;  %915 = vrot.lane.b32.xlu1 %v15185_v49, %s5971_s7 }
 0x10a   : > { %913 = vrot.lane.b32.xlu0 %v15186_v62, %s5971_s7  ;;  %v15193_v62 = vld [vmem:[#allocation60_spill] sm:$0xff] }
 0x10b   : > { %v7030_v45 = vpop.permute.xlu1 %719 }
 0x10c   : > { %15188 = vst [vmem:[#allocation132_spill] sm:$0xff] %v7030_v45  ;;  %v7032_v59 = vpop.permute.xlu0 %717  ;;  %v7049_v45 = vld [vmem:[%s6067_s30 + $0x268] sm:$0x3] }
 0x10d   : > { %15189 = vst [vmem:[#allocation133_spill] sm:$0xff] %v7032_v59  ;;  %919 = vrot.lane.b32.xlu1 %v7028_v11, %s5971_s7  ;;  %v15197_v11 = vld [vmem:[#allocation58_spill] sm:$0xff] }
 0x10e   : > { %917 = vrot.lane.b32.xlu0 %v15190_v58, %s5971_s7 }
 0x10f   : > { %v7038_v30 = vpop.permute.xlu1 %723 }
 0x110   : > { %15191 = vst [vmem:[#allocation134_spill] sm:$0xff] %v7038_v30  ;;  %v7040_v49 = vpop.permute.xlu0 %721  ;;  %v7059_v30 = vrot.slane %v7049_v45, 1 }
 0x111   : > { %15192 = vst [vmem:[#allocation135_spill] sm:$0xff] %v7040_v49  ;;  %923 = vrot.lane.b32.xlu1 %v15193_v62, %s5971_s7  ;;  %v870_v49 = vrot.slane %v6903_v23, 1 }
 0x112   : > { %921 = vrot.lane.b32.xlu0 %v15194_v28, %s5971_s7  ;;  %15198 = vst [vmem:[#allocation138_spill] sm:$0xff] %v7059_v30 }
 0x113   : > { %v7046_v7 = vpop.permute.xlu1 %763 }
 0x114   : > { %15195 = vst [vmem:[#allocation136_spill] sm:$0xff] %v7046_v7  ;;  %v7051_v59 = vpop.permute.xlu0 %761  ;;  %v7071_v7 = vsel %vm371_vm0, %v870_v49, %v7059_v30 }
 0x115   : > { %15196 = vst [vmem:[#allocation137_spill] sm:$0xff] %v7051_v59  ;;  %927 = vrot.lane.b32.xlu1 %v6518_v55, %s5971_s7  ;;  %v15201_v59 = vld [vmem:[#allocation62_spill] sm:$0xff]  ;;  %15202 = vst [vmem:[#allocation141_spill] sm:$0xff] %v7071_v7 }
 0x116   : > { %925 = vrot.lane.b32.xlu0 %v15197_v11, %s5971_s7 }
 0x117   : > { %v7061_v62 = vpop.permute.xlu1 %767 }
 0x118   : > { %15199 = vst [vmem:[#allocation139_spill] sm:$0xff] %v7061_v62  ;;  %v7063_v28 = vpop.permute.xlu0 %765 }
 0x119   : > { %15200 = vst [vmem:[#allocation140_spill] sm:$0xff] %v7063_v28  ;;  %931 = vrot.lane.b32.xlu1 %v6536_v56, %s5971_s7 }
 0x11a   : > { %929 = vrot.lane.b32.xlu0 %v15201_v59, %s5971_s7 }
 0x11b   : > { %v7073_v55 = vpop.permute.xlu1 %771 }
 0x11c   : > { %15203 = vst [vmem:[#allocation142_spill] sm:$0xff] %v7073_v55  ;;  %v7075_v11 = vpop.permute.xlu0 %769  ;;  %v969_v55 = vrot.slane %v6798_v0, 2 }
 0x11d   : > { %15204 = vst [vmem:[#allocation143_spill] sm:$0xff] %v7075_v11  ;;  %935 = vrot.lane.b32.xlu1 %v7071_v7, %s5971_s7 }
 0x11e   : > { %933 = vrot.lane.b32.xlu0 %v6530_v54, %s5971_s7 }
 0x11f   : > { %v7081_v28 = vpop.permute.xlu1 %775 }
 0x120   : > { %15205 = vst [vmem:[#allocation144_spill] sm:$0xff] %v7081_v28  ;;  %v7083_v62 = vpop.permute.xlu0 %773 }
 0x121   : > { %15206 = vst [vmem:[#allocation145_spill] sm:$0xff] %v7083_v62  ;;  %983 = vrot.lane.b32.xlu1 %v6561_v9, %s5972_s8  ;;  %v970_v62 = vrot.slane %v6924_v60, 2 }
 0x122   : > { %981 = vrot.lane.b32.xlu0 %v6545_v35, %s5972_s8 }
 0x123   : > { %v7089_v49 = vpop.permute.xlu1 %779  ;;  %v7108_v35 = vsel %vm564_vm1, %v969_v55, %v970_v62 }
 0x124   : > { %15207 = vst [vmem:[#allocation146_spill] sm:$0xff] %v7089_v49  ;;  %v7091_v11 = vpop.permute.xlu0 %777 }
 0x125   : > { %15208 = vst [vmem:[#allocation147_spill] sm:$0xff] %v7091_v11  ;;  %987 = vrot.lane.b32.xlu1 %v6575_v32, %s5972_s8 }
 0x126   : > { %985 = vrot.lane.b32.xlu0 %v6556_v5, %s5972_s8 }
 0x127   : > { %v7099_v28 = vpop.permute.xlu1 %783 }
 0x128   : > { %15209 = vst [vmem:[#allocation148_spill] sm:$0xff] %v7099_v28  ;;  %v7101_v30 = vpop.permute.xlu0 %781  ;;  %v973_v28 = vrot.slane %v6964_v50, 2 }
 0x129   : > { %15210 = vst [vmem:[#allocation149_spill] sm:$0xff] %v7101_v30  ;;  %991 = vrot.lane.b32.xlu1 %v6589_v13, %s5972_s8 }
 0x12a   : > { %989 = vrot.lane.b32.xlu0 %v6570_v25, %s5972_s8 }
 0x12b   : > { %v7110_v11 = vpop.permute.xlu1 %787 }
 0x12c   : > { %15211 = vst [vmem:[#allocation150_spill] sm:$0xff] %v7110_v11  ;;  %v7112_v49 = vpop.permute.xlu0 %785 }
 0x12d   : > { %15212 = vst [vmem:[#allocation151_spill] sm:$0xff] %v7112_v49  ;;  %995 = vrot.lane.b32.xlu1 %v7108_v35, %s5972_s8  ;;  %v972_v49 = vrot.slane %v6833_v38, 2 }
 0x12e   : > { %993 = vrot.lane.b32.xlu0 %v6584_v22, %s5972_s8 }
 0x12f   : > { %v7118_v60 = vpop.permute.xlu1 %791 }
 0x130   : > { %15213 = vst [vmem:[#allocation152_spill] sm:$0xff] %v7118_v60  ;;  %v7120_v30 = vpop.permute.xlu0 %789 }
 0x131   : > { %15214 = vst [vmem:[#allocation153_spill] sm:$0xff] %v7120_v30  ;;  %999 = vrot.lane.b32.xlu1 %v6617_v2, %s5972_s8 }
 0x132   : > { %997 = vrot.lane.b32.xlu0 %v6598_v4, %s5972_s8 }
 0x133   : > { %v7126_v55 = vpop.permute.xlu1 %795 }
 0x134   : > { %15215 = vst [vmem:[#allocation154_spill] sm:$0xff] %v7126_v55  ;;  %v7128_v62 = vpop.permute.xlu0 %793 }
 0x135   : > { %15216 = vst [vmem:[#allocation155_spill] sm:$0xff] %v7128_v62  ;;  %1003 = vrot.lane.b32.xlu1 %v6631_v40, %s5972_s8  ;;  %v7145_v62 = vsel %vm564_vm1, %v972_v49, %v973_v28 }
 0x136   : > { %1001 = vrot.lane.b32.xlu0 %v6612_v17, %s5972_s8  ;;  %15219 = vst [vmem:[#allocation158_spill] sm:$0xff] %v7145_v62 }
 0x137   : > { %v7136_v30 = vpop.permute.xlu1 %799 }
 0x138   : > { %15217 = vst [vmem:[#allocation156_spill] sm:$0xff] %v7136_v30  ;;  %v7138_v60 = vpop.permute.xlu0 %797 }
 0x139   : > { %15218 = vst [vmem:[#allocation157_spill] sm:$0xff] %v7138_v60  ;;  %1007 = vrot.lane.b32.xlu1 %v6645_v29, %s5972_s8 }
 0x13a   : > { %1005 = vrot.lane.b32.xlu0 %v6626_v31, %s5972_s8 }
 0x13b   : > { %v7147_v55 = vpop.permute.xlu1 %803 }
 0x13c   : > { %15220 = vst [vmem:[#allocation159_spill] sm:$0xff] %v7147_v55  ;;  %v7149_v11 = vpop.permute.xlu0 %801  ;;  %v15227_v55 = vld [vmem:[#allocation74_spill] sm:$0xff] }
 0x13d   : > { %15221 = vst [vmem:[#allocation160_spill] sm:$0xff] %v7149_v11  ;;  %1011 = vrot.lane.b32.xlu1 %v7145_v62, %s5972_s8  ;;  %v15226_v11 = vld [vmem:[#allocation77_spill] sm:$0xff] }
 0x13e   : > { %1009 = vrot.lane.b32.xlu0 %v6640_v15, %s5972_s8 }
 0x13f   : > { %v7155_v60 = vpop.permute.xlu1 %807 }
 0x140   : > { %15222 = vst [vmem:[#allocation161_spill] sm:$0xff] %v7155_v60  ;;  %v7157_v30 = vpop.permute.xlu0 %805  ;;  %v975_v60 = vrot.slane %v6868_v34, 2 }
 0x141   : > { %15223 = vst [vmem:[#allocation162_spill] sm:$0xff] %v7157_v30  ;;  %1015 = vrot.lane.b32.xlu1 %v6673_v18, %s5972_s8  ;;  %v976_v30 = vrot.slane %v7006_v41, 2  ;;  %v15235_v41 = vld [vmem:[#allocation78_spill] sm:$0xff] }
 0x142   : > { %1013 = vrot.lane.b32.xlu0 %v6654_v1, %s5972_s8  ;;  %v15230_v1 = vld [vmem:[#allocation40_spill] sm:$0xff] }
 0x143   : > { %v7163_v28 = vpop.permute.xlu1 %811 }
 0x144   : > { %15224 = vst [vmem:[#allocation163_spill] sm:$0xff] %v7163_v28  ;;  %v7165_v49 = vpop.permute.xlu0 %809  ;;  %v15231_v28 = vld [vmem:[#allocation76_spill] sm:$0xff] }
 0x145   : > { %15225 = vst [vmem:[#allocation164_spill] sm:$0xff] %v7165_v49  ;;  %1019 = vrot.lane.b32.xlu1 %v15226_v11, %s5972_s8  ;;  %v7182_v49 = vsel %vm564_vm1, %v975_v60, %v976_v30  ;;  %v15238_v30 = vld [vmem:[#allocation41_spill] sm:$0xff] }
 0x146   : > { %1017 = vrot.lane.b32.xlu0 %v15227_v55, %s5972_s8  ;;  %15232 = vst [vmem:[#allocation40_spill] sm:$0xff] %v7182_v49 }
 0x147   : > { %v7173_v50 = vpop.permute.xlu1 %815 }
 0x148   : > { %15228 = vst [vmem:[#allocation165_spill] sm:$0xff] %v7173_v50  ;;  %v7175_v4 = vpop.permute.xlu0 %813 }
 0x149   : > { %15229 = vst [vmem:[#allocation166_spill] sm:$0xff] %v7175_v4  ;;  %1023 = vrot.lane.b32.xlu1 %v15230_v1, %s5972_s8 }
 0x14a   : > { %1021 = vrot.lane.b32.xlu0 %v15231_v28, %s5972_s8 }
 0x14b   : > { %v7184_v11 = vpop.permute.xlu1 %819 }
 0x14c   : > { %15233 = vst [vmem:[#allocation167_spill] sm:$0xff] %v7184_v11  ;;  %v7186_v18 = vpop.permute.xlu0 %817 }
 0x14d   : > { %15234 = vst [vmem:[#allocation168_spill] sm:$0xff] %v7186_v18  ;;  %1027 = vrot.lane.b32.xlu1 %v7182_v49, %s5972_s8 }
 0x14e   : > { %1025 = vrot.lane.b32.xlu0 %v15235_v41, %s5972_s8 }
 0x14f   : > { %v7192_v4 = vpop.permute.xlu1 %823 }
 0x150   : > { %15236 = vst [vmem:[#allocation78_spill] sm:$0xff] %v7192_v4  ;;  %v7194_v50 = vpop.permute.xlu0 %821  ;;  %v978_v4 = vrot.slane %v6903_v23, 2 }
 0x151   : > { %15237 = vst [vmem:[#allocation169_spill] sm:$0xff] %v7194_v50  ;;  %1031 = vrot.lane.b32.xlu1 %v6731_v51, %s5972_s8  ;;  %v979_v50 = vrot.slane %v7049_v45, 2 }
 0x152   : > { %1029 = vrot.lane.b32.xlu0 %v15238_v30, %s5972_s8 }
 0x153   : > { %v7200_v60 = vpop.permute.xlu1 %875 }
 0x154   : > { %15239 = vst [vmem:[#allocation170_spill] sm:$0xff] %v7200_v60  ;;  %v7202_v11 = vpop.permute.xlu0 %873 }
 0x155   : > { %15240 = vst [vmem:[#allocation171_spill] sm:$0xff] %v7202_v11  ;;  %1035 = vrot.lane.b32.xlu1 %v6749_v8, %s5972_s8  ;;  %v7219_v11 = vsel %vm564_vm1, %v978_v4, %v979_v50  ;;  %v5702_v4 = vld [vmem:[%s6067_s30 + $0x20] sm:$0xff] }
 0x156   : > { %1033 = vrot.lane.b32.xlu0 %v6724_v43, %s5972_s8  ;;  %15243 = vst [vmem:[#allocation174_spill] sm:$0xff] %v7219_v11 }
 0x157   : > { %v7210_v18 = vpop.permute.xlu1 %879 }
 0x158   : > { %15241 = vst [vmem:[#allocation172_spill] sm:$0xff] %v7210_v18  ;;  %v7212_v51 = vpop.permute.xlu0 %877  ;;  %v5701_v18 = vld [vmem:[%s6067_s30 + $0x30] sm:$0xff] }
 0x159   : > { %15242 = vst [vmem:[#allocation173_spill] sm:$0xff] %v7212_v51  ;;  %1039 = vrot.lane.b32.xlu1 %v6765_v37, %s5972_s8 }
 0x15a   : > { %1037 = vrot.lane.b32.xlu0 %v6742_v61, %s5972_s8 }
 0x15b   : > { %v7221_v60 = vpop.permute.xlu1 %883 }
 0x15c   : > { %15244 = vst [vmem:[#allocation175_spill] sm:$0xff] %v7221_v60  ;;  %v7223_v30 = vpop.permute.xlu0 %881  ;;  %v5703_v60 = vld [vmem:[%s6067_s30 + $0x50] sm:$0xff] }
 0x15d   : > { %15245 = vst [vmem:[#allocation176_spill] sm:$0xff] %v7223_v30  ;;  %1043 = vrot.lane.b32.xlu1 %v7219_v11, %s5972_s8 }
 0x15e   : > { %1041 = vrot.lane.b32.xlu0 %v6760_v3, %s5972_s8 }
 0x15f   : > { %v7229_v45 = vpop.permute.xlu1 %887 }
 0x160   : > { %15246 = vst [vmem:[#allocation177_spill] sm:$0xff] %v7229_v45  ;;  %v7231_v51 = vpop.permute.xlu0 %885  ;;  %v5704_v45 = vld [vmem:[%s6067_s30 + $0x40] sm:$0xff] }
 0x161   : > { %15247 = vst [vmem:[#allocation178_spill] sm:$0xff] %v7231_v51  ;;  %1083 = vrot.lane.b32.xlu1 %v5701_v18, %s5973_s9  ;;  %v5705_v18 = vld [vmem:[%s6067_s30 + $0x70] sm:$0xff] }
 0x162   : > { %1081 = vrot.lane.b32.xlu0 %v5702_v4, %s5973_s9  ;;  %v5706_v4 = vld [vmem:[%s6067_s30 + $0x60] sm:$0xff] }
 0x163   : > { %v7237_v50 = vpop.permute.xlu1 %891 }
 0x164   : > { %15248 = vst [vmem:[#allocation179_spill] sm:$0xff] %v7237_v50  ;;  %v7239_v30 = vpop.permute.xlu0 %889 }
 0x165   : > { %15249 = vst [vmem:[#allocation180_spill] sm:$0xff] %v7239_v30  ;;  %1087 = vrot.lane.b32.xlu1 %v5703_v60, %s5973_s9  ;;  %v7254_v30 = vld [vmem:[%s6067_s30 + $0x90] sm:$0xff] }
 0x166   : > { %1085 = vrot.lane.b32.xlu0 %v5704_v45, %s5973_s9 }
 0x167   : > { %v7245_v51 = vpop.permute.xlu1 %895 }
 0x168   : > { %15250 = vst [vmem:[#allocation181_spill] sm:$0xff] %v7245_v51  ;;  %v7247_v11 = vpop.permute.xlu0 %893 }
 0x169   : > { %15251 = vst [vmem:[#allocation182_spill] sm:$0xff] %v7247_v11  ;;  %1091 = vrot.lane.b32.xlu1 %v5705_v18, %s5973_s9  ;;  %v7269_v11 = vld [vmem:[%s6067_s30 + $0xd0] sm:$0xff] }
 0x16a   : > { %1089 = vrot.lane.b32.xlu0 %v5706_v4, %s5973_s9  ;;  %v7274_v4 = vld [vmem:[%s6067_s30 + $0xc0] sm:$0xff] }
 0x16b   : > { %v7256_v60 = vpop.permute.xlu1 %899 }
 0x16c   : > { %15252 = vst [vmem:[#allocation183_spill] sm:$0xff] %v7256_v60  ;;  %v7258_v50 = vpop.permute.xlu0 %897 }
 0x16d   : > { %15253 = vst [vmem:[#allocation184_spill] sm:$0xff] %v7258_v50  ;;  %1095 = vrot.lane.b32.xlu1 %v7254_v30, %s5973_s9 }
 0x16e   : > { %1093 = vrot.lane.b32.xlu0 %v6798_v0, %s5973_s9  ;;  %v7283_v0 = vld [vmem:[%s6067_s30 + $0xf0] sm:$0xff] }
 0x16f   : > { %v7264_v45 = vpop.permute.xlu1 %903  ;;  %15258 = vst [vmem:[#allocation189_spill] sm:$0xff] %v7283_v0 }
 0x170   : > { %15254 = vst [vmem:[#allocation185_spill] sm:$0xff] %v7264_v45  ;;  %v7266_v18 = vpop.permute.xlu0 %901 }
 0x171   : > { %15255 = vst [vmem:[#allocation186_spill] sm:$0xff] %v7266_v18  ;;  %1099 = vrot.lane.b32.xlu1 %v7269_v11, %s5973_s9  ;;  %v7288_v18 = vld [vmem:[%s6067_s30 + $0xe0] sm:$0xff] }
 0x172   : > { %1097 = vrot.lane.b32.xlu0 %v7274_v4, %s5973_s9 }
 0x173   : > { %v7278_v50 = vpop.permute.xlu1 %907 }
 0x174   : > { %15256 = vst [vmem:[#allocation187_spill] sm:$0xff] %v7278_v50  ;;  %v7280_v51 = vpop.permute.xlu0 %905 }
 0x175   : > { %15257 = vst [vmem:[#allocation188_spill] sm:$0xff] %v7280_v51  ;;  %1103 = vrot.lane.b32.xlu1 %v7283_v0, %s5973_s9  ;;  %v7301_v51 = vld [vmem:[%s6067_s30 + $0x130] sm:$0xff] }
 0x176   : > { %1101 = vrot.lane.b32.xlu0 %v7288_v18, %s5973_s9 }
 0x177   : > { %v7292_v45 = vpop.permute.xlu1 %911 }
 0x178   : > { %15259 = vst [vmem:[#allocation190_spill] sm:$0xff] %v7292_v45  ;;  %v7294_v60 = vpop.permute.xlu0 %909 }
 0x179   : > { %15260 = vst [vmem:[#allocation191_spill] sm:$0xff] %v7294_v60  ;;  %1107 = vrot.lane.b32.xlu1 %v6239_v10, %s5973_s9 }
 0x17a   : > { %1105 = vrot.lane.b32.xlu0 %v6245_v16, %s5973_s9 }
 0x17b   : > { %v7303_v50 = vpop.permute.xlu1 %915 }
 0x17c   : > { %15261 = vst [vmem:[#allocation192_spill] sm:$0xff] %v7303_v50  ;;  %v7305_v0 = vpop.permute.xlu0 %913 }
 0x17d   : > { %15262 = vst [vmem:[#allocation193_spill] sm:$0xff] %v7305_v0  ;;  %1111 = vrot.lane.b32.xlu1 %v7301_v51, %s5973_s9 }
 0x17e   : > { %1109 = vrot.lane.b32.xlu0 %v6833_v38, %s5973_s9 }
 0x17f   : > { %v7311_v60 = vpop.permute.xlu1 %919 }
 0x180   : > { %15263 = vst [vmem:[#allocation194_spill] sm:$0xff] %v7311_v60  ;;  %v7313_v45 = vpop.permute.xlu0 %917 }
 0x181   : > { %15264 = vst [vmem:[#allocation195_spill] sm:$0xff] %v7313_v45  ;;  %1115 = vrot.lane.b32.xlu1 %v6301_v6, %s5973_s9  ;;  %v15309_v45 = vld [vmem:[#allocation38_spill] sm:$0xff] }
 0x182   : > { %1113 = vrot.lane.b32.xlu0 %v6307_v24, %s5973_s9  ;;  %v7336_v24 = vld [vmem:[%s6067_s30 + $0x1d0] sm:$0xff] }
 0x183   : > { %v7319_v10 = vpop.permute.xlu1 %923 }
 0x184   : > { %15265 = vst [vmem:[#allocation196_spill] sm:$0xff] %v7319_v10  ;;  %v7321_v16 = vpop.permute.xlu0 %921  ;;  %v15308_v10 = vld [vmem:[#allocation36_spill] sm:$0xff] }
 0x185   : > { %15266 = vst [vmem:[#allocation197_spill] sm:$0xff] %v7321_v16  ;;  %1119 = vrot.lane.b32.xlu1 %v6334_v46, %s5973_s9 }
 0x186   : > { %1117 = vrot.lane.b32.xlu0 %v6340_v44, %s5973_s9 }
 0x187   : > { %v7327_v38 = vpop.permute.xlu1 %927 }
 0x188   : > { %15267 = vst [vmem:[#allocation198_spill] sm:$0xff] %v7327_v38  ;;  %v7329_v60 = vpop.permute.xlu0 %925 }
 0x189   : > { %15268 = vst [vmem:[#allocation199_spill] sm:$0xff] %v7329_v60  ;;  %1123 = vrot.lane.b32.xlu1 %v6366_v33, %s5973_s9  ;;  %v15304_v60 = vld [vmem:[#allocation32_spill] sm:$0xff] }
 0x18a   : > { %1121 = vrot.lane.b32.xlu0 %v6372_v26, %s5973_s9 }
 0x18b   : > { %v7338_v6 = vpop.permute.xlu1 %931 }
 0x18c   : > { %15269 = vst [vmem:[#allocation200_spill] sm:$0xff] %v7338_v6  ;;  %v7340_v16 = vpop.permute.xlu0 %929 }
 0x18d   : > { %15270 = vst [vmem:[#allocation201_spill] sm:$0xff] %v7340_v16  ;;  %1127 = vrot.lane.b32.xlu1 %v7336_v24, %s5973_s9  ;;  %v15320_v16 = vld [vmem:[#allocation58_spill] sm:$0xff] }
 0x18e   : > { %1125 = vrot.lane.b32.xlu0 %v6868_v34, %s5973_s9 }
 0x18f   : > { %v7346_v44 = vpop.permute.xlu1 %935 }
 0x190   : > { %15271 = vst [vmem:[#allocation202_spill] sm:$0xff] %v7346_v44  ;;  %v7348_v46 = vpop.permute.xlu0 %933 }
 0x191   : > { %15272 = vst [vmem:[#allocation203_spill] sm:$0xff] %v7348_v46  ;;  %1131 = vrot.lane.b32.xlu1 %v15092_v47, %s5973_s9  ;;  %v7371_v47 = vld [vmem:[%s6067_s30 + $0x270] sm:$0xff] }
 0x192   : > { %1129 = vrot.lane.b32.xlu0 %v15095_v19, %s5973_s9 }
 0x193   : > { %v7354_v26 = vpop.permute.xlu1 %983 }
 0x194   : > { %15273 = vst [vmem:[#allocation204_spill] sm:$0xff] %v7354_v26  ;;  %v7356_v33 = vpop.permute.xlu0 %981 }
 0x195   : > { %15274 = vst [vmem:[#allocation205_spill] sm:$0xff] %v7356_v33  ;;  %1135 = vrot.lane.b32.xlu1 %v6461_v57, %s5973_s9 }
 0x196   : > { %1133 = vrot.lane.b32.xlu0 %v15101_v52, %s5973_s9 }
 0x197   : > { %v7362_v34 = vpop.permute.xlu1 %987 }
 0x198   : > { %15275 = vst [vmem:[#allocation206_spill] sm:$0xff] %v7362_v34  ;;  %v7364_v38 = vpop.permute.xlu0 %985 }
 0x199   : > { %15276 = vst [vmem:[#allocation207_spill] sm:$0xff] %v7364_v38  ;;  %1139 = vrot.lane.b32.xlu1 %v6493_v63, %s5973_s9 }
 0x19a   : > { %1137 = vrot.lane.b32.xlu0 %v6499_v42, %s5973_s9  ;;  %v7392_v42 = vld [vmem:[%s6067_s30 + $0x98] sm:$0x3] }
 0x19b   : > { %v7373_v19 = vpop.permute.xlu1 %991 }
 0x19c   : > { %15277 = vst [vmem:[#allocation208_spill] sm:$0xff] %v7373_v19  ;;  %v7375_v33 = vpop.permute.xlu0 %989 }
 0x19d   : > { %15278 = vst [vmem:[#allocation209_spill] sm:$0xff] %v7375_v33  ;;  %1143 = vrot.lane.b32.xlu1 %v7371_v47, %s5973_s9 }
 0x19e   : > { %1141 = vrot.lane.b32.xlu0 %v6903_v23, %s5973_s9  ;;  %v1181_v23 = vrot.slane %v7254_v30, 1 }
 0x19f   : > { %v7381_v57 = vpop.permute.xlu1 %995 }
 0x1a0   : > { %15279 = vst [vmem:[#allocation210_spill] sm:$0xff] %v7381_v57  ;;  %v7383_v52 = vpop.permute.xlu0 %993 }
 0x1a1   : > { %15280 = vst [vmem:[#allocation211_spill] sm:$0xff] %v7383_v52  ;;  %1195 = vrot.lane.b32.xlu1 %v15149_v12, %s5974_s10  ;;  %v1182_v12 = vrot.slane %v7392_v42, 1 }
 0x1a2   : > { %1193 = vrot.lane.b32.xlu0 %v15144_v14, %s5974_s10 }
 0x1a3   : > { %v7389_v63 = vpop.permute.xlu1 %999 }
 0x1a4   : > { %15281 = vst [vmem:[#allocation212_spill] sm:$0xff] %v7389_v63  ;;  %v7394_v33 = vpop.permute.xlu0 %997 }
 0x1a5   : > { %15282 = vst [vmem:[#allocation213_spill] sm:$0xff] %v7394_v33  ;;  %1199 = vrot.lane.b32.xlu1 %v15153_v36, %s5974_s10  ;;  %v1183_v36 = vsel %vm371_vm0, %v1181_v23, %v1182_v12  ;;  %v15292_v12 = vld [vmem:[#allocation22_spill] sm:$0xff] }
 0x1a6   : > { %1197 = vrot.lane.b32.xlu0 %v15148_v39, %s5974_s10 }
 0x1a7   : > { %v7402_v52 = vpop.permute.xlu1 %1003 }
 0x1a8   : > { %15283 = vst [vmem:[#allocation214_spill] sm:$0xff] %v7402_v52  ;;  %v7404_v14 = vpop.permute.xlu0 %1001 }
 0x1a9   : > { %15284 = vst [vmem:[#allocation215_spill] sm:$0xff] %v7404_v14  ;;  %1203 = vrot.lane.b32.xlu1 %v15156_v27, %s5974_s10 }
 0x1aa   : > { %1201 = vrot.lane.b32.xlu0 %v15152_v21, %s5974_s10  ;;  %v7429_v21 = vld [vmem:[%s6067_s30 + $0x138] sm:$0x3] }
 0x1ab   : > { %v7411_v33 = vpop.permute.xlu1 %1007  ;;  %15290 = vst [vmem:[#allocation221_spill] sm:$0xff] %v7429_v21 }
 0x1ac   : > { %15285 = vst [vmem:[#allocation216_spill] sm:$0xff] %v7411_v33  ;;  %v7413_v63 = vpop.permute.xlu0 %1005 }
 0x1ad   : > { %15286 = vst [vmem:[#allocation217_spill] sm:$0xff] %v7413_v63  ;;  %1207 = vrot.lane.b32.xlu1 %v1183_v36, %s5974_s10  ;;  %v1184_v36 = vrot.slane %v7301_v51, 1  ;;  %v14636_v63 = vrot.slane %v7429_v21, 1 }
 0x1ae   : > { %1205 = vrot.lane.b32.xlu0 %v6943_v53, %s5974_s10  ;;  %v15293_v53 = vld [vmem:[#allocation23_spill] sm:$0xff] }
 0x1af   : > { %v7418_v39 = vpop.permute.xlu1 %1011  ;;  %v7450_v19 = vsel %vm371_vm0, %v1184_v36, %v14636_v63  ;;  %v15305_v36 = vld [vmem:[#allocation34_spill] sm:$0xff] }
 0x1b0   : > { %15287 = vst [vmem:[#allocation218_spill] sm:$0xff] %v7418_v39  ;;  %v7420_v14 = vpop.permute.xlu0 %1009 }
 0x1b1   : > { %15288 = vst [vmem:[#allocation219_spill] sm:$0xff] %v7420_v14  ;;  %1211 = vrot.lane.b32.xlu1 %v15165_v20, %s5974_s10 }
 0x1b2   : > { %1209 = vrot.lane.b32.xlu0 %v15159_v48, %s5974_s10 }
 0x1b3   : > { %v7426_v27 = vpop.permute.xlu1 %1015 }
 0x1b4   : > { %15289 = vst [vmem:[#allocation220_spill] sm:$0xff] %v7426_v27  ;;  %v7431_v23 = vpop.permute.xlu0 %1013  ;;  %v15296_v27 = vld [vmem:[#allocation25_spill] sm:$0xff] }
 0x1b5   : > { %15291 = vst [vmem:[#allocation222_spill] sm:$0xff] %v7431_v23  ;;  %1215 = vrot.lane.b32.xlu1 %v15292_v12, %s5974_s10  ;;  %v15297_v23 = vld [vmem:[#allocation27_spill] sm:$0xff] }
 0x1b6   : > { %1213 = vrot.lane.b32.xlu0 %v15293_v53, %s5974_s10  ;;  %15298 = vst [vmem:[#allocation27_spill] sm:$0xff] %v7450_v19 }
 0x1b7   : > { %v7439_v52 = vpop.permute.xlu1 %1019 }
 0x1b8   : > { %15294 = vst [vmem:[#allocation23_spill] sm:$0xff] %v7439_v52  ;;  %v7441_v57 = vpop.permute.xlu0 %1017 }
 0x1b9   : > { %15295 = vst [vmem:[#allocation223_spill] sm:$0xff] %v7441_v57  ;;  %1219 = vrot.lane.b32.xlu1 %v15296_v27, %s5974_s10  ;;  %v15301_v57 = vld [vmem:[#allocation121_spill] sm:$0xff] }
 0x1ba   : > { %1217 = vrot.lane.b32.xlu0 %v15297_v23, %s5974_s10 }
 0x1bb   : > { %v7452_v38 = vpop.permute.xlu1 %1023 }
 0x1bc   : > { %15299 = vst [vmem:[#allocation224_spill] sm:$0xff] %v7452_v38  ;;  %v7454_v34 = vpop.permute.xlu0 %1021  ;;  %v7471_v38 = vld [vmem:[%s6067_s30 + $0x1d8] sm:$0x3] }
 0x1bd   : > { %15300 = vst [vmem:[#allocation225_spill] sm:$0xff] %v7454_v34  ;;  %1223 = vrot.lane.b32.xlu1 %v7450_v19, %s5974_s10 }
 0x1be   : > { %1221 = vrot.lane.b32.xlu0 %v15301_v57, %s5974_s10  ;;  %v7849_v57 = vld [vmem:[%s6067_s30 + $0x2a0] sm:$0xff] }
 0x1bf   : > { %v7460_v52 = vpop.permute.xlu1 %1027 }
 0x1c0   : > { %15302 = vst [vmem:[#allocation226_spill] sm:$0xff] %v7460_v52  ;;  %v7462_v26 = vpop.permute.xlu0 %1025  ;;  %v7481_v52 = vrot.slane %v7471_v38, 1 }
 0x1c1   : > { %15303 = vst [vmem:[#allocation227_spill] sm:$0xff] %v7462_v26  ;;  %1227 = vrot.lane.b32.xlu1 %v15304_v60, %s5974_s10  ;;  %v1187_v26 = vrot.slane %v7336_v24, 1 }
 0x1c2   : > { %1225 = vrot.lane.b32.xlu0 %v15305_v36, %s5974_s10  ;;  %15310 = vst [vmem:[#allocation230_spill] sm:$0xff] %v7481_v52 }
 0x1c3   : > { %v7468_v63 = vpop.permute.xlu1 %1031 }
 0x1c4   : > { %15306 = vst [vmem:[#allocation228_spill] sm:$0xff] %v7468_v63  ;;  %v7473_v34 = vpop.permute.xlu0 %1029  ;;  %v7493_v63 = vsel %vm371_vm0, %v1187_v26, %v7481_v52  ;;  %v15321_v26 = vld [vmem:[#allocation60_spill] sm:$0xff] }
 0x1c5   : > { %15307 = vst [vmem:[#allocation229_spill] sm:$0xff] %v7473_v34  ;;  %1231 = vrot.lane.b32.xlu1 %v15308_v10, %s5974_s10  ;;  %v15313_v34 = vld [vmem:[#allocation46_spill] sm:$0xff]  ;;  %15314 = vst [vmem:[#allocation233_spill] sm:$0xff] %v7493_v63 }
 0x1c6   : > { %1229 = vrot.lane.b32.xlu0 %v15309_v45, %s5974_s10 }
 0x1c7   : > { %v7483_v0 = vpop.permute.xlu1 %1035 }
 0x1c8   : > { %15311 = vst [vmem:[#allocation231_spill] sm:$0xff] %v7483_v0  ;;  %v7485_v50 = vpop.permute.xlu0 %1033  ;;  %v15317_v0 = vld [vmem:[#allocation131_spill] sm:$0xff] }
 0x1c9   : > { %15312 = vst [vmem:[#allocation232_spill] sm:$0xff] %v7485_v50  ;;  %1235 = vrot.lane.b32.xlu1 %v15190_v58, %s5974_s10 }
 0x1ca   : > { %1233 = vrot.lane.b32.xlu0 %v15313_v34, %s5974_s10 }
 0x1cb   : > { %v7495_v19 = vpop.permute.xlu1 %1039 }
 0x1cc   : > { %15315 = vst [vmem:[#allocation234_spill] sm:$0xff] %v7495_v19  ;;  %v7497_v46 = vpop.permute.xlu0 %1037  ;;  %v7514_v19 = vld [vmem:[%s6067_s30 + $0x278] sm:$0x3] }
 0x1cd   : > { %15316 = vst [vmem:[#allocation235_spill] sm:$0xff] %v7497_v46  ;;  %1239 = vrot.lane.b32.xlu1 %v7493_v63, %s5974_s10  ;;  %v15324_v63 = vld [vmem:[#allocation64_spill] sm:$0xff] }
 0x1ce   : > { %1237 = vrot.lane.b32.xlu0 %v15317_v0, %s5974_s10 }
 0x1cf   : > { %v7503_v50 = vpop.permute.xlu1 %1043 }
 0x1d0   : > { %15318 = vst [vmem:[#allocation236_spill] sm:$0xff] %v7503_v50  ;;  %v7505_v44 = vpop.permute.xlu0 %1041  ;;  %v7524_v50 = vrot.slane %v7514_v19, 1 }
 0x1d1   : > { %15319 = vst [vmem:[#allocation237_spill] sm:$0xff] %v7505_v44  ;;  %1243 = vrot.lane.b32.xlu1 %v15320_v16, %s5974_s10  ;;  %v1190_v44 = vrot.slane %v7371_v47, 1 }
 0x1d2   : > { %1241 = vrot.lane.b32.xlu0 %v15321_v26, %s5974_s10  ;;  %15325 = vst [vmem:[#allocation240_spill] sm:$0xff] %v7524_v50 }
 0x1d3   : > { %v7511_v52 = vpop.permute.xlu1 %1083 }
 0x1d4   : > { %15322 = vst [vmem:[#allocation238_spill] sm:$0xff] %v7511_v52  ;;  %v7516_v46 = vpop.permute.xlu0 %1081 }
 0x1d5   : > { %15323 = vst [vmem:[#allocation239_spill] sm:$0xff] %v7516_v46  ;;  %1247 = vrot.lane.b32.xlu1 %v15201_v59, %s5974_s10  ;;  %v7536_v46 = vsel %vm371_vm0, %v1190_v44, %v7524_v50 }
 0x1d6   : > { %1245 = vrot.lane.b32.xlu0 %v15324_v63, %s5974_s10  ;;  %15328 = vst [vmem:[#allocation243_spill] sm:$0xff] %v7536_v46 }
 0x1d7   : > { %v7526_v6 = vpop.permute.xlu1 %1087 }
 0x1d8   : > { %15326 = vst [vmem:[#allocation241_spill] sm:$0xff] %v7526_v6  ;;  %v7528_v14 = vpop.permute.xlu0 %1085 }
 0x1d9   : > { %15327 = vst [vmem:[#allocation242_spill] sm:$0xff] %v7528_v14  ;;  %1251 = vrot.lane.b32.xlu1 %v6530_v54, %s5974_s10 }
 0x1da   : > { %1249 = vrot.lane.b32.xlu0 %v6536_v56, %s5974_s10 }
 0x1db   : > { %v7538_v52 = vpop.permute.xlu1 %1091 }
 0x1dc   : > { %15329 = vst [vmem:[#allocation244_spill] sm:$0xff] %v7538_v52  ;;  %v7540_v39 = vpop.permute.xlu0 %1089  ;;  %v1289_v52 = vrot.slane %v7254_v30, 2 }
 0x1dd   : > { %15330 = vst [vmem:[#allocation245_spill] sm:$0xff] %v7540_v39  ;;  %1255 = vrot.lane.b32.xlu1 %v7536_v46, %s5974_s10  ;;  %v7728_v46 = vld [vmem:[%s6067_s30 + $0x150] sm:$0xff] }
 0x1de   : > { %1253 = vrot.lane.b32.xlu0 %v7071_v7, %s5974_s10  ;;  %v7835_v7 = vld [vmem:[%s6067_s30 + $0x280] sm:$0xff] }
 0x1df   : > { %v7546_v14 = vpop.permute.xlu1 %1095 }
 0x1e0   : > { %15331 = vst [vmem:[#allocation246_spill] sm:$0xff] %v7546_v14  ;;  %v7548_v6 = vpop.permute.xlu0 %1093 }
 0x1e1   : > { %15332 = vst [vmem:[#allocation247_spill] sm:$0xff] %v7548_v6  ;;  %1303 = vrot.lane.b32.xlu1 %v6556_v5, %s5975_s11  ;;  %v1290_v6 = vrot.slane %v7392_v42, 2 }
 0x1e2   : > { %1301 = vrot.lane.b32.xlu0 %v6561_v9, %s5975_s11 }
 0x1e3   : > { %v7554_v44 = vpop.permute.xlu1 %1099  ;;  %v1291_v9 = vsel %vm564_vm1, %v1289_v52, %v1290_v6  ;;  %v1293_v6 = vrot.slane %v7429_v21, 2 }
 0x1e4   : > { %15333 = vst [vmem:[#allocation248_spill] sm:$0xff] %v7554_v44  ;;  %v7556_v39 = vpop.permute.xlu0 %1097  ;;  %v15349_v44 = vld [vmem:[#allocation75_spill] sm:$0xff] }
 0x1e5   : > { %15334 = vst [vmem:[#allocation249_spill] sm:$0xff] %v7556_v39  ;;  %1307 = vrot.lane.b32.xlu1 %v6570_v25, %s5975_s11 }
 0x1e6   : > { %1305 = vrot.lane.b32.xlu0 %v6575_v32, %s5975_s11 }
 0x1e7   : > { %v7564_v14 = vpop.permute.xlu1 %1103 }
 0x1e8   : > { %15335 = vst [vmem:[#allocation250_spill] sm:$0xff] %v7564_v14  ;;  %v7566_v5 = vpop.permute.xlu0 %1101 }
 0x1e9   : > { %15336 = vst [vmem:[#allocation251_spill] sm:$0xff] %v7566_v5  ;;  %1311 = vrot.lane.b32.xlu1 %v6584_v22, %s5975_s11 }
 0x1ea   : > { %1309 = vrot.lane.b32.xlu0 %v6589_v13, %s5975_s11 }
 0x1eb   : > { %v7573_v25 = vpop.permute.xlu1 %1107 }
 0x1ec   : > { %15337 = vst [vmem:[#allocation252_spill] sm:$0xff] %v7573_v25  ;;  %v7575_v30 = vpop.permute.xlu0 %1105  ;;  %v7820_v25 = vld [vmem:[%s6067_s30 + $0x250] sm:$0xff] }
 0x1ed   : > { %15338 = vst [vmem:[#allocation253_spill] sm:$0xff] %v7575_v30  ;;  %1315 = vrot.lane.b32.xlu1 %v1291_v9, %s5975_s11  ;;  %15397 = vst [vmem:[#allocation303_spill] sm:$0xff] %v7820_v25 }
 0x1ee   : > { %1313 = vrot.lane.b32.xlu0 %v7108_v35, %s5975_s11  ;;  %v1292_v35 = vrot.slane %v7301_v51, 2 }
 0x1ef   : > { %v7580_v32 = vpop.permute.xlu1 %1111 }
 0x1f0   : > { %15339 = vst [vmem:[#allocation254_spill] sm:$0xff] %v7580_v32  ;;  %v7582_v42 = vpop.permute.xlu0 %1109  ;;  %v1294_v30 = vsel %vm564_vm1, %v1292_v35, %v1293_v6 }
 0x1f1   : > { %15340 = vst [vmem:[#allocation255_spill] sm:$0xff] %v7582_v42  ;;  %1319 = vrot.lane.b32.xlu1 %v6612_v17, %s5975_s11  ;;  %v7792_v42 = vld [vmem:[%s6067_s30 + $0x210] sm:$0xff] }
 0x1f2   : > { %1317 = vrot.lane.b32.xlu0 %v6617_v2, %s5975_s11  ;;  %15389 = vst [vmem:[#allocation295_spill] sm:$0xff] %v7792_v42 }
 0x1f3   : > { %v7588_v22 = vpop.permute.xlu1 %1115 }
 0x1f4   : > { %15341 = vst [vmem:[#allocation256_spill] sm:$0xff] %v7588_v22  ;;  %v7590_v13 = vpop.permute.xlu0 %1113 }
 0x1f5   : > { %15342 = vst [vmem:[#allocation257_spill] sm:$0xff] %v7590_v13  ;;  %1323 = vrot.lane.b32.xlu1 %v6626_v31, %s5975_s11 }
 0x1f6   : > { %1321 = vrot.lane.b32.xlu0 %v6631_v40, %s5975_s11 }
 0x1f7   : > { %v7598_v52 = vpop.permute.xlu1 %1119 }
 0x1f8   : > { %15343 = vst [vmem:[#allocation258_spill] sm:$0xff] %v7598_v52  ;;  %v7600_v9 = vpop.permute.xlu0 %1117 }
 0x1f9   : > { %15344 = vst [vmem:[#allocation259_spill] sm:$0xff] %v7600_v9  ;;  %1327 = vrot.lane.b32.xlu1 %v6640_v15, %s5975_s11 }
 0x1fa   : > { %1325 = vrot.lane.b32.xlu0 %v6645_v29, %s5975_s11 }
 0x1fb   : > { %v7607_v5 = vpop.permute.xlu1 %1123 }
 0x1fc   : > { %15345 = vst [vmem:[#allocation260_spill] sm:$0xff] %v7607_v5  ;;  %v7609_v14 = vpop.permute.xlu0 %1121  ;;  %v1296_v5 = vrot.slane %v7471_v38, 2 }
 0x1fd   : > { %15346 = vst [vmem:[#allocation261_spill] sm:$0xff] %v7609_v14  ;;  %1331 = vrot.lane.b32.xlu1 %v1294_v30, %s5975_s11  ;;  %v15352_v30 = vld [vmem:[#allocation77_spill] sm:$0xff] }
 0x1fe   : > { %1329 = vrot.lane.b32.xlu0 %v7145_v62, %s5975_s11 }
 0x1ff   : > { %v7614_v51 = vpop.permute.xlu1 %1127 }
 0x200   : > { %15347 = vst [vmem:[#allocation262_spill] sm:$0xff] %v7614_v51  ;;  %v7616_v39 = vpop.permute.xlu0 %1125  ;;  %v1295_v51 = vrot.slane %v7336_v24, 2 }
 0x201   : > { %15348 = vst [vmem:[#allocation263_spill] sm:$0xff] %v7616_v39  ;;  %1335 = vrot.lane.b32.xlu1 %v15227_v55, %s5975_s11 }
 0x202   : > { %1333 = vrot.lane.b32.xlu0 %v15349_v44, %s5975_s11 }
 0x203   : > { %v7622_v35 = vpop.permute.xlu1 %1131 }
 0x204   : > { %15350 = vst [vmem:[#allocation75_spill] sm:$0xff] %v7622_v35  ;;  %v7624_v6 = vpop.permute.xlu0 %1129  ;;  %v1297_v35 = vsel %vm564_vm1, %v1295_v51, %v1296_v5 }
 0x205   : > { %15351 = vst [vmem:[#allocation264_spill] sm:$0xff] %v7624_v6  ;;  %1339 = vrot.lane.b32.xlu1 %v15231_v28, %s5975_s11 }
 0x206   : > { %1337 = vrot.lane.b32.xlu0 %v15352_v30, %s5975_s11 }
 0x207   : > { %v7632_v39 = vpop.permute.xlu1 %1135 }
 0x208   : > { %15353 = vst [vmem:[#allocation77_spill] sm:$0xff] %v7632_v39  ;;  %v7634_v52 = vpop.permute.xlu0 %1133  ;;  %v15359_v39 = vld [vmem:[#allocation49_spill] sm:$0xff] }
 0x209   : > { %15354 = vst [vmem:[#allocation265_spill] sm:$0xff] %v7634_v52  ;;  %1343 = vrot.lane.b32.xlu1 %v15235_v41, %s5975_s11  ;;  %v1299_v52 = vrot.slane %v7514_v19, 2 }
 0x20a   : > { %1341 = vrot.lane.b32.xlu0 %v15230_v1, %s5975_s11 }
 0x20b   : > { %v7641_v6 = vpop.permute.xlu1 %1139 }
 0x20c   : > { %15355 = vst [vmem:[#allocation266_spill] sm:$0xff] %v7641_v6  ;;  %v7643_v14 = vpop.permute.xlu0 %1137 }
 0x20d   : > { %15356 = vst [vmem:[#allocation267_spill] sm:$0xff] %v7643_v14  ;;  %1347 = vrot.lane.b32.xlu1 %v1297_v35, %s5975_s11  ;;  %v1298_v35 = vrot.slane %v7371_v47, 2  ;;  %v15366_v47 = vld [vmem:[#allocation174_spill] sm:$0xff] }
 0x20e   : > { %1345 = vrot.lane.b32.xlu0 %v7182_v49, %s5975_s11 }
 0x20f   : > { %v7648_v38 = vpop.permute.xlu1 %1143 }
 0x210   : > { %15357 = vst [vmem:[#allocation268_spill] sm:$0xff] %v7648_v38  ;;  %v7650_v24 = vpop.permute.xlu0 %1141 }
 0x211   : > { %15358 = vst [vmem:[#allocation269_spill] sm:$0xff] %v7650_v24  ;;  %1351 = vrot.lane.b32.xlu1 %v6724_v43, %s5975_s11  ;;  %v7744_v24 = vld [vmem:[%s6067_s30 + $0x160] sm:$0xff] }
 0x212   : > { %1349 = vrot.lane.b32.xlu0 %v15359_v39, %s5975_s11 }
 0x213   : > { %v7656_v5 = vpop.permute.xlu1 %1195 }
 0x214   : > { %15360 = vst [vmem:[#allocation49_spill] sm:$0xff] %v7656_v5  ;;  %v7658_v51 = vpop.permute.xlu0 %1193 }
 0x215   : > { %15361 = vst [vmem:[#allocation270_spill] sm:$0xff] %v7658_v51  ;;  %1355 = vrot.lane.b32.xlu1 %v6742_v61, %s5975_s11  ;;  %v1300_v51 = vsel %vm564_vm1, %v1298_v35, %v1299_v52  ;;  %v5712_v52 = vld [vmem:[%s6067_s30 + $0xa0] sm:$0xff] }
 0x216   : > { %1353 = vrot.lane.b32.xlu0 %v6749_v8, %s5975_s11 }
 0x217   : > { %v7666_v22 = vpop.permute.xlu1 %1199 }
 0x218   : > { %15362 = vst [vmem:[#allocation271_spill] sm:$0xff] %v7666_v22  ;;  %v7668_v9 = vpop.permute.xlu0 %1197  ;;  %v7687_v22 = vld [vmem:[%s6067_s30 + $0xb0] sm:$0xff] }
 0x219   : > { %15363 = vst [vmem:[#allocation272_spill] sm:$0xff] %v7668_v9  ;;  %1359 = vrot.lane.b32.xlu1 %v6760_v3, %s5975_s11 }
 0x21a   : > { %1357 = vrot.lane.b32.xlu0 %v6765_v37, %s5975_s11 }
 0x21b   : > { %v7675_v5 = vpop.permute.xlu1 %1203 }
 0x21c   : > { %15364 = vst [vmem:[#allocation273_spill] sm:$0xff] %v7675_v5  ;;  %v7677_v13 = vpop.permute.xlu0 %1201 }
 0x21d   : > { %15365 = vst [vmem:[#allocation274_spill] sm:$0xff] %v7677_v13  ;;  %1363 = vrot.lane.b32.xlu1 %v1300_v51, %s5975_s11  ;;  %v15373_v13 = vld [vmem:[#allocation189_spill] sm:$0xff] }
 0x21e   : > { %1361 = vrot.lane.b32.xlu0 %v15366_v47, %s5975_s11  ;;  %v7739_v47 = vld [vmem:[%s6067_s30 + $0x170] sm:$0xff] }
 0x21f   : > { %v7682_v19 = vpop.permute.xlu1 %1207 }
 0x220   : > { %15367 = vst [vmem:[#allocation275_spill] sm:$0xff] %v7682_v19  ;;  %v7684_v9 = vpop.permute.xlu0 %1205 }
 0x221   : > { %15368 = vst [vmem:[#allocation276_spill] sm:$0xff] %v7684_v9  ;;  %1407 = vrot.lane.b32.xlu1 %v7687_v22, %s5976_s18 }
 0x222   : > { %1405 = vrot.lane.b32.xlu0 %v5712_v52, %s5976_s18 }
 0x223   : > { %v7693_v35 = vpop.permute.xlu1 %1211 }
 0x224   : > { %15369 = vst [vmem:[#allocation277_spill] sm:$0xff] %v7693_v35  ;;  %v7695_v51 = vpop.permute.xlu0 %1209  ;;  %v7714_v35 = vld [vmem:[%s6067_s30 + $0x110] sm:$0xff] }
 0x225   : > { %15370 = vst [vmem:[#allocation278_spill] sm:$0xff] %v7695_v51  ;;  %1411 = vrot.lane.b32.xlu1 %v7269_v11, %s5976_s18 }
 0x226   : > { %1409 = vrot.lane.b32.xlu0 %v7274_v4, %s5976_s18 }
 0x227   : > { %v7701_v9 = vpop.permute.xlu1 %1215 }
 0x228   : > { %15371 = vst [vmem:[#allocation279_spill] sm:$0xff] %v7701_v9  ;;  %v7703_v19 = vpop.permute.xlu0 %1213  ;;  %v7719_v9 = vld [vmem:[%s6067_s30 + $0x100] sm:$0xff] }
 0x229   : > { %15372 = vst [vmem:[#allocation280_spill] sm:$0xff] %v7703_v19  ;;  %1415 = vrot.lane.b32.xlu1 %v15373_v13, %s5976_s18 }
 0x22a   : > { %1413 = vrot.lane.b32.xlu0 %v7288_v18, %s5976_s18 }
 0x22b   : > { %v7709_v52 = vpop.permute.xlu1 %1219 }
 0x22c   : > { %15374 = vst [vmem:[#allocation189_spill] sm:$0xff] %v7709_v52  ;;  %v7711_v51 = vpop.permute.xlu0 %1217 }
 0x22d   : > { %15375 = vst [vmem:[#allocation281_spill] sm:$0xff] %v7711_v51  ;;  %1419 = vrot.lane.b32.xlu1 %v7714_v35, %s5976_s18  ;;  %v5716_v51 = vld [vmem:[%s6067_s30 + $0x140] sm:$0xff] }
 0x22e   : > { %1417 = vrot.lane.b32.xlu0 %v7719_v9, %s5976_s18 }
 0x22f   : > { %v7723_v19 = vpop.permute.xlu1 %1223 }
 0x230   : > { %15376 = vst [vmem:[#allocation282_spill] sm:$0xff] %v7723_v19  ;;  %v7725_v5 = vpop.permute.xlu0 %1221 }
 0x231   : > { %15377 = vst [vmem:[#allocation283_spill] sm:$0xff] %v7725_v5  ;;  %1423 = vrot.lane.b32.xlu1 %v7728_v46, %s5976_s18 }
 0x232   : > { %1421 = vrot.lane.b32.xlu0 %v5716_v51, %s5976_s18 }
 0x233   : > { %v7734_v50 = vpop.permute.xlu1 %1227 }
 0x234   : > { %15378 = vst [vmem:[#allocation284_spill] sm:$0xff] %v7734_v50  ;;  %v7736_v21 = vpop.permute.xlu0 %1225  ;;  %v7753_v50 = vld [vmem:[%s6067_s30 + $0x190] sm:$0xff] }
 0x235   : > { %15379 = vst [vmem:[#allocation285_spill] sm:$0xff] %v7736_v21  ;;  %1427 = vrot.lane.b32.xlu1 %v7739_v47, %s5976_s18  ;;  %v7758_v21 = vld [vmem:[%s6067_s30 + $0x180] sm:$0xff] }
 0x236   : > { %1425 = vrot.lane.b32.xlu0 %v7744_v24, %s5976_s18 }
 0x237   : > { %v7748_v38 = vpop.permute.xlu1 %1231 }
 0x238   : > { %15380 = vst [vmem:[#allocation286_spill] sm:$0xff] %v7748_v38  ;;  %v7750_v51 = vpop.permute.xlu0 %1229  ;;  %v7767_v38 = vld [vmem:[%s6067_s30 + $0x1b0] sm:$0xff] }
 0x239   : > { %15381 = vst [vmem:[#allocation287_spill] sm:$0xff] %v7750_v51  ;;  %1431 = vrot.lane.b32.xlu1 %v7753_v50, %s5976_s18  ;;  %v7772_v51 = vld [vmem:[%s6067_s30 + $0x1a0] sm:$0xff] }
 0x23a   : > { %1429 = vrot.lane.b32.xlu0 %v7758_v21, %s5976_s18 }
 0x23b   : > { %v7762_v14 = vpop.permute.xlu1 %1235 }
 0x23c   : > { %15382 = vst [vmem:[#allocation288_spill] sm:$0xff] %v7762_v14  ;;  %v7764_v6 = vpop.permute.xlu0 %1233  ;;  %v7781_v14 = vld [vmem:[%s6067_s30 + $0x1f0] sm:$0xff] }
 0x23d   : > { %15383 = vst [vmem:[#allocation289_spill] sm:$0xff] %v7764_v6  ;;  %1435 = vrot.lane.b32.xlu1 %v7767_v38, %s5976_s18  ;;  %15386 = vst [vmem:[#allocation292_spill] sm:$0xff] %v7781_v14  ;;  %v5724_v6 = vld [vmem:[%s6067_s30 + $0x1e0] sm:$0xff] }
 0x23e   : > { %1433 = vrot.lane.b32.xlu0 %v7772_v51, %s5976_s18 }
 0x23f   : > { %v7776_v49 = vpop.permute.xlu1 %1239 }
 0x240   : > { %15384 = vst [vmem:[#allocation290_spill] sm:$0xff] %v7776_v49  ;;  %v7778_v62 = vpop.permute.xlu0 %1237  ;;  %v7797_v49 = vld [vmem:[%s6067_s30 + $0x200] sm:$0xff] }
 0x241   : > { %15385 = vst [vmem:[#allocation291_spill] sm:$0xff] %v7778_v62  ;;  %1439 = vrot.lane.b32.xlu1 %v7781_v14, %s5976_s18  ;;  %15390 = vst [vmem:[#allocation296_spill] sm:$0xff] %v7797_v49  ;;  %v15409_v14 = vld [vmem:[#allocation14_spill] sm:$0xff] }
 0x242   : > { %1437 = vrot.lane.b32.xlu0 %v5724_v6, %s5976_s18 }
 0x243   : > { %v7787_v5 = vpop.permute.xlu1 %1243 }
 0x244   : > { %15387 = vst [vmem:[#allocation293_spill] sm:$0xff] %v7787_v5  ;;  %v7789_v19 = vpop.permute.xlu0 %1241  ;;  %v7806_v5 = vld [vmem:[%s6067_s30 + $0x230] sm:$0xff] }
 0x245   : > { %15388 = vst [vmem:[#allocation294_spill] sm:$0xff] %v7789_v19  ;;  %1443 = vrot.lane.b32.xlu1 %v7792_v42, %s5976_s18  ;;  %15393 = vst [vmem:[#allocation299_spill] sm:$0xff] %v7806_v5  ;;  %v7811_v19 = vld [vmem:[%s6067_s30 + $0x220] sm:$0xff] }
 0x246   : > { %1441 = vrot.lane.b32.xlu0 %v7797_v49, %s5976_s18  ;;  %15394 = vst [vmem:[#allocation300_spill] sm:$0xff] %v7811_v19  ;;  %v7877_v42 = vld [vmem:[%s6067_s30 + $0x2e0] sm:$0xff] }
 0x247   : > { %v7801_v62 = vpop.permute.xlu1 %1247 }
 0x248   : > { %15391 = vst [vmem:[#allocation297_spill] sm:$0xff] %v7801_v62  ;;  %v7803_v6 = vpop.permute.xlu0 %1245  ;;  %v7825_v62 = vld [vmem:[%s6067_s30 + $0x240] sm:$0xff] }
 0x249   : > { %15392 = vst [vmem:[#allocation298_spill] sm:$0xff] %v7803_v6  ;;  %1447 = vrot.lane.b32.xlu1 %v7806_v5, %s5976_s18  ;;  %15398 = vst [vmem:[#allocation304_spill] sm:$0xff] %v7825_v62  ;;  %v7830_v6 = vld [vmem:[%s6067_s30 + $0x290] sm:$0xff]  ;;  %v7863_v5 = vld [vmem:[%s6067_s30 + $0x2c0] sm:$0xff] }
 0x24a   : > { %1445 = vrot.lane.b32.xlu0 %v7811_v19, %s5976_s18 }
 0x24b   : > { %v7815_v32 = vpop.permute.xlu1 %1251 }
 0x24c   : > { %15395 = vst [vmem:[#allocation301_spill] sm:$0xff] %v7815_v32  ;;  %v7817_v52 = vpop.permute.xlu0 %1249  ;;  %v7844_v32 = vld [vmem:[%s6067_s30 + $0x2b0] sm:$0xff] }
 0x24d   : > { %15396 = vst [vmem:[#allocation302_spill] sm:$0xff] %v7817_v52  ;;  %1451 = vrot.lane.b32.xlu1 %v7820_v25, %s5976_s18 }
 0x24e   : > { %1449 = vrot.lane.b32.xlu0 %v7825_v62, %s5976_s18 }
 0x24f   : > { %v7832_v33 = vpop.permute.xlu1 %1255 }
 0x250   : > { %15399 = vst [vmem:[#allocation305_spill] sm:$0xff] %v7832_v33  ;;  %v7837_v52 = vpop.permute.xlu0 %1253 }
 0x251   : > { %15400 = vst [vmem:[#allocation306_spill] sm:$0xff] %v7837_v52  ;;  %1455 = vrot.lane.b32.xlu1 %v7830_v6, %s5976_s18  ;;  %v7858_v52 = vld [vmem:[%s6067_s30 + $0x2d0] sm:$0xff] }
 0x252   : > { %1453 = vrot.lane.b32.xlu0 %v7835_v7, %s5976_s18 }
 0x253   : > { %v7846_v0 = vpop.permute.xlu1 %1303 }
 0x254   : > { %15401 = vst [vmem:[#allocation307_spill] sm:$0xff] %v7846_v0  ;;  %v7851_v25 = vpop.permute.xlu0 %1301 }
 0x255   : > { %15402 = vst [vmem:[#allocation308_spill] sm:$0xff] %v7851_v25  ;;  %1459 = vrot.lane.b32.xlu1 %v7844_v32, %s5976_s18  ;;  %v7872_v25 = vld [vmem:[%s6067_s30 + $0x2f0] sm:$0xff] }
 0x256   : > { %1457 = vrot.lane.b32.xlu0 %v7849_v57, %s5976_s18 }
 0x257   : > { %v7860_v33 = vpop.permute.xlu1 %1307 }
 0x258   : > { %15403 = vst [vmem:[#allocation309_spill] sm:$0xff] %v7860_v33  ;;  %v7865_v62 = vpop.permute.xlu0 %1305 }
 0x259   : > { %15404 = vst [vmem:[#allocation310_spill] sm:$0xff] %v7865_v62  ;;  %1463 = vrot.lane.b32.xlu1 %v7858_v52, %s5976_s18 }
 0x25a   : > { %1461 = vrot.lane.b32.xlu0 %v7863_v5, %s5976_s18 }
 0x25b   : > { %v7874_v0 = vpop.permute.xlu1 %1311 }
 0x25c   : > { %15405 = vst [vmem:[#allocation311_spill] sm:$0xff] %v7874_v0  ;;  %v7879_v19 = vpop.permute.xlu0 %1309  ;;  %v15410_v0 = vld [vmem:[#allocation15_spill] sm:$0xff] }
 0x25d   : > { %15406 = vst [vmem:[#allocation312_spill] sm:$0xff] %v7879_v19  ;;  %1467 = vrot.lane.b32.xlu1 %v7872_v25, %s5976_s18 }
 0x25e   : > { %1465 = vrot.lane.b32.xlu0 %v7877_v42, %s5976_s18 }
 0x25f   : > { %v7885_v62 = vpop.permute.xlu1 %1315 }
 0x260   : > { %15407 = vst [vmem:[#allocation313_spill] sm:$0xff] %v7885_v62  ;;  %v7887_v33 = vpop.permute.xlu0 %1313 }
 0x261   : > { %15408 = vst [vmem:[#allocation314_spill] sm:$0xff] %v7887_v33  ;;  %1535 = vrot.lane.b32.xlu1 %v15409_v14, %s5977_s19 }
 0x262   : > { %1533 = vrot.lane.b32.xlu0 %v15410_v0, %s5977_s19 }
 0x263   : > { %v7893_v49 = vpop.permute.xlu1 %1319 }
 0x264   : > { %15411 = vst [vmem:[#allocation14_spill] sm:$0xff] %v7893_v49  ;;  %v7895_v19 = vpop.permute.xlu0 %1317 }
 0x265   : > { %15412 = vst [vmem:[#allocation15_spill] sm:$0xff] %v7895_v19  ;;  %1539 = vrot.lane.b32.xlu1 %v15165_v20, %s5977_s19 }
 0x266   : > { %1537 = vrot.lane.b32.xlu0 %v15159_v48, %s5977_s19 }
 0x267   : > { %v7901_v62 = vpop.permute.xlu1 %1323 }
 0x268   : > { %15413 = vst [vmem:[#allocation315_spill] sm:$0xff] %v7901_v62  ;;  %v7903_v33 = vpop.permute.xlu0 %1321 }
 0x269   : > { %15414 = vst [vmem:[#allocation316_spill] sm:$0xff] %v7903_v33  ;;  %1543 = vrot.lane.b32.xlu1 %v15292_v12, %s5977_s19  ;;  %v15419_v33 = vld [vmem:[#allocation28_spill] sm:$0xff]  ;;  %v15420_v12 = vld [vmem:[#allocation30_spill] sm:$0xff] }
 0x26a   : > { %1541 = vrot.lane.b32.xlu0 %v15293_v53, %s5977_s19 }
 0x26b   : > { %v7909_v0 = vpop.permute.xlu1 %1327 }
 0x26c   : > { %15415 = vst [vmem:[#allocation317_spill] sm:$0xff] %v7909_v0  ;;  %v7911_v49 = vpop.permute.xlu0 %1325 }
 0x26d   : > { %15416 = vst [vmem:[#allocation318_spill] sm:$0xff] %v7911_v49  ;;  %1547 = vrot.lane.b32.xlu1 %v15296_v27, %s5977_s19 }
 0x26e   : > { %1545 = vrot.lane.b32.xlu0 %v15297_v23, %s5977_s19 }
 0x26f   : > { %v7917_v19 = vpop.permute.xlu1 %1331 }
 0x270   : > { %15417 = vst [vmem:[#allocation319_spill] sm:$0xff] %v7917_v19  ;;  %v7919_v62 = vpop.permute.xlu0 %1329 }
 0x271   : > { %15418 = vst [vmem:[#allocation320_spill] sm:$0xff] %v7919_v62  ;;  %1551 = vrot.lane.b32.xlu1 %v15419_v33, %s5977_s19  ;;  %v15430_v62 = vld [vmem:[#allocation53_spill] sm:$0xff] }
 0x272   : > { %1549 = vrot.lane.b32.xlu0 %v15420_v12, %s5977_s19  ;;  %v15429_v12 = vld [vmem:[#allocation51_spill] sm:$0xff] }
 0x273   : > { %v7925_v20 = vpop.permute.xlu1 %1335 }
 0x274   : > { %15421 = vst [vmem:[#allocation321_spill] sm:$0xff] %v7925_v20  ;;  %v7927_v0 = vpop.permute.xlu0 %1333 }
 0x275   : > { %15422 = vst [vmem:[#allocation322_spill] sm:$0xff] %v7927_v0  ;;  %1555 = vrot.lane.b32.xlu1 %v15304_v60, %s5977_s19  ;;  %v8024_v60 = vld [vmem:[%s6067_s30 + $0x2c8] sm:$0x3] }
 0x276   : > { %1553 = vrot.lane.b32.xlu0 %v15305_v36, %s5977_s19  ;;  %v8046_v33 = vrot.slane %v8024_v60, 1 }
 0x277   : > { %v7933_v49 = vpop.permute.xlu1 %1339 }
 0x278   : > { %15423 = vst [vmem:[#allocation323_spill] sm:$0xff] %v7933_v49  ;;  %v7935_v19 = vpop.permute.xlu0 %1337  ;;  %15450 = vst [vmem:[#allocation347_spill] sm:$0xff] %v8046_v33 }
 0x279   : > { %15424 = vst [vmem:[#allocation324_spill] sm:$0xff] %v7935_v19  ;;  %1559 = vrot.lane.b32.xlu1 %v15308_v10, %s5977_s19 }
 0x27a   : > { %1557 = vrot.lane.b32.xlu0 %v15309_v45, %s5977_s19 }
 0x27b   : > { %v7941_v20 = vpop.permute.xlu1 %1343 }
 0x27c   : > { %15425 = vst [vmem:[#allocation325_spill] sm:$0xff] %v7941_v20  ;;  %v7943_v0 = vpop.permute.xlu0 %1341 }
 0x27d   : > { %15426 = vst [vmem:[#allocation326_spill] sm:$0xff] %v7943_v0  ;;  %1563 = vrot.lane.b32.xlu1 %v15190_v58, %s5977_s19  ;;  %v7973_v58 = vld [vmem:[%s6067_s30 + $0x288] sm:$0x3] }
 0x27e   : > { %1561 = vrot.lane.b32.xlu0 %v15313_v34, %s5977_s19  ;;  %15435 = vst [vmem:[#allocation333_spill] sm:$0xff] %v7973_v58 }
 0x27f   : > { %v7949_v49 = vpop.permute.xlu1 %1347 }
 0x280   : > { %15427 = vst [vmem:[#allocation327_spill] sm:$0xff] %v7949_v49  ;;  %v7951_v19 = vpop.permute.xlu0 %1345 }
 0x281   : > { %15428 = vst [vmem:[#allocation328_spill] sm:$0xff] %v7951_v19  ;;  %1567 = vrot.lane.b32.xlu1 %v15429_v12, %s5977_s19  ;;  %v7968_v19 = vld [vmem:[%s6067_s30 + $0x298] sm:$0x3] }
 0x282   : > { %1565 = vrot.lane.b32.xlu0 %v15430_v62, %s5977_s19 }
 0x283   : > { %v7957_v20 = vpop.permute.xlu1 %1351 }
 0x284   : > { %15431 = vst [vmem:[#allocation329_spill] sm:$0xff] %v7957_v20  ;;  %v7959_v0 = vpop.permute.xlu0 %1349  ;;  %v7981_v20 = vrot.slane %v7968_v19, 1 }
 0x285   : > { %15432 = vst [vmem:[#allocation330_spill] sm:$0xff] %v7959_v0  ;;  %1571 = vrot.lane.b32.xlu1 %v15320_v16, %s5977_s19  ;;  %v1512_v0 = vrot.slane %v7830_v6, 1  ;;  %v7988_v16 = vld [vmem:[%s6067_s30 + $0x2b8] sm:$0x3] }
 0x286   : > { %1569 = vrot.lane.b32.xlu0 %v15321_v26, %s5977_s19  ;;  %15436 = vst [vmem:[#allocation334_spill] sm:$0xff] %v7981_v20 }
 0x287   : > { %v7965_v49 = vpop.permute.xlu1 %1355 }
 0x288   : > { %15433 = vst [vmem:[#allocation331_spill] sm:$0xff] %v7965_v49  ;;  %v7970_v12 = vpop.permute.xlu0 %1353  ;;  %v1509_v49 = vrot.slane %v7835_v7, 1 }
 0x289   : > { %15434 = vst [vmem:[#allocation332_spill] sm:$0xff] %v7970_v12  ;;  %1575 = vrot.lane.b32.xlu1 %v15201_v59, %s5977_s19  ;;  %v7993_v59 = vld [vmem:[%s6067_s30 + $0x2a8] sm:$0x3]  ;;  %v8005_v12 = vrot.slane %v7988_v16, 1 }
 0x28a   : > { %1573 = vrot.lane.b32.xlu0 %v15324_v63, %s5977_s19  ;;  %v1518_v63 = vrot.slane %v7844_v32, 1 }
 0x28b   : > { %v7983_v62 = vpop.permute.xlu1 %1359  ;;  %15440 = vst [vmem:[#allocation338_spill] sm:$0xff] %v8005_v12 }
 0x28c   : > { %15437 = vst [vmem:[#allocation335_spill] sm:$0xff] %v7983_v62  ;;  %v7990_v26 = vpop.permute.xlu0 %1357  ;;  %v8001_v62 = vsel %vm371_vm0, %v1512_v0, %v7981_v20  ;;  %v8019_v0 = vld [vmem:[%s6067_s30 + $0x2d8] sm:$0x3] }
 0x28d   : > { %15438 = vst [vmem:[#allocation336_spill] sm:$0xff] %v7990_v26  ;;  %1579 = vrot.lane.b32.xlu1 %v6530_v54, %s5977_s19  ;;  %15439 = vst [vmem:[#allocation337_spill] sm:$0xff] %v8001_v62  ;;  %v15442_v26 = vrot.slane %v7973_v58, 1  ;;  %v1515_v54 = vrot.slane %v7849_v57, 1 }
 0x28e   : > { %1577 = vrot.lane.b32.xlu0 %v6536_v56, %s5977_s19  ;;  %v8016_v56 = vrot.slane %v7993_v59, 1 }
 0x28f   : > { %v8007_v10 = vpop.permute.xlu1 %1363  ;;  %v8012_v34 = vsel %vm371_vm0, %v1509_v49, %v15442_v26  ;;  %v8032_v49 = vsel %vm371_vm0, %v1518_v63, %v8005_v12  ;;  %v1524_v26 = vrot.slane %v7858_v52, 1  ;;  %v8054_v12 = vld [vmem:[%s6067_s30 + $0x2e8] sm:$0x3] }
 0x290   : > { %15441 = vst [vmem:[#allocation339_spill] sm:$0xff] %v8007_v10  ;;  %15443 = vst [vmem:[#allocation340_spill] sm:$0xff] %v8012_v34  ;;  %v8021_v20 = vpop.permute.xlu0 %1361  ;;  %v8036_v10 = vrot.slane %v8019_v0, 1  ;;  %v8076_v27 = vrot.slane %v8054_v12, 1 }
 0x291   : > { %15444 = vst [vmem:[#allocation341_spill] sm:$0xff] %v8016_v56  ;;  %15445 = vst [vmem:[#allocation342_spill] sm:$0xff] %v8021_v20  ;;  %1583 = vrot.lane.b32.xlu1 %v8001_v62, %s5977_s19  ;;  %v8042_v20 = vsel %vm371_vm0, %v1515_v54, %v8016_v56  ;;  %v1521_v62 = vrot.slane %v7863_v5, 1 }
 0x292   : > { %1581 = vrot.lane.b32.xlu0 %v8012_v34, %s5977_s19  ;;  %15446 = vst [vmem:[#allocation343_spill] sm:$0xff] %v8032_v49  ;;  %15447 = vst [vmem:[#allocation344_spill] sm:$0xff] %v8036_v10  ;;  %v8049_v34 = vld [vmem:[%s6067_s30 + $0x2f8] sm:$0x3]  ;;  %v8062_v54 = vsel %vm371_vm0, %v1524_v26, %v8036_v10 }
 0x293   : > { %v8038_v45 = vpop.permute.xlu1 %1407  ;;  %15449 = vst [vmem:[#allocation346_spill] sm:$0xff] %v8042_v20  ;;  %15452 = vst [vmem:[#allocation349_spill] sm:$0xff] %v8062_v54  ;;  %v8066_v56 = vrot.slane %v8049_v34, 1 }
 0x294   : > { %15448 = vst [vmem:[#allocation345_spill] sm:$0xff] %v8038_v45  ;;  %v8051_v63 = vpop.permute.xlu0 %1405  ;;  %v1530_v45 = vrot.slane %v7872_v25, 1  ;;  %15456 = vst [vmem:[#allocation353_spill] sm:$0xff] %v8076_v27 }
 0x295   : > { %15451 = vst [vmem:[#allocation348_spill] sm:$0xff] %v8051_v63  ;;  %1587 = vrot.lane.b32.xlu1 %v8032_v49, %s5977_s19  ;;  %15453 = vst [vmem:[#allocation350_spill] sm:$0xff] %v8066_v56  ;;  %v8072_v63 = vsel %vm371_vm0, %v1521_v62, %v8046_v33  ;;  %v1527_v49 = vrot.slane %v7877_v42, 1 }
 0x296   : > { %1585 = vrot.lane.b32.xlu0 %v8042_v20, %s5977_s19  ;;  %15455 = vst [vmem:[#allocation352_spill] sm:$0xff] %v8072_v63  ;;  %v8086_v26 = vsel %vm371_vm0, %v1530_v45, %v8066_v56  ;;  %v15464_v45 = vld [vmem:[#allocation68_spill] sm:$0xff]  ;;  %v15475_v56 = vld [vmem:[#allocation73_spill] sm:$0xff] }
 0x297   : > { %v8068_v36 = vpop.permute.xlu1 %1411  ;;  %15458 = vst [vmem:[#allocation355_spill] sm:$0xff] %v8086_v26  ;;  %v8092_v62 = vsel %vm371_vm0, %v1527_v49, %v8076_v27 }
 0x298   : > { %15454 = vst [vmem:[#allocation351_spill] sm:$0xff] %v8068_v36  ;;  %v8078_v20 = vpop.permute.xlu0 %1409  ;;  %15460 = vst [vmem:[#allocation357_spill] sm:$0xff] %v8092_v62 }
 0x299   : > { %15457 = vst [vmem:[#allocation354_spill] sm:$0xff] %v8078_v20  ;;  %1591 = vrot.lane.b32.xlu1 %v8062_v54, %s5977_s19 }
 0x29a   : > { %1589 = vrot.lane.b32.xlu0 %v8072_v63, %s5977_s19 }
 0x29b   : > { %v8088_v36 = vpop.permute.xlu1 %1415 }
 0x29c   : > { %15459 = vst [vmem:[#allocation356_spill] sm:$0xff] %v8088_v36  ;;  %v8094_v10 = vpop.permute.xlu0 %1413  ;;  %v15465_v36 = vld [vmem:[#allocation69_spill] sm:$0xff] }
 0x29d   : > { %15461 = vst [vmem:[#allocation358_spill] sm:$0xff] %v8094_v10  ;;  %1595 = vrot.lane.b32.xlu1 %v8086_v26, %s5977_s19 }
 0x29e   : > { %1593 = vrot.lane.b32.xlu0 %v8092_v62, %s5977_s19 }
 0x29f   : > { %v8100_v20 = vpop.permute.xlu1 %1419 }
 0x2a0   : > { %15462 = vst [vmem:[#allocation359_spill] sm:$0xff] %v8100_v20  ;;  %v8102_v33 = vpop.permute.xlu0 %1417 }
 0x2a1   : > { %15463 = vst [vmem:[#allocation360_spill] sm:$0xff] %v8102_v33  ;;  %1655 = vrot.lane.b32.xlu1 %v15464_v45, %s5978_s21 }
 0x2a2   : > { %1653 = vrot.lane.b32.xlu0 %v15465_v36, %s5978_s21 }
 0x2a3   : > { %v8108_v49 = vpop.permute.xlu1 %1423 }
 0x2a4   : > { %15466 = vst [vmem:[#allocation68_spill] sm:$0xff] %v8108_v49  ;;  %v8110_v10 = vpop.permute.xlu0 %1421 }
 0x2a5   : > { %15467 = vst [vmem:[#allocation69_spill] sm:$0xff] %v8110_v10  ;;  %1659 = vrot.lane.b32.xlu1 %v6612_v17, %s5978_s21 }
 0x2a6   : > { %1657 = vrot.lane.b32.xlu0 %v6617_v2, %s5978_s21 }
 0x2a7   : > { %v8116_v20 = vpop.permute.xlu1 %1427 }
 0x2a8   : > { %15468 = vst [vmem:[#allocation361_spill] sm:$0xff] %v8116_v20  ;;  %v8118_v33 = vpop.permute.xlu0 %1425 }
 0x2a9   : > { %15469 = vst [vmem:[#allocation362_spill] sm:$0xff] %v8118_v33  ;;  %1663 = vrot.lane.b32.xlu1 %v6626_v31, %s5978_s21  ;;  %v15474_v33 = vld [vmem:[#allocation72_spill] sm:$0xff] }
 0x2aa   : > { %1661 = vrot.lane.b32.xlu0 %v6631_v40, %s5978_s21 }
 0x2ab   : > { %v8124_v36 = vpop.permute.xlu1 %1431 }
 0x2ac   : > { %15470 = vst [vmem:[#allocation363_spill] sm:$0xff] %v8124_v36  ;;  %v8126_v49 = vpop.permute.xlu0 %1429 }
 0x2ad   : > { %15471 = vst [vmem:[#allocation364_spill] sm:$0xff] %v8126_v49  ;;  %1667 = vrot.lane.b32.xlu1 %v6640_v15, %s5978_s21 }
 0x2ae   : > { %1665 = vrot.lane.b32.xlu0 %v6645_v29, %s5978_s21 }
 0x2af   : > { %v8132_v10 = vpop.permute.xlu1 %1435 }
 0x2b0   : > { %15472 = vst [vmem:[#allocation365_spill] sm:$0xff] %v8132_v10  ;;  %v8134_v20 = vpop.permute.xlu0 %1433 }
 0x2b1   : > { %15473 = vst [vmem:[#allocation366_spill] sm:$0xff] %v8134_v20  ;;  %1671 = vrot.lane.b32.xlu1 %v15474_v33, %s5978_s21 }
 0x2b2   : > { %1669 = vrot.lane.b32.xlu0 %v15475_v56, %s5978_s21 }
 0x2b3   : > { %v8140_v27 = vpop.permute.xlu1 %1439 }
 0x2b4   : > { %15476 = vst [vmem:[#allocation72_spill] sm:$0xff] %v8140_v27  ;;  %v8142_v31 = vpop.permute.xlu0 %1437 }
 0x2b5   : > { %15477 = vst [vmem:[#allocation73_spill] sm:$0xff] %v8142_v31  ;;  %1675 = vrot.lane.b32.xlu1 %v15227_v55, %s5978_s21 }
 0x2b6   : > { %1673 = vrot.lane.b32.xlu0 %v15349_v44, %s5978_s21 }
 0x2b7   : > { %v8148_v49 = vpop.permute.xlu1 %1443 }
 0x2b8   : > { %15478 = vst [vmem:[#allocation367_spill] sm:$0xff] %v8148_v49  ;;  %v8150_v15 = vpop.permute.xlu0 %1441 }
 0x2b9   : > { %15479 = vst [vmem:[#allocation368_spill] sm:$0xff] %v8150_v15  ;;  %1679 = vrot.lane.b32.xlu1 %v15231_v28, %s5978_s21  ;;  %v15484_v15 = vld [vmem:[#allocation41_spill] sm:$0xff]  ;;  %v15485_v28 = vld [vmem:[#allocation42_spill] sm:$0xff] }
 0x2ba   : > { %1677 = vrot.lane.b32.xlu0 %v15352_v30, %s5978_s21 }
 0x2bb   : > { %v8156_v56 = vpop.permute.xlu1 %1447 }
 0x2bc   : > { %15480 = vst [vmem:[#allocation369_spill] sm:$0xff] %v8156_v56  ;;  %v8158_v27 = vpop.permute.xlu0 %1445 }
 0x2bd   : > { %15481 = vst [vmem:[#allocation370_spill] sm:$0xff] %v8158_v27  ;;  %1683 = vrot.lane.b32.xlu1 %v15235_v41, %s5978_s21 }
 0x2be   : > { %1681 = vrot.lane.b32.xlu0 %v15230_v1, %s5978_s21 }
 0x2bf   : > { %v8164_v31 = vpop.permute.xlu1 %1451 }
 0x2c0   : > { %15482 = vst [vmem:[#allocation371_spill] sm:$0xff] %v8164_v31  ;;  %v8166_v49 = vpop.permute.xlu0 %1449 }
 0x2c1   : > { %15483 = vst [vmem:[#allocation372_spill] sm:$0xff] %v8166_v49  ;;  %1687 = vrot.lane.b32.xlu1 %v15484_v15, %s5978_s21  ;;  %v1629_v49 = vrot.slane %v7835_v7, 2 }
 0x2c2   : > { %1685 = vrot.lane.b32.xlu0 %v15485_v28, %s5978_s21  ;;  %v1632_v28 = vrot.slane %v7830_v6, 2 }
 0x2c3   : > { %v8172_v55 = vpop.permute.xlu1 %1455 }
 0x2c4   : > { %15486 = vst [vmem:[#allocation42_spill] sm:$0xff] %v8172_v55  ;;  %v8174_v56 = vpop.permute.xlu0 %1453  ;;  %v1633_v55 = vrot.slane %v7968_v19, 2  ;;  %v1639_v19 = vrot.slane %v7988_v16, 2  ;;  %v1644_v16 = vrot.slane %v7858_v52, 2 }
 0x2c5   : > { %15487 = vst [vmem:[#allocation373_spill] sm:$0xff] %v8174_v56  ;;  %1691 = vrot.lane.b32.xlu1 %v6724_v43, %s5978_s21  ;;  %v1630_v43 = vrot.slane %v7973_v58, 2  ;;  %v1635_v58 = vrot.slane %v7849_v57, 2 }
 0x2c6   : > { %1689 = vrot.lane.b32.xlu0 %v15359_v39, %s5978_s21 }
 0x2c7   : > { %v8180_v27 = vpop.permute.xlu1 %1459  ;;  %v1631_v7 = vsel %vm564_vm1, %v1629_v49, %v1630_v43  ;;  %v1642_v49 = vrot.slane %v8024_v60, 2  ;;  %v1647_v60 = vrot.slane %v7877_v42, 2 }
 0x2c8   : > { %15488 = vst [vmem:[#allocation374_spill] sm:$0xff] %v8180_v27  ;;  %v8182_v31 = vpop.permute.xlu0 %1457  ;;  %v8201_v27 = vsel %vm564_vm1, %v1632_v28, %v1633_v55  ;;  %v1645_v28 = vrot.slane %v8019_v0, 2  ;;  %v1650_v0 = vrot.slane %v7872_v25, 2 }
 0x2c9   : > { %15489 = vst [vmem:[#allocation375_spill] sm:$0xff] %v8182_v31  ;;  %1695 = vrot.lane.b32.xlu1 %v6742_v61, %s5978_s21  ;;  %v1638_v31 = vrot.slane %v7844_v32, 2 }
 0x2ca   : > { %1693 = vrot.lane.b32.xlu0 %v6749_v8, %s5978_s21 }
 0x2cb   : > { %v8190_v56 = vpop.permute.xlu1 %1463  ;;  %v8216_v55 = vsel %vm564_vm1, %v1638_v31, %v1639_v19  ;;  %v8234_v31 = vsel %vm564_vm1, %v1644_v16, %v1645_v28 }
 0x2cc   : > { %15490 = vst [vmem:[#allocation376_spill] sm:$0xff] %v8190_v56  ;;  %v8194_v15 = vpop.permute.xlu0 %1461 }
 0x2cd   : > { %15491 = vst [vmem:[#allocation377_spill] sm:$0xff] %v8194_v15  ;;  %1699 = vrot.lane.b32.xlu1 %v6760_v3, %s5978_s21  ;;  %v1636_v15 = vrot.slane %v7993_v59, 2  ;;  %v1641_v59 = vrot.slane %v7863_v5, 2 }
 0x2ce   : > { %1697 = vrot.lane.b32.xlu0 %v6765_v37, %s5978_s21 }
 0x2cf   : > { %v8205_v61 = vpop.permute.xlu1 %1467  ;;  %v8223_v43 = vsel %vm564_vm1, %v1635_v58, %v1636_v15  ;;  %v1651_v15 = vrot.slane %v8049_v34, 2  ;;  %v8241_v19 = vsel %vm564_vm1, %v1641_v59, %v1642_v49 }
 0x2d0   : > { %15492 = vst [vmem:[#allocation378_spill] sm:$0xff] %v8205_v61  ;;  %v8210_v56 = vpop.permute.xlu0 %1465 }
 0x2d1   : > { %15493 = vst [vmem:[#allocation379_spill] sm:$0xff] %v8210_v56  ;;  %1703 = vrot.lane.b32.xlu1 %v8201_v27, %s5978_s21  ;;  %v8252_v16 = vsel %vm564_vm1, %v1650_v0, %v1651_v15 }
 0x2d2   : > { %1701 = vrot.lane.b32.xlu0 %v1631_v7, %s5978_s21  ;;  %v1648_v7 = vrot.slane %v8054_v12, 2 }
 0x2d3   : > { %v8220_v3 = vpop.permute.xlu1 %1535 }
 0x2d4   : > { %15494 = vst [vmem:[#allocation380_spill] sm:$0xff] %v8220_v3  ;;  %v8227_v56 = vpop.permute.xlu0 %1533  ;;  %v8257_v28 = vsel %vm564_vm1, %v1647_v60, %v1648_v7  ;;  %v15526_v3 = vld [vmem:[#allocation304_spill] sm:$0xff] }
 0x2d5   : > { %15495 = vst [vmem:[#allocation381_spill] sm:$0xff] %v8227_v56  ;;  %1707 = vrot.lane.b32.xlu1 %v8216_v55, %s5978_s21 }
 0x2d6   : > { %1705 = vrot.lane.b32.xlu0 %v8223_v43, %s5978_s21 }
 0x2d7   : > { %v8238_v58 = vpop.permute.xlu1 %1539 }
 0x2d8   : > { %15496 = vst [vmem:[#allocation382_spill] sm:$0xff] %v8238_v58  ;;  %v8245_v56 = vpop.permute.xlu0 %1537 }
 0x2d9   : > { %15497 = vst [vmem:[#allocation383_spill] sm:$0xff] %v8245_v56  ;;  %1711 = vrot.lane.b32.xlu1 %v8234_v31, %s5978_s21  ;;  %v15522_v56 = vld [vmem:[#allocation300_spill] sm:$0xff] }
 0x2da   : > { %1709 = vrot.lane.b32.xlu0 %v8241_v19, %s5978_s21 }
 0x2db   : > { %v8254_v34 = vpop.permute.xlu1 %1543 }
 0x2dc   : > { %15498 = vst [vmem:[#allocation384_spill] sm:$0xff] %v8254_v34  ;;  %v8259_v59 = vpop.permute.xlu0 %1541  ;;  %v8329_v34 = vld [vmem:[%s6067_s30 + $0x1c0] sm:$0xff] }
 0x2dd   : > { %15499 = vst [vmem:[#allocation385_spill] sm:$0xff] %v8259_v59  ;;  %1715 = vrot.lane.b32.xlu1 %v8252_v16, %s5978_s21 }
 0x2de   : > { %1713 = vrot.lane.b32.xlu0 %v8257_v28, %s5978_s21 }
 0x2df   : > { %v8265_v12 = vpop.permute.xlu1 %1547 }
 0x2e0   : > { %15500 = vst [vmem:[#allocation386_spill] sm:$0xff] %v8265_v12  ;;  %v8267_v49 = vpop.permute.xlu0 %1545 }
 0x2e1   : > { %15501 = vst [vmem:[#allocation387_spill] sm:$0xff] %v8267_v49  ;;  %1752 = vrot.lane.b32.xlu1 %v7274_v4, %s5979_s23 }
 0x2e2   : > { %1750 = vrot.lane.b32.xlu0 %v7687_v22, %s5979_s23 }
 0x2e3   : > { %v8273_v0 = vpop.permute.xlu1 %1551 }
 0x2e4   : > { %15502 = vst [vmem:[#allocation388_spill] sm:$0xff] %v8273_v0  ;;  %v8275_v15 = vpop.permute.xlu0 %1549  ;;  %v8294_v0 = vld [vmem:[%s6067_s30 + $0x120] sm:$0xff] }
 0x2e5   : > { %15503 = vst [vmem:[#allocation389_spill] sm:$0xff] %v8275_v15  ;;  %1756 = vrot.lane.b32.xlu1 %v7288_v18, %s5979_s23 }
 0x2e6   : > { %1754 = vrot.lane.b32.xlu0 %v7269_v11, %s5979_s23 }
 0x2e7   : > { %v8281_v60 = vpop.permute.xlu1 %1555 }
 0x2e8   : > { %15504 = vst [vmem:[#allocation390_spill] sm:$0xff] %v8281_v60  ;;  %v8283_v7 = vpop.permute.xlu0 %1553  ;;  %v15576_v60 = vld [vmem:[#allocation141_spill] sm:$0xff] }
 0x2e9   : > { %15505 = vst [vmem:[#allocation391_spill] sm:$0xff] %v8283_v7  ;;  %1760 = vrot.lane.b32.xlu1 %v7719_v9, %s5979_s23 }
 0x2ea   : > { %1758 = vrot.lane.b32.xlu0 %v15373_v13, %s5979_s23 }
 0x2eb   : > { %v8289_v4 = vpop.permute.xlu1 %1559 }
 0x2ec   : > { %15506 = vst [vmem:[#allocation392_spill] sm:$0xff] %v8289_v4  ;;  %v8291_v22 = vpop.permute.xlu0 %1557 }
 0x2ed   : > { %15507 = vst [vmem:[#allocation393_spill] sm:$0xff] %v8291_v22  ;;  %1764 = vrot.lane.b32.xlu1 %v8294_v0, %s5979_s23  ;;  %v15575_v22 = vld [vmem:[#allocation62_spill] sm:$0xff] }
 0x2ee   : > { %1762 = vrot.lane.b32.xlu0 %v7714_v35, %s5979_s23 }
 0x2ef   : > { %v8300_v11 = vpop.permute.xlu1 %1563 }
 0x2f0   : > { %15508 = vst [vmem:[#allocation394_spill] sm:$0xff] %v8300_v11  ;;  %v8302_v18 = vpop.permute.xlu0 %1561 }
 0x2f1   : > { %15509 = vst [vmem:[#allocation395_spill] sm:$0xff] %v8302_v18  ;;  %1768 = vrot.lane.b32.xlu1 %v7744_v24, %s5979_s23 }
 0x2f2   : > { %1766 = vrot.lane.b32.xlu0 %v7728_v46, %s5979_s23 }
 0x2f3   : > { %v8308_v13 = vpop.permute.xlu1 %1567 }
 0x2f4   : > { %15510 = vst [vmem:[#allocation396_spill] sm:$0xff] %v8308_v13  ;;  %v8310_v15 = vpop.permute.xlu0 %1565 }
 0x2f5   : > { %15511 = vst [vmem:[#allocation397_spill] sm:$0xff] %v8310_v15  ;;  %1772 = vrot.lane.b32.xlu1 %v7758_v21, %s5979_s23  ;;  %v15523_v15 = vld [vmem:[#allocation295_spill] sm:$0xff] }
 0x2f6   : > { %1770 = vrot.lane.b32.xlu0 %v7739_v47, %s5979_s23 }
 0x2f7   : > { %v8316_v12 = vpop.permute.xlu1 %1571 }
 0x2f8   : > { %15512 = vst [vmem:[#allocation398_spill] sm:$0xff] %v8316_v12  ;;  %v8318_v49 = vpop.permute.xlu0 %1569 }
 0x2f9   : > { %15513 = vst [vmem:[#allocation399_spill] sm:$0xff] %v8318_v49  ;;  %1776 = vrot.lane.b32.xlu1 %v7772_v51, %s5979_s23  ;;  %v15518_v51 = vld [vmem:[#allocation296_spill] sm:$0xff] }
 0x2fa   : > { %1774 = vrot.lane.b32.xlu0 %v7753_v50, %s5979_s23  ;;  %v15519_v50 = vld [vmem:[#allocation292_spill] sm:$0xff] }
 0x2fb   : > { %v8324_v46 = vpop.permute.xlu1 %1575 }
 0x2fc   : > { %15514 = vst [vmem:[#allocation400_spill] sm:$0xff] %v8324_v46  ;;  %v8326_v24 = vpop.permute.xlu0 %1573 }
 0x2fd   : > { %15515 = vst [vmem:[#allocation401_spill] sm:$0xff] %v8326_v24  ;;  %1780 = vrot.lane.b32.xlu1 %v8329_v34, %s5979_s23 }
 0x2fe   : > { %1778 = vrot.lane.b32.xlu0 %v7767_v38, %s5979_s23 }
 0x2ff   : > { %v8335_v21 = vpop.permute.xlu1 %1579 }
 0x300   : > { %15516 = vst [vmem:[#allocation402_spill] sm:$0xff] %v8335_v21  ;;  %v8337_v47 = vpop.permute.xlu0 %1577 }
 0x301   : > { %15517 = vst [vmem:[#allocation403_spill] sm:$0xff] %v8337_v47  ;;  %1784 = vrot.lane.b32.xlu1 %v15518_v51, %s5979_s23  ;;  %v15527_v51 = vld [vmem:[#allocation299_spill] sm:$0xff] }
 0x302   : > { %1782 = vrot.lane.b32.xlu0 %v15519_v50, %s5979_s23 }
 0x303   : > { %v8343_v59 = vpop.permute.xlu1 %1583 }
 0x304   : > { %15520 = vst [vmem:[#allocation296_spill] sm:$0xff] %v8343_v59  ;;  %v8345_v58 = vpop.permute.xlu0 %1581 }
 0x305   : > { %15521 = vst [vmem:[#allocation292_spill] sm:$0xff] %v8345_v58  ;;  %1788 = vrot.lane.b32.xlu1 %v15522_v56, %s5979_s23  ;;  %v8364_v58 = vld [vmem:[%s6067_s30 + $0x260] sm:$0xff] }
 0x306   : > { %1786 = vrot.lane.b32.xlu0 %v15523_v15, %s5979_s23  ;;  %v15530_v15 = vld [vmem:[#allocation303_spill] sm:$0xff] }
 0x307   : > { %v8351_v38 = vpop.permute.xlu1 %1587 }
 0x308   : > { %15524 = vst [vmem:[#allocation300_spill] sm:$0xff] %v8351_v38  ;;  %v8353_v13 = vpop.permute.xlu0 %1585  ;;  %v8512_v38 = vld [vmem:[%s6067_s30 + $0x308] sm:$0x3] }
 0x309   : > { %15525 = vst [vmem:[#allocation295_spill] sm:$0xff] %v8353_v13  ;;  %1792 = vrot.lane.b32.xlu1 %v15526_v3, %s5979_s23 }
 0x30a   : > { %1790 = vrot.lane.b32.xlu0 %v15527_v51, %s5979_s23 }
 0x30b   : > { %v8359_v50 = vpop.permute.xlu1 %1591 }
 0x30c   : > { %15528 = vst [vmem:[#allocation304_spill] sm:$0xff] %v8359_v50  ;;  %v8361_v59 = vpop.permute.xlu0 %1589 }
 0x30d   : > { %15529 = vst [vmem:[#allocation299_spill] sm:$0xff] %v8361_v59  ;;  %1796 = vrot.lane.b32.xlu1 %v8364_v58, %s5979_s23 }
 0x30e   : > { %1794 = vrot.lane.b32.xlu0 %v15530_v15, %s5979_s23 }
 0x30f   : > { %v8370_v21 = vpop.permute.xlu1 %1595 }
 0x310   : > { %15531 = vst [vmem:[#allocation303_spill] sm:$0xff] %v8370_v21  ;;  %v8372_v47 = vpop.permute.xlu0 %1593 }
 0x311   : > { %15532 = vst [vmem:[#allocation404_spill] sm:$0xff] %v8372_v47  ;;  %1800 = vrot.lane.b32.xlu1 %v7849_v57, %s5979_s23  ;;  %v8395_v57 = vld [vmem:[%s6067_s30 + $0x300] sm:$0xff] }
 0x312   : > { %1798 = vrot.lane.b32.xlu0 %v7830_v6, %s5979_s23  ;;  %v1847_v13 = vrot.slane %v8395_v57, 1 }
 0x313   : > { %v8378_v46 = vpop.permute.xlu1 %1655 }
 0x314   : > { %15533 = vst [vmem:[#allocation405_spill] sm:$0xff] %v8378_v46  ;;  %v8380_v24 = vpop.permute.xlu0 %1653 }
 0x315   : > { %15534 = vst [vmem:[#allocation406_spill] sm:$0xff] %v8380_v24  ;;  %1804 = vrot.lane.b32.xlu1 %v7863_v5, %s5979_s23 }
 0x316   : > { %1802 = vrot.lane.b32.xlu0 %v7844_v32, %s5979_s23 }
 0x317   : > { %v8386_v12 = vpop.permute.xlu1 %1659 }
 0x318   : > { %15535 = vst [vmem:[#allocation407_spill] sm:$0xff] %v8386_v12  ;;  %v8388_v49 = vpop.permute.xlu0 %1657 }
 0x319   : > { %15536 = vst [vmem:[#allocation408_spill] sm:$0xff] %v8388_v49  ;;  %1808 = vrot.lane.b32.xlu1 %v7877_v42, %s5979_s23  ;;  %v15558_v49 = vld [vmem:[#allocation46_spill] sm:$0xff] }
 0x31a   : > { %1806 = vrot.lane.b32.xlu0 %v7858_v52, %s5979_s23 }
 0x31b   : > { %v8397_v6 = vpop.permute.xlu1 %1663 }
 0x31c   : > { %15537 = vst [vmem:[#allocation409_spill] sm:$0xff] %v8397_v6  ;;  %v8399_v46 = vpop.permute.xlu0 %1661 }
 0x31d   : > { %15538 = vst [vmem:[#allocation410_spill] sm:$0xff] %v8399_v46  ;;  %1812 = vrot.lane.b32.xlu1 %v8395_v57, %s5979_s23  ;;  %v15555_v46 = vld [vmem:[#allocation32_spill] sm:$0xff] }
 0x31e   : > { %1810 = vrot.lane.b32.xlu0 %v7872_v25, %s5979_s23  ;;  %v15543_v25 = vld [vmem:[#allocation18_spill] sm:$0xff] }
 0x31f   : > { %v8405_v32 = vpop.permute.xlu1 %1667 }
 0x320   : > { %15539 = vst [vmem:[#allocation411_spill] sm:$0xff] %v8405_v32  ;;  %v8407_v5 = vpop.permute.xlu0 %1665 }
 0x321   : > { %15540 = vst [vmem:[#allocation412_spill] sm:$0xff] %v8407_v5  ;;  %1852 = vrot.lane.b32.xlu1 %v15159_v48, %s5980_s26  ;;  %v15546_v48 = vld [vmem:[#allocation22_spill] sm:$0xff] }
 0x322   : > { %1850 = vrot.lane.b32.xlu0 %v15409_v14, %s5980_s26 }
 0x323   : > { %v8413_v42 = vpop.permute.xlu1 %1671 }
 0x324   : > { %15541 = vst [vmem:[#allocation413_spill] sm:$0xff] %v8413_v42  ;;  %v8415_v52 = vpop.permute.xlu0 %1669 }
 0x325   : > { %15542 = vst [vmem:[#allocation414_spill] sm:$0xff] %v8415_v52  ;;  %1856 = vrot.lane.b32.xlu1 %v15293_v53, %s5980_s26  ;;  %v15548_v52 = vld [vmem:[#allocation121_spill] sm:$0xff] }
 0x326   : > { %1854 = vrot.lane.b32.xlu0 %v15543_v25, %s5980_s26  ;;  %v15549_v53 = vld [vmem:[#allocation25_spill] sm:$0xff] }
 0x327   : > { %v8421_v32 = vpop.permute.xlu1 %1675 }
 0x328   : > { %15544 = vst [vmem:[#allocation18_spill] sm:$0xff] %v8421_v32  ;;  %v8423_v5 = vpop.permute.xlu0 %1673 }
 0x329   : > { %15545 = vst [vmem:[#allocation415_spill] sm:$0xff] %v8423_v5  ;;  %1860 = vrot.lane.b32.xlu1 %v15297_v23, %s5980_s26  ;;  %v15550_v5 = vld [vmem:[#allocation34_spill] sm:$0xff]  ;;  %v15551_v23 = vld [vmem:[#allocation28_spill] sm:$0xff] }
 0x32a   : > { %1858 = vrot.lane.b32.xlu0 %v15546_v48, %s5980_s26 }
 0x32b   : > { %v8429_v14 = vpop.permute.xlu1 %1679 }
 0x32c   : > { %v8431_v42 = vpop.permute.xlu0 %1677 }
 0x32d   : > { %15547 = vst [vmem:[#allocation22_spill] sm:$0xff] %v8431_v42  ;;  %1864 = vrot.lane.b32.xlu1 %v15548_v52, %s5980_s26  ;;  %v15554_v42 = vld [vmem:[#allocation38_spill] sm:$0xff] }
 0x32e   : > { %1862 = vrot.lane.b32.xlu0 %v15549_v53, %s5980_s26 }
 0x32f   : > { %v8437_v25 = vpop.permute.xlu1 %1683 }
 0x330   : > { %v8439_v32 = vpop.permute.xlu0 %1681 }
 0x331   : > { %1868 = vrot.lane.b32.xlu1 %v15550_v5, %s5980_s26  ;;  %v15559_v5 = vld [vmem:[#allocation36_spill] sm:$0xff] }
 0x332   : > { %1866 = vrot.lane.b32.xlu0 %v15551_v23, %s5980_s26 }
 0x333   : > { %v8445_v48 = vpop.permute.xlu1 %1687 }
 0x334   : > { %15552 = vst [vmem:[#allocation121_spill] sm:$0xff] %v8445_v48  ;;  %v8447_v6 = vpop.permute.xlu0 %1685 }
 0x335   : > { %15553 = vst [vmem:[#allocation25_spill] sm:$0xff] %v8447_v6  ;;  %1872 = vrot.lane.b32.xlu1 %v15554_v42, %s5980_s26  ;;  %v15562_v6 = vld [vmem:[#allocation131_spill] sm:$0xff]  ;;  %v15563_v42 = vld [vmem:[#allocation44_spill] sm:$0xff] }
 0x336   : > { %1870 = vrot.lane.b32.xlu0 %v15555_v46, %s5980_s26 }
 0x337   : > { %v8453_v53 = vpop.permute.xlu1 %1691 }
 0x338   : > { %15556 = vst [vmem:[#allocation34_spill] sm:$0xff] %v8453_v53  ;;  %v8455_v12 = vpop.permute.xlu0 %1689 }
 0x339   : > { %15557 = vst [vmem:[#allocation38_spill] sm:$0xff] %v8455_v12  ;;  %1876 = vrot.lane.b32.xlu1 %v15558_v49, %s5980_s26  ;;  %v15566_v12 = vld [vmem:[#allocation60_spill] sm:$0xff]  ;;  %v15567_v49 = vld [vmem:[#allocation51_spill] sm:$0xff] }
 0x33a   : > { %1874 = vrot.lane.b32.xlu0 %v15559_v5, %s5980_s26 }
 0x33b   : > { %v8461_v24 = vpop.permute.xlu1 %1695 }
 0x33c   : > { %15560 = vst [vmem:[#allocation32_spill] sm:$0xff] %v8461_v24  ;;  %v8463_v48 = vpop.permute.xlu0 %1693 }
 0x33d   : > { %15561 = vst [vmem:[#allocation46_spill] sm:$0xff] %v8463_v48  ;;  %1880 = vrot.lane.b32.xlu1 %v15562_v6, %s5980_s26  ;;  %v15570_v48 = vld [vmem:[#allocation64_spill] sm:$0xff] }
 0x33e   : > { %1878 = vrot.lane.b32.xlu0 %v15563_v42, %s5980_s26  ;;  %v15571_v42 = vld [vmem:[#allocation58_spill] sm:$0xff] }
 0x33f   : > { %v8469_v46 = vpop.permute.xlu1 %1699 }
 0x340   : > { %15564 = vst [vmem:[#allocation36_spill] sm:$0xff] %v8469_v46  ;;  %v8471_v53 = vpop.permute.xlu0 %1697 }
 0x341   : > { %15565 = vst [vmem:[#allocation44_spill] sm:$0xff] %v8471_v53  ;;  %1884 = vrot.lane.b32.xlu1 %v15566_v12, %s5980_s26  ;;  %v15574_v12 = vld [vmem:[#allocation67_spill] sm:$0xff] }
 0x342   : > { %1882 = vrot.lane.b32.xlu0 %v15567_v49, %s5980_s26  ;;  %v8522_v49 = vrot.slane %v8512_v38, 1 }
 0x343   : > { %v8477_v5 = vpop.permute.xlu1 %1703 }
 0x344   : > { %15568 = vst [vmem:[#allocation60_spill] sm:$0xff] %v8477_v5  ;;  %v8479_v24 = vpop.permute.xlu0 %1701 }
 0x345   : > { %15569 = vst [vmem:[#allocation416_spill] sm:$0xff] %v8479_v24  ;;  %1888 = vrot.lane.b32.xlu1 %v15570_v48, %s5980_s26  ;;  %v15577_v48 = vld [vmem:[#allocation66_spill] sm:$0xff] }
 0x346   : > { %1886 = vrot.lane.b32.xlu0 %v15571_v42, %s5980_s26  ;;  %15583 = vst [vmem:[#allocation66_spill] sm:$0xff] %v8522_v49 }
 0x347   : > { %v8485_v46 = vpop.permute.xlu1 %1707 }
 0x348   : > { %15572 = vst [vmem:[#allocation64_spill] sm:$0xff] %v8485_v46  ;;  %v8487_v53 = vpop.permute.xlu0 %1705 }
 0x349   : > { %15573 = vst [vmem:[#allocation58_spill] sm:$0xff] %v8487_v53  ;;  %1892 = vrot.lane.b32.xlu1 %v15574_v12, %s5980_s26  ;;  %v15578_v53 = vld [vmem:[#allocation346_spill] sm:$0xff]  ;;  %v15579_v12 = vld [vmem:[#allocation337_spill] sm:$0xff] }
 0x34a   : > { %1890 = vrot.lane.b32.xlu0 %v15575_v22, %s5980_s26 }
 0x34b   : > { %v8493_v5 = vpop.permute.xlu1 %1711 }
 0x34c   : > { %v8495_v24 = vpop.permute.xlu0 %1709 }
 0x34d   : > { %1896 = vrot.lane.b32.xlu1 %v15576_v60, %s5980_s26 }
 0x34e   : > { %1894 = vrot.lane.b32.xlu0 %v15577_v48, %s5980_s26  ;;  %v15582_v48 = vld [vmem:[#allocation343_spill] sm:$0xff] }
 0x34f   : > { %v8501_v42 = vpop.permute.xlu1 %1715 }
 0x350   : > { %v8503_v46 = vpop.permute.xlu0 %1713 }
 0x351   : > { %1900 = vrot.lane.b32.xlu1 %v15578_v53, %s5980_s26 }
 0x352   : > { %1898 = vrot.lane.b32.xlu0 %v15579_v12, %s5980_s26 }
 0x353   : > { %v8509_v22 = vpop.permute.xlu1 %1752 }
 0x354   : > { %15580 = vst [vmem:[#allocation67_spill] sm:$0xff] %v8509_v22  ;;  %v8514_v7 = vpop.permute.xlu0 %1750  ;;  %v8534_v22 = vsel %vm371_vm0, %v1847_v13, %v8522_v49 }
 0x355   : > { %15581 = vst [vmem:[#allocation62_spill] sm:$0xff] %v8514_v7  ;;  %1904 = vrot.lane.b32.xlu1 %v8072_v63, %s5980_s26  ;;  %15586 = vst [vmem:[#allocation418_spill] sm:$0xff] %v8534_v22 }
 0x356   : > { %1902 = vrot.lane.b32.xlu0 %v15582_v48, %s5980_s26 }
 0x357   : > { %v8524_v23 = vpop.permute.xlu1 %1756 }
 0x358   : > { %15584 = vst [vmem:[#allocation346_spill] sm:$0xff] %v8524_v23  ;;  %v8526_v12 = vpop.permute.xlu0 %1754 }
 0x359   : > { %15585 = vst [vmem:[#allocation417_spill] sm:$0xff] %v8526_v12  ;;  %1908 = vrot.lane.b32.xlu1 %v8092_v62, %s5980_s26  ;;  %v8549_v62 = vld [vmem:[%s6067_s30 + $0xf0] sm:$0xff] }
 0x35a   : > { %1906 = vrot.lane.b32.xlu0 %v8062_v54, %s5980_s26  ;;  %v15591_v54 = vld [vmem:[#allocation88_spill] sm:$0xff] }
 0x35b   : > { %v8536_v7 = vpop.permute.xlu1 %1760  ;;  %v8554_v13 = vsel %vm2142_vm2, %v8549_v62, %v15591_v54  ;;  %v15596_v54 = vld [vmem:[#allocation183_spill] sm:$0xff] }
 0x35c   : > { %15587 = vst [vmem:[#allocation419_spill] sm:$0xff] %v8536_v7  ;;  %v8538_v63 = vpop.permute.xlu0 %1758  ;;  %15592 = vst [vmem:[#allocation88_spill] sm:$0xff] %v8554_v13  ;;  %v15593_v7 = vld [vmem:[#allocation11_spill] sm:$0xff] }
 0x35d   : > { %15588 = vst [vmem:[#allocation420_spill] sm:$0xff] %v8538_v63  ;;  %1912 = vrot.lane.b32.xlu1 %v8534_v22, %s5980_s26  ;;  %v2189_v63 = vsel %vm2175_vm3, %v8554_v13, %v15593_v7  ;;  %v15600_v13 = vld [vmem:[#allocation216_spill] sm:$0xff] }
 0x35e   : > { %1910 = vrot.lane.b32.xlu0 %v8086_v26, %s5980_s26  ;;  %s5985_s26 = smov [#allocation2]  }
 0x35f   : > { %v8544_v23 = vpop.permute.xlu1 %1764 }
 0x360   : > { %15589 = vst [vmem:[#allocation421_spill] sm:$0xff] %v8544_v23  ;;  %v8546_v12 = vpop.permute.xlu0 %1762  ;;  %v15594_v23 = vld [vmem:[#allocation150_spill] sm:$0xff] }
 0x361   : > { %15590 = vst [vmem:[#allocation422_spill] sm:$0xff] %v8546_v12  ;;  %1951 = vrot.lane.b32.xlu1 %v6617_v2, %s5981_s27  ;;  %v2222_v12 = vsel %vm2208_vm4, %v2189_v63, %v15594_v23  ;;  %v15598_v2 = vld [vmem:[#allocation90_spill] sm:$0xff]  ;;  %v15601_v63 = vld [vmem:[#allocation91_spill] sm:$0xff] }
 0x362   : > { %1949 = vrot.lane.b32.xlu0 %v15464_v45, %s5981_s27  ;;  %v2255_v49 = vsel %vm2241_vm5, %v2222_v12, %v15596_v54  ;;  %v8574_v7 = vsel %vm2142_vm2, %v7714_v35, %v15598_v2  ;;  %v8583_v23 = vsel %vm2142_vm2, %v7719_v9, %v15601_v63  ;;  %v15603_v12 = vld [vmem:[#allocation10_spill] sm:$0xff]  ;;  %v15607_v9 = vld [vmem:[#allocation189_spill] sm:$0xff] }
 0x363   : > { %v8565_v22 = vpop.permute.xlu1 %1768  ;;  %15599 = vst [vmem:[#allocation183_spill] sm:$0xff] %v8574_v7  ;;  %v2288_v45 = vsel %vm2274_vm6, %v2255_v49, %v15600_v13  ;;  %15602 = vst [vmem:[#allocation90_spill] sm:$0xff] %v8583_v23  ;;  %v2191_v54 = vsel %vm2175_vm3, %v8574_v7, %v15603_v12  ;;  %v15605_v49 = vld [vmem:[#allocation116_spill] sm:$0xff]  ;;  %v15609_v12 = vld [vmem:[#allocation153_spill] sm:$0xff] }
 0x364   : > { %15595 = vst [vmem:[#allocation11_spill] sm:$0xff] %v8565_v22  ;;  %v8569_v26 = vpop.permute.xlu0 %1766  ;;  %v15604_v22 = vld [vmem:[#allocation252_spill] sm:$0xff] }
 0x365   : > { %15597 = vst [vmem:[#allocation150_spill] sm:$0xff] %v8569_v26  ;;  %1955 = vrot.lane.b32.xlu1 %v6631_v40, %s5981_s27  ;;  %v2321_v35 = vsel %vm2307_vm7, %v2288_v45, %v15604_v22  ;;  %v2190_v40 = vsel %vm2175_vm3, %v8583_v23, %v15605_v49  ;;  %v15606_v13 = vld [vmem:[#allocation152_spill] sm:$0xff]  ;;  %v15610_v45 = vld [vmem:[#allocation185_spill] sm:$0xff]  ;;  %v15613_v23 = vld [vmem:[#allocation186_spill] sm:$0xff] }
 0x366   : > { %1953 = vrot.lane.b32.xlu0 %v6612_v17, %s5981_s27  ;;  %v2224_v2 = vsel %vm2208_vm4, %v2191_v54, %v15606_v13  ;;  %v2354_v63 = vsel %vm15008_vm8, %v2321_v35, %v15607_v9  ;;  %v2223_v22 = vsel %vm2208_vm4, %v2190_v40, %v15609_v12  ;;  %v15611_v17 = vld [vmem:[#allocation317_spill] sm:$0xff]  ;;  %v15614_v13 = vld [vmem:[#allocation218_spill] sm:$0xff]  ;;  %v15615_v40 = vld [vmem:[#allocation219_spill] sm:$0xff] }
 0x367   : > { %v8599_v26 = vpop.permute.xlu1 %1772  ;;  %v2257_v7 = vsel %vm2241_vm5, %v2224_v2, %v15610_v45  ;;  %v2387_v48 = vsel %vm15007_vm9, %v2354_v63, %v15611_v17  ;;  %v2256_v54 = vsel %vm2241_vm5, %v2223_v22, %v15613_v23  ;;  %v15616_v63 = vld [vmem:[#allocation254_spill] sm:$0xff] }
 0x368   : > { %15608 = vst [vmem:[#allocation216_spill] sm:$0xff] %v8599_v26  ;;  %v8607_v49 = vpop.permute.xlu0 %1770  ;;  %v2290_v35 = vsel %vm2274_vm6, %v2257_v7, %v15614_v13  ;;  %v2420_v9 = vsel %vm2406_vm10, %v2387_v48, %v8124_v36  ;;  %v2289_v2 = vsel %vm2274_vm6, %v2256_v54, %v15615_v40  ;;  %v15617_v23 = vld [vmem:[#allocation70_spill] sm:$0xff]  ;;  %v15618_v7 = vld [vmem:[#allocation255_spill] sm:$0xff]  ;;  %v15651_v26 = vld [vmem:[#allocation201_spill] sm:$0xff] }
 0x369   : > { %15612 = vst [vmem:[#allocation91_spill] sm:$0xff] %v8607_v49  ;;  %1959 = vrot.lane.b32.xlu1 %v6645_v29, %s5981_s27  ;;  %v2323_v12 = vsel %vm2307_vm7, %v2290_v35, %v15616_v63  ;;  %v2453_v45 = vsel %vm2439_vm11, %v2420_v9, %v8289_v4  ;;  %v2322_v48 = vsel %vm2307_vm7, %v2289_v2, %v15618_v7  ;;  %v15619_v22 = vld [vmem:[#allocation282_spill] sm:$0xff]  ;;  %v15620_v13 = vld [vmem:[#allocation283_spill] sm:$0xff]  ;;  %v15623_v2 = vld [vmem:[#allocation320_spill] sm:$0xff] }
 0x36a   : > { %1957 = vrot.lane.b32.xlu0 %v15617_v23, %s5981_s27  ;;  %v2356_v17 = vsel %vm15008_vm8, %v2323_v12, %v15619_v22  ;;  %v2486_v29 = vsel %vm2472_vm12, %v2453_v45, %v8429_v14  ;;  %v2355_v35 = vsel %vm15008_vm8, %v2322_v48, %v15620_v13  ;;  %v15621_v40 = vld [vmem:[#allocation319_spill] sm:$0xff]  ;;  %v15624_v14 = vld [vmem:[#allocation158_spill] sm:$0xff]  ;;  %v15784_v4 = vld [vmem:[#allocation352_spill] sm:$0xff] }
 0x36b   : > { %v1777_v54 = vpop.permute.xlu1 %1776  ;;  %v2389_v9 = vsel %vm15007_vm9, %v2356_v17, %v15621_v40  ;;  %v2388_v7 = vsel %vm15007_vm9, %v2355_v35, %v15623_v2  ;;  %v15625_v22 = vld [vmem:[#allocation71_spill] sm:$0xff]  ;;  %v15652_v49 = vld [vmem:[#allocation234_spill] sm:$0xff]  ;;  %v15791_v36 = vld [vmem:[#allocation353_spill] sm:$0xff] }
 0x36c   : > { %v8636_v63 = vsel %vm2505_vm13, %v2486_v29, %v1777_v54  ;;  %v8638_v23 = vpop.permute.xlu0 %1774  ;;  %v2422_v12 = vsel %vm2406_vm10, %v2389_v9, %v8132_v10  ;;  %v2421_v45 = vsel %vm2406_vm10, %v2388_v7, %v8134_v20  ;;  %v15769_v10 = vld [vmem:[#allocation138_spill] sm:$0xff] }
 0x36d   : > { %15622 = vst [vmem:[#allocation10_spill] sm:$0xff] %v8638_v23  ;;  %1963 = vrot.lane.b32.xlu1 %v15624_v14, %s5981_s27  ;;  %v2455_v48 = vsel %vm2439_vm11, %v2422_v12, %v8300_v11  ;;  %v2454_v17 = vsel %vm2439_vm11, %v2421_v45, %v8302_v18  ;;  %v15634_v45 = vld [vmem:[#allocation40_spill] sm:$0xff] }
 0x36e   : > { %1961 = vrot.lane.b32.xlu0 %v15625_v22, %s5981_s27  ;;  %v2488_v29 = vsel %vm2472_vm12, %v2455_v48, %v8437_v25  ;;  %v2487_v13 = vsel %vm2472_vm12, %v2454_v17, %v8439_v32  ;;  %v15628_v32 = vld [vmem:[#allocation74_spill] sm:$0xff]  ;;  %v15637_v22 = vld [vmem:[#allocation104_spill] sm:$0xff]  ;;  %v15639_v17 = vld [vmem:[#allocation105_spill] sm:$0xff] }
 0x36f   : > { %v1781_v54 = vpop.permute.xlu1 %1780 }
 0x370   : > { %v8659_v35 = vsel %vm2505_vm13, %v2488_v29, %v1781_v54  ;;  %v1779_v40 = vpop.permute.xlu0 %1778  ;;  %v8706_v29 = vsel %vm2142_vm2, %v15522_v56, %v15639_v17  ;;  %v15641_v54 = vld [vmem:[#allocation132_spill] sm:$0xff] }
 0x371   : > { %v8662_v9 = vsel %vm2505_vm13, %v2487_v13, %v1779_v40  ;;  %1967 = vrot.lane.b32.xlu1 %v15349_v44, %s5981_s27  ;;  %v15631_v44 = vld [vmem:[#allocation76_spill] sm:$0xff]  ;;  %15640 = vst [vmem:[#allocation219_spill] sm:$0xff] %v8706_v29  ;;  %v15642_v13 = vld [vmem:[#allocation41_spill] sm:$0xff] }
 0x372   : > { %1965 = vrot.lane.b32.xlu0 %v15474_v33, %s5981_s27  ;;  %v15643_v40 = vld [vmem:[#allocation133_spill] sm:$0xff] }
 0x373   : > { %v8668_v2 = vpop.permute.xlu1 %1784 }
 0x374   : > { %15626 = vst [vmem:[#allocation252_spill] sm:$0xff] %v8668_v2  ;;  %v8670_v25 = vpop.permute.xlu0 %1782  ;;  %v15667_v2 = vld [vmem:[#allocation335_spill] sm:$0xff] }
 0x375   : > { %15627 = vst [vmem:[#allocation116_spill] sm:$0xff] %v8670_v25  ;;  %1971 = vrot.lane.b32.xlu1 %v15352_v30, %s5981_s27 }
 0x376   : > { %1969 = vrot.lane.b32.xlu0 %v15628_v32, %s5981_s27  ;;  %v15644_v32 = vld [vmem:[#allocation167_spill] sm:$0xff] }
 0x377   : > { %v8676_v7 = vpop.permute.xlu1 %1788 }
 0x378   : > { %15629 = vst [vmem:[#allocation152_spill] sm:$0xff] %v8676_v7  ;;  %v8678_v12 = vpop.permute.xlu0 %1786  ;;  %v15665_v7 = vld [vmem:[#allocation202_spill] sm:$0xff] }
 0x379   : > { %15630 = vst [vmem:[#allocation189_spill] sm:$0xff] %v8678_v12  ;;  %1975 = vrot.lane.b32.xlu1 %v15230_v1, %s5981_s27  ;;  %v8699_v1 = vsel %vm2142_vm2, %v15527_v51, %v15637_v22  ;;  %v2204_v51 = vsel %vm2175_vm3, %v8706_v29, %v15643_v40  ;;  %v15647_v22 = vld [vmem:[#allocation200_spill] sm:$0xff]  ;;  %v15666_v12 = vld [vmem:[#allocation302_spill] sm:$0xff] }
 0x37a   : > { %1973 = vrot.lane.b32.xlu0 %v15631_v44, %s5981_s27  ;;  %15638 = vst [vmem:[#allocation218_spill] sm:$0xff] %v8699_v1 }
 0x37b   : > { %v8684_v33 = vpop.permute.xlu1 %1792 }
 0x37c   : > { %15632 = vst [vmem:[#allocation153_spill] sm:$0xff] %v8684_v33  ;;  %v8686_v14 = vpop.permute.xlu0 %1790 }
 0x37d   : > { %15633 = vst [vmem:[#allocation185_spill] sm:$0xff] %v8686_v14  ;;  %1979 = vrot.lane.b32.xlu1 %v15634_v45, %s5981_s27  ;;  %v15646_v45 = vld [vmem:[#allocation168_spill] sm:$0xff] }
 0x37e   : > { %1977 = vrot.lane.b32.xlu0 %v15235_v41, %s5981_s27  ;;  %v2205_v41 = vsel %vm2175_vm3, %v8699_v1, %v15641_v54  ;;  %v2237_v56 = vsel %vm2208_vm4, %v2204_v51, %v15646_v45  ;;  %v15649_v54 = vld [vmem:[#allocation106_spill] sm:$0xff]  ;;  %v15653_v51 = vld [vmem:[#allocation107_spill] sm:$0xff] }
 0x37f   : > { %v8692_v30 = vpop.permute.xlu1 %1796  ;;  %v2238_v44 = vsel %vm2208_vm4, %v2205_v41, %v15644_v32  ;;  %v2270_v40 = vsel %vm2241_vm5, %v2237_v56, %v15651_v26  ;;  %v15758_v32 = vld [vmem:[#allocation233_spill] sm:$0xff] }
 0x380   : > { %15635 = vst [vmem:[#allocation317_spill] sm:$0xff] %v8692_v30  ;;  %v8694_v48 = vpop.permute.xlu0 %1794  ;;  %v2271_v17 = vsel %vm2241_vm5, %v2238_v44, %v15647_v22  ;;  %v8740_v44 = vsel %vm2142_vm2, %v15526_v3, %v15653_v51  ;;  %v15657_v30 = vld [vmem:[#allocation266_spill] sm:$0xff]  ;;  %v15661_v51 = vld [vmem:[#allocation267_spill] sm:$0xff]  ;;  %v15724_v22 = vld [vmem:[#allocation16_spill] sm:$0xff] }
 0x381   : > { %15636 = vst [vmem:[#allocation186_spill] sm:$0xff] %v8694_v48  ;;  %1983 = vrot.lane.b32.xlu1 %v15359_v39, %s5981_s27  ;;  %v2304_v41 = vsel %vm2274_vm6, %v2271_v17, %v15652_v49  ;;  %15654 = vst [vmem:[#allocation282_spill] sm:$0xff] %v8740_v44  ;;  %v15658_v49 = vld [vmem:[#allocation47_spill] sm:$0xff]  ;;  %v15660_v48 = vld [vmem:[#allocation78_spill] sm:$0xff] }
 0x382   : > { %1981 = vrot.lane.b32.xlu0 %v15642_v13, %s5981_s27  ;;  %v8729_v13 = vsel %vm2142_vm2, %v15530_v15, %v15649_v54  ;;  %v15656_v15 = vld [vmem:[#allocation235_spill] sm:$0xff]  ;;  %v2337_v56 = vsel %vm2307_vm7, %v2304_v41, %v15657_v30  ;;  %v15672_v30 = vld [vmem:[#allocation376_spill] sm:$0xff] }
 0x383   : > { %v8718_v39 = vpop.permute.xlu1 %1800  ;;  %15650 = vst [vmem:[#allocation255_spill] sm:$0xff] %v8729_v13  ;;  %v2303_v54 = vsel %vm2274_vm6, %v2270_v40, %v15656_v15  ;;  %v15659_v17 = vld [vmem:[#allocation135_spill] sm:$0xff]  ;;  %v15664_v15 = vld [vmem:[#allocation169_spill] sm:$0xff] }
 0x384   : > { %15645 = vst [vmem:[#allocation254_spill] sm:$0xff] %v8718_v39  ;;  %v8724_v23 = vpop.permute.xlu0 %1798  ;;  %v15655_v39 = vld [vmem:[#allocation134_spill] sm:$0xff]  ;;  %v2336_v33 = vsel %vm2307_vm7, %v2303_v54, %v15661_v51  ;;  %v15669_v54 = vld [vmem:[#allocation203_spill] sm:$0xff] }
 0x385   : > { %15648 = vst [vmem:[#allocation70_spill] sm:$0xff] %v8724_v23  ;;  %1987 = vrot.lane.b32.xlu1 %v6749_v8, %s5981_s27  ;;  %v2207_v23 = vsel %vm2175_vm3, %v8729_v13, %v15655_v39  ;;  %v2206_v8 = vsel %vm2175_vm3, %v8740_v44, %v15659_v17  ;;  %v15662_v39 = vld [vmem:[#allocation301_spill] sm:$0xff]  ;;  %v2369_v17 = vsel %vm15008_vm8, %v2336_v33, %v15666_v12  ;;  %v15762_v51 = vld [vmem:[#allocation54_spill] sm:$0xff] }
 0x386   : > { %1985 = vrot.lane.b32.xlu0 %v15658_v49, %s5981_s27  ;;  %v2240_v3 = vsel %vm2208_vm4, %v2207_v23, %v15660_v48  ;;  %v2370_v14 = vsel %vm15008_vm8, %v2337_v56, %v15662_v39  ;;  %v2239_v41 = vsel %vm2208_vm4, %v2206_v8, %v15664_v15  ;;  %v15670_v56 = vld [vmem:[#allocation236_spill] sm:$0xff]  ;;  %v15673_v33 = vld [vmem:[#allocation237_spill] sm:$0xff]  ;;  %v15725_v15 = vrot.slane %v15724_v22, 1 }
 0x387   : > { %v8760_v40 = vpop.permute.xlu1 %1804  ;;  %v2273_v49 = vsel %vm2241_vm5, %v2240_v3, %v15665_v7  ;;  %v2403_v23 = vsel %vm15007_vm9, %v2370_v14, %v15667_v2  ;;  %v2272_v25 = vsel %vm2241_vm5, %v2239_v41, %v15669_v54  ;;  %v15671_v39 = vld [vmem:[#allocation336_spill] sm:$0xff] }
 0x388   : > { %15663 = vst [vmem:[#allocation283_spill] sm:$0xff] %v8760_v40  ;;  %v8770_v48 = vpop.permute.xlu0 %1802  ;;  %v2306_v40 = vsel %vm2274_vm6, %v2273_v49, %v15670_v56  ;;  %v2402_v8 = vsel %vm15007_vm9, %v2369_v17, %v15671_v39  ;;  %v2436_v7 = vsel %vm2406_vm10, %v2403_v23, %v15672_v30  ;;  %v2305_v2 = vsel %vm2274_vm6, %v2272_v25, %v15673_v33  ;;  %v15674_v14 = vld [vmem:[#allocation268_spill] sm:$0xff]  ;;  %v15676_v39 = vld [vmem:[#allocation55_spill] sm:$0xff]  ;;  %v15677_v17 = vld [vmem:[#allocation269_spill] sm:$0xff] }
 0x389   : > { %15668 = vst [vmem:[#allocation319_spill] sm:$0xff] %v8770_v48  ;;  %1991 = vrot.lane.b32.xlu1 %v6765_v37, %s5981_s27  ;;  %v2339_v3 = vsel %vm2307_vm7, %v2306_v40, %v15674_v14  ;;  %v15675_v48 = vld [vmem:[#allocation377_spill] sm:$0xff]  ;;  %v2469_v49 = vsel %vm2439_vm11, %v2436_v7, %v8359_v50  ;;  %v2338_v23 = vsel %vm2307_vm7, %v2305_v2, %v15677_v17  ;;  %v15680_v7 = vld [vmem:[#allocation339_spill] sm:$0xff]  ;;  %v15787_v50 = vld [vmem:[#allocation344_spill] sm:$0xff] }
 0x38a   : > { %v2435_v41 = vsel %vm2406_vm10, %v2402_v8, %v15675_v48  ;;  %1989 = vrot.lane.b32.xlu0 %v15676_v39, %s5981_s27  ;;  %v15678_v56 = vld [vmem:[#allocation305_spill] sm:$0xff]  ;;  %v2502_v40 = vsel %vm2472_vm12, %v2469_v49, %v8493_v5  ;;  %v15679_v8 = vld [vmem:[#allocation306_spill] sm:$0xff] }
 0x38b   : > { %v2372_v37 = vsel %vm15008_vm8, %v2339_v3, %v15678_v56  ;;  %v2468_v25 = vsel %vm2439_vm11, %v2435_v41, %v8361_v59  ;;  %v1809_v33 = vpop.permute.xlu1 %1808  ;;  %v2371_v14 = vsel %vm15008_vm8, %v2338_v23, %v15679_v8  ;;  %v15681_v56 = vld [vmem:[#allocation342_spill] sm:$0xff]  ;;  %v15720_v8 = vld [vmem:[#allocation13_spill] sm:$0xff] }
 0x38c   : > { %v2405_v54 = vsel %vm15007_vm9, %v2372_v37, %v15680_v7  ;;  %v2501_v39 = vsel %vm2472_vm12, %v2468_v25, %v8495_v24  ;;  %v8807_v2 = vsel %vm2505_vm13, %v2502_v40, %v1809_v33  ;;  %v1807_v3 = vpop.permute.xlu0 %1806  ;;  %v2404_v41 = vsel %vm15007_vm9, %v2371_v14, %v15681_v56  ;;  %v15682_v23 = vld [vmem:[#allocation174_spill] sm:$0xff]  ;;  %v15683_v37 = vld [vmem:[#allocation379_spill] sm:$0xff] }
 0x38d   : > { %v2438_v5 = vsel %vm2406_vm10, %v2405_v54, %v8205_v61  ;;  %v8814_v49 = vsel %vm2505_vm13, %v2501_v39, %v1807_v3  ;;  %1995 = vrot.lane.b32.xlu1 %v15682_v23, %s5981_s27  ;;  %v2437_v7 = vsel %vm2406_vm10, %v2404_v41, %v15683_v37  ;;  %v15684_v25 = vld [vmem:[#allocation79_spill] sm:$0xff]  ;;  %v15721_v17 = vrot.slane %v15720_v8, 1 }
 0x38e   : > { %v2471_v24 = vsel %vm2439_vm11, %v2438_v5, %v8370_v21  ;;  %1993 = vrot.lane.b32.xlu0 %v15684_v25, %s5981_s27  ;;  %v2470_v40 = vsel %vm2439_vm11, %v2437_v7, %v8372_v47  ;;  %v1947_v5 = vrot.slane %v8512_v38, 2  ;;  %v5735_v7 = vld [vmem:[%s6067_s30 + $0xd0] sm:$0xff] }
 0x38f   : > { %v2504_v54 = vsel %vm2472_vm12, %v2471_v24, %v8501_v42  ;;  %v1813_v33 = vpop.permute.xlu1 %1812  ;;  %v2503_v14 = vsel %vm2472_vm12, %v2470_v40, %v8503_v46  ;;  %v1946_v46 = vrot.slane %v8395_v57, 2  ;;  %v15780_v37 = vld [vmem:[#allocation343_spill] sm:$0xff] }
 0x390   : > { %v8831_v39 = vsel %vm2505_vm13, %v2504_v54, %v1813_v33  ;;  %v1811_v3 = vpop.permute.xlu0 %1810  ;;  %v5738_v33 = vld [vmem:[%s6067_s30 + $0x110] sm:$0xff] }
 0x391   : > { %v8834_v56 = vsel %vm2505_vm13, %v2503_v14, %v1811_v3  ;;  %1999 = vrot.lane.b32.xlu1 %v8223_v43, %s5981_s27  ;;  %v5739_v14 = vld [vmem:[%s6067_s30 + $0x100] sm:$0xff] }
 0x392   : > { %1997 = vrot.lane.b32.xlu0 %v8201_v27, %s5981_s27  ;;  %v1948_v27 = vsel %vm564_vm1, %v1946_v46, %v1947_v5  ;;  %v5740_v5 = vld [vmem:[%s6067_s30 + $0x130] sm:$0xff]  ;;  %vm15004_vm1 = vcmask 490496  }
 0x393   : > { %v8840_v41 = vpop.permute.xlu1 %1852 }
 0x394   : > { %15685 = vst [vmem:[#allocation320_spill] sm:$0xff] %v8840_v41  ;;  %v8842_v42 = vpop.permute.xlu0 %1850  ;;  %v9055_v41 = vld [vmem:[%s6067_s30 + $0x310] sm:$0xff] }
 0x395   : > { %15686 = vst [vmem:[#allocation158_spill] sm:$0xff] %v8842_v42  ;;  %2003 = vrot.lane.b32.xlu1 %v8241_v19, %s5981_s27  ;;  %v15718_v42 = vld [vmem:[#allocation12_spill] sm:$0xff] }
 0x396   : > { %2001 = vrot.lane.b32.xlu0 %v8216_v55, %s5981_s27 }
 0x397   : > { %v8850_v43 = vpop.permute.xlu1 %1856 }
 0x398   : > { %15687 = vst [vmem:[#allocation71_spill] sm:$0xff] %v8850_v43  ;;  %v8852_v23 = vpop.permute.xlu0 %1854  ;;  %v5754_v43 = vld [vmem:[%s6067_s30 + $0x270] sm:$0xff] }
 0x399   : > { %15688 = vst [vmem:[#allocation74_spill] sm:$0xff] %v8852_v23  ;;  %2007 = vrot.lane.b32.xlu1 %v8257_v28, %s5981_s27 }
 0x39a   : > { %2005 = vrot.lane.b32.xlu0 %v8234_v31, %s5981_s27  ;;  %v5736_v31 = vld [vmem:[%s6067_s30 + $0xc0] sm:$0xff] }
 0x39b   : > { %v8859_v19 = vpop.permute.xlu1 %1860 }
 0x39c   : > { %15689 = vst [vmem:[#allocation76_spill] sm:$0xff] %v8859_v19  ;;  %v8861_v55 = vpop.permute.xlu0 %1858 }
 0x39d   : > { %15690 = vst [vmem:[#allocation40_spill] sm:$0xff] %v8861_v55  ;;  %2011 = vrot.lane.b32.xlu1 %v1948_v27, %s5981_s27  ;;  %v8987_v55 = vld [vmem:[%s6067_s30 + $0x250] sm:$0xff] }
 0x39e   : > { %2009 = vrot.lane.b32.xlu0 %v8252_v16, %s5981_s27  ;;  %v5737_v16 = vld [vmem:[%s6067_s30 + $0xe0] sm:$0xff]  ;;  %s5892_s27 = sshll.u32 %s5985_s26, 4  ;;  %s5893_s27 = int_to_ptr.vmem [resolvable:$false] %s5892_s27 }
 0x39f   : > { %v8866_v38 = vpop.permute.xlu1 %1864 }
 0x3a0   : > { %15691 = vst [vmem:[#allocation104_spill] sm:$0xff] %v8866_v38  ;;  %v8868_v28 = vpop.permute.xlu0 %1862  ;;  %v8959_v38 = vld [vmem:[%s6067_s30 + $0x210] sm:$0xff] }
 0x3a1   : > { %15692 = vst [vmem:[#allocation105_spill] sm:$0xff] %v8868_v28  ;;  %2048 = vrot.lane.b32.xlu1 %v5735_v7, %s5982_s28  ;;  %v8964_v28 = vld [vmem:[%s6067_s30 + $0x200] sm:$0xff] }
 0x3a2   : > { %2046 = vrot.lane.b32.xlu0 %v5736_v31, %s5982_s28 }
 0x3a3   : > { %v8874_v24 = vpop.permute.xlu1 %1868 }
 0x3a4   : > { %15693 = vst [vmem:[#allocation132_spill] sm:$0xff] %v8874_v24  ;;  %v8876_v25 = vpop.permute.xlu0 %1866 }
 0x3a5   : > { %15694 = vst [vmem:[#allocation41_spill] sm:$0xff] %v8876_v25  ;;  %2052 = vrot.lane.b32.xlu1 %v8549_v62, %s5982_s28 }
 0x3a6   : > { %2050 = vrot.lane.b32.xlu0 %v5737_v16, %s5982_s28  ;;  %v8909_v16 = vld [vmem:[%s6067_s30 + $0x170] sm:$0xff] }
 0x3a7   : > { %v8882_v40 = vpop.permute.xlu1 %1872 }
 0x3a8   : > { %15695 = vst [vmem:[#allocation133_spill] sm:$0xff] %v8882_v40  ;;  %v8884_v54 = vpop.permute.xlu0 %1870 }
 0x3a9   : > { %15696 = vst [vmem:[#allocation106_spill] sm:$0xff] %v8884_v54  ;;  %2056 = vrot.lane.b32.xlu1 %v5738_v33, %s5982_s28  ;;  %v8914_v33 = vld [vmem:[%s6067_s30 + $0x160] sm:$0xff]  ;;  %v5747_v54 = vld [vmem:[%s6067_s30 + $0x1d0] sm:$0xff] }
 0x3aa   : > { %2054 = vrot.lane.b32.xlu0 %v5739_v14, %s5982_s28  ;;  %v8923_v14 = vld [vmem:[%s6067_s30 + $0x190] sm:$0xff]  ;;  %v9305_v29 = vrot.slane %v8914_v33, 7 }
 0x3ab   : > { %v1877_v3 = vpop.permute.xlu1 %1876 }
 0x3ac   : > { %v8892_v62 = vsel %vm15006_vm14, %v8636_v63, %v1877_v3  ;;  %v8894_v46 = vpop.permute.xlu0 %1874 }
 0x3ad   : > { %15697 = vst [vmem:[#allocation234_spill] sm:$0xff] %v8894_v46  ;;  %2060 = vrot.lane.b32.xlu1 %v5740_v5, %s5982_s28 }
 0x3ae   : > { %2058 = vrot.lane.b32.xlu0 %v8294_v0, %s5982_s28 }
 0x3af   : > { %v1881_v27 = vpop.permute.xlu1 %1880 }
 0x3b0   : > { %v8902_v7 = vsel %vm15006_vm14, %v8659_v35, %v1881_v27  ;;  %v1879_v31 = vpop.permute.xlu0 %1878  ;;  %v8937_v27 = vld [vmem:[%s6067_s30 + $0x1b0] sm:$0xff] }
 0x3b1   : > { %v8906_v63 = vsel %vm15006_vm14, %v8662_v9, %v1879_v31  ;;  %2064 = vrot.lane.b32.xlu1 %v8909_v16, %s5982_s28  ;;  %v8928_v9 = vld [vmem:[%s6067_s30 + $0x180] sm:$0xff] }
 0x3b2   : > { %2062 = vrot.lane.b32.xlu0 %v8914_v33, %s5982_s28  ;;  %v8942_v31 = vld [vmem:[%s6067_s30 + $0x1a0] sm:$0xff] }
 0x3b3   : > { %v8918_v0 = vpop.permute.xlu1 %1884 }
 0x3b4   : > { %15698 = vst [vmem:[#allocation107_spill] sm:$0xff] %v8918_v0  ;;  %v8920_v35 = vpop.permute.xlu0 %1882 }
 0x3b5   : > { %15699 = vst [vmem:[#allocation134_spill] sm:$0xff] %v8920_v35  ;;  %2068 = vrot.lane.b32.xlu1 %v8923_v14, %s5982_s28  ;;  %v15719_v35 = vrot.slane %v15718_v42, 1 }
 0x3b6   : > { %2066 = vrot.lane.b32.xlu0 %v8928_v9, %s5982_s28 }
 0x3b7   : > { %v8932_v3 = vpop.permute.xlu1 %1888 }
 0x3b8   : > { %15700 = vst [vmem:[#allocation235_spill] sm:$0xff] %v8932_v3  ;;  %v8934_v5 = vpop.permute.xlu0 %1886 }
 0x3b9   : > { %15701 = vst [vmem:[#allocation47_spill] sm:$0xff] %v8934_v5  ;;  %2072 = vrot.lane.b32.xlu1 %v8937_v27, %s5982_s28  ;;  %v9045_v5 = vld [vmem:[%s6067_s30 + $0x2f0] sm:$0xff] }
 0x3ba   : > { %2070 = vrot.lane.b32.xlu0 %v8942_v31, %s5982_s28 }
 0x3bb   : > { %v8946_v46 = vpop.permute.xlu1 %1892 }
 0x3bc   : > { %15702 = vst [vmem:[#allocation135_spill] sm:$0xff] %v8946_v46  ;;  %v8948_v40 = vpop.permute.xlu0 %1890 }
 0x3bd   : > { %15703 = vst [vmem:[#allocation78_spill] sm:$0xff] %v8948_v40  ;;  %2076 = vrot.lane.b32.xlu1 %v5747_v54, %s5982_s28 }
 0x3be   : > { %2074 = vrot.lane.b32.xlu0 %v8329_v34, %s5982_s28  ;;  %v8973_v34 = vld [vmem:[%s6067_s30 + $0x230] sm:$0xff] }
 0x3bf   : > { %v8954_v24 = vpop.permute.xlu1 %1896 }
 0x3c0   : > { %15704 = vst [vmem:[#allocation202_spill] sm:$0xff] %v8954_v24  ;;  %v8956_v25 = vpop.permute.xlu0 %1894  ;;  %v8978_v24 = vld [vmem:[%s6067_s30 + $0x220] sm:$0xff] }
 0x3c1   : > { %15705 = vst [vmem:[#allocation335_spill] sm:$0xff] %v8956_v25  ;;  %2080 = vrot.lane.b32.xlu1 %v8959_v38, %s5982_s28 }
 0x3c2   : > { %2078 = vrot.lane.b32.xlu0 %v8964_v28, %s5982_s28 }
 0x3c3   : > { %v8968_v54 = vpop.permute.xlu1 %1900 }
 0x3c4   : > { %15706 = vst [vmem:[#allocation236_spill] sm:$0xff] %v8968_v54  ;;  %v8970_v19 = vpop.permute.xlu0 %1898  ;;  %v8992_v54 = vld [vmem:[%s6067_s30 + $0x240] sm:$0xff] }
 0x3c5   : > { %15707 = vst [vmem:[#allocation336_spill] sm:$0xff] %v8970_v19  ;;  %2084 = vrot.lane.b32.xlu1 %v8973_v34, %s5982_s28 }
 0x3c6   : > { %2082 = vrot.lane.b32.xlu0 %v8978_v24, %s5982_s28 }
 0x3c7   : > { %v8982_v25 = vpop.permute.xlu1 %1904 }
 0x3c8   : > { %15708 = vst [vmem:[#allocation237_spill] sm:$0xff] %v8982_v25  ;;  %v8984_v46 = vpop.permute.xlu0 %1902 }
 0x3c9   : > { %15709 = vst [vmem:[#allocation268_spill] sm:$0xff] %v8984_v46  ;;  %2088 = vrot.lane.b32.xlu1 %v8987_v55, %s5982_s28 }
 0x3ca   : > { %2086 = vrot.lane.b32.xlu0 %v8992_v54, %s5982_s28 }
 0x3cb   : > { %v1909_v19 = vpop.permute.xlu1 %1908 }
 0x3cc   : > { %v8998_v40 = vsel %vm15006_vm14, %v8807_v2, %v1909_v19  ;;  %v1907_v25 = vpop.permute.xlu0 %1906 }
 0x3cd   : > { %v9002_v46 = vsel %vm15006_vm14, %v8814_v49, %v1907_v25  ;;  %2092 = vrot.lane.b32.xlu1 %v5754_v43, %s5982_s28  ;;  %v9017_v49 = vld [vmem:[%s6067_s30 + $0x2b0] sm:$0xff]  ;;  %v9022_v43 = vld [vmem:[%s6067_s30 + $0x2a0] sm:$0xff] }
 0x3ce   : > { %2090 = vrot.lane.b32.xlu0 %v8364_v58, %s5982_s28  ;;  %v9031_v25 = vld [vmem:[%s6067_s30 + $0x2d0] sm:$0xff] }
 0x3cf   : > { %v1913_v3 = vpop.permute.xlu1 %1912 }
 0x3d0   : > { %v9010_v23 = vsel %vm15006_vm14, %v8831_v39, %v1913_v3  ;;  %v1911_v2 = vpop.permute.xlu0 %1910 }
 0x3d1   : > { %v9014_v19 = vsel %vm15006_vm14, %v8834_v56, %v1911_v2  ;;  %2096 = vrot.lane.b32.xlu1 %v9017_v49, %s5982_s28  ;;  %v9036_v56 = vld [vmem:[%s6067_s30 + $0x2c0] sm:$0xff] }
 0x3d2   : > { %2094 = vrot.lane.b32.xlu0 %v9022_v43, %s5982_s28 }
 0x3d3   : > { %v9026_v58 = vpop.permute.xlu1 %1951 }
 0x3d4   : > { %15710 = vst [vmem:[#allocation55_spill] sm:$0xff] %v9026_v58  ;;  %v9028_v39 = vpop.permute.xlu0 %1949  ;;  %v9050_v58 = vld [vmem:[%s6067_s30 + $0x2e0] sm:$0xff] }
 0x3d5   : > { %15711 = vst [vmem:[#allocation305_spill] sm:$0xff] %v9028_v39  ;;  %2100 = vrot.lane.b32.xlu1 %v9031_v25, %s5982_s28 }
 0x3d6   : > { %2098 = vrot.lane.b32.xlu0 %v9036_v56, %s5982_s28 }
 0x3d7   : > { %v9040_v3 = vpop.permute.xlu1 %1955 }
 0x3d8   : > { %15712 = vst [vmem:[#allocation339_spill] sm:$0xff] %v9040_v3  ;;  %v9042_v2 = vpop.permute.xlu0 %1953 }
 0x3d9   : > { %15713 = vst [vmem:[#allocation342_spill] sm:$0xff] %v9042_v2  ;;  %2104 = vrot.lane.b32.xlu1 %v9045_v5, %s5982_s28 }
 0x3da   : > { %2102 = vrot.lane.b32.xlu0 %v9050_v58, %s5982_s28 }
 0x3db   : > { %v9057_v0 = vpop.permute.xlu1 %1959 }
 0x3dc   : > { %15714 = vst [vmem:[#allocation174_spill] sm:$0xff] %v9057_v0  ;;  %v9059_v39 = vpop.permute.xlu0 %1957 }
 0x3dd   : > { %15715 = vst [vmem:[#allocation79_spill] sm:$0xff] %v9059_v39  ;;  %2108 = vrot.lane.b32.xlu1 %v9055_v41, %s5982_s28 }
 0x3de   : > { %2106 = vrot.lane.b32.xlu0 %v8395_v57, %s5982_s28  ;;  %v15726_v57 = vld [vmem:[#allocation17_spill] sm:$0xff]  ;;  %s5894_s28 = scalar_lea.vmem %s5893_s27, 8192 }
 0x3df   : > { %v9065_v3 = vpop.permute.xlu1 %1963 }
 0x3e0   : > { %15716 = vst [vmem:[#allocation423_spill] sm:$0xff] %v9065_v3  ;;  %v9067_v2 = vpop.permute.xlu0 %1961  ;;  %v15727_v3 = vrot.slane %v15726_v57, 1 }
 0x3e1   : > { %15717 = vst [vmem:[#allocation424_spill] sm:$0xff] %v9067_v2  ;;  %2643 = vrot.lane.b32.xlu1 %v15719_v35, %s5968_s4  ;;  %v15730_v35 = vld [vmem:[#allocation20_spill] sm:$0xff] }
 0x3e2   : > { %2641 = vrot.lane.b32.xlu0 %v15721_v17, %s5968_s4  ;;  %v15731_v8 = vrot.slane %v15730_v35, 1  ;;  %v15732_v17 = vld [vmem:[#allocation21_spill] sm:$0xff] }
 0x3e3   : > { %v9075_v0 = vpop.permute.xlu1 %1967 }
 0x3e4   : > { %15722 = vst [vmem:[#allocation12_spill] sm:$0xff] %v9075_v0  ;;  %v9077_v39 = vpop.permute.xlu0 %1965  ;;  %v15733_v0 = vrot.slane %v15732_v17, 1 }
 0x3e5   : > { %15723 = vst [vmem:[#allocation13_spill] sm:$0xff] %v9077_v39  ;;  %2647 = vrot.lane.b32.xlu1 %v15725_v15, %s5968_s4 }
 0x3e6   : > { %2645 = vrot.lane.b32.xlu0 %v15727_v3, %s5968_s4  ;;  %v15735_v3 = vld [vmem:[#allocation117_spill] sm:$0xff] }
 0x3e7   : > { %v9085_v2 = vpop.permute.xlu1 %1971  ;;  %v15736_v57 = vrot.slane %v15735_v3, 1  ;;  %v15739_v3 = vld [vmem:[#allocation27_spill] sm:$0xff] }
 0x3e8   : > { %15728 = vst [vmem:[#allocation16_spill] sm:$0xff] %v9085_v2  ;;  %v9087_v42 = vpop.permute.xlu0 %1969  ;;  %v15750_v2 = vld [vmem:[#allocation37_spill] sm:$0xff] }
 0x3e9   : > { %15729 = vst [vmem:[#allocation17_spill] sm:$0xff] %v9087_v42  ;;  %2651 = vrot.lane.b32.xlu1 %v15731_v8, %s5968_s4  ;;  %v15751_v42 = vld [vmem:[#allocation39_spill] sm:$0xff] }
 0x3ea   : > { %2649 = vrot.lane.b32.xlu0 %v15733_v0, %s5968_s4 }
 0x3eb   : > { %v1976_v39 = vpop.permute.xlu1 %1975 }
 0x3ec   : > { %v9097_v22 = vsel %vm15005_vm15, %v8892_v62, %v1976_v39  ;;  %v9099_v15 = vpop.permute.xlu0 %1973  ;;  %v15737_v62 = vld [vmem:[#allocation221_spill] sm:$0xff] }
 0x3ed   : > { %15734 = vst [vmem:[#allocation20_spill] sm:$0xff] %v9099_v15  ;;  %2655 = vrot.lane.b32.xlu1 %v15736_v57, %s5968_s4  ;;  %v15738_v39 = vrot.slane %v15737_v62, 1  ;;  %v15742_v15 = vld [vmem:[#allocation29_spill] sm:$0xff]  ;;  %v15747_v62 = vld [vmem:[#allocation35_spill] sm:$0xff] }
 0x3ee   : > { %2653 = vrot.lane.b32.xlu0 %v15548_v52, %s5968_s4 }
 0x3ef   : > { %v1980_v35 = vpop.permute.xlu1 %1979 }
 0x3f0   : > { %v9108_v8 = vsel %vm15005_vm15, %v8902_v7, %v1980_v35  ;;  %v1978_v0 = vpop.permute.xlu0 %1977  ;;  %v15743_v7 = vld [vmem:[#allocation31_spill] sm:$0xff] }
 0x3f1   : > { %v9112_v17 = vsel %vm15005_vm15, %v8906_v63, %v1978_v0  ;;  %2659 = vrot.lane.b32.xlu1 %v15738_v39, %s5968_s4  ;;  %v15746_v0 = vld [vmem:[#allocation33_spill] sm:$0xff] }
 0x3f2   : > { %2657 = vrot.lane.b32.xlu0 %v15739_v3, %s5968_s4 }
 0x3f3   : > { %v9119_v57 = vpop.permute.xlu1 %1983 }
 0x3f4   : > { %15740 = vst [vmem:[#allocation21_spill] sm:$0xff] %v9119_v57  ;;  %v9121_v52 = vpop.permute.xlu0 %1981 }
 0x3f5   : > { %15741 = vst [vmem:[#allocation117_spill] sm:$0xff] %v9121_v52  ;;  %2663 = vrot.lane.b32.xlu1 %v15742_v15, %s5968_s4 }
 0x3f6   : > { %2661 = vrot.lane.b32.xlu0 %v15743_v7, %s5968_s4 }
 0x3f7   : > { %v9127_v35 = vpop.permute.xlu1 %1987 }
 0x3f8   : > { %15744 = vst [vmem:[#allocation221_spill] sm:$0xff] %v9127_v35  ;;  %v9129_v63 = vpop.permute.xlu0 %1985 }
 0x3f9   : > { %15745 = vst [vmem:[#allocation27_spill] sm:$0xff] %v9129_v63  ;;  %2667 = vrot.lane.b32.xlu1 %v15746_v0, %s5968_s4  ;;  %v15754_v63 = vld [vmem:[#allocation128_spill] sm:$0xff] }
 0x3fa   : > { %2665 = vrot.lane.b32.xlu0 %v15747_v62, %s5968_s4 }
 0x3fb   : > { %v9135_v39 = vpop.permute.xlu1 %1991 }
 0x3fc   : > { %15748 = vst [vmem:[#allocation29_spill] sm:$0xff] %v9135_v39  ;;  %v9137_v3 = vpop.permute.xlu0 %1989 }
 0x3fd   : > { %15749 = vst [vmem:[#allocation31_spill] sm:$0xff] %v9137_v3  ;;  %2671 = vrot.lane.b32.xlu1 %v15750_v2, %s5968_s4  ;;  %v15757_v3 = vld [vmem:[#allocation230_spill] sm:$0xff] }
 0x3fe   : > { %2669 = vrot.lane.b32.xlu0 %v15751_v42, %s5968_s4 }
 0x3ff   : > { %v9143_v57 = vpop.permute.xlu1 %1995 }
 0x400   : > { %15752 = vst [vmem:[#allocation33_spill] sm:$0xff] %v9143_v57  ;;  %v9145_v35 = vpop.permute.xlu0 %1993 }
 0x401   : > { %15753 = vst [vmem:[#allocation35_spill] sm:$0xff] %v9145_v35  ;;  %2675 = vrot.lane.b32.xlu1 %v15754_v63, %s5968_s4  ;;  %v15761_v35 = vld [vmem:[#allocation52_spill] sm:$0xff] }
 0x402   : > { %2673 = vrot.lane.b32.xlu0 %v15562_v6, %s5968_s4 }
 0x403   : > { %v9151_v52 = vpop.permute.xlu1 %1999 }
 0x404   : > { %15755 = vst [vmem:[#allocation37_spill] sm:$0xff] %v9151_v52  ;;  %v9153_v39 = vpop.permute.xlu0 %1997 }
 0x405   : > { %15756 = vst [vmem:[#allocation425_spill] sm:$0xff] %v9153_v39  ;;  %2679 = vrot.lane.b32.xlu1 %v15757_v3, %s5968_s4 }
 0x406   : > { %2677 = vrot.lane.b32.xlu0 %v15758_v32, %s5968_s4  ;;  %v9367_v32 = vrot.slane %v8964_v28, 7  ;;  %v9385_v28 = vrot.slane %v8978_v24, 7 }
 0x407   : > { %v9159_v12 = vpop.permute.xlu1 %2003 }
 0x408   : > { %15759 = vst [vmem:[#allocation426_spill] sm:$0xff] %v9159_v12  ;;  %v9161_v57 = vpop.permute.xlu0 %2001  ;;  %v15763_v12 = vld [vmem:[#allocation59_spill] sm:$0xff]  ;;  %15818 = vst [vmem:[#allocation451_spill] sm:$0xff] %v9367_v32 }
 0x409   : > { %15760 = vst [vmem:[#allocation427_spill] sm:$0xff] %v9161_v57  ;;  %2683 = vrot.lane.b32.xlu1 %v15761_v35, %s5968_s4  ;;  %v15764_v57 = vld [vmem:[#allocation61_spill] sm:$0xff]  ;;  %15822 = vst [vmem:[#allocation455_spill] sm:$0xff] %v9385_v28 }
 0x40a   : > { %2681 = vrot.lane.b32.xlu0 %v15762_v51, %s5968_s4 }
 0x40b   : > { %v2008_v26 = vpop.permute.xlu1 %2007 }
 0x40c   : > { %v9169_v52 = vsel %vm15005_vm15, %v8998_v40, %v2008_v26  ;;  %v2006_v39 = vpop.permute.xlu0 %2005  ;;  %v15765_v40 = vld [vmem:[#allocation63_spill] sm:$0xff] }
 0x40d   : > { %v9173_v45 = vsel %vm15005_vm15, %v9002_v46, %v2006_v39  ;;  %2687 = vrot.lane.b32.xlu1 %v15763_v12, %s5968_s4  ;;  %v15766_v46 = vld [vmem:[#allocation65_spill] sm:$0xff] }
 0x40e   : > { %2685 = vrot.lane.b32.xlu0 %v15764_v57, %s5968_s4 }
 0x40f   : > { %v2012_v11 = vpop.permute.xlu1 %2011 }
 0x410   : > { %v9181_v21 = vsel %vm15005_vm15, %v9010_v23, %v2012_v11  ;;  %v2010_v18 = vpop.permute.xlu0 %2009  ;;  %v15772_v23 = vld [vmem:[#allocation240_spill] sm:$0xff] }
 0x411   : > { %v9185_v26 = vsel %vm15005_vm15, %v9014_v19, %v2010_v18  ;;  %2691 = vrot.lane.b32.xlu1 %v15765_v40, %s5968_s4  ;;  %v15773_v19 = vld [vmem:[#allocation243_spill] sm:$0xff]  ;;  %vm5983_vm15 = vmmov 1  }
 0x412   : > { %2689 = vrot.lane.b32.xlu0 %v15766_v46, %s5968_s4 }
 0x413   : > { %v9191_v39 = vpop.permute.xlu1 %2048 }
 0x414   : > { %15767 = vst [vmem:[#allocation52_spill] sm:$0xff] %v9191_v39  ;;  %v9193_v47 = vpop.permute.xlu0 %2046 }
 0x415   : > { %15768 = vst [vmem:[#allocation54_spill] sm:$0xff] %v9193_v47  ;;  %2695 = vrot.lane.b32.xlu1 %v15769_v10, %s5968_s4  ;;  %v15776_v47 = vld [vmem:[#allocation341_spill] sm:$0xff] }
 0x416   : > { %2693 = vrot.lane.b32.xlu0 %v15576_v60, %s5968_s4  ;;  %v286_v60 = vld [vmem:[%s6067_s30 + $0x318] sm:$0x3] }
 0x417   : > { %v9199_v11 = vpop.permute.xlu1 %2052  ;;  %v9264_v44 = vrot.slane %v286_v60, 1  ;;  %v9284_v60 = vld [vmem:[%s6067_s30 + $0x150] sm:$0xff] }
 0x418   : > { %15770 = vst [vmem:[#allocation61_spill] sm:$0xff] %v9199_v11  ;;  %v9201_v18 = vpop.permute.xlu0 %2050 }
 0x419   : > { %15771 = vst [vmem:[#allocation428_spill] sm:$0xff] %v9201_v18  ;;  %2699 = vrot.lane.b32.xlu1 %v15772_v23, %s5968_s4  ;;  %v15779_v18 = vld [vmem:[#allocation338_spill] sm:$0xff]  ;;  %v15788_v23 = vld [vmem:[#allocation349_spill] sm:$0xff]  ;;  %15798 = vst [vmem:[#allocation433_spill] sm:$0xff] %v9264_v44 }
 0x41a   : > { %2697 = vrot.lane.b32.xlu0 %v15773_v19, %s5968_s4 }
 0x41b   : > { %v9207_v61 = vpop.permute.xlu1 %2056 }
 0x41c   : > { %15774 = vst [vmem:[#allocation429_spill] sm:$0xff] %v9207_v61  ;;  %v9209_v39 = vpop.permute.xlu0 %2054 }
 0x41d   : > { %15775 = vst [vmem:[#allocation430_spill] sm:$0xff] %v9209_v39  ;;  %2703 = vrot.lane.b32.xlu1 %v15776_v47, %s5968_s4  ;;  %v15783_v39 = vld [vmem:[#allocation347_spill] sm:$0xff] }
 0x41e   : > { %2701 = vrot.lane.b32.xlu0 %v15578_v53, %s5968_s4 }
 0x41f   : > { %v9215_v20 = vpop.permute.xlu1 %2060 }
 0x420   : > { %15777 = vst [vmem:[#allocation341_spill] sm:$0xff] %v9215_v20  ;;  %v9217_v11 = vpop.permute.xlu0 %2058 }
 0x421   : > { %15778 = vst [vmem:[#allocation431_spill] sm:$0xff] %v9217_v11  ;;  %2707 = vrot.lane.b32.xlu1 %v15779_v18, %s5968_s4 }
 0x422   : > { %2705 = vrot.lane.b32.xlu0 %v15780_v37, %s5968_s4 }
 0x423   : > { %v9223_v19 = vpop.permute.xlu1 %2064 }
 0x424   : > { %15781 = vst [vmem:[#allocation338_spill] sm:$0xff] %v9223_v19  ;;  %v9225_v61 = vpop.permute.xlu0 %2062 }
 0x425   : > { %15782 = vst [vmem:[#allocation343_spill] sm:$0xff] %v9225_v61  ;;  %2711 = vrot.lane.b32.xlu1 %v15783_v39, %s5968_s4 }
 0x426   : > { %2709 = vrot.lane.b32.xlu0 %v15784_v4, %s5968_s4 }
 0x427   : > { %v9231_v20 = vpop.permute.xlu1 %2068 }
 0x428   : > { %15785 = vst [vmem:[#allocation347_spill] sm:$0xff] %v9231_v20  ;;  %v9233_v11 = vpop.permute.xlu0 %2066  ;;  %v15792_v20 = vld [vmem:[#allocation357_spill] sm:$0xff] }
 0x429   : > { %15786 = vst [vmem:[#allocation352_spill] sm:$0xff] %v9233_v11  ;;  %2715 = vrot.lane.b32.xlu1 %v15787_v50, %s5968_s4 }
 0x42a   : > { %2713 = vrot.lane.b32.xlu0 %v15788_v23, %s5968_s4 }
 0x42b   : > { %v2073_v19 = vpop.permute.xlu1 %2072 }
 0x42c   : > { %v9241_v61 = vsel %vm15004_vm1, %v9097_v22, %v2073_v19  ;;  %v9243_v59 = vpop.permute.xlu0 %2070  ;;  %v15795_v19 = vld [vmem:[#allocation350_spill] sm:$0xff] }
 0x42d   : > { %15789 = vst [vmem:[#allocation344_spill] sm:$0xff] %v9241_v61  ;;  %15790 = vst [vmem:[#allocation349_spill] sm:$0xff] %v9243_v59  ;;  %2719 = vrot.lane.b32.xlu1 %v15791_v36, %s5968_s4  ;;  %v15796_v61 = vld [vmem:[#allocation355_spill] sm:$0xff] }
 0x42e   : > { %2717 = vrot.lane.b32.xlu0 %v15792_v20, %s5968_s4 }
 0x42f   : > { %v2077_v11 = vpop.permute.xlu1 %2076 }
 0x430   : > { %v9251_v30 = vsel %vm15004_vm1, %v9108_v8, %v2077_v11  ;;  %v2075_v48 = vpop.permute.xlu0 %2074  ;;  %v2638_v8 = vrot.slane %v9055_v41, 1  ;;  %v14798_v41 = vrot.slane %v9284_v60, 7 }
 0x431   : > { %15793 = vst [vmem:[#allocation353_spill] sm:$0xff] %v9251_v30  ;;  %v9256_v22 = vsel %vm15004_vm1, %v9112_v17, %v2075_v48  ;;  %2723 = vrot.lane.b32.xlu1 %v15795_v19, %s5968_s4  ;;  %v15800_v30 = vld [vmem:[#allocation66_spill] sm:$0xff] }
 0x432   : > { %15794 = vst [vmem:[#allocation357_spill] sm:$0xff] %v9256_v22  ;;  %2721 = vrot.lane.b32.xlu0 %v15796_v61, %s5968_s4  ;;  %v15801_v48 = vld [vmem:[#allocation418_spill] sm:$0xff]  ;;  %v9277_v22 = vsel %vm371_vm0, %v2638_v8, %v9264_v44 }
 0x433   : > { %v9262_v59 = vpop.permute.xlu1 %2080  ;;  %15803 = vst [vmem:[#allocation436_spill] sm:$0xff] %v9277_v22 }
 0x434   : > { %15797 = vst [vmem:[#allocation432_spill] sm:$0xff] %v9262_v59  ;;  %v9267_v11 = vpop.permute.xlu0 %2078  ;;  %v9290_v59 = vld [vmem:[%s6067_s30 + $0x140] sm:$0xff] }
 0x435   : > { %15799 = vst [vmem:[#allocation434_spill] sm:$0xff] %v9267_v11  ;;  %2727 = vrot.lane.b32.xlu1 %v15800_v30, %s5968_s4 }
 0x436   : > { %2725 = vrot.lane.b32.xlu0 %v15801_v48, %s5968_s4  ;;  %v9476_v48 = vld [vmem:[%s6067_s30 + $0x350] sm:$0xff] }
 0x437   : > { %v9273_v17 = vpop.permute.xlu1 %2084 }
 0x438   : > { %15802 = vst [vmem:[#allocation435_spill] sm:$0xff] %v9273_v17  ;;  %v9279_v13 = vpop.permute.xlu0 %2082  ;;  %v2787_v17 = vrot.slane %v9290_v59, 7 }
 0x439   : > { %15804 = vst [vmem:[#allocation437_spill] sm:$0xff] %v9279_v13  ;;  %2731 = vrot.lane.b32.xlu1 %v9264_v44, %s5968_s4  ;;  %v9301_v13 = vrot.slane %v8909_v16, 7  ;;  %v9319_v16 = vrot.slane %v8928_v9, 7  ;;  %v9363_v44 = vrot.slane %v8959_v38, 7  ;;  %v9380_v38 = vrot.slane %v8973_v34, 7 }
 0x43a   : > { %2729 = vrot.lane.b32.xlu0 %v9277_v22, %s5968_s4  ;;  %v9399_v34 = vrot.slane %v8992_v54, 7 }
 0x43b   : > { %v9293_v11 = vpop.permute.xlu1 %2088  ;;  %15817 = vst [vmem:[#allocation450_spill] sm:$0xff] %v9363_v44  ;;  %15821 = vst [vmem:[#allocation454_spill] sm:$0xff] %v9380_v38 }
 0x43c   : > { %15805 = vst [vmem:[#allocation438_spill] sm:$0xff] %v9293_v11  ;;  %v9295_v8 = vpop.permute.xlu0 %2086  ;;  %v9314_v11 = vrot.slane %v8923_v14, 7  ;;  %v9333_v14 = vrot.slane %v8942_v31, 7  ;;  %15826 = vst [vmem:[#allocation459_spill] sm:$0xff] %v9399_v34 }
 0x43d   : > { %15806 = vst [vmem:[#allocation439_spill] sm:$0xff] %v9295_v8  ;;  %2821 = vrot.lane.b32.xlu1 %v14798_v41, %s5969_s5  ;;  %v9328_v41 = vrot.slane %v8937_v27, 7  ;;  %v9348_v27 = vld [vmem:[%s6067_s30 + $0x1e0] sm:$0xff] }
 0x43e   : > { %2819 = vrot.lane.b32.xlu0 %v2787_v17, %s5969_s5  ;;  %15812 = vst [vmem:[#allocation445_spill] sm:$0xff] %v9333_v14 }
 0x43f   : > { %v9307_v1 = vpop.permute.xlu1 %2092  ;;  %15811 = vst [vmem:[#allocation444_spill] sm:$0xff] %v9328_v41 }
 0x440   : > { %15807 = vst [vmem:[#allocation440_spill] sm:$0xff] %v9307_v1  ;;  %v9309_v22 = vpop.permute.xlu0 %2090 }
 0x441   : > { %15808 = vst [vmem:[#allocation441_spill] sm:$0xff] %v9309_v22  ;;  %2825 = vrot.lane.b32.xlu1 %v9301_v13, %s5969_s5  ;;  %v2795_v22 = vrot.slane %v9348_v27, 7 }
 0x442   : > { %2823 = vrot.lane.b32.xlu0 %v9305_v29, %s5969_s5 }
 0x443   : > { %v9321_v33 = vpop.permute.xlu1 %2096 }
 0x444   : > { %15809 = vst [vmem:[#allocation442_spill] sm:$0xff] %v9321_v33  ;;  %v9323_v17 = vpop.permute.xlu0 %2094  ;;  %v9342_v33 = vld [vmem:[%s6067_s30 + $0x1f0] sm:$0xff] }
 0x445   : > { %15810 = vst [vmem:[#allocation443_spill] sm:$0xff] %v9323_v17  ;;  %2829 = vrot.lane.b32.xlu1 %v9314_v11, %s5969_s5  ;;  %v14800_v17 = vrot.slane %v9342_v33, 7 }
 0x446   : > { %2827 = vrot.lane.b32.xlu0 %v9319_v16, %s5969_s5 }
 0x447   : > { %v9335_v1 = vpop.permute.xlu1 %2100 }
 0x448   : > { %15813 = vst [vmem:[#allocation446_spill] sm:$0xff] %v9335_v1  ;;  %v9337_v9 = vpop.permute.xlu0 %2098 }
 0x449   : > { %15814 = vst [vmem:[#allocation447_spill] sm:$0xff] %v9337_v9  ;;  %2833 = vrot.lane.b32.xlu1 %v9328_v41, %s5969_s5 }
 0x44a   : > { %2831 = vrot.lane.b32.xlu0 %v9333_v14, %s5969_s5 }
 0x44b   : > { %v2105_v31 = vpop.permute.xlu1 %2104 }
 0x44c   : > { %v9353_v1 = vsel %vm15004_vm1, %v9169_v52, %v2105_v31  ;;  %v2103_v9 = vpop.permute.xlu0 %2102  ;;  %v9408_v31 = vld [vmem:[%s6067_s30 + $0x290] sm:$0xff] }
 0x44d   : > { %15815 = vst [vmem:[#allocation448_spill] sm:$0xff] %v9353_v1  ;;  %v9357_v8 = vsel %vm15004_vm1, %v9173_v45, %v2103_v9  ;;  %2837 = vrot.lane.b32.xlu1 %v14800_v17, %s5969_s5  ;;  %v9429_v1 = vrot.slane %v9022_v43, 7 }
 0x44e   : > { %15816 = vst [vmem:[#allocation449_spill] sm:$0xff] %v9357_v8  ;;  %2835 = vrot.lane.b32.xlu0 %v2795_v22, %s5969_s5 }
 0x44f   : > { %v2109_v3 = vpop.permute.xlu1 %2108 }
 0x450   : > { %v9371_v52 = vsel %vm15004_vm1, %v9181_v21, %v2109_v3  ;;  %v2107_v45 = vpop.permute.xlu0 %2106 }
 0x451   : > { %15819 = vst [vmem:[#allocation452_spill] sm:$0xff] %v9371_v52  ;;  %v9375_v9 = vsel %vm15004_vm1, %v9185_v26, %v2107_v45  ;;  %2841 = vrot.lane.b32.xlu1 %v9363_v44, %s5969_s5  ;;  %v9394_v26 = vrot.slane %v8987_v55, 7  ;;  %v14801_v45 = vrot.slane %v9408_v31, 7  ;;  %v9414_v55 = vld [vmem:[%s6067_s30 + $0x280] sm:$0xff]  ;;  %vm5062_vm1 = vcmask 1043456  }
 0x452   : > { %15820 = vst [vmem:[#allocation453_spill] sm:$0xff] %v9375_v9  ;;  %2839 = vrot.lane.b32.xlu0 %v9367_v32, %s5969_s5  ;;  %v2803_v17 = vrot.slane %v9414_v55, 7  ;;  %v9425_v9 = vrot.slane %v9017_v49, 7  ;;  %vm12681_vm14 = vmpackc.low %vm5062_vm1, %vm5983_vm15  ;;  %vm17140_vm1 = vcmask 457728  }
 0x453   : > { %v9387_v21 = vpop.permute.xlu1 %2643  ;;  %15825 = vst [vmem:[#allocation458_spill] sm:$0xff] %v9394_v26 }
 0x454   : > { %15823 = vst [vmem:[#allocation456_spill] sm:$0xff] %v9387_v21  ;;  %v9389_v3 = vpop.permute.xlu0 %2641  ;;  %15831 = vst [vmem:[#allocation464_spill] sm:$0xff] %v9425_v9 }
 0x455   : > { %15824 = vst [vmem:[#allocation457_spill] sm:$0xff] %v9389_v3  ;;  %2845 = vrot.lane.b32.xlu1 %v9380_v38, %s5969_s5 }
 0x456   : > { %2843 = vrot.lane.b32.xlu0 %v9385_v28, %s5969_s5 }
 0x457   : > { %v9401_v22 = vpop.permute.xlu1 %2647 }
 0x458   : > { %15827 = vst [vmem:[#allocation460_spill] sm:$0xff] %v9401_v22  ;;  %v9403_v24 = vpop.permute.xlu0 %2645  ;;  %v9460_v22 = vld [vmem:[%s6067_s30 + $0x330] sm:$0xff] }
 0x459   : > { %15828 = vst [vmem:[#allocation461_spill] sm:$0xff] %v9403_v24  ;;  %2849 = vrot.lane.b32.xlu1 %v9394_v26, %s5969_s5  ;;  %v14809_v21 = vrot.slane %v9460_v22, 7 }
 0x45a   : > { %2847 = vrot.lane.b32.xlu0 %v9399_v34, %s5969_s5 }
 0x45b   : > { %v9417_v54 = vpop.permute.xlu1 %2651 }
 0x45c   : > { %15829 = vst [vmem:[#allocation462_spill] sm:$0xff] %v9417_v54  ;;  %v9419_v52 = vpop.permute.xlu0 %2649 }
 0x45d   : > { %15830 = vst [vmem:[#allocation463_spill] sm:$0xff] %v9419_v52  ;;  %2853 = vrot.lane.b32.xlu1 %v14801_v45, %s5969_s5  ;;  %v9438_v52 = vrot.slane %v9031_v25, 7 }
 0x45e   : > { %2851 = vrot.lane.b32.xlu0 %v2803_v17, %s5969_s5  ;;  %v9443_v17 = vrot.slane %v9036_v56, 7 }
 0x45f   : > { %v9431_v8 = vpop.permute.xlu1 %2655  ;;  %15834 = vst [vmem:[#allocation467_spill] sm:$0xff] %v9438_v52 }
 0x460   : > { %15832 = vst [vmem:[#allocation465_spill] sm:$0xff] %v9431_v8  ;;  %v9433_v24 = vpop.permute.xlu0 %2653  ;;  %15835 = vst [vmem:[#allocation468_spill] sm:$0xff] %v9443_v17  ;;  %v9457_v8 = vrot.slane %v9050_v58, 7 }
 0x461   : > { %15833 = vst [vmem:[#allocation466_spill] sm:$0xff] %v9433_v24  ;;  %2857 = vrot.lane.b32.xlu1 %v9425_v9, %s5969_s5  ;;  %v9452_v24 = vrot.slane %v9045_v5, 7  ;;  %v9521_v9 = vld [vmem:[%s6067_s30 + $0x380] sm:$0xff] }
 0x462   : > { %2855 = vrot.lane.b32.xlu0 %v9429_v1, %s5969_s5  ;;  %15839 = vst [vmem:[#allocation472_spill] sm:$0xff] %v9457_v8 }
 0x463   : > { %v9445_v45 = vpop.permute.xlu1 %2659  ;;  %15838 = vst [vmem:[#allocation471_spill] sm:$0xff] %v9452_v24 }
 0x464   : > { %15836 = vst [vmem:[#allocation469_spill] sm:$0xff] %v9445_v45  ;;  %v9447_v54 = vpop.permute.xlu0 %2657  ;;  %v9465_v45 = vld [vmem:[%s6067_s30 + $0x320] sm:$0xff] }
 0x465   : > { %15837 = vst [vmem:[#allocation470_spill] sm:$0xff] %v9447_v54  ;;  %2861 = vrot.lane.b32.xlu1 %v9438_v52, %s5969_s5  ;;  %v2811_v6 = vrot.slane %v9465_v45, 7  ;;  %v9501_v52 = vld [vmem:[%s6067_s30 + $0x360] sm:$0xff] }
 0x466   : > { %2859 = vrot.lane.b32.xlu0 %v9443_v17, %s5969_s5 }
 0x467   : > { %v9462_v3 = vpop.permute.xlu1 %2663 }
 0x468   : > { %15840 = vst [vmem:[#allocation473_spill] sm:$0xff] %v9462_v3  ;;  %v9467_v54 = vpop.permute.xlu0 %2661  ;;  %v9481_v3 = vld [vmem:[%s6067_s30 + $0x340] sm:$0xff] }
 0x469   : > { %15841 = vst [vmem:[#allocation474_spill] sm:$0xff] %v9467_v54  ;;  %2865 = vrot.lane.b32.xlu1 %v9452_v24, %s5969_s5  ;;  %v9489_v54 = vrot.slane %v9476_v48, 7  ;;  %v9493_v63 = vrot.slane %v9481_v3, 7  ;;  %v9496_v24 = vld [vmem:[%s6067_s30 + $0x370] sm:$0xff] }
 0x46a   : > { %2863 = vrot.lane.b32.xlu0 %v9457_v8, %s5969_s5 }
 0x46b   : > { %v9478_v30 = vpop.permute.xlu1 %2667  ;;  %15844 = vst [vmem:[#allocation477_spill] sm:$0xff] %v9489_v54  ;;  %15845 = vst [vmem:[#allocation478_spill] sm:$0xff] %v9493_v63 }
 0x46c   : > { %15842 = vst [vmem:[#allocation475_spill] sm:$0xff] %v9478_v30  ;;  %v9483_v10 = vpop.permute.xlu0 %2665 }
 0x46d   : > { %15843 = vst [vmem:[#allocation476_spill] sm:$0xff] %v9483_v10  ;;  %2869 = vrot.lane.b32.xlu1 %v14809_v21, %s5969_s5  ;;  %v9508_v21 = vrot.slane %v9496_v24, 7  ;;  %v9516_v10 = vld [vmem:[%s6067_s30 + $0x390] sm:$0xff] }
 0x46e   : > { %2867 = vrot.lane.b32.xlu0 %v2811_v6, %s5969_s5  ;;  %v9513_v6 = vrot.slane %v9501_v52, 7 }
 0x46f   : > { %v9498_v30 = vpop.permute.xlu1 %2671  ;;  %15848 = vst [vmem:[#allocation481_spill] sm:$0xff] %v9508_v21 }
 0x470   : > { %15846 = vst [vmem:[#allocation479_spill] sm:$0xff] %v9498_v30  ;;  %v9503_v8 = vpop.permute.xlu0 %2669  ;;  %15849 = vst [vmem:[#allocation482_spill] sm:$0xff] %v9513_v6 }
 0x471   : > { %15847 = vst [vmem:[#allocation480_spill] sm:$0xff] %v9503_v8  ;;  %2873 = vrot.lane.b32.xlu1 %v9489_v54, %s5969_s5  ;;  %v9528_v54 = vrot.slane %v9516_v10, 7 }
 0x472   : > { %2871 = vrot.lane.b32.xlu0 %v9493_v63, %s5969_s5  ;;  %v9533_v63 = vrot.slane %v9521_v9, 7 }
 0x473   : > { %v9518_v30 = vpop.permute.xlu1 %2675  ;;  %15852 = vst [vmem:[#allocation485_spill] sm:$0xff] %v9528_v54 }
 0x474   : > { %15850 = vst [vmem:[#allocation483_spill] sm:$0xff] %v9518_v30  ;;  %v9523_v8 = vpop.permute.xlu0 %2673  ;;  %15853 = vst [vmem:[#allocation486_spill] sm:$0xff] %v9533_v63 }
 0x475   : > { %15851 = vst [vmem:[#allocation484_spill] sm:$0xff] %v9523_v8  ;;  %2877 = vrot.lane.b32.xlu1 %v9508_v21, %s5969_s5 }
 0x476   : > { %2875 = vrot.lane.b32.xlu0 %v9513_v6, %s5969_s5  ;;  %v5767_v6 = vld [vmem:[%s6067_s30 + $0x148] sm:$0x3] }
 0x477   : > { %v9535_v17 = vpop.permute.xlu1 %2679 }
 0x478   : > { %15854 = vst [vmem:[#allocation487_spill] sm:$0xff] %v9535_v17  ;;  %v9537_v30 = vpop.permute.xlu0 %2677 }
 0x479   : > { %15855 = vst [vmem:[#allocation488_spill] sm:$0xff] %v9537_v30  ;;  %2881 = vrot.lane.b32.xlu1 %v9528_v54, %s5969_s5  ;;  %v9556_v54 = vld [vmem:[%s6067_s30 + $0x168] sm:$0x3] }
 0x47a   : > { %2879 = vrot.lane.b32.xlu0 %v9533_v63, %s5969_s5  ;;  %15860 = vst [vmem:[#allocation493_spill] sm:$0xff] %v9556_v54  ;;  %v15934_v63 = vld [vmem:[#allocation26_spill] sm:$0xff] }
 0x47b   : > { %v9543_v8 = vpop.permute.xlu1 %2683 }
 0x47c   : > { %15856 = vst [vmem:[#allocation489_spill] sm:$0xff] %v9543_v8  ;;  %v9545_v21 = vpop.permute.xlu0 %2681  ;;  %v9561_v8 = vld [vmem:[%s6067_s30 + $0x158] sm:$0x3] }
 0x47d   : > { %15857 = vst [vmem:[#allocation490_spill] sm:$0xff] %v9545_v21  ;;  %2925 = vrot.lane.b32.xlu1 %v5767_v6, %s5970_s6  ;;  %15861 = vst [vmem:[#allocation494_spill] sm:$0xff] %v9561_v8 }
 0x47e   : > { %2923 = vrot.lane.b32.xlu0 %v9290_v59, %s5970_s6  ;;  %v9570_v59 = vld [vmem:[%s6067_s30 + $0x188] sm:$0x3] }
 0x47f   : > { %v9551_v17 = vpop.permute.xlu1 %2687  ;;  %15864 = vst [vmem:[#allocation497_spill] sm:$0xff] %v9570_v59 }
 0x480   : > { %15858 = vst [vmem:[#allocation491_spill] sm:$0xff] %v9551_v17  ;;  %v9553_v30 = vpop.permute.xlu0 %2685 }
 0x481   : > { %15859 = vst [vmem:[#allocation492_spill] sm:$0xff] %v9553_v30  ;;  %2929 = vrot.lane.b32.xlu1 %v9556_v54, %s5970_s6  ;;  %v9575_v30 = vld [vmem:[%s6067_s30 + $0x178] sm:$0x3] }
 0x482   : > { %2927 = vrot.lane.b32.xlu0 %v9561_v8, %s5970_s6  ;;  %15865 = vst [vmem:[#allocation498_spill] sm:$0xff] %v9575_v30  ;;  %v9584_v8 = vld [vmem:[%s6067_s30 + $0x1a8] sm:$0x3] }
 0x483   : > { %v9565_v6 = vpop.permute.xlu1 %2691  ;;  %15868 = vst [vmem:[#allocation501_spill] sm:$0xff] %v9584_v8 }
 0x484   : > { %15862 = vst [vmem:[#allocation495_spill] sm:$0xff] %v9565_v6  ;;  %v9567_v21 = vpop.permute.xlu0 %2689 }
 0x485   : > { %15863 = vst [vmem:[#allocation496_spill] sm:$0xff] %v9567_v21  ;;  %2933 = vrot.lane.b32.xlu1 %v9570_v59, %s5970_s6  ;;  %v9589_v21 = vld [vmem:[%s6067_s30 + $0x198] sm:$0x3] }
 0x486   : > { %2931 = vrot.lane.b32.xlu0 %v9575_v30, %s5970_s6  ;;  %15869 = vst [vmem:[#allocation502_spill] sm:$0xff] %v9589_v21  ;;  %v15931_v30 = vld [vmem:[#allocation30_spill] sm:$0xff] }
 0x487   : > { %v9579_v17 = vpop.permute.xlu1 %2695 }
 0x488   : > { %15866 = vst [vmem:[#allocation499_spill] sm:$0xff] %v9579_v17  ;;  %v9581_v54 = vpop.permute.xlu0 %2693 }
 0x489   : > { %15867 = vst [vmem:[#allocation500_spill] sm:$0xff] %v9581_v54  ;;  %2937 = vrot.lane.b32.xlu1 %v9584_v8, %s5970_s6  ;;  %v9600_v54 = vld [vmem:[%s6067_s30 + $0x1b8] sm:$0x3] }
 0x48a   : > { %2935 = vrot.lane.b32.xlu0 %v9589_v21, %s5970_s6  ;;  %15872 = vst [vmem:[#allocation505_spill] sm:$0xff] %v9600_v54  ;;  %v9609_v21 = vld [vmem:[%s6067_s30 + $0x1f8] sm:$0x3] }
 0x48b   : > { %v9593_v6 = vpop.permute.xlu1 %2699  ;;  %15875 = vst [vmem:[#allocation508_spill] sm:$0xff] %v9609_v21 }
 0x48c   : > { %15870 = vst [vmem:[#allocation503_spill] sm:$0xff] %v9593_v6  ;;  %v9595_v59 = vpop.permute.xlu0 %2697 }
 0x48d   : > { %15871 = vst [vmem:[#allocation504_spill] sm:$0xff] %v9595_v59  ;;  %2941 = vrot.lane.b32.xlu1 %v9348_v27, %s5970_s6  ;;  %v5776_v59 = vld [vmem:[%s6067_s30 + $0x1e8] sm:$0x3] }
 0x48e   : > { %2939 = vrot.lane.b32.xlu0 %v9600_v54, %s5970_s6  ;;  %v9620_v54 = vld [vmem:[%s6067_s30 + $0x218] sm:$0x3] }
 0x48f   : > { %v9604_v17 = vpop.permute.xlu1 %2703  ;;  %15878 = vst [vmem:[#allocation511_spill] sm:$0xff] %v9620_v54 }
 0x490   : > { %15873 = vst [vmem:[#allocation506_spill] sm:$0xff] %v9604_v17  ;;  %v9606_v8 = vpop.permute.xlu0 %2701 }
 0x491   : > { %15874 = vst [vmem:[#allocation507_spill] sm:$0xff] %v9606_v8  ;;  %2945 = vrot.lane.b32.xlu1 %v9609_v21, %s5970_s6  ;;  %v9625_v8 = vld [vmem:[%s6067_s30 + $0x208] sm:$0x3] }
 0x492   : > { %2943 = vrot.lane.b32.xlu0 %v5776_v59, %s5970_s6  ;;  %15879 = vst [vmem:[#allocation512_spill] sm:$0xff] %v9625_v8  ;;  %v9634_v59 = vld [vmem:[%s6067_s30 + $0x238] sm:$0x3] }
 0x493   : > { %v9615_v27 = vpop.permute.xlu1 %2707  ;;  %15882 = vst [vmem:[#allocation515_spill] sm:$0xff] %v9634_v59 }
 0x494   : > { %15876 = vst [vmem:[#allocation509_spill] sm:$0xff] %v9615_v27  ;;  %v9617_v6 = vpop.permute.xlu0 %2705 }
 0x495   : > { %15877 = vst [vmem:[#allocation510_spill] sm:$0xff] %v9617_v6  ;;  %2949 = vrot.lane.b32.xlu1 %v9620_v54, %s5970_s6  ;;  %v9639_v6 = vld [vmem:[%s6067_s30 + $0x228] sm:$0x3] }
 0x496   : > { %2947 = vrot.lane.b32.xlu0 %v9625_v8, %s5970_s6  ;;  %15883 = vst [vmem:[#allocation516_spill] sm:$0xff] %v9639_v6  ;;  %v9648_v8 = vld [vmem:[%s6067_s30 + $0x258] sm:$0x3] }
 0x497   : > { %v9629_v17 = vpop.permute.xlu1 %2711  ;;  %15886 = vst [vmem:[#allocation519_spill] sm:$0xff] %v9648_v8 }
 0x498   : > { %15880 = vst [vmem:[#allocation513_spill] sm:$0xff] %v9629_v17  ;;  %v9631_v21 = vpop.permute.xlu0 %2709 }
 0x499   : > { %15881 = vst [vmem:[#allocation514_spill] sm:$0xff] %v9631_v21  ;;  %2953 = vrot.lane.b32.xlu1 %v9634_v59, %s5970_s6  ;;  %v9653_v21 = vld [vmem:[%s6067_s30 + $0x248] sm:$0x3] }
 0x49a   : > { %2951 = vrot.lane.b32.xlu0 %v9639_v6, %s5970_s6  ;;  %15887 = vst [vmem:[#allocation520_spill] sm:$0xff] %v9653_v21  ;;  %v5783_v6 = vld [vmem:[%s6067_s30 + $0x288] sm:$0x3] }
 0x49b   : > { %v9643_v27 = vpop.permute.xlu1 %2715 }
 0x49c   : > { %15884 = vst [vmem:[#allocation517_spill] sm:$0xff] %v9643_v27  ;;  %v9645_v54 = vpop.permute.xlu0 %2713 }
 0x49d   : > { %15885 = vst [vmem:[#allocation518_spill] sm:$0xff] %v9645_v54  ;;  %2957 = vrot.lane.b32.xlu1 %v9648_v8, %s5970_s6  ;;  %v9670_v8 = vld [vmem:[%s6067_s30 + $0x298] sm:$0x3] }
 0x49e   : > { %2955 = vrot.lane.b32.xlu0 %v9653_v21, %s5970_s6  ;;  %15892 = vst [vmem:[#allocation525_spill] sm:$0xff] %v9670_v8 }
 0x49f   : > { %v9657_v17 = vpop.permute.xlu1 %2719 }
 0x4a0   : > { %15888 = vst [vmem:[#allocation521_spill] sm:$0xff] %v9657_v17  ;;  %v9659_v59 = vpop.permute.xlu0 %2717 }
 0x4a1   : > { %15889 = vst [vmem:[#allocation522_spill] sm:$0xff] %v9659_v59  ;;  %2961 = vrot.lane.b32.xlu1 %v5783_v6, %s5970_s6  ;;  %v9681_v6 = vld [vmem:[%s6067_s30 + $0x2a8] sm:$0x3] }
 0x4a2   : > { %2959 = vrot.lane.b32.xlu0 %v9414_v55, %s5970_s6  ;;  %15895 = vst [vmem:[#allocation528_spill] sm:$0xff] %v9681_v6 }
 0x4a3   : > { %v9665_v54 = vpop.permute.xlu1 %2723 }
 0x4a4   : > { %15890 = vst [vmem:[#allocation523_spill] sm:$0xff] %v9665_v54  ;;  %v9667_v27 = vpop.permute.xlu0 %2721  ;;  %v9692_v54 = vld [vmem:[%s6067_s30 + $0x2b8] sm:$0x3] }
 0x4a5   : > { %15891 = vst [vmem:[#allocation524_spill] sm:$0xff] %v9667_v27  ;;  %2965 = vrot.lane.b32.xlu1 %v9670_v8, %s5970_s6  ;;  %15898 = vst [vmem:[#allocation531_spill] sm:$0xff] %v9692_v54  ;;  %v15929_v8 = vld [vmem:[#allocation24_spill] sm:$0xff] }
 0x4a6   : > { %2963 = vrot.lane.b32.xlu0 %v9408_v31, %s5970_s6  ;;  %v15930_v21 = vrot.slane %v15929_v8, 1 }
 0x4a7   : > { %v9676_v59 = vpop.permute.xlu1 %2727 }
 0x4a8   : > { %15893 = vst [vmem:[#allocation526_spill] sm:$0xff] %v9676_v59  ;;  %v9678_v17 = vpop.permute.xlu0 %2725 }
 0x4a9   : > { %15894 = vst [vmem:[#allocation527_spill] sm:$0xff] %v9678_v17  ;;  %2969 = vrot.lane.b32.xlu1 %v9681_v6, %s5970_s6  ;;  %v9703_v6 = vld [vmem:[%s6067_s30 + $0x2c8] sm:$0x3] }
 0x4aa   : > { %2967 = vrot.lane.b32.xlu0 %v9022_v43, %s5970_s6  ;;  %15901 = vst [vmem:[#allocation534_spill] sm:$0xff] %v9703_v6 }
 0x4ab   : > { %v9687_v55 = vpop.permute.xlu1 %2731 }
 0x4ac   : > { %15896 = vst [vmem:[#allocation529_spill] sm:$0xff] %v9687_v55  ;;  %v9689_v27 = vpop.permute.xlu0 %2729  ;;  %v9714_v55 = vld [vmem:[%s6067_s30 + $0x2d8] sm:$0x3] }
 0x4ad   : > { %15897 = vst [vmem:[#allocation530_spill] sm:$0xff] %v9689_v27  ;;  %2973 = vrot.lane.b32.xlu1 %v9692_v54, %s5970_s6  ;;  %15904 = vst [vmem:[#allocation537_spill] sm:$0xff] %v9714_v55 }
 0x4ae   : > { %2971 = vrot.lane.b32.xlu0 %v9017_v49, %s5970_s6 }
 0x4af   : > { %v9698_v17 = vpop.permute.xlu1 %2821 }
 0x4b0   : > { %15899 = vst [vmem:[#allocation532_spill] sm:$0xff] %v9698_v17  ;;  %v9700_v59 = vpop.permute.xlu0 %2819  ;;  %v9725_v17 = vld [vmem:[%s6067_s30 + $0x2e8] sm:$0x3] }
 0x4b1   : > { %15900 = vst [vmem:[#allocation533_spill] sm:$0xff] %v9700_v59  ;;  %2977 = vrot.lane.b32.xlu1 %v9703_v6, %s5970_s6  ;;  %15907 = vst [vmem:[#allocation540_spill] sm:$0xff] %v9725_v17 }
 0x4b2   : > { %2975 = vrot.lane.b32.xlu0 %v9036_v56, %s5970_s6 }
 0x4b3   : > { %v9709_v43 = vpop.permute.xlu1 %2825 }
 0x4b4   : > { %15902 = vst [vmem:[#allocation535_spill] sm:$0xff] %v9709_v43  ;;  %v9711_v27 = vpop.permute.xlu0 %2823  ;;  %v9736_v43 = vld [vmem:[%s6067_s30 + $0x2f8] sm:$0x3] }
 0x4b5   : > { %15903 = vst [vmem:[#allocation536_spill] sm:$0xff] %v9711_v27  ;;  %2981 = vrot.lane.b32.xlu1 %v9714_v55, %s5970_s6  ;;  %15910 = vst [vmem:[#allocation543_spill] sm:$0xff] %v9736_v43 }
 0x4b6   : > { %2979 = vrot.lane.b32.xlu0 %v9031_v25, %s5970_s6  ;;  %v9743_v25 = vld [vmem:[%s6067_s30 + $0x328] sm:$0x3] }
 0x4b7   : > { %v9720_v49 = vpop.permute.xlu1 %2829 }
 0x4b8   : > { %15905 = vst [vmem:[#allocation538_spill] sm:$0xff] %v9720_v49  ;;  %v9722_v59 = vpop.permute.xlu0 %2827 }
 0x4b9   : > { %15906 = vst [vmem:[#allocation539_spill] sm:$0xff] %v9722_v59  ;;  %2985 = vrot.lane.b32.xlu1 %v9725_v17, %s5970_s6 }
 0x4ba   : > { %2983 = vrot.lane.b32.xlu0 %v9050_v58, %s5970_s6  ;;  %v9754_v58 = vld [vmem:[%s6067_s30 + $0x338] sm:$0x3] }
 0x4bb   : > { %v9731_v56 = vpop.permute.xlu1 %2833 }
 0x4bc   : > { %15908 = vst [vmem:[#allocation541_spill] sm:$0xff] %v9731_v56  ;;  %v9733_v27 = vpop.permute.xlu0 %2831 }
 0x4bd   : > { %15909 = vst [vmem:[#allocation542_spill] sm:$0xff] %v9733_v27  ;;  %2989 = vrot.lane.b32.xlu1 %v9736_v43, %s5970_s6 }
 0x4be   : > { %2987 = vrot.lane.b32.xlu0 %v9045_v5, %s5970_s6  ;;  %v9765_v5 = vld [vmem:[%s6067_s30 + $0x348] sm:$0x3] }
 0x4bf   : > { %v9745_v59 = vpop.permute.xlu1 %2837 }
 0x4c0   : > { %15911 = vst [vmem:[#allocation544_spill] sm:$0xff] %v9745_v59  ;;  %v9747_v49 = vpop.permute.xlu0 %2835 }
 0x4c1   : > { %15912 = vst [vmem:[#allocation545_spill] sm:$0xff] %v9747_v49  ;;  %2993 = vrot.lane.b32.xlu1 %v9743_v25, %s5970_s6 }
 0x4c2   : > { %2991 = vrot.lane.b32.xlu0 %v9465_v45, %s5970_s6 }
 0x4c3   : > { %v9756_v27 = vpop.permute.xlu1 %2841 }
 0x4c4   : > { %15913 = vst [vmem:[#allocation546_spill] sm:$0xff] %v9756_v27  ;;  %v9758_v56 = vpop.permute.xlu0 %2839 }
 0x4c5   : > { %15914 = vst [vmem:[#allocation547_spill] sm:$0xff] %v9758_v56  ;;  %2997 = vrot.lane.b32.xlu1 %v9754_v58, %s5970_s6  ;;  %v9776_v56 = vld [vmem:[%s6067_s30 + $0x358] sm:$0x3] }
 0x4c6   : > { %2995 = vrot.lane.b32.xlu0 %v9460_v22, %s5970_s6 }
 0x4c7   : > { %v9767_v49 = vpop.permute.xlu1 %2845 }
 0x4c8   : > { %15915 = vst [vmem:[#allocation548_spill] sm:$0xff] %v9767_v49  ;;  %v9769_v59 = vpop.permute.xlu0 %2843  ;;  %v9787_v49 = vld [vmem:[%s6067_s30 + $0x368] sm:$0x3] }
 0x4c9   : > { %15916 = vst [vmem:[#allocation549_spill] sm:$0xff] %v9769_v59  ;;  %3001 = vrot.lane.b32.xlu1 %v9765_v5, %s5970_s6 }
 0x4ca   : > { %2999 = vrot.lane.b32.xlu0 %v9481_v3, %s5970_s6 }
 0x4cb   : > { %v9778_v27 = vpop.permute.xlu1 %2849 }
 0x4cc   : > { %15917 = vst [vmem:[#allocation550_spill] sm:$0xff] %v9778_v27  ;;  %v9780_v43 = vpop.permute.xlu0 %2847  ;;  %v9798_v27 = vld [vmem:[%s6067_s30 + $0x378] sm:$0x3] }
 0x4cd   : > { %15918 = vst [vmem:[#allocation551_spill] sm:$0xff] %v9780_v43  ;;  %3005 = vrot.lane.b32.xlu1 %v9776_v56, %s5970_s6 }
 0x4ce   : > { %3003 = vrot.lane.b32.xlu0 %v9476_v48, %s5970_s6 }
 0x4cf   : > { %v9789_v59 = vpop.permute.xlu1 %2853 }
 0x4d0   : > { %15919 = vst [vmem:[#allocation552_spill] sm:$0xff] %v9789_v59  ;;  %v9791_v17 = vpop.permute.xlu0 %2851  ;;  %v9809_v59 = vld [vmem:[%s6067_s30 + $0x388] sm:$0x3] }
 0x4d1   : > { %15920 = vst [vmem:[#allocation553_spill] sm:$0xff] %v9791_v17  ;;  %3009 = vrot.lane.b32.xlu1 %v9787_v49, %s5970_s6 }
 0x4d2   : > { %3007 = vrot.lane.b32.xlu0 %v9501_v52, %s5970_s6 }
 0x4d3   : > { %v9800_v43 = vpop.permute.xlu1 %2857 }
 0x4d4   : > { %15921 = vst [vmem:[#allocation554_spill] sm:$0xff] %v9800_v43  ;;  %v9802_v55 = vpop.permute.xlu0 %2855  ;;  %v9820_v43 = vld [vmem:[%s6067_s30 + $0x398] sm:$0x3] }
 0x4d5   : > { %15922 = vst [vmem:[#allocation555_spill] sm:$0xff] %v9802_v55  ;;  %3013 = vrot.lane.b32.xlu1 %v9798_v27, %s5970_s6 }
 0x4d6   : > { %3011 = vrot.lane.b32.xlu0 %v9496_v24, %s5970_s6 }
 0x4d7   : > { %v9811_v17 = vpop.permute.xlu1 %2861 }
 0x4d8   : > { %15923 = vst [vmem:[#allocation556_spill] sm:$0xff] %v9811_v17  ;;  %v9813_v6 = vpop.permute.xlu0 %2859 }
 0x4d9   : > { %15924 = vst [vmem:[#allocation557_spill] sm:$0xff] %v9813_v6  ;;  %3017 = vrot.lane.b32.xlu1 %v9809_v59, %s5970_s6 }
 0x4da   : > { %3015 = vrot.lane.b32.xlu0 %v9521_v9, %s5970_s6 }
 0x4db   : > { %v9822_v55 = vpop.permute.xlu1 %2865 }
 0x4dc   : > { %15925 = vst [vmem:[#allocation558_spill] sm:$0xff] %v9822_v55  ;;  %v9824_v54 = vpop.permute.xlu0 %2863 }
 0x4dd   : > { %15926 = vst [vmem:[#allocation559_spill] sm:$0xff] %v9824_v54  ;;  %3021 = vrot.lane.b32.xlu1 %v9820_v43, %s5970_s6 }
 0x4de   : > { %3019 = vrot.lane.b32.xlu0 %v9516_v10, %s5970_s6 }
 0x4df   : > { %v9830_v17 = vpop.permute.xlu1 %2869 }
 0x4e0   : > { %15927 = vst [vmem:[#allocation560_spill] sm:$0xff] %v9830_v17  ;;  %v9832_v6 = vpop.permute.xlu0 %2867 }
 0x4e1   : > { %15928 = vst [vmem:[#allocation561_spill] sm:$0xff] %v9832_v6  ;;  %3099 = vrot.lane.b32.xlu1 %v15930_v21, %s5971_s7 }
 0x4e2   : > { %3097 = vrot.lane.b32.xlu0 %v15931_v30, %s5971_s7 }
 0x4e3   : > { %v9839_v55 = vpop.permute.xlu1 %2873 }
 0x4e4   : > { %15932 = vst [vmem:[#allocation24_spill] sm:$0xff] %v9839_v55  ;;  %v9841_v54 = vpop.permute.xlu0 %2871  ;;  %v15945_v55 = vld [vmem:[#allocation43_spill] sm:$0xff] }
 0x4e5   : > { %15933 = vst [vmem:[#allocation30_spill] sm:$0xff] %v9841_v54  ;;  %3103 = vrot.lane.b32.xlu1 %v15743_v7, %s5971_s7 }
 0x4e6   : > { %3101 = vrot.lane.b32.xlu0 %v15934_v63, %s5971_s7 }
 0x4e7   : > { %v9847_v17 = vpop.permute.xlu1 %2877 }
 0x4e8   : > { %15935 = vst [vmem:[#allocation26_spill] sm:$0xff] %v9847_v17  ;;  %v9849_v6 = vpop.permute.xlu0 %2875 }
 0x4e9   : > { %15936 = vst [vmem:[#allocation562_spill] sm:$0xff] %v9849_v6  ;;  %3107 = vrot.lane.b32.xlu1 %v15747_v62, %s5971_s7  ;;  %v15941_v6 = vld [vmem:[#allocation53_spill] sm:$0xff] }
 0x4ea   : > { %3105 = vrot.lane.b32.xlu0 %v15742_v15, %s5971_s7 }
 0x4eb   : > { %v9855_v30 = vpop.permute.xlu1 %2881 }
 0x4ec   : > { %15937 = vst [vmem:[#allocation563_spill] sm:$0xff] %v9855_v30  ;;  %v9857_v8 = vpop.permute.xlu0 %2879 }
 0x4ed   : > { %15938 = vst [vmem:[#allocation564_spill] sm:$0xff] %v9857_v8  ;;  %3111 = vrot.lane.b32.xlu1 %v15751_v42, %s5971_s7  ;;  %v15944_v8 = vld [vmem:[#allocation45_spill] sm:$0xff]  ;;  %v15946_v42 = vrot.slane %v15945_v55, 1 }
 0x4ee   : > { %3109 = vrot.lane.b32.xlu0 %v15746_v0, %s5971_s7 }
 0x4ef   : > { %v9863_v21 = vpop.permute.xlu1 %2925 }
 0x4f0   : > { %15939 = vst [vmem:[#allocation565_spill] sm:$0xff] %v9863_v21  ;;  %v9865_v17 = vpop.permute.xlu0 %2923 }
 0x4f1   : > { %15940 = vst [vmem:[#allocation566_spill] sm:$0xff] %v9865_v17  ;;  %3115 = vrot.lane.b32.xlu1 %v15941_v6, %s5971_s7 }
 0x4f2   : > { %3113 = vrot.lane.b32.xlu0 %v15750_v2, %s5971_s7 }
 0x4f3   : > { %v9871_v54 = vpop.permute.xlu1 %2929 }
 0x4f4   : > { %15942 = vst [vmem:[#allocation53_spill] sm:$0xff] %v9871_v54  ;;  %v9873_v30 = vpop.permute.xlu0 %2927  ;;  %v15957_v54 = vld [vmem:[#allocation340_spill] sm:$0xff] }
 0x4f5   : > { %15943 = vst [vmem:[#allocation567_spill] sm:$0xff] %v9873_v30  ;;  %3119 = vrot.lane.b32.xlu1 %v15944_v8, %s5971_s7 }
 0x4f6   : > { %3117 = vrot.lane.b32.xlu0 %v15946_v42, %s5971_s7 }
 0x4f7   : > { %v9880_v21 = vpop.permute.xlu1 %2933 }
 0x4f8   : > { %15947 = vst [vmem:[#allocation45_spill] sm:$0xff] %v9880_v21  ;;  %v9882_v17 = vpop.permute.xlu0 %2931 }
 0x4f9   : > { %15948 = vst [vmem:[#allocation43_spill] sm:$0xff] %v9882_v17  ;;  %3123 = vrot.lane.b32.xlu1 %v15761_v35, %s5971_s7 }
 0x4fa   : > { %3121 = vrot.lane.b32.xlu0 %v15762_v51, %s5971_s7 }
 0x4fb   : > { %v9888_v6 = vpop.permute.xlu1 %2937 }
 0x4fc   : > { %15949 = vst [vmem:[#allocation568_spill] sm:$0xff] %v9888_v6  ;;  %v9890_v30 = vpop.permute.xlu0 %2935 }
 0x4fd   : > { %15950 = vst [vmem:[#allocation569_spill] sm:$0xff] %v9890_v30  ;;  %3127 = vrot.lane.b32.xlu1 %v15763_v12, %s5971_s7  ;;  %v15955_v30 = vld [vmem:[#allocation333_spill] sm:$0xff] }
 0x4fe   : > { %3125 = vrot.lane.b32.xlu0 %v15764_v57, %s5971_s7  ;;  %v15956_v21 = vrot.slane %v15955_v30, 1  ;;  %v15961_v12 = vld [vmem:[#allocation337_spill] sm:$0xff] }
 0x4ff   : > { %v9896_v42 = vpop.permute.xlu1 %2941 }
 0x500   : > { %15951 = vst [vmem:[#allocation570_spill] sm:$0xff] %v9896_v42  ;;  %v9898_v55 = vpop.permute.xlu0 %2939 }
 0x501   : > { %15952 = vst [vmem:[#allocation571_spill] sm:$0xff] %v9898_v55  ;;  %3131 = vrot.lane.b32.xlu1 %v15765_v40, %s5971_s7  ;;  %v15960_v40 = vld [vmem:[#allocation334_spill] sm:$0xff] }
 0x502   : > { %3129 = vrot.lane.b32.xlu0 %v15766_v46, %s5971_s7 }
 0x503   : > { %v9904_v17 = vpop.permute.xlu1 %2945 }
 0x504   : > { %15953 = vst [vmem:[#allocation572_spill] sm:$0xff] %v9904_v17  ;;  %v9906_v6 = vpop.permute.xlu0 %2943 }
 0x505   : > { %15954 = vst [vmem:[#allocation573_spill] sm:$0xff] %v9906_v6  ;;  %3135 = vrot.lane.b32.xlu1 %v15956_v21, %s5971_s7 }
 0x506   : > { %3133 = vrot.lane.b32.xlu0 %v15957_v54, %s5971_s7 }
 0x507   : > { %v9913_v42 = vpop.permute.xlu1 %2949 }
 0x508   : > { %15958 = vst [vmem:[#allocation333_spill] sm:$0xff] %v9913_v42  ;;  %v9915_v55 = vpop.permute.xlu0 %2947 }
 0x509   : > { %15959 = vst [vmem:[#allocation340_spill] sm:$0xff] %v9915_v55  ;;  %3139 = vrot.lane.b32.xlu1 %v15960_v40, %s5971_s7 }
 0x50a   : > { %3137 = vrot.lane.b32.xlu0 %v15961_v12, %s5971_s7 }
 0x50b   : > { %v9921_v17 = vpop.permute.xlu1 %2953 }
 0x50c   : > { %15962 = vst [vmem:[#allocation334_spill] sm:$0xff] %v9921_v17  ;;  %v9923_v6 = vpop.permute.xlu0 %2951 }
 0x50d   : > { %15963 = vst [vmem:[#allocation337_spill] sm:$0xff] %v9923_v6  ;;  %3143 = vrot.lane.b32.xlu1 %v15776_v47, %s5971_s7 }
 0x50e   : > { %3141 = vrot.lane.b32.xlu0 %v15578_v53, %s5971_s7 }
 0x50f   : > { %v9929_v54 = vpop.permute.xlu1 %2957 }
 0x510   : > { %15964 = vst [vmem:[#allocation574_spill] sm:$0xff] %v9929_v54  ;;  %v9931_v30 = vpop.permute.xlu0 %2955 }
 0x511   : > { %15965 = vst [vmem:[#allocation575_spill] sm:$0xff] %v9931_v30  ;;  %3147 = vrot.lane.b32.xlu1 %v15779_v18, %s5971_s7 }
 0x512   : > { %3145 = vrot.lane.b32.xlu0 %v15780_v37, %s5971_s7 }
 0x513   : > { %v9937_v21 = vpop.permute.xlu1 %2961 }
 0x514   : > { %15966 = vst [vmem:[#allocation576_spill] sm:$0xff] %v9937_v21  ;;  %v9939_v17 = vpop.permute.xlu0 %2959 }
 0x515   : > { %15967 = vst [vmem:[#allocation577_spill] sm:$0xff] %v9939_v17  ;;  %3151 = vrot.lane.b32.xlu1 %v15783_v39, %s5971_s7 }
 0x516   : > { %3149 = vrot.lane.b32.xlu0 %v15784_v4, %s5971_s7 }
 0x517   : > { %v9945_v6 = vpop.permute.xlu1 %2965 }
 0x518   : > { %15968 = vst [vmem:[#allocation578_spill] sm:$0xff] %v9945_v6  ;;  %v9947_v54 = vpop.permute.xlu0 %2963  ;;  %v3074_v6 = vrot.slane %v9743_v25, 1  ;;  %v3076_v25 = vrot.slane %v9460_v22, 1 }
 0x519   : > { %15969 = vst [vmem:[#allocation579_spill] sm:$0xff] %v9947_v54  ;;  %3155 = vrot.lane.b32.xlu1 %v15787_v50, %s5971_s7  ;;  %v3073_v54 = vrot.slane %v9465_v45, 1 }
 0x51a   : > { %3153 = vrot.lane.b32.xlu0 %v15788_v23, %s5971_s7 }
 0x51b   : > { %v9953_v30 = vpop.permute.xlu1 %2969  ;;  %v3075_v42 = vsel %vm371_vm0, %v3073_v54, %v3074_v6 }
 0x51c   : > { %15970 = vst [vmem:[#allocation580_spill] sm:$0xff] %v9953_v30  ;;  %v9955_v21 = vpop.permute.xlu0 %2967 }
 0x51d   : > { %15971 = vst [vmem:[#allocation581_spill] sm:$0xff] %v9955_v21  ;;  %3159 = vrot.lane.b32.xlu1 %v15791_v36, %s5971_s7  ;;  %v9972_v21 = vrot.slane %v9754_v58, 1 }
 0x51e   : > { %3157 = vrot.lane.b32.xlu0 %v15792_v20, %s5971_s7 }
 0x51f   : > { %v9962_v17 = vpop.permute.xlu1 %2973  ;;  %15974 = vst [vmem:[#allocation584_spill] sm:$0xff] %v9972_v21 }
 0x520   : > { %15972 = vst [vmem:[#allocation582_spill] sm:$0xff] %v9962_v17  ;;  %v9965_v55 = vpop.permute.xlu0 %2971 }
 0x521   : > { %15973 = vst [vmem:[#allocation583_spill] sm:$0xff] %v9965_v55  ;;  %3163 = vrot.lane.b32.xlu1 %v15795_v19, %s5971_s7  ;;  %v9986_v55 = vsel %vm371_vm0, %v3076_v25, %v9972_v21  ;;  %v10005_v25 = vrot.slane %v9776_v56, 1 }
 0x522   : > { %3161 = vrot.lane.b32.xlu0 %v15796_v61, %s5971_s7  ;;  %15978 = vst [vmem:[#allocation588_spill] sm:$0xff] %v9986_v55  ;;  %v9989_v61 = vrot.slane %v9765_v5, 1 }
 0x523   : > { %v9974_v30 = vpop.permute.xlu1 %2977  ;;  %15983 = vst [vmem:[#allocation593_spill] sm:$0xff] %v10005_v25 }
 0x524   : > { %15975 = vst [vmem:[#allocation585_spill] sm:$0xff] %v9974_v30  ;;  %v9978_v17 = vpop.permute.xlu0 %2975  ;;  %15979 = vst [vmem:[#allocation589_spill] sm:$0xff] %v9989_v61  ;;  %v3079_v30 = vrot.slane %v9481_v3, 1 }
 0x525   : > { %15976 = vst [vmem:[#allocation586_spill] sm:$0xff] %v9978_v17  ;;  %3167 = vrot.lane.b32.xlu1 %v3074_v6, %s5971_s7 }
 0x526   : > { %3165 = vrot.lane.b32.xlu0 %v3075_v42, %s5971_s7  ;;  %v10002_v42 = vsel %vm371_vm0, %v3079_v30, %v9989_v61  ;;  %v10021_v30 = vrot.slane %v9787_v49, 1 }
 0x527   : > { %v9982_v45 = vpop.permute.xlu1 %2981  ;;  %15982 = vst [vmem:[#allocation592_spill] sm:$0xff] %v10002_v42 }
 0x528   : > { %15977 = vst [vmem:[#allocation587_spill] sm:$0xff] %v9982_v45  ;;  %v9992_v54 = vpop.permute.xlu0 %2979  ;;  %v3082_v45 = vrot.slane %v9476_v48, 1  ;;  %15987 = vst [vmem:[#allocation597_spill] sm:$0xff] %v10021_v30 }
 0x529   : > { %15980 = vst [vmem:[#allocation590_spill] sm:$0xff] %v9992_v54  ;;  %3171 = vrot.lane.b32.xlu1 %v9972_v21, %s5971_s7 }
 0x52a   : > { %3169 = vrot.lane.b32.xlu0 %v9986_v55, %s5971_s7  ;;  %v3085_v55 = vrot.slane %v9501_v52, 1 }
 0x52b   : > { %v9998_v6 = vpop.permute.xlu1 %2985 }
 0x52c   : > { %15981 = vst [vmem:[#allocation591_spill] sm:$0xff] %v9998_v6  ;;  %v10008_v17 = vpop.permute.xlu0 %2983  ;;  %v10018_v6 = vsel %vm371_vm0, %v3082_v45, %v10005_v25  ;;  %v10037_v45 = vrot.slane %v9798_v27, 1 }
 0x52d   : > { %15984 = vst [vmem:[#allocation594_spill] sm:$0xff] %v10008_v17  ;;  %3175 = vrot.lane.b32.xlu1 %v9989_v61, %s5971_s7  ;;  %15986 = vst [vmem:[#allocation596_spill] sm:$0xff] %v10018_v6 }
 0x52e   : > { %3173 = vrot.lane.b32.xlu0 %v10002_v42, %s5971_s7  ;;  %15991 = vst [vmem:[#allocation601_spill] sm:$0xff] %v10037_v45  ;;  %v3088_v42 = vrot.slane %v9496_v24, 1 }
 0x52f   : > { %v10014_v54 = vpop.permute.xlu1 %2989 }
 0x530   : > { %15985 = vst [vmem:[#allocation595_spill] sm:$0xff] %v10014_v54  ;;  %v10024_v21 = vpop.permute.xlu0 %2987  ;;  %v10034_v54 = vsel %vm371_vm0, %v3085_v55, %v10021_v30  ;;  %v10053_v55 = vrot.slane %v9809_v59, 1 }
 0x531   : > { %15988 = vst [vmem:[#allocation598_spill] sm:$0xff] %v10024_v21  ;;  %3179 = vrot.lane.b32.xlu1 %v10005_v25, %s5971_s7  ;;  %15990 = vst [vmem:[#allocation600_spill] sm:$0xff] %v10034_v54  ;;  %v3091_v25 = vrot.slane %v9521_v9, 1 }
 0x532   : > { %3177 = vrot.lane.b32.xlu0 %v10018_v6, %s5971_s7  ;;  %15995 = vst [vmem:[#allocation605_spill] sm:$0xff] %v10053_v55 }
 0x533   : > { %v10030_v17 = vpop.permute.xlu1 %2993 }
 0x534   : > { %15989 = vst [vmem:[#allocation599_spill] sm:$0xff] %v10030_v17  ;;  %v10040_v61 = vpop.permute.xlu0 %2991  ;;  %v10050_v17 = vsel %vm371_vm0, %v3088_v42, %v10037_v45  ;;  %v10069_v42 = vrot.slane %v9820_v43, 1 }
 0x535   : > { %15992 = vst [vmem:[#allocation602_spill] sm:$0xff] %v10040_v61  ;;  %3183 = vrot.lane.b32.xlu1 %v10021_v30, %s5971_s7  ;;  %15994 = vst [vmem:[#allocation604_spill] sm:$0xff] %v10050_v17 }
 0x536   : > { %3181 = vrot.lane.b32.xlu0 %v10034_v54, %s5971_s7  ;;  %15999 = vst [vmem:[#allocation609_spill] sm:$0xff] %v10069_v42  ;;  %v3094_v54 = vrot.slane %v9516_v10, 1 }
 0x537   : > { %v10046_v21 = vpop.permute.xlu1 %2997 }
 0x538   : > { %15993 = vst [vmem:[#allocation603_spill] sm:$0xff] %v10046_v21  ;;  %v10056_v6 = vpop.permute.xlu0 %2995  ;;  %v10066_v21 = vsel %vm371_vm0, %v3091_v25, %v10053_v55  ;;  %v10082_v25 = vsel %vm371_vm0, %v3094_v54, %v10069_v42 }
 0x539   : > { %15996 = vst [vmem:[#allocation606_spill] sm:$0xff] %v10056_v6  ;;  %3187 = vrot.lane.b32.xlu1 %v10037_v45, %s5971_s7  ;;  %15998 = vst [vmem:[#allocation608_spill] sm:$0xff] %v10066_v21 }
 0x53a   : > { %3185 = vrot.lane.b32.xlu0 %v10050_v17, %s5971_s7  ;;  %16002 = vst [vmem:[#allocation612_spill] sm:$0xff] %v10082_v25 }
 0x53b   : > { %v10062_v61 = vpop.permute.xlu1 %3001 }
 0x53c   : > { %15997 = vst [vmem:[#allocation607_spill] sm:$0xff] %v10062_v61  ;;  %v10072_v30 = vpop.permute.xlu0 %2999 }
 0x53d   : > { %16000 = vst [vmem:[#allocation610_spill] sm:$0xff] %v10072_v30  ;;  %3191 = vrot.lane.b32.xlu1 %v10053_v55, %s5971_s7 }
 0x53e   : > { %3189 = vrot.lane.b32.xlu0 %v10066_v21, %s5971_s7  ;;  %v10190_v21 = vld [vmem:[%s6067_s30 + $0x300] sm:$0xff] }
 0x53f   : > { %v10078_v6 = vpop.permute.xlu1 %3005 }
 0x540   : > { %16001 = vst [vmem:[#allocation611_spill] sm:$0xff] %v10078_v6  ;;  %v10084_v61 = vpop.permute.xlu0 %3003  ;;  %v16006_v6 = vrot.slane %v9284_v60, 7 }
 0x541   : > { %16003 = vst [vmem:[#allocation613_spill] sm:$0xff] %v10084_v61  ;;  %3195 = vrot.lane.b32.xlu1 %v10069_v42, %s5971_s7  ;;  %v10114_v42 = vld [vmem:[%s6067_s30 + $0x1c0] sm:$0xff] }
 0x542   : > { %3193 = vrot.lane.b32.xlu0 %v10082_v25, %s5971_s7  ;;  %16011 = vst [vmem:[#allocation620_spill] sm:$0xff] %v10114_v42  ;;  %v16016_v25 = vrot.slane %v9342_v33, 7 }
 0x543   : > { %v10090_v30 = vpop.permute.xlu1 %3009 }
 0x544   : > { %16004 = vst [vmem:[#allocation614_spill] sm:$0xff] %v10090_v30  ;;  %v10092_v55 = vpop.permute.xlu0 %3007 }
 0x545   : > { %16005 = vst [vmem:[#allocation615_spill] sm:$0xff] %v10092_v55  ;;  %3254 = vrot.lane.b32.xlu1 %v9305_v29, %s5972_s8 }
 0x546   : > { %3252 = vrot.lane.b32.xlu0 %v16006_v6, %s5972_s8  ;;  %v14915_v6 = vrot.slane %v10114_v42, 7  ;;  %v16068_v42 = vld [vmem:[#allocation501_spill] sm:$0xff] }
 0x547   : > { %v10099_v54 = vpop.permute.xlu1 %3013 }
 0x548   : > { %16007 = vst [vmem:[#allocation616_spill] sm:$0xff] %v10099_v54  ;;  %v10101_v61 = vpop.permute.xlu0 %3011 }
 0x549   : > { %16008 = vst [vmem:[#allocation617_spill] sm:$0xff] %v10101_v61  ;;  %3258 = vrot.lane.b32.xlu1 %v9319_v16, %s5972_s8 }
 0x54a   : > { %3256 = vrot.lane.b32.xlu0 %v9301_v13, %s5972_s8 }
 0x54b   : > { %v10107_v30 = vpop.permute.xlu1 %3017 }
 0x54c   : > { %16009 = vst [vmem:[#allocation618_spill] sm:$0xff] %v10107_v30  ;;  %v10109_v55 = vpop.permute.xlu0 %3015 }
 0x54d   : > { %16010 = vst [vmem:[#allocation619_spill] sm:$0xff] %v10109_v55  ;;  %3262 = vrot.lane.b32.xlu1 %v9333_v14, %s5972_s8  ;;  %v16112_v14 = vld [vmem:[#allocation543_spill] sm:$0xff] }
 0x54e   : > { %3260 = vrot.lane.b32.xlu0 %v9314_v11, %s5972_s8 }
 0x54f   : > { %v10119_v61 = vpop.permute.xlu1 %3021 }
 0x550   : > { %16012 = vst [vmem:[#allocation621_spill] sm:$0xff] %v10119_v61  ;;  %v10121_v54 = vpop.permute.xlu0 %3019 }
 0x551   : > { %16013 = vst [vmem:[#allocation622_spill] sm:$0xff] %v10121_v54  ;;  %3266 = vrot.lane.b32.xlu1 %v14915_v6, %s5972_s8 }
 0x552   : > { %3264 = vrot.lane.b32.xlu0 %v9328_v41, %s5972_s8  ;;  %v16079_v41 = vld [vmem:[#allocation511_spill] sm:$0xff] }
 0x553   : > { %v10128_v55 = vpop.permute.xlu1 %3099 }
 0x554   : > { %16014 = vst [vmem:[#allocation623_spill] sm:$0xff] %v10128_v55  ;;  %v10130_v30 = vpop.permute.xlu0 %3097  ;;  %v10152_v55 = vld [vmem:[%s6067_s30 + $0x260] sm:$0xff] }
 0x555   : > { %16015 = vst [vmem:[#allocation624_spill] sm:$0xff] %v10130_v30  ;;  %3270 = vrot.lane.b32.xlu1 %v9367_v32, %s5972_s8  ;;  %16021 = vst [vmem:[#allocation629_spill] sm:$0xff] %v10152_v55 }
 0x556   : > { %3268 = vrot.lane.b32.xlu0 %v16016_v25, %s5972_s8  ;;  %v14917_v25 = vrot.slane %v10152_v55, 7  ;;  %v16030_v55 = vld [vmem:[#allocation464_spill] sm:$0xff] }
 0x557   : > { %v10137_v61 = vpop.permute.xlu1 %3103 }
 0x558   : > { %16017 = vst [vmem:[#allocation625_spill] sm:$0xff] %v10137_v61  ;;  %v10139_v54 = vpop.permute.xlu0 %3101 }
 0x559   : > { %16018 = vst [vmem:[#allocation626_spill] sm:$0xff] %v10139_v54  ;;  %3274 = vrot.lane.b32.xlu1 %v9385_v28, %s5972_s8  ;;  %v16041_v28 = vrot.slane %v9460_v22, 7 }
 0x55a   : > { %3272 = vrot.lane.b32.xlu0 %v9363_v44, %s5972_s8  ;;  %v16045_v44 = vld [vmem:[#allocation477_spill] sm:$0xff] }
 0x55b   : > { %v10145_v6 = vpop.permute.xlu1 %3107 }
 0x55c   : > { %16019 = vst [vmem:[#allocation627_spill] sm:$0xff] %v10145_v6  ;;  %v10147_v30 = vpop.permute.xlu0 %3105 }
 0x55d   : > { %16020 = vst [vmem:[#allocation628_spill] sm:$0xff] %v10147_v30  ;;  %3278 = vrot.lane.b32.xlu1 %v9399_v34, %s5972_s8  ;;  %v16026_v34 = vrot.slane %v9408_v31, 7 }
 0x55e   : > { %3276 = vrot.lane.b32.xlu0 %v9380_v38, %s5972_s8  ;;  %v16040_v38 = vld [vmem:[#allocation478_spill] sm:$0xff] }
 0x55f   : > { %v10157_v54 = vpop.permute.xlu1 %3111 }
 0x560   : > { %16022 = vst [vmem:[#allocation630_spill] sm:$0xff] %v10157_v54  ;;  %v10159_v61 = vpop.permute.xlu0 %3109 }
 0x561   : > { %16023 = vst [vmem:[#allocation631_spill] sm:$0xff] %v10159_v61  ;;  %3282 = vrot.lane.b32.xlu1 %v14917_v25, %s5972_s8  ;;  %v16029_v25 = vld [vmem:[#allocation468_spill] sm:$0xff] }
 0x562   : > { %3280 = vrot.lane.b32.xlu0 %v9394_v26, %s5972_s8  ;;  %v16033_v26 = vld [vmem:[#allocation472_spill] sm:$0xff] }
 0x563   : > { %v10166_v30 = vpop.permute.xlu1 %3115 }
 0x564   : > { %16024 = vst [vmem:[#allocation632_spill] sm:$0xff] %v10166_v30  ;;  %v10168_v6 = vpop.permute.xlu0 %3113 }
 0x565   : > { %16025 = vst [vmem:[#allocation633_spill] sm:$0xff] %v10168_v6  ;;  %3286 = vrot.lane.b32.xlu1 %v9429_v1, %s5972_s8 }
 0x566   : > { %3284 = vrot.lane.b32.xlu0 %v16026_v34, %s5972_s8  ;;  %v14928_v34 = vrot.slane %v10190_v21, 7 }
 0x567   : > { %v10175_v54 = vpop.permute.xlu1 %3119 }
 0x568   : > { %16027 = vst [vmem:[#allocation634_spill] sm:$0xff] %v10175_v54  ;;  %v10177_v61 = vpop.permute.xlu0 %3117 }
 0x569   : > { %16028 = vst [vmem:[#allocation635_spill] sm:$0xff] %v10177_v61  ;;  %3290 = vrot.lane.b32.xlu1 %v16029_v25, %s5972_s8  ;;  %v16034_v61 = vld [vmem:[#allocation467_spill] sm:$0xff] }
 0x56a   : > { %3288 = vrot.lane.b32.xlu0 %v16030_v55, %s5972_s8 }
 0x56b   : > { %v10183_v30 = vpop.permute.xlu1 %3123 }
 0x56c   : > { %16031 = vst [vmem:[#allocation468_spill] sm:$0xff] %v10183_v30  ;;  %v10185_v6 = vpop.permute.xlu0 %3121 }
 0x56d   : > { %16032 = vst [vmem:[#allocation464_spill] sm:$0xff] %v10185_v6  ;;  %3294 = vrot.lane.b32.xlu1 %v16033_v26, %s5972_s8  ;;  %v16037_v6 = vld [vmem:[#allocation471_spill] sm:$0xff] }
 0x56e   : > { %3292 = vrot.lane.b32.xlu0 %v16034_v61, %s5972_s8  ;;  %v5801_v26 = vld [vmem:[%s6067_s30 + $0x2f0] sm:$0xff] }
 0x56f   : > { %v10195_v54 = vpop.permute.xlu1 %3127 }
 0x570   : > { %16035 = vst [vmem:[#allocation467_spill] sm:$0xff] %v10195_v54  ;;  %v10197_v45 = vpop.permute.xlu0 %3125 }
 0x571   : > { %16036 = vst [vmem:[#allocation636_spill] sm:$0xff] %v10197_v45  ;;  %3298 = vrot.lane.b32.xlu1 %v14928_v34, %s5972_s8  ;;  %v16044_v34 = vld [vmem:[#allocation482_spill] sm:$0xff] }
 0x572   : > { %3296 = vrot.lane.b32.xlu0 %v16037_v6, %s5972_s8  ;;  %v16109_v6 = vld [vmem:[#allocation540_spill] sm:$0xff] }
 0x573   : > { %v10204_v30 = vpop.permute.xlu1 %3131 }
 0x574   : > { %16038 = vst [vmem:[#allocation637_spill] sm:$0xff] %v10204_v30  ;;  %v10206_v17 = vpop.permute.xlu0 %3129  ;;  %v10222_v30 = vld [vmem:[%s6067_s30 + $0x3a0] sm:$0xff] }
 0x575   : > { %16039 = vst [vmem:[#allocation638_spill] sm:$0xff] %v10206_v17  ;;  %3302 = vrot.lane.b32.xlu1 %v16040_v38, %s5972_s8  ;;  %16046 = vst [vmem:[#allocation641_spill] sm:$0xff] %v10222_v30  ;;  %v16049_v38 = vld [vmem:[#allocation486_spill] sm:$0xff] }
 0x576   : > { %3300 = vrot.lane.b32.xlu0 %v16041_v28, %s5972_s8  ;;  %v14931_v28 = vrot.slane %v10222_v30, 7 }
 0x577   : > { %v10213_v54 = vpop.permute.xlu1 %3135 }
 0x578   : > { %16042 = vst [vmem:[#allocation639_spill] sm:$0xff] %v10213_v54  ;;  %v10215_v45 = vpop.permute.xlu0 %3133  ;;  %v16050_v54 = vld [vmem:[#allocation481_spill] sm:$0xff] }
 0x579   : > { %16043 = vst [vmem:[#allocation640_spill] sm:$0xff] %v10215_v45  ;;  %3306 = vrot.lane.b32.xlu1 %v16044_v34, %s5972_s8 }
 0x57a   : > { %3304 = vrot.lane.b32.xlu0 %v16045_v44, %s5972_s8 }
 0x57b   : > { %v10224_v17 = vpop.permute.xlu1 %3139 }
 0x57c   : > { %16047 = vst [vmem:[#allocation642_spill] sm:$0xff] %v10224_v17  ;;  %v10226_v32 = vpop.permute.xlu0 %3137  ;;  %v16053_v17 = vld [vmem:[#allocation485_spill] sm:$0xff] }
 0x57d   : > { %16048 = vst [vmem:[#allocation643_spill] sm:$0xff] %v10226_v32  ;;  %3310 = vrot.lane.b32.xlu1 %v16049_v38, %s5972_s8  ;;  %v16056_v38 = vld [vmem:[#allocation494_spill] sm:$0xff] }
 0x57e   : > { %3308 = vrot.lane.b32.xlu0 %v16050_v54, %s5972_s8 }
 0x57f   : > { %v10233_v45 = vpop.permute.xlu1 %3143 }
 0x580   : > { %16051 = vst [vmem:[#allocation644_spill] sm:$0xff] %v10233_v45  ;;  %v10235_v34 = vpop.permute.xlu0 %3141 }
 0x581   : > { %16052 = vst [vmem:[#allocation645_spill] sm:$0xff] %v10235_v34  ;;  %3314 = vrot.lane.b32.xlu1 %v14931_v28, %s5972_s8  ;;  %v16059_v28 = vld [vmem:[#allocation498_spill] sm:$0xff] }
 0x582   : > { %3312 = vrot.lane.b32.xlu0 %v16053_v17, %s5972_s8  ;;  %v16060_v17 = vld [vmem:[#allocation493_spill] sm:$0xff] }
 0x583   : > { %v10242_v32 = vpop.permute.xlu1 %3147 }
 0x584   : > { %16054 = vst [vmem:[#allocation646_spill] sm:$0xff] %v10242_v32  ;;  %v10244_v44 = vpop.permute.xlu0 %3145 }
 0x585   : > { %16055 = vst [vmem:[#allocation647_spill] sm:$0xff] %v10244_v44  ;;  %3351 = vrot.lane.b32.xlu1 %v16056_v38, %s5973_s9  ;;  %v16063_v38 = vld [vmem:[#allocation502_spill] sm:$0xff] }
 0x586   : > { %3349 = vrot.lane.b32.xlu0 %v9284_v60, %s5973_s9  ;;  %v16064_v60 = vld [vmem:[#allocation497_spill] sm:$0xff] }
 0x587   : > { %v10250_v45 = vpop.permute.xlu1 %3151 }
 0x588   : > { %16057 = vst [vmem:[#allocation494_spill] sm:$0xff] %v10250_v45  ;;  %v10252_v34 = vpop.permute.xlu0 %3149 }
 0x589   : > { %16058 = vst [vmem:[#allocation648_spill] sm:$0xff] %v10252_v34  ;;  %3355 = vrot.lane.b32.xlu1 %v16059_v28, %s5973_s9  ;;  %v16067_v34 = vld [vmem:[#allocation505_spill] sm:$0xff] }
 0x58a   : > { %3353 = vrot.lane.b32.xlu0 %v16060_v17, %s5973_s9 }
 0x58b   : > { %v10258_v32 = vpop.permute.xlu1 %3155 }
 0x58c   : > { %16061 = vst [vmem:[#allocation498_spill] sm:$0xff] %v10258_v32  ;;  %v10260_v44 = vpop.permute.xlu0 %3153 }
 0x58d   : > { %16062 = vst [vmem:[#allocation493_spill] sm:$0xff] %v10260_v44  ;;  %3359 = vrot.lane.b32.xlu1 %v16063_v38, %s5973_s9  ;;  %v10281_v44 = vld [vmem:[%s6067_s30 + $0x1c8] sm:$0x3] }
 0x58e   : > { %3357 = vrot.lane.b32.xlu0 %v16064_v60, %s5973_s9  ;;  %16071 = vst [vmem:[#allocation651_spill] sm:$0xff] %v10281_v44 }
 0x58f   : > { %v10266_v54 = vpop.permute.xlu1 %3159 }
 0x590   : > { %16065 = vst [vmem:[#allocation502_spill] sm:$0xff] %v10266_v54  ;;  %v10268_v45 = vpop.permute.xlu0 %3157 }
 0x591   : > { %16066 = vst [vmem:[#allocation497_spill] sm:$0xff] %v10268_v45  ;;  %3363 = vrot.lane.b32.xlu1 %v16067_v34, %s5973_s9  ;;  %v16074_v34 = vld [vmem:[#allocation512_spill] sm:$0xff] }
 0x592   : > { %3361 = vrot.lane.b32.xlu0 %v16068_v42, %s5973_s9 }
 0x593   : > { %v10274_v19 = vpop.permute.xlu1 %3163 }
 0x594   : > { %16069 = vst [vmem:[#allocation649_spill] sm:$0xff] %v10274_v19  ;;  %v10276_v32 = vpop.permute.xlu0 %3161  ;;  %v16075_v19 = vld [vmem:[#allocation508_spill] sm:$0xff] }
 0x595   : > { %16070 = vst [vmem:[#allocation650_spill] sm:$0xff] %v10276_v32  ;;  %3367 = vrot.lane.b32.xlu1 %v9342_v33, %s5973_s9  ;;  %v16078_v33 = vld [vmem:[#allocation516_spill] sm:$0xff] }
 0x596   : > { %3365 = vrot.lane.b32.xlu0 %v10281_v44, %s5973_s9 }
 0x597   : > { %v10285_v45 = vpop.permute.xlu1 %3167 }
 0x598   : > { %16072 = vst [vmem:[#allocation652_spill] sm:$0xff] %v10285_v45  ;;  %v10287_v54 = vpop.permute.xlu0 %3165  ;;  %v16101_v45 = vld [vmem:[#allocation534_spill] sm:$0xff] }
 0x599   : > { %16073 = vst [vmem:[#allocation653_spill] sm:$0xff] %v10287_v54  ;;  %3371 = vrot.lane.b32.xlu1 %v16074_v34, %s5973_s9  ;;  %v16082_v34 = vld [vmem:[#allocation520_spill] sm:$0xff] }
 0x59a   : > { %3369 = vrot.lane.b32.xlu0 %v16075_v19, %s5973_s9  ;;  %v16083_v19 = vld [vmem:[#allocation515_spill] sm:$0xff] }
 0x59b   : > { %v10293_v32 = vpop.permute.xlu1 %3171 }
 0x59c   : > { %16076 = vst [vmem:[#allocation512_spill] sm:$0xff] %v10293_v32  ;;  %v10295_v42 = vpop.permute.xlu0 %3169 }
 0x59d   : > { %16077 = vst [vmem:[#allocation508_spill] sm:$0xff] %v10295_v42  ;;  %3375 = vrot.lane.b32.xlu1 %v16078_v33, %s5973_s9  ;;  %v10314_v33 = vld [vmem:[%s6067_s30 + $0x268] sm:$0x3] }
 0x59e   : > { %3373 = vrot.lane.b32.xlu0 %v16079_v41, %s5973_s9  ;;  %16086 = vst [vmem:[#allocation654_spill] sm:$0xff] %v10314_v33  ;;  %v16087_v41 = vld [vmem:[#allocation519_spill] sm:$0xff] }
 0x59f   : > { %v10301_v44 = vpop.permute.xlu1 %3175 }
 0x5a0   : > { %16080 = vst [vmem:[#allocation516_spill] sm:$0xff] %v10301_v44  ;;  %v10303_v54 = vpop.permute.xlu0 %3173 }
 0x5a1   : > { %16081 = vst [vmem:[#allocation511_spill] sm:$0xff] %v10303_v54  ;;  %3379 = vrot.lane.b32.xlu1 %v16082_v34, %s5973_s9  ;;  %v16090_v34 = vld [vmem:[#allocation525_spill] sm:$0xff] }
 0x5a2   : > { %3377 = vrot.lane.b32.xlu0 %v16083_v19, %s5973_s9 }
 0x5a3   : > { %v10309_v32 = vpop.permute.xlu1 %3179 }
 0x5a4   : > { %16084 = vst [vmem:[#allocation520_spill] sm:$0xff] %v10309_v32  ;;  %v10311_v42 = vpop.permute.xlu0 %3177  ;;  %v16093_v32 = vld [vmem:[#allocation528_spill] sm:$0xff] }
 0x5a5   : > { %16085 = vst [vmem:[#allocation515_spill] sm:$0xff] %v10311_v42  ;;  %3383 = vrot.lane.b32.xlu1 %v10314_v33, %s5973_s9  ;;  %v16105_v33 = vld [vmem:[#allocation537_spill] sm:$0xff] }
 0x5a6   : > { %3381 = vrot.lane.b32.xlu0 %v16087_v41, %s5973_s9  ;;  %v10335_v41 = vld [vmem:[%s6067_s30 + $0x2a0] sm:$0xff] }
 0x5a7   : > { %v10320_v54 = vpop.permute.xlu1 %3183  ;;  %16094 = vst [vmem:[#allocation528_spill] sm:$0xff] %v10335_v41 }
 0x5a8   : > { %16088 = vst [vmem:[#allocation519_spill] sm:$0xff] %v10320_v54  ;;  %v10322_v44 = vpop.permute.xlu0 %3181 }
 0x5a9   : > { %16089 = vst [vmem:[#allocation655_spill] sm:$0xff] %v10322_v44  ;;  %3387 = vrot.lane.b32.xlu1 %v16090_v34, %s5973_s9  ;;  %v16097_v34 = vld [vmem:[#allocation531_spill] sm:$0xff] }
 0x5aa   : > { %3385 = vrot.lane.b32.xlu0 %v9408_v31, %s5973_s9  ;;  %v10346_v31 = vld [vmem:[%s6067_s30 + $0x2b0] sm:$0xff] }
 0x5ab   : > { %v10328_v19 = vpop.permute.xlu1 %3187  ;;  %16098 = vst [vmem:[#allocation531_spill] sm:$0xff] %v10346_v31 }
 0x5ac   : > { %16091 = vst [vmem:[#allocation525_spill] sm:$0xff] %v10328_v19  ;;  %v10330_v42 = vpop.permute.xlu0 %3185 }
 0x5ad   : > { %16092 = vst [vmem:[#allocation656_spill] sm:$0xff] %v10330_v42  ;;  %3391 = vrot.lane.b32.xlu1 %v16093_v32, %s5973_s9 }
 0x5ae   : > { %3389 = vrot.lane.b32.xlu0 %v10335_v41, %s5973_s9 }
 0x5af   : > { %v10339_v54 = vpop.permute.xlu1 %3191 }
 0x5b0   : > { %16095 = vst [vmem:[#allocation657_spill] sm:$0xff] %v10339_v54  ;;  %v10341_v44 = vpop.permute.xlu0 %3189  ;;  %v10357_v54 = vld [vmem:[%s6067_s30 + $0x2c0] sm:$0xff] }
 0x5b1   : > { %16096 = vst [vmem:[#allocation658_spill] sm:$0xff] %v10341_v44  ;;  %3395 = vrot.lane.b32.xlu1 %v16097_v34, %s5973_s9  ;;  %16102 = vst [vmem:[#allocation534_spill] sm:$0xff] %v10357_v54 }
 0x5b2   : > { %3393 = vrot.lane.b32.xlu0 %v10346_v31, %s5973_s9 }
 0x5b3   : > { %v10350_v42 = vpop.permute.xlu1 %3195 }
 0x5b4   : > { %16099 = vst [vmem:[#allocation659_spill] sm:$0xff] %v10350_v42  ;;  %v10352_v19 = vpop.permute.xlu0 %3193  ;;  %v10368_v42 = vld [vmem:[%s6067_s30 + $0x2d0] sm:$0xff] }
 0x5b5   : > { %16100 = vst [vmem:[#allocation660_spill] sm:$0xff] %v10352_v19  ;;  %3399 = vrot.lane.b32.xlu1 %v16101_v45, %s5973_s9  ;;  %16106 = vst [vmem:[#allocation537_spill] sm:$0xff] %v10368_v42 }
 0x5b6   : > { %3397 = vrot.lane.b32.xlu0 %v10357_v54, %s5973_s9  ;;  %v5800_v54 = vld [vmem:[%s6067_s30 + $0x2e0] sm:$0xff] }
 0x5b7   : > { %v10361_v44 = vpop.permute.xlu1 %3254 }
 0x5b8   : > { %16103 = vst [vmem:[#allocation661_spill] sm:$0xff] %v10361_v44  ;;  %v10363_v41 = vpop.permute.xlu0 %3252 }
 0x5b9   : > { %16104 = vst [vmem:[#allocation662_spill] sm:$0xff] %v10363_v41  ;;  %3403 = vrot.lane.b32.xlu1 %v16105_v33, %s5973_s9 }
 0x5ba   : > { %3401 = vrot.lane.b32.xlu0 %v10368_v42, %s5973_s9 }
 0x5bb   : > { %v10372_v19 = vpop.permute.xlu1 %3258 }
 0x5bc   : > { %16107 = vst [vmem:[#allocation663_spill] sm:$0xff] %v10372_v19  ;;  %v10374_v31 = vpop.permute.xlu0 %3256 }
 0x5bd   : > { %16108 = vst [vmem:[#allocation664_spill] sm:$0xff] %v10374_v31  ;;  %3407 = vrot.lane.b32.xlu1 %v16109_v6, %s5973_s9  ;;  %v10393_v31 = vld [vmem:[%s6067_s30 + $0x308] sm:$0x3] }
 0x5be   : > { %3405 = vrot.lane.b32.xlu0 %v5800_v54, %s5973_s9 }
 0x5bf   : > { %v10380_v41 = vpop.permute.xlu1 %3262 }
 0x5c0   : > { %16110 = vst [vmem:[#allocation540_spill] sm:$0xff] %v10380_v41  ;;  %v10382_v44 = vpop.permute.xlu0 %3260  ;;  %v11401_v41 = vld [vmem:[%s6067_s30 + $0x278] sm:$0x3] }
 0x5c1   : > { %16111 = vst [vmem:[#allocation665_spill] sm:$0xff] %v10382_v44  ;;  %3411 = vrot.lane.b32.xlu1 %v16112_v14, %s5973_s9 }
 0x5c2   : > { %3409 = vrot.lane.b32.xlu0 %v5801_v26, %s5973_s9 }
 0x5c3   : > { %v10388_v42 = vpop.permute.xlu1 %3266 }
 0x5c4   : > { %16113 = vst [vmem:[#allocation543_spill] sm:$0xff] %v10388_v42  ;;  %v10390_v19 = vpop.permute.xlu0 %3264 }
 0x5c5   : > { %16114 = vst [vmem:[#allocation666_spill] sm:$0xff] %v10390_v19  ;;  %3415 = vrot.lane.b32.xlu1 %v10393_v31, %s5973_s9 }
 0x5c6   : > { %3413 = vrot.lane.b32.xlu0 %v10190_v21, %s5973_s9 }
 0x5c7   : > { %v10399_v54 = vpop.permute.xlu1 %3270 }
 0x5c8   : > { %16115 = vst [vmem:[#allocation667_spill] sm:$0xff] %v10399_v54  ;;  %v10401_v44 = vpop.permute.xlu0 %3268 }
 0x5c9   : > { %16116 = vst [vmem:[#allocation668_spill] sm:$0xff] %v10401_v44  ;;  %3419 = vrot.lane.b32.xlu1 %v9754_v58, %s5973_s9  ;;  %v16370_v44 = vld [vmem:[#allocation166_spill] sm:$0xff] }
 0x5ca   : > { %3417 = vrot.lane.b32.xlu0 %v9460_v22, %s5973_s9 }
 0x5cb   : > { %v10407_v26 = vpop.permute.xlu1 %3274 }
 0x5cc   : > { %16117 = vst [vmem:[#allocation669_spill] sm:$0xff] %v10407_v26  ;;  %v10409_v19 = vpop.permute.xlu0 %3272 }
 0x5cd   : > { %16118 = vst [vmem:[#allocation670_spill] sm:$0xff] %v10409_v19  ;;  %3423 = vrot.lane.b32.xlu1 %v9765_v5, %s5973_s9  ;;  %v16374_v19 = vld [vmem:[#allocation171_spill] sm:$0xff] }
 0x5ce   : > { %3421 = vrot.lane.b32.xlu0 %v9481_v3, %s5973_s9 }
 0x5cf   : > { %v10415_v42 = vpop.permute.xlu1 %3278 }
 0x5d0   : > { %16119 = vst [vmem:[#allocation671_spill] sm:$0xff] %v10415_v42  ;;  %v10417_v54 = vpop.permute.xlu0 %3276 }
 0x5d1   : > { %16120 = vst [vmem:[#allocation672_spill] sm:$0xff] %v10417_v54  ;;  %3427 = vrot.lane.b32.xlu1 %v9776_v56, %s5973_s9  ;;  %v16140_v54 = vld [vmem:[#allocation39_spill] sm:$0xff] }
 0x5d2   : > { %3425 = vrot.lane.b32.xlu0 %v9476_v48, %s5973_s9 }
 0x5d3   : > { %v10423_v22 = vpop.permute.xlu1 %3282 }
 0x5d4   : > { %16121 = vst [vmem:[#allocation673_spill] sm:$0xff] %v10423_v22  ;;  %v10425_v58 = vpop.permute.xlu0 %3280 }
 0x5d5   : > { %16122 = vst [vmem:[#allocation674_spill] sm:$0xff] %v10425_v58  ;;  %3431 = vrot.lane.b32.xlu1 %v9787_v49, %s5973_s9 }
 0x5d6   : > { %3429 = vrot.lane.b32.xlu0 %v9501_v52, %s5973_s9 }
 0x5d7   : > { %v10431_v3 = vpop.permute.xlu1 %3286 }
 0x5d8   : > { %16123 = vst [vmem:[#allocation675_spill] sm:$0xff] %v10431_v3  ;;  %v10433_v5 = vpop.permute.xlu0 %3284  ;;  %v11154_v3 = vld [vmem:[%s6067_s30 + $0x238] sm:$0x3] }
 0x5d9   : > { %16124 = vst [vmem:[#allocation676_spill] sm:$0xff] %v10433_v5  ;;  %3435 = vrot.lane.b32.xlu1 %v9798_v27, %s5973_s9  ;;  %v16366_v5 = vld [vmem:[#allocation163_spill] sm:$0xff] }
 0x5da   : > { %3433 = vrot.lane.b32.xlu0 %v9496_v24, %s5973_s9  ;;  %v304_v24 = vld [vmem:[%s6067_s30 + $0x3a8] sm:$0x3] }
 0x5db   : > { %v10439_v48 = vpop.permute.xlu1 %3290 }
 0x5dc   : > { %16125 = vst [vmem:[#allocation677_spill] sm:$0xff] %v10439_v48  ;;  %v10441_v56 = vpop.permute.xlu0 %3288  ;;  %v16365_v48 = vld [vmem:[#allocation162_spill] sm:$0xff] }
 0x5dd   : > { %16126 = vst [vmem:[#allocation678_spill] sm:$0xff] %v10441_v56  ;;  %3439 = vrot.lane.b32.xlu1 %v9809_v59, %s5973_s9  ;;  %v16360_v56 = vld [vmem:[#allocation157_spill] sm:$0xff] }
 0x5de   : > { %3437 = vrot.lane.b32.xlu0 %v9521_v9, %s5973_s9 }
 0x5df   : > { %v10447_v52 = vpop.permute.xlu1 %3294 }
 0x5e0   : > { %16127 = vst [vmem:[#allocation679_spill] sm:$0xff] %v10447_v52  ;;  %v10449_v49 = vpop.permute.xlu0 %3292  ;;  %v16351_v52 = vld [vmem:[#allocation145_spill] sm:$0xff] }
 0x5e1   : > { %16128 = vst [vmem:[#allocation680_spill] sm:$0xff] %v10449_v49  ;;  %3443 = vrot.lane.b32.xlu1 %v9820_v43, %s5973_s9  ;;  %v16133_v43 = vld [vmem:[#allocation28_spill] sm:$0xff]  ;;  %v5838_v49 = vld [vmem:[%s6067_s30 + $0x360] sm:$0xff] }
 0x5e2   : > { %3441 = vrot.lane.b32.xlu0 %v9516_v10, %s5973_s9 }
 0x5e3   : > { %v10456_v27 = vpop.permute.xlu1 %3298 }
 0x5e4   : > { %16129 = vst [vmem:[#allocation681_spill] sm:$0xff] %v10456_v27  ;;  %v10458_v22 = vpop.permute.xlu0 %3296  ;;  %v16348_v27 = vld [vmem:[#allocation142_spill] sm:$0xff] }
 0x5e5   : > { %16130 = vst [vmem:[#allocation682_spill] sm:$0xff] %v10458_v22  ;;  %3447 = vrot.lane.b32.xlu1 %v304_v24, %s5973_s9 }
 0x5e6   : > { %3445 = vrot.lane.b32.xlu0 %v10222_v30, %s5973_s9  ;;  %v16144_v30 = vld [vmem:[#allocation128_spill] sm:$0xff]  ;;  %s5460_s9 = sshll.u32 %s5958_s15, 12 }
 0x5e7   : > { %v10463_v9 = vpop.permute.xlu1 %3302 }
 0x5e8   : > { %16131 = vst [vmem:[#allocation683_spill] sm:$0xff] %v10463_v9  ;;  %v10465_v59 = vpop.permute.xlu0 %3300 }
 0x5e9   : > { %16132 = vst [vmem:[#allocation684_spill] sm:$0xff] %v10465_v59  ;;  %3504 = vrot.lane.b32.xlu1 %v15934_v63, %s5974_s10 }
 0x5ea   : > { %3502 = vrot.lane.b32.xlu0 %v16133_v43, %s5974_s10 }
 0x5eb   : > { %v10471_v10 = vpop.permute.xlu1 %3306 }
 0x5ec   : > { %16134 = vst [vmem:[#allocation28_spill] sm:$0xff] %v10471_v10  ;;  %v10473_v58 = vpop.permute.xlu0 %3304 }
 0x5ed   : > { %16135 = vst [vmem:[#allocation685_spill] sm:$0xff] %v10473_v58  ;;  %3508 = vrot.lane.b32.xlu1 %v15742_v15, %s5974_s10 }
 0x5ee   : > { %3506 = vrot.lane.b32.xlu0 %v15743_v7, %s5974_s10 }
 0x5ef   : > { %v10479_v24 = vpop.permute.xlu1 %3310 }
 0x5f0   : > { %16136 = vst [vmem:[#allocation686_spill] sm:$0xff] %v10479_v24  ;;  %v10481_v42 = vpop.permute.xlu0 %3308 }
 0x5f1   : > { %16137 = vst [vmem:[#allocation687_spill] sm:$0xff] %v10481_v42  ;;  %3512 = vrot.lane.b32.xlu1 %v15746_v0, %s5974_s10  ;;  %v16143_v42 = vld [vmem:[#allocation51_spill] sm:$0xff] }
 0x5f2   : > { %3510 = vrot.lane.b32.xlu0 %v15747_v62, %s5974_s10 }
 0x5f3   : > { %v10487_v63 = vpop.permute.xlu1 %3314 }
 0x5f4   : > { %16138 = vst [vmem:[#allocation688_spill] sm:$0xff] %v10487_v63  ;;  %v10489_v43 = vpop.permute.xlu0 %3312 }
 0x5f5   : > { %16139 = vst [vmem:[#allocation689_spill] sm:$0xff] %v10489_v43  ;;  %3516 = vrot.lane.b32.xlu1 %v15750_v2, %s5974_s10 }
 0x5f6   : > { %3514 = vrot.lane.b32.xlu0 %v16140_v54, %s5974_s10 }
 0x5f7   : > { %v10495_v58 = vpop.permute.xlu1 %3351 }
 0x5f8   : > { %16141 = vst [vmem:[#allocation39_spill] sm:$0xff] %v10495_v58  ;;  %v10497_v24 = vpop.permute.xlu0 %3349 }
 0x5f9   : > { %16142 = vst [vmem:[#allocation690_spill] sm:$0xff] %v10497_v24  ;;  %3520 = vrot.lane.b32.xlu1 %v16143_v42, %s5974_s10  ;;  %v16155_v24 = vld [vmem:[#allocation63_spill] sm:$0xff] }
 0x5fa   : > { %3518 = vrot.lane.b32.xlu0 %v16144_v30, %s5974_s10 }
 0x5fb   : > { %v10503_v10 = vpop.permute.xlu1 %3355 }
 0x5fc   : > { %16145 = vst [vmem:[#allocation51_spill] sm:$0xff] %v10503_v10  ;;  %v10505_v63 = vpop.permute.xlu0 %3353 }
 0x5fd   : > { %16146 = vst [vmem:[#allocation128_spill] sm:$0xff] %v10505_v63  ;;  %3524 = vrot.lane.b32.xlu1 %v15762_v51, %s5974_s10  ;;  %v16151_v63 = vld [vmem:[#allocation59_spill] sm:$0xff] }
 0x5fe   : > { %3522 = vrot.lane.b32.xlu0 %v15944_v8, %s5974_s10 }
 0x5ff   : > { %v10511_v43 = vpop.permute.xlu1 %3359 }
 0x600   : > { %16147 = vst [vmem:[#allocation691_spill] sm:$0xff] %v10511_v43  ;;  %v10513_v58 = vpop.permute.xlu0 %3357 }
 0x601   : > { %16148 = vst [vmem:[#allocation692_spill] sm:$0xff] %v10513_v58  ;;  %3528 = vrot.lane.b32.xlu1 %v15764_v57, %s5974_s10  ;;  %v16154_v58 = vld [vmem:[#allocation138_spill] sm:$0xff] }
 0x602   : > { %3526 = vrot.lane.b32.xlu0 %v15761_v35, %s5974_s10 }
 0x603   : > { %v10519_v42 = vpop.permute.xlu1 %3363 }
 0x604   : > { %16149 = vst [vmem:[#allocation693_spill] sm:$0xff] %v10519_v42  ;;  %v10521_v10 = vpop.permute.xlu0 %3361 }
 0x605   : > { %16150 = vst [vmem:[#allocation694_spill] sm:$0xff] %v10521_v10  ;;  %3532 = vrot.lane.b32.xlu1 %v15766_v46, %s5974_s10  ;;  %v16456_v46 = vld [vmem:[#allocation503_spill] sm:$0xff] }
 0x606   : > { %3530 = vrot.lane.b32.xlu0 %v16151_v63, %s5974_s10 }
 0x607   : > { %v10527_v8 = vpop.permute.xlu1 %3367 }
 0x608   : > { %16152 = vst [vmem:[#allocation59_spill] sm:$0xff] %v10527_v8  ;;  %v10529_v43 = vpop.permute.xlu0 %3365 }
 0x609   : > { %16153 = vst [vmem:[#allocation695_spill] sm:$0xff] %v10529_v43  ;;  %3536 = vrot.lane.b32.xlu1 %v16154_v58, %s5974_s10  ;;  %v16342_v43 = vld [vmem:[#allocation130_spill] sm:$0xff] }
 0x60a   : > { %3534 = vrot.lane.b32.xlu0 %v16155_v24, %s5974_s10 }
 0x60b   : > { %v10535_v59 = vpop.permute.xlu1 %3371 }
 0x60c   : > { %16156 = vst [vmem:[#allocation696_spill] sm:$0xff] %v10535_v59  ;;  %v10537_v42 = vpop.permute.xlu0 %3369 }
 0x60d   : > { %16157 = vst [vmem:[#allocation697_spill] sm:$0xff] %v10537_v42  ;;  %3540 = vrot.lane.b32.xlu1 %v15960_v40, %s5974_s10  ;;  %v16341_v42 = vld [vmem:[#allocation129_spill] sm:$0xff] }
 0x60e   : > { %3538 = vrot.lane.b32.xlu0 %v15961_v12, %s5974_s10 }
 0x60f   : > { %v10543_v10 = vpop.permute.xlu1 %3375 }
 0x610   : > { %16158 = vst [vmem:[#allocation698_spill] sm:$0xff] %v10543_v10  ;;  %v10545_v8 = vpop.permute.xlu0 %3373  ;;  %v16340_v10 = vld [vmem:[#allocation127_spill] sm:$0xff] }
 0x611   : > { %16159 = vst [vmem:[#allocation699_spill] sm:$0xff] %v10545_v8  ;;  %3544 = vrot.lane.b32.xlu1 %v15776_v47, %s5974_s10 }
 0x612   : > { %3542 = vrot.lane.b32.xlu0 %v15578_v53, %s5974_s10 }
 0x613   : > { %v10551_v58 = vpop.permute.xlu1 %3379 }
 0x614   : > { %16160 = vst [vmem:[#allocation700_spill] sm:$0xff] %v10551_v58  ;;  %v10553_v59 = vpop.permute.xlu0 %3377 }
 0x615   : > { %16161 = vst [vmem:[#allocation701_spill] sm:$0xff] %v10553_v59  ;;  %3689 = vrot.lane.b32.xlu1 %v9429_v1, %s5975_s11  ;;  %v16199_v59 = vld [vmem:[#allocation444_spill] sm:$0xff] }
 0x616   : > { %3657 = vrot.lane.b32.xlu0 %v9305_v29, %s5975_s11 }
 0x617   : > { %v10559_v12 = vpop.permute.xlu1 %3383 }
 0x618   : > { %16162 = vst [vmem:[#allocation702_spill] sm:$0xff] %v10559_v12  ;;  %v10561_v40 = vpop.permute.xlu0 %3381 }
 0x619   : > { %16163 = vst [vmem:[#allocation703_spill] sm:$0xff] %v10561_v40  ;;  %3691 = vrot.lane.b32.xlu1 %v16030_v55, %s5975_s11 }
 0x61a   : > { %3659 = vrot.lane.b32.xlu0 %v9301_v13, %s5975_s11 }
 0x61b   : > { %v10567_v53 = vpop.permute.xlu1 %3387 }
 0x61c   : > { %16164 = vst [vmem:[#allocation704_spill] sm:$0xff] %v10567_v53  ;;  %v10569_v58 = vpop.permute.xlu0 %3385  ;;  %v16322_v53 = vld [vmem:[#allocation115_spill] sm:$0xff] }
 0x61d   : > { %16165 = vst [vmem:[#allocation705_spill] sm:$0xff] %v10569_v58  ;;  %3794 = vrot.lane.b32.xlu1 %v16093_v32, %s5976_s18 }
 0x61e   : > { %3754 = vrot.lane.b32.xlu0 %v16060_v17, %s5976_s18 }
 0x61f   : > { %v10575_v1 = vpop.permute.xlu1 %3391 }
 0x620   : > { %16166 = vst [vmem:[#allocation706_spill] sm:$0xff] %v10575_v1  ;;  %v10577_v29 = vpop.permute.xlu0 %3389  ;;  %v16317_v1 = vld [vmem:[#allocation111_spill] sm:$0xff] }
 0x621   : > { %16167 = vst [vmem:[#allocation707_spill] sm:$0xff] %v10577_v29  ;;  %3796 = vrot.lane.b32.xlu1 %v16097_v34, %s5976_s18 }
 0x622   : > { %3756 = vrot.lane.b32.xlu0 %v16059_v28, %s5976_s18 }
 0x623   : > { %v10583_v13 = vpop.permute.xlu1 %3395 }
 0x624   : > { %16168 = vst [vmem:[#allocation708_spill] sm:$0xff] %v10583_v13  ;;  %v10585_v55 = vpop.permute.xlu0 %3393  ;;  %v16312_v13 = vld [vmem:[#allocation103_spill] sm:$0xff] }
 0x625   : > { %16169 = vst [vmem:[#allocation709_spill] sm:$0xff] %v10585_v55  ;;  %3935 = vrot.lane.b32.xlu1 %v15776_v47, %s5977_s19  ;;  %v16311_v55 = vld [vmem:[#allocation102_spill] sm:$0xff] }
 0x626   : > { %3895 = vrot.lane.b32.xlu0 %v15743_v7, %s5977_s19 }
 0x627   : > { %v10591_v32 = vpop.permute.xlu1 %3399 }
 0x628   : > { %16170 = vst [vmem:[#allocation710_spill] sm:$0xff] %v10591_v32  ;;  %v10593_v17 = vpop.permute.xlu0 %3397  ;;  %v5836_v32 = vld [vmem:[%s6067_s30 + $0x210] sm:$0xff] }
 0x629   : > { %16171 = vst [vmem:[#allocation711_spill] sm:$0xff] %v10593_v17  ;;  %3548 = vrot.lane.b32.xlu1 %v15779_v18, %s5974_s10  ;;  %v5835_v17 = vld [vmem:[%s6067_s30 + $0x1e0] sm:$0xff] }
 0x62a   : > { %3546 = vrot.lane.b32.xlu0 %v15780_v37, %s5974_s10 }
 0x62b   : > { %v10599_v28 = vpop.permute.xlu1 %3403 }
 0x62c   : > { %16172 = vst [vmem:[#allocation712_spill] sm:$0xff] %v10599_v28  ;;  %v10601_v34 = vpop.permute.xlu0 %3401  ;;  %v5834_v28 = vld [vmem:[%s6067_s30 + $0x1f0] sm:$0xff] }
 0x62d   : > { %16173 = vst [vmem:[#allocation713_spill] sm:$0xff] %v10601_v34  ;;  %3937 = vrot.lane.b32.xlu1 %v15779_v18, %s5977_s19 }
 0x62e   : > { %3897 = vrot.lane.b32.xlu0 %v15742_v15, %s5977_s19 }
 0x62f   : > { %v10607_v47 = vpop.permute.xlu1 %3407 }
 0x630   : > { %16174 = vst [vmem:[#allocation714_spill] sm:$0xff] %v10607_v47  ;;  %v10609_v7 = vpop.permute.xlu0 %3405 }
 0x631   : > { %16175 = vst [vmem:[#allocation715_spill] sm:$0xff] %v10609_v7  ;;  %3552 = vrot.lane.b32.xlu1 %v15783_v39, %s5974_s10 }
 0x632   : > { %3550 = vrot.lane.b32.xlu0 %v15784_v4, %s5974_s10 }
 0x633   : > { %v10615_v37 = vpop.permute.xlu1 %3411 }
 0x634   : > { %16176 = vst [vmem:[#allocation716_spill] sm:$0xff] %v10615_v37  ;;  %v10617_v12 = vpop.permute.xlu0 %3409 }
 0x635   : > { %16177 = vst [vmem:[#allocation717_spill] sm:$0xff] %v10617_v12  ;;  %3693 = vrot.lane.b32.xlu1 %v16029_v25, %s5975_s11 }
 0x636   : > { %3661 = vrot.lane.b32.xlu0 %v9319_v16, %s5975_s11 }
 0x637   : > { %v10623_v15 = vpop.permute.xlu1 %3415 }
 0x638   : > { %16178 = vst [vmem:[#allocation718_spill] sm:$0xff] %v10623_v15  ;;  %v10625_v18 = vpop.permute.xlu0 %3413 }
 0x639   : > { %16179 = vst [vmem:[#allocation719_spill] sm:$0xff] %v10625_v18  ;;  %3695 = vrot.lane.b32.xlu1 %v16034_v61, %s5975_s11 }
 0x63a   : > { %3663 = vrot.lane.b32.xlu0 %v9314_v11, %s5975_s11 }
 0x63b   : > { %v10631_v4 = vpop.permute.xlu1 %3419 }
 0x63c   : > { %16180 = vst [vmem:[#allocation720_spill] sm:$0xff] %v10631_v4  ;;  %v10633_v40 = vpop.permute.xlu0 %3417 }
 0x63d   : > { %16181 = vst [vmem:[#allocation721_spill] sm:$0xff] %v10633_v40  ;;  %3798 = vrot.lane.b32.xlu1 %v16101_v45, %s5976_s18 }
 0x63e   : > { %3758 = vrot.lane.b32.xlu0 %v16064_v60, %s5976_s18 }
 0x63f   : > { %v10639_v16 = vpop.permute.xlu1 %3423 }
 0x640   : > { %16182 = vst [vmem:[#allocation722_spill] sm:$0xff] %v10639_v16  ;;  %v10641_v25 = vpop.permute.xlu0 %3421  ;;  %v16297_v16 = vld [vmem:[#allocation92_spill] sm:$0xff] }
 0x641   : > { %16183 = vst [vmem:[#allocation723_spill] sm:$0xff] %v10641_v25  ;;  %3800 = vrot.lane.b32.xlu1 %v16105_v33, %s5976_s18 }
 0x642   : > { %3760 = vrot.lane.b32.xlu0 %v16063_v38, %s5976_s18 }
 0x643   : > { %v10647_v61 = vpop.permute.xlu1 %3427 }
 0x644   : > { %16184 = vst [vmem:[#allocation724_spill] sm:$0xff] %v10647_v61  ;;  %v10649_v11 = vpop.permute.xlu0 %3425 }
 0x645   : > { %16185 = vst [vmem:[#allocation725_spill] sm:$0xff] %v10649_v11  ;;  %3939 = vrot.lane.b32.xlu1 %v15783_v39, %s5977_s19  ;;  %v16292_v11 = vld [vmem:[#allocation600_spill] sm:$0xff] }
 0x646   : > { %3899 = vrot.lane.b32.xlu0 %v15747_v62, %s5977_s19 }
 0x647   : > { %v10655_v45 = vpop.permute.xlu1 %3431 }
 0x648   : > { %16186 = vst [vmem:[#allocation726_spill] sm:$0xff] %v10655_v45  ;;  %v10657_v60 = vpop.permute.xlu0 %3429  ;;  %v16216_v45 = vld [vmem:[#allocation66_spill] sm:$0xff] }
 0x649   : > { %16187 = vst [vmem:[#allocation727_spill] sm:$0xff] %v10657_v60  ;;  %3556 = vrot.lane.b32.xlu1 %v15787_v50, %s5974_s10 }
 0x64a   : > { %3554 = vrot.lane.b32.xlu0 %v15788_v23, %s5974_s10 }
 0x64b   : > { %v10663_v38 = vpop.permute.xlu1 %3435 }
 0x64c   : > { %16188 = vst [vmem:[#allocation728_spill] sm:$0xff] %v10663_v38  ;;  %v10665_v33 = vpop.permute.xlu0 %3433 }
 0x64d   : > { %16189 = vst [vmem:[#allocation729_spill] sm:$0xff] %v10665_v33  ;;  %3941 = vrot.lane.b32.xlu1 %v15787_v50, %s5977_s19  ;;  %v16194_v33 = vld [vmem:[#allocation472_spill] sm:$0xff]  ;;  %v16195_v50 = vld [vmem:[#allocation445_spill] sm:$0xff] }
 0x64e   : > { %3901 = vrot.lane.b32.xlu0 %v15746_v0, %s5977_s19 }
 0x64f   : > { %v10671_v62 = vpop.permute.xlu1 %3439 }
 0x650   : > { %16190 = vst [vmem:[#allocation730_spill] sm:$0xff] %v10671_v62  ;;  %v10673_v39 = vpop.permute.xlu0 %3437 }
 0x651   : > { %16191 = vst [vmem:[#allocation731_spill] sm:$0xff] %v10673_v39  ;;  %3560 = vrot.lane.b32.xlu1 %v15791_v36, %s5974_s10  ;;  %v16198_v39 = vld [vmem:[#allocation471_spill] sm:$0xff] }
 0x652   : > { %3558 = vrot.lane.b32.xlu0 %v15792_v20, %s5974_s10 }
 0x653   : > { %v10679_v23 = vpop.permute.xlu1 %3443 }
 0x654   : > { %16192 = vst [vmem:[#allocation732_spill] sm:$0xff] %v10679_v23  ;;  %v10681_v38 = vpop.permute.xlu0 %3441 }
 0x655   : > { %16193 = vst [vmem:[#allocation733_spill] sm:$0xff] %v10681_v38  ;;  %3697 = vrot.lane.b32.xlu1 %v16194_v33, %s5975_s11  ;;  %v16202_v33 = vld [vmem:[#allocation501_spill] sm:$0xff] }
 0x656   : > { %3665 = vrot.lane.b32.xlu0 %v16195_v50, %s5975_s11 }
 0x657   : > { %v10687_v0 = vpop.permute.xlu1 %3447 }
 0x658   : > { %16196 = vst [vmem:[#allocation472_spill] sm:$0xff] %v10687_v0  ;;  %v10689_v62 = vpop.permute.xlu0 %3445 }
 0x659   : > { %16197 = vst [vmem:[#allocation445_spill] sm:$0xff] %v10689_v62  ;;  %3699 = vrot.lane.b32.xlu1 %v16198_v39, %s5975_s11  ;;  %v16205_v39 = vld [vmem:[#allocation505_spill] sm:$0xff] }
 0x65a   : > { %3667 = vrot.lane.b32.xlu0 %v16199_v59, %s5975_s11 }
 0x65b   : > { %v10695_v20 = vpop.permute.xlu1 %3504 }
 0x65c   : > { %16200 = vst [vmem:[#allocation471_spill] sm:$0xff] %v10695_v20  ;;  %v10697_v23 = vpop.permute.xlu0 %3502  ;;  %v5822_v20 = vld [vmem:[%s6067_s30 + $0xa0] sm:$0xff] }
 0x65d   : > { %16201 = vst [vmem:[#allocation444_spill] sm:$0xff] %v10697_v23  ;;  %3802 = vrot.lane.b32.xlu1 %v16109_v6, %s5976_s18  ;;  %v5820_v23 = vld [vmem:[%s6067_s30 + $0x60] sm:$0xff] }
 0x65e   : > { %3762 = vrot.lane.b32.xlu0 %v16202_v33, %s5976_s18 }
 0x65f   : > { %v10703_v50 = vpop.permute.xlu1 %3508 }
 0x660   : > { %16203 = vst [vmem:[#allocation501_spill] sm:$0xff] %v10703_v50  ;;  %v10705_v0 = vpop.permute.xlu0 %3506  ;;  %v16286_v50 = vld [vmem:[#allocation81_spill] sm:$0xff] }
 0x661   : > { %16204 = vst [vmem:[#allocation734_spill] sm:$0xff] %v10705_v0  ;;  %3804 = vrot.lane.b32.xlu1 %v16112_v14, %s5976_s18  ;;  %v16210_v14 = vld [vmem:[#allocation350_spill] sm:$0xff] }
 0x662   : > { %3764 = vrot.lane.b32.xlu0 %v16205_v39, %s5976_s18  ;;  %v16211_v39 = vld [vmem:[#allocation355_spill] sm:$0xff] }
 0x663   : > { %v10711_v59 = vpop.permute.xlu1 %3512 }
 0x664   : > { %16206 = vst [vmem:[#allocation505_spill] sm:$0xff] %v10711_v59  ;;  %v10713_v62 = vpop.permute.xlu0 %3510 }
 0x665   : > { %16207 = vst [vmem:[#allocation735_spill] sm:$0xff] %v10713_v62  ;;  %3943 = vrot.lane.b32.xlu1 %v15791_v36, %s5977_s19 }
 0x666   : > { %3903 = vrot.lane.b32.xlu0 %v16140_v54, %s5977_s19 }
 0x667   : > { %v10719_v6 = vpop.permute.xlu1 %3516 }
 0x668   : > { %16208 = vst [vmem:[#allocation736_spill] sm:$0xff] %v10719_v6  ;;  %v10721_v33 = vpop.permute.xlu0 %3514 }
 0x669   : > { %16209 = vst [vmem:[#allocation737_spill] sm:$0xff] %v10721_v33  ;;  %3564 = vrot.lane.b32.xlu1 %v16210_v14, %s5974_s10  ;;  %v16217_v33 = vld [vmem:[#allocation418_spill] sm:$0xff] }
 0x66a   : > { %3562 = vrot.lane.b32.xlu0 %v16211_v39, %s5974_s10 }
 0x66b   : > { %v10727_v38 = vpop.permute.xlu1 %3520 }
 0x66c   : > { %16212 = vst [vmem:[#allocation350_spill] sm:$0xff] %v10727_v38  ;;  %v10729_v60 = vpop.permute.xlu0 %3518 }
 0x66d   : > { %16213 = vst [vmem:[#allocation355_spill] sm:$0xff] %v10729_v60  ;;  %3945 = vrot.lane.b32.xlu1 %v16210_v14, %s5977_s19  ;;  %v16220_v14 = vrot.slane %v10190_v21, 7  ;;  %v5803_v60 = vld [vmem:[%s6067_s30 + $0x310] sm:$0xff] }
 0x66e   : > { %3905 = vrot.lane.b32.xlu0 %v15750_v2, %s5977_s19  ;;  %v3655_v2 = vrot.slane %v5803_v60, 7 }
 0x66f   : > { %v10735_v36 = vpop.permute.xlu1 %3524 }
 0x670   : > { %16214 = vst [vmem:[#allocation738_spill] sm:$0xff] %v10735_v36  ;;  %v10737_v54 = vpop.permute.xlu0 %3522  ;;  %v16221_v36 = vld [vmem:[#allocation620_spill] sm:$0xff] }
 0x671   : > { %16215 = vst [vmem:[#allocation739_spill] sm:$0xff] %v10737_v54  ;;  %3568 = vrot.lane.b32.xlu1 %v16216_v45, %s5974_s10  ;;  %v16222_v6 = vrot.slane %v16221_v36, 7  ;;  %v5804_v54 = vld [vmem:[%s6067_s30 + $0x1d0] sm:$0xff] }
 0x672   : > { %3566 = vrot.lane.b32.xlu0 %v16217_v33, %s5974_s10  ;;  %v3653_v62 = vrot.slane %v5804_v54, 7 }
 0x673   : > { %v10743_v39 = vpop.permute.xlu1 %3528 }
 0x674   : > { %16218 = vst [vmem:[#allocation66_spill] sm:$0xff] %v10743_v39  ;;  %v10745_v38 = vpop.permute.xlu0 %3526  ;;  %v16227_v39 = vld [vmem:[#allocation651_spill] sm:$0xff] }
 0x675   : > { %16219 = vst [vmem:[#allocation418_spill] sm:$0xff] %v10745_v38  ;;  %3701 = vrot.lane.b32.xlu1 %v16220_v14, %s5975_s11 }
 0x676   : > { %3669 = vrot.lane.b32.xlu0 %v16222_v6, %s5975_s11 }
 0x677   : > { %v10755_v59 = vpop.permute.xlu1 %3532 }
 0x678   : > { %16223 = vst [vmem:[#allocation620_spill] sm:$0xff] %v10755_v59  ;;  %v10757_v0 = vpop.permute.xlu0 %3530 }
 0x679   : > { %16224 = vst [vmem:[#allocation740_spill] sm:$0xff] %v10757_v0  ;;  %3703 = vrot.lane.b32.xlu1 %v3655_v2, %s5975_s11 }
 0x67a   : > { %3671 = vrot.lane.b32.xlu0 %v3653_v62, %s5975_s11 }
 0x67b   : > { %v10761_v38 = vpop.permute.xlu1 %3536 }
 0x67c   : > { %16225 = vst [vmem:[#allocation741_spill] sm:$0xff] %v10761_v38  ;;  %v10763_v14 = vpop.permute.xlu0 %3534  ;;  %v5805_v38 = vld [vmem:[%s6067_s30 + $0x1d8] sm:$0x3] }
 0x67d   : > { %16226 = vst [vmem:[#allocation742_spill] sm:$0xff] %v10763_v14  ;;  %3768 = vrot.lane.b32.xlu1 %v16227_v39, %s5976_s18  ;;  %v5806_v14 = vld [vmem:[%s6067_s30 + $0x318] sm:$0x3] }
 0x67e   : > { %3766 = vrot.lane.b32.xlu0 %v16221_v36, %s5976_s18 }
 0x67f   : > { %v10769_v6 = vpop.permute.xlu1 %3540 }
 0x680   : > { %16228 = vst [vmem:[#allocation651_spill] sm:$0xff] %v10769_v6  ;;  %v10771_v59 = vpop.permute.xlu0 %3538  ;;  %v5812_v6 = vld [vmem:[%s6067_s30 + $0x350] sm:$0xff] }
 0x681   : > { %16229 = vst [vmem:[#allocation743_spill] sm:$0xff] %v10771_v59  ;;  %3808 = vrot.lane.b32.xlu1 %v10393_v31, %s5976_s18  ;;  %v5821_v59 = vld [vmem:[%s6067_s30 + $0xb0] sm:$0xff] }
 0x682   : > { %3806 = vrot.lane.b32.xlu0 %v10190_v21, %s5976_s18 }
 0x683   : > { %v10777_v62 = vpop.permute.xlu1 %3544 }
 0x684   : > { %16230 = vst [vmem:[#allocation744_spill] sm:$0xff] %v10777_v62  ;;  %v10779_v2 = vpop.permute.xlu0 %3542  ;;  %v16262_v62 = vld [vmem:[#allocation450_spill] sm:$0xff] }
 0x685   : > { %16231 = vst [vmem:[#allocation745_spill] sm:$0xff] %v10779_v2  ;;  %3772 = vrot.lane.b32.xlu1 %v5805_v38, %s5976_s18  ;;  %v16236_v38 = vld [vmem:[#allocation131_spill] sm:$0xff]  ;;  %v16284_v2 = vld [vmem:[#allocation57_spill] sm:$0xff] }
 0x686   : > { %3770 = vrot.lane.b32.xlu0 %v5804_v54, %s5976_s18 }
 0x687   : > { %v10784_v36 = vpop.permute.xlu1 %3689 }
 0x688   : > { %16232 = vst [vmem:[#allocation746_spill] sm:$0xff] %v10784_v36  ;;  %v10786_v39 = vpop.permute.xlu0 %3657  ;;  %v16285_v36 = vld [vmem:[#allocation80_spill] sm:$0xff] }
 0x689   : > { %16233 = vst [vmem:[#allocation747_spill] sm:$0xff] %v10786_v39  ;;  %3812 = vrot.lane.b32.xlu1 %v5806_v14, %s5976_s18  ;;  %v5817_v39 = vld [vmem:[%s6067_s30 + $0x50] sm:$0xff] }
 0x68a   : > { %3810 = vrot.lane.b32.xlu0 %v5803_v60, %s5976_s18 }
 0x68b   : > { %v10791_v31 = vpop.permute.xlu1 %3691 }
 0x68c   : > { %16234 = vst [vmem:[#allocation748_spill] sm:$0xff] %v10791_v31  ;;  %v10793_v21 = vpop.permute.xlu0 %3659  ;;  %v5816_v31 = vld [vmem:[%s6067_s30 + $0x10] sm:$0xff] }
 0x68d   : > { %16235 = vst [vmem:[#allocation749_spill] sm:$0xff] %v10793_v21  ;;  %3909 = vrot.lane.b32.xlu1 %v16144_v30, %s5977_s19  ;;  %v16241_v21 = vld [vmem:[#allocation584_spill] sm:$0xff] }
 0x68e   : > { %3907 = vrot.lane.b32.xlu0 %v16236_v38, %s5977_s19  ;;  %v16242_v30 = vld [vmem:[#allocation588_spill] sm:$0xff] }
 0x68f   : > { %v10799_v54 = vpop.permute.xlu1 %3794 }
 0x690   : > { %16237 = vst [vmem:[#allocation131_spill] sm:$0xff] %v10799_v54  ;;  %v10801_v0 = vpop.permute.xlu0 %3754 }
 0x691   : > { %16238 = vst [vmem:[#allocation750_spill] sm:$0xff] %v10801_v0  ;;  %3949 = vrot.lane.b32.xlu1 %v16216_v45, %s5977_s19  ;;  %v16245_v0 = vld [vmem:[#allocation230_spill] sm:$0xff]  ;;  %v16246_v45 = vld [vmem:[#allocation233_spill] sm:$0xff] }
 0x692   : > { %3947 = vrot.lane.b32.xlu0 %v16217_v33, %s5977_s19 }
 0x693   : > { %v10807_v60 = vpop.permute.xlu1 %3796 }
 0x694   : > { %16239 = vst [vmem:[#allocation751_spill] sm:$0xff] %v10807_v60  ;;  %v10809_v14 = vpop.permute.xlu0 %3756 }
 0x695   : > { %16240 = vst [vmem:[#allocation752_spill] sm:$0xff] %v10809_v14  ;;  %3572 = vrot.lane.b32.xlu1 %v16241_v21, %s5974_s10  ;;  %v16249_v14 = vld [vmem:[#allocation433_spill] sm:$0xff]  ;;  %v16250_v21 = vld [vmem:[#allocation436_spill] sm:$0xff] }
 0x696   : > { %3570 = vrot.lane.b32.xlu0 %v16242_v30, %s5974_s10 }
 0x697   : > { %v10815_v38 = vpop.permute.xlu1 %3935 }
 0x698   : > { %16243 = vst [vmem:[#allocation584_spill] sm:$0xff] %v10815_v38  ;;  %v10817_v54 = vpop.permute.xlu0 %3895  ;;  %v16261_v38 = vld [vmem:[#allocation477_spill] sm:$0xff] }
 0x699   : > { %16244 = vst [vmem:[#allocation588_spill] sm:$0xff] %v10817_v54  ;;  %3913 = vrot.lane.b32.xlu1 %v16245_v0, %s5977_s19  ;;  %v16253_v0 = vld [vmem:[#allocation589_spill] sm:$0xff] }
 0x69a   : > { %3911 = vrot.lane.b32.xlu0 %v16246_v45, %s5977_s19  ;;  %v16254_v45 = vld [vmem:[#allocation592_spill] sm:$0xff] }
 0x69b   : > { %v10823_v33 = vpop.permute.xlu1 %3548 }
 0x69c   : > { %16247 = vst [vmem:[#allocation230_spill] sm:$0xff] %v10823_v33  ;;  %v10825_v60 = vpop.permute.xlu0 %3546 }
 0x69d   : > { %16248 = vst [vmem:[#allocation233_spill] sm:$0xff] %v10825_v60  ;;  %3953 = vrot.lane.b32.xlu1 %v16249_v14, %s5977_s19  ;;  %v16257_v14 = vld [vmem:[#allocation478_spill] sm:$0xff] }
 0x69e   : > { %3951 = vrot.lane.b32.xlu0 %v16250_v21, %s5977_s19  ;;  %v16258_v21 = vld [vmem:[#allocation451_spill] sm:$0xff] }
 0x69f   : > { %v10831_v30 = vpop.permute.xlu1 %3937 }
 0x6a0   : > { %16251 = vst [vmem:[#allocation433_spill] sm:$0xff] %v10831_v30  ;;  %v10833_v54 = vpop.permute.xlu0 %3897 }
 0x6a1   : > { %16252 = vst [vmem:[#allocation436_spill] sm:$0xff] %v10833_v54  ;;  %3576 = vrot.lane.b32.xlu1 %v16253_v0, %s5974_s10 }
 0x6a2   : > { %3574 = vrot.lane.b32.xlu0 %v16254_v45, %s5974_s10 }
 0x6a3   : > { %v10839_v33 = vpop.permute.xlu1 %3552 }
 0x6a4   : > { %16255 = vst [vmem:[#allocation589_spill] sm:$0xff] %v10839_v33  ;;  %v10841_v60 = vpop.permute.xlu0 %3550 }
 0x6a5   : > { %16256 = vst [vmem:[#allocation592_spill] sm:$0xff] %v10841_v60  ;;  %3705 = vrot.lane.b32.xlu1 %v16257_v14, %s5975_s11  ;;  %v5807_v14 = vld [vmem:[%s6067_s30 + $0x340] sm:$0xff] }
 0x6a6   : > { %3673 = vrot.lane.b32.xlu0 %v16258_v21, %s5975_s11  ;;  %v10862_v21 = vld [vmem:[%s6067_s30 + $0x208] sm:$0x3] }
 0x6a7   : > { %v10847_v30 = vpop.permute.xlu1 %3693 }
 0x6a8   : > { %16259 = vst [vmem:[#allocation478_spill] sm:$0xff] %v10847_v30  ;;  %v10849_v54 = vpop.permute.xlu0 %3661  ;;  %v10871_v30 = vld [vmem:[%s6067_s30 + $0x218] sm:$0x3] }
 0x6a9   : > { %16260 = vst [vmem:[#allocation451_spill] sm:$0xff] %v10849_v54  ;;  %3707 = vrot.lane.b32.xlu1 %v16261_v38, %s5975_s11 }
 0x6aa   : > { %3675 = vrot.lane.b32.xlu0 %v16262_v62, %s5975_s11  ;;  %v5810_v62 = vld [vmem:[%s6067_s30 + $0x348] sm:$0x3] }
 0x6ab   : > { %v10855_v33 = vpop.permute.xlu1 %3695 }
 0x6ac   : > { %16263 = vst [vmem:[#allocation477_spill] sm:$0xff] %v10855_v33  ;;  %v10857_v60 = vpop.permute.xlu0 %3663  ;;  %v5811_v33 = vld [vmem:[%s6067_s30 + $0x358] sm:$0x3] }
 0x6ad   : > { %16264 = vst [vmem:[#allocation450_spill] sm:$0xff] %v10857_v60  ;;  %3814 = vrot.lane.b32.xlu1 %v5807_v14, %s5976_s18 }
 0x6ae   : > { %3774 = vrot.lane.b32.xlu0 %v10862_v21, %s5976_s18 }
 0x6af   : > { %v10866_v54 = vpop.permute.xlu1 %3798 }
 0x6b0   : > { %16265 = vst [vmem:[#allocation753_spill] sm:$0xff] %v10866_v54  ;;  %v10868_v38 = vpop.permute.xlu0 %3758 }
 0x6b1   : > { %16266 = vst [vmem:[#allocation754_spill] sm:$0xff] %v10868_v38  ;;  %3776 = vrot.lane.b32.xlu1 %v10871_v30, %s5976_s18 }
 0x6b2   : > { %3816 = vrot.lane.b32.xlu0 %v5810_v62, %s5976_s18 }
 0x6b3   : > { %v10877_v60 = vpop.permute.xlu1 %3800 }
 0x6b4   : > { %16267 = vst [vmem:[#allocation755_spill] sm:$0xff] %v10877_v60  ;;  %v10879_v14 = vpop.permute.xlu0 %3760  ;;  %v16281_v60 = vld [vmem:[#allocation50_spill] sm:$0xff] }
 0x6b5   : > { %16268 = vst [vmem:[#allocation756_spill] sm:$0xff] %v10879_v14  ;;  %3820 = vrot.lane.b32.xlu1 %v5811_v33, %s5976_s18  ;;  %v16273_v33 = vld [vmem:[#allocation596_spill] sm:$0xff] }
 0x6b6   : > { %3818 = vrot.lane.b32.xlu0 %v5812_v6, %s5976_s18 }
 0x6b7   : > { %v10885_v54 = vpop.permute.xlu1 %3939 }
 0x6b8   : > { %16269 = vst [vmem:[#allocation757_spill] sm:$0xff] %v10885_v54  ;;  %v10887_v38 = vpop.permute.xlu0 %3899  ;;  %v16283_v54 = vld [vmem:[#allocation56_spill] sm:$0xff] }
 0x6b9   : > { %16270 = vst [vmem:[#allocation758_spill] sm:$0xff] %v10887_v38  ;;  %3955 = vrot.lane.b32.xlu1 %v16254_v45, %s5977_s19 }
 0x6ba   : > { %3915 = vrot.lane.b32.xlu0 %v15762_v51, %s5977_s19  ;;  %v16276_v51 = vld [vmem:[#allocation593_spill] sm:$0xff] }
 0x6bb   : > { %v10893_v62 = vpop.permute.xlu1 %3556 }
 0x6bc   : > { %16271 = vst [vmem:[#allocation759_spill] sm:$0xff] %v10893_v62  ;;  %v10895_v14 = vpop.permute.xlu0 %3554 }
 0x6bd   : > { %16272 = vst [vmem:[#allocation760_spill] sm:$0xff] %v10895_v14  ;;  %3578 = vrot.lane.b32.xlu1 %v16273_v33, %s5974_s10  ;;  %v5814_v14 = vld [vmem:[%s6067_s30] sm:$0xff] }
 0x6be   : > { %3957 = vrot.lane.b32.xlu0 %v16253_v0, %s5977_s19 }
 0x6bf   : > { %v10901_v6 = vpop.permute.xlu1 %3941 }
 0x6c0   : > { %16274 = vst [vmem:[#allocation596_spill] sm:$0xff] %v10901_v6  ;;  %v10903_v38 = vpop.permute.xlu0 %3901 }
 0x6c1   : > { %16275 = vst [vmem:[#allocation761_spill] sm:$0xff] %v10903_v38  ;;  %3917 = vrot.lane.b32.xlu1 %v15761_v35, %s5977_s19  ;;  %v5813_v38 = vld [vmem:[%s6067_s30 + $0x20] sm:$0xff]  ;;  %v16280_v35 = vld [vmem:[#allocation48_spill] sm:$0xff] }
 0x6c2   : > { %3580 = vrot.lane.b32.xlu0 %v16276_v51, %s5974_s10  ;;  %v2145_v6 = vsel %vm2142_vm2, %v5813_v38, %v16280_v35  ;;  %v2148_v38 = vsel %vm2142_vm2, %v5817_v39, %v16285_v36  ;;  %v5818_v35 = vld [vmem:[%s6067_s30 + $0x40] sm:$0xff]  ;;  %v16290_v36 = vld [vmem:[#allocation84_spill] sm:$0xff] }
 0x6c3   : > { %v10909_v45 = vpop.permute.xlu1 %3560  ;;  %v2152_v39 = vsel %vm2142_vm2, %v5821_v59, %v16290_v36  ;;  %v5825_v59 = vld [vmem:[%s6067_s30 + $0xe0] sm:$0xff] }
 0x6c4   : > { %16277 = vst [vmem:[#allocation593_spill] sm:$0xff] %v10909_v45  ;;  %v10911_v62 = vpop.permute.xlu0 %3558  ;;  %v2143_v45 = vsel %vm2142_vm2, %v5814_v14, %v16281_v60  ;;  %v2147_v60 = vsel %vm2142_vm2, %v5818_v35, %v16286_v50  ;;  %v16287_v14 = vld [vmem:[#allocation597_spill] sm:$0xff] }
 0x6c5   : > { %16278 = vst [vmem:[#allocation762_spill] sm:$0xff] %v10911_v62  ;;  %3961 = vrot.lane.b32.xlu1 %v16276_v51, %s5977_s19  ;;  %v5815_v51 = vld [vmem:[%s6067_s30 + $0x30] sm:$0xff]  ;;  %v16291_v50 = vld [vmem:[#allocation85_spill] sm:$0xff] }
 0x6c6   : > { %3959 = vrot.lane.b32.xlu0 %v16273_v33, %s5977_s19  ;;  %v2146_v33 = vsel %vm2142_vm2, %v5815_v51, %v16283_v54  ;;  %v5819_v54 = vld [vmem:[%s6067_s30 + $0x70] sm:$0xff]  ;;  %v16288_v51 = vld [vmem:[#allocation82_spill] sm:$0xff]  ;;  %v2151_v35 = vsel %vm2142_vm2, %v5822_v20, %v16291_v50  ;;  %v16295_v36 = vld [vmem:[#allocation89_spill] sm:$0xff] }
 0x6c7   : > { %v10917_v0 = vpop.permute.xlu1 %3697  ;;  %v10968_v20 = vsel %vm2142_vm2, %v5825_v59, %v16295_v36  ;;  %v5826_v50 = vld [vmem:[%s6067_s30 + $0x150] sm:$0xff]  ;;  %v5829_v59 = vld [vmem:[%s6067_s30 + $0x160] sm:$0xff] }
 0x6c8   : > { %16279 = vst [vmem:[#allocation763_spill] sm:$0xff] %v10917_v0  ;;  %v10925_v62 = vpop.permute.xlu0 %3665  ;;  %v2144_v0 = vsel %vm2142_vm2, %v5816_v31, %v16284_v2  ;;  %v16289_v2 = vld [vmem:[#allocation83_spill] sm:$0xff]  ;;  %16296 = vst [vmem:[#allocation50_spill] sm:$0xff] %v10968_v20  ;;  %v2160_v40 = vsel %vm2142_vm2, %v5826_v50, %v16297_v16  ;;  %v16302_v50 = vld [vmem:[#allocation96_spill] sm:$0xff] }
 0x6c9   : > { %16282 = vst [vmem:[#allocation48_spill] sm:$0xff] %v10925_v62  ;;  %3584 = vrot.lane.b32.xlu1 %v16287_v14, %s5974_s10  ;;  %v2150_v62 = vsel %vm2142_vm2, %v5819_v54, %v16288_v51  ;;  %v2149_v31 = vsel %vm2142_vm2, %v5820_v23, %v16289_v2  ;;  %v5823_v54 = vld [vmem:[%s6067_s30 + $0xd0] sm:$0xff]  ;;  %v16293_v51 = vld [vmem:[#allocation86_spill] sm:$0xff]  ;;  %v5824_v23 = vld [vmem:[%s6067_s30 + $0xc0] sm:$0xff] }
 0x6ca   : > { %3582 = vrot.lane.b32.xlu0 %v16292_v11, %s5974_s10  ;;  %v10958_v61 = vsel %vm2142_vm2, %v5823_v54, %v16293_v51  ;;  %v16294_v2 = vld [vmem:[#allocation87_spill] sm:$0xff]  ;;  %v5827_v54 = vld [vmem:[%s6067_s30 + $0x140] sm:$0xff] }
 0x6cb   : > { %v10963_v25 = vsel %vm2142_vm2, %v5824_v23, %v16294_v2  ;;  %v10973_v4 = vpop.permute.xlu1 %3699  ;;  %v16299_v51 = vld [vmem:[#allocation93_spill] sm:$0xff]  ;;  %v5828_v23 = vld [vmem:[%s6067_s30 + $0x170] sm:$0xff]  ;;  %v16300_v2 = vld [vmem:[#allocation94_spill] sm:$0xff] }
 0x6cc   : > { %16298 = vst [vmem:[#allocation56_spill] sm:$0xff] %v10973_v4  ;;  %v2159_v18 = vsel %vm2142_vm2, %v5827_v54, %v16299_v51  ;;  %v10981_v15 = vsel %vm2142_vm2, %v5828_v23, %v16300_v2  ;;  %v16301_v36 = vld [vmem:[#allocation95_spill] sm:$0xff]  ;;  %v10993_v37 = vpop.permute.xlu0 %3667  ;;  %v5831_v54 = vld [vmem:[%s6067_s30 + $0x180] sm:$0xff]  ;;  %v16305_v2 = vld [vmem:[#allocation98_spill] sm:$0xff] }
 0x6cd   : > { %v10986_v12 = vsel %vm2142_vm2, %v5829_v59, %v16301_v36  ;;  %v5830_v16 = vld [vmem:[%s6067_s30 + $0x190] sm:$0xff]  ;;  %16303 = vst [vmem:[#allocation57_spill] sm:$0xff] %v10993_v37  ;;  %v16304_v51 = vld [vmem:[#allocation97_spill] sm:$0xff]  ;;  %v16309_v37 = vld [vmem:[#allocation482_spill] sm:$0xff] }
 0x6ce   : > { %v10991_v4 = vsel %vm2142_vm2, %v5830_v16, %v16302_v50  ;;  %v10998_v7 = vsel %vm2142_vm2, %v5831_v54, %v16304_v51  ;;  %v5832_v23 = vld [vmem:[%s6067_s30 + $0x1b0] sm:$0xff]  ;;  %v5833_v59 = vld [vmem:[%s6067_s30 + $0x1a0] sm:$0xff]  ;;  %v16308_v16 = vld [vmem:[#allocation100_spill] sm:$0xff]  ;;  %3709 = vrot.lane.b32.xlu1 %v16309_v37, %s5975_s11 }
 0x6cf   : > { %v11003_v47 = vsel %vm2142_vm2, %v5832_v23, %v16305_v2  ;;  %v16307_v36 = vld [vmem:[#allocation99_spill] sm:$0xff]  ;;  %v2168_v50 = vsel %vm2142_vm2, %v5834_v28, %v16308_v16  ;;  %v16310_v54 = vld [vmem:[#allocation101_spill] sm:$0xff]  ;;  %v11021_v23 = vsel %vm2142_vm2, %v5836_v32, %v16311_v55  ;;  %v2178_v55 = vsel %vm2175_vm3, %v2145_v6, %v16317_v1  ;;  %v16318_v32 = vld [vmem:[#allocation112_spill] sm:$0xff] }
 0x6d0   : > { %16306 = vst [vmem:[#allocation80_spill] sm:$0xff] %v11003_v47  ;;  %v11008_v34 = vsel %vm2142_vm2, %v5833_v59, %v16307_v36  ;;  %v2167_v51 = vsel %vm2142_vm2, %v5835_v17, %v16310_v54  ;;  %v5837_v2 = vld [vmem:[%s6067_s30 + $0x200] sm:$0xff]  ;;  %v16313_v36 = vld [vmem:[#allocation108_spill] sm:$0xff]  ;;  %v16314_v16 = vld [vmem:[#allocation455_spill] sm:$0xff]  ;;  %v2181_v58 = vsel %vm2175_vm3, %v2148_v38, %v16318_v32 }
 0x6d1   : > { %v11026_v59 = vsel %vm2142_vm2, %v5837_v2, %v16312_v13  ;;  %v2177_v28 = vsel %vm2175_vm3, %v2144_v0, %v16313_v36  ;;  %3677 = vrot.lane.b32.xlu0 %v16314_v16, %s5975_s11  ;;  %v16315_v37 = vld [vmem:[#allocation109_spill] sm:$0xff]  ;;  %v16316_v17 = vld [vmem:[#allocation110_spill] sm:$0xff]  ;;  %v11040_v13 = vpop.permute.xlu1 %3802  ;;  %v16325_v1 = vld [vmem:[#allocation7_spill] sm:$0xff] }
 0x6d2   : > { %v2176_v29 = vsel %vm2175_vm3, %v2143_v45, %v16315_v37  ;;  %v2179_v54 = vsel %vm2175_vm3, %v2146_v33, %v16316_v17  ;;  %16319 = vst [vmem:[#allocation81_spill] sm:$0xff] %v11040_v13  ;;  %v16320_v2 = vld [vmem:[#allocation113_spill] sm:$0xff]  ;;  %v16321_v36 = vld [vmem:[#allocation114_spill] sm:$0xff]  ;;  %v2182_v45 = vsel %vm2175_vm3, %v2149_v31, %v16322_v53  ;;  %v11050_v17 = vpop.permute.xlu0 %3762  ;;  %v2184_v6 = vsel %vm2175_vm3, %v2151_v35, %v16325_v1 }
 0x6d3   : > { %v2180_v0 = vsel %vm2175_vm3, %v2147_v60, %v16320_v2  ;;  %v2183_v16 = vsel %vm2175_vm3, %v2150_v62, %v16321_v36  ;;  %v16323_v37 = vld [vmem:[#allocation5_spill] sm:$0xff]  ;;  %16324 = vst [vmem:[#allocation597_spill] sm:$0xff] %v11050_v17  ;;  %v16327_v13 = vld [vmem:[#allocation6_spill] sm:$0xff]  ;;  %v16328_v62 = vld [vmem:[#allocation19_spill] sm:$0xff] }
 0x6d4   : > { %v2185_v33 = vsel %vm2175_vm3, %v2152_v39, %v16323_v37  ;;  %v16326_v38 = vld [vmem:[#allocation9_spill] sm:$0xff]  ;;  %v2186_v60 = vsel %vm2175_vm3, %v10963_v25, %v16327_v13  ;;  %v2193_v2 = vsel %vm2175_vm3, %v2160_v40, %v16328_v62  ;;  %v16330_v31 = vld [vmem:[#allocation118_spill] sm:$0xff]  ;;  %v16331_v36 = vld [vmem:[#allocation119_spill] sm:$0xff] }
 0x6d5   : > { %v2187_v32 = vsel %vm2175_vm3, %v10958_v61, %v16326_v38  ;;  %v16329_v53 = vld [vmem:[#allocation481_spill] sm:$0xff]  ;;  %v2192_v39 = vsel %vm2175_vm3, %v2159_v18, %v16330_v31  ;;  %v2195_v35 = vsel %vm2175_vm3, %v10981_v15, %v16331_v36  ;;  %v16332_v37 = vld [vmem:[#allocation120_spill] sm:$0xff]  ;;  %v16333_v38 = vld [vmem:[#allocation122_spill] sm:$0xff] }
 0x6d6   : > { %3711 = vrot.lane.b32.xlu1 %v16329_v53, %s5975_s11  ;;  %v2194_v1 = vsel %vm2175_vm3, %v10986_v12, %v16332_v37  ;;  %v2197_v13 = vsel %vm2175_vm3, %v10991_v4, %v16333_v38  ;;  %v16334_v40 = vld [vmem:[#allocation454_spill] sm:$0xff]  ;;  %v16335_v62 = vld [vmem:[#allocation123_spill] sm:$0xff]  ;;  %v16336_v53 = vld [vmem:[#allocation124_spill] sm:$0xff]  ;;  %v11088_v38 = vpop.permute.xlu1 %3804  ;;  %v11100_v9 = vpop.permute.xlu0 %3764 }
 0x6d7   : > { %3679 = vrot.lane.b32.xlu0 %v16334_v40, %s5975_s11  ;;  %v2196_v18 = vsel %vm2175_vm3, %v10998_v7, %v16335_v62  ;;  %v2199_v31 = vsel %vm2175_vm3, %v11003_v47, %v16336_v53  ;;  %v16337_v36 = vld [vmem:[#allocation125_spill] sm:$0xff]  ;;  %v16338_v17 = vld [vmem:[#allocation126_spill] sm:$0xff]  ;;  %16339 = vst [vmem:[#allocation82_spill] sm:$0xff] %v11088_v38  ;;  %v2200_v40 = vsel %vm2175_vm3, %v2167_v51, %v16340_v10  ;;  %v16343_v47 = vld [vmem:[#allocation136_spill] sm:$0xff] }
 0x6d8   : > { %v2198_v37 = vsel %vm2175_vm3, %v11008_v34, %v16337_v36  ;;  %v2201_v8 = vsel %vm2175_vm3, %v2168_v50, %v16338_v17  ;;  %v2203_v62 = vsel %vm2175_vm3, %v11021_v23, %v16341_v42  ;;  %v2202_v53 = vsel %vm2175_vm3, %v11026_v59, %v16342_v43  ;;  %16344 = vst [vmem:[#allocation83_spill] sm:$0xff] %v11100_v9  ;;  %v16345_v50 = vld [vmem:[#allocation137_spill] sm:$0xff]  ;;  %v16346_v38 = vld [vmem:[#allocation139_spill] sm:$0xff]  ;;  %v16347_v10 = vld [vmem:[#allocation140_spill] sm:$0xff] }
 0x6d9   : > { %v2210_v36 = vsel %vm2208_vm4, %v2177_v28, %v16343_v47  ;;  %v2209_v17 = vsel %vm2208_vm4, %v2176_v29, %v16345_v50  ;;  %v2212_v22 = vsel %vm2208_vm4, %v2179_v54, %v16346_v38  ;;  %v2211_v51 = vsel %vm2208_vm4, %v2178_v55, %v16347_v10  ;;  %v16349_v43 = vld [vmem:[#allocation143_spill] sm:$0xff]  ;;  %v16350_v28 = vld [vmem:[#allocation144_spill] sm:$0xff]  ;;  %v16352_v50 = vld [vmem:[#allocation146_spill] sm:$0xff]  ;;  %16455 = vst [vmem:[#allocation124_spill] sm:$0xff] %v11401_v41 }
 0x6da   : > { %v2214_v42 = vsel %vm2208_vm4, %v2181_v58, %v16348_v27  ;;  %3822 = vrot.lane.b32.xlu1 %v5838_v49, %s5976_s18  ;;  %v2213_v47 = vsel %vm2208_vm4, %v2180_v0, %v16349_v43  ;;  %v2216_v9 = vsel %vm2208_vm4, %v2183_v16, %v16350_v28  ;;  %v2215_v29 = vsel %vm2208_vm4, %v2182_v45, %v16351_v52  ;;  %v11121_v38 = vld [vmem:[%s6067_s30 + $0x228] sm:$0x3]  ;;  %v16353_v58 = vld [vmem:[#allocation147_spill] sm:$0xff]  ;;  %v16354_v27 = vld [vmem:[#allocation148_spill] sm:$0xff]  ;;  %v11133_v45 = vpop.permute.xlu1 %3943 }
 0x6db   : > { %v2218_v54 = vsel %vm2208_vm4, %v2185_v33, %v16352_v50  ;;  %3778 = vrot.lane.b32.xlu0 %v11121_v38, %s5976_s18  ;;  %v2217_v49 = vsel %vm2208_vm4, %v2184_v6, %v16353_v58  ;;  %v2220_v55 = vsel %vm2208_vm4, %v2187_v32, %v16354_v27  ;;  %v16355_v0 = vld [vmem:[#allocation149_spill] sm:$0xff]  ;;  %v16356_v10 = vld [vmem:[#allocation154_spill] sm:$0xff]  ;;  %16357 = vst [vmem:[#allocation84_spill] sm:$0xff] %v11133_v45  ;;  %v16358_v33 = vld [vmem:[#allocation155_spill] sm:$0xff]  ;;  %v11143_v27 = vpop.permute.xlu0 %3903 }
 0x6dc   : > { %v2219_v16 = vsel %vm2208_vm4, %v2186_v60, %v16355_v0  ;;  %v2226_v52 = vsel %vm2208_vm4, %v2193_v2, %v16356_v10  ;;  %v2225_v43 = vsel %vm2208_vm4, %v2192_v39, %v16358_v33  ;;  %v16359_v28 = vld [vmem:[#allocation156_spill] sm:$0xff]  ;;  %v2227_v6 = vsel %vm2208_vm4, %v2194_v1, %v16360_v56  ;;  %v16361_v58 = vld [vmem:[#allocation159_spill] sm:$0xff]  ;;  %16362 = vst [vmem:[#allocation85_spill] sm:$0xff] %v11143_v27  ;;  %v16364_v0 = vld [vmem:[#allocation161_spill] sm:$0xff] }
 0x6dd   : > { %v2228_v50 = vsel %vm2208_vm4, %v2195_v35, %v16359_v28  ;;  %v2230_v32 = vsel %vm2208_vm4, %v2197_v13, %v16361_v58  ;;  %v16363_v60 = vld [vmem:[#allocation160_spill] sm:$0xff]  ;;  %v2232_v45 = vsel %vm2208_vm4, %v2199_v31, %v16364_v0  ;;  %v2231_v39 = vsel %vm2208_vm4, %v2198_v37, %v16365_v48  ;;  %v16368_v27 = vld [vmem:[#allocation165_spill] sm:$0xff]  ;;  %v16372_v37 = vld [vmem:[#allocation170_spill] sm:$0xff] }
 0x6de   : > { %v2229_v2 = vsel %vm2208_vm4, %v2196_v18, %v16363_v60  ;;  %v2234_v35 = vsel %vm2208_vm4, %v2201_v8, %v16366_v5  ;;  %3780 = vrot.lane.b32.xlu1 %v11154_v3, %s5976_s18  ;;  %v16367_v1 = vld [vmem:[#allocation164_spill] sm:$0xff]  ;;  %v11162_v18 = vsel %vm2208_vm4, %v2203_v62, %v16368_v27  ;;  %v11166_v31 = vsel %vm2208_vm4, %v2202_v53, %v16370_v44  ;;  %v5841_v8 = vld [vmem:[%s6067_s30 + $0x368] sm:$0x3]  ;;  %v16378_v27 = vld [vmem:[#allocation173_spill] sm:$0xff] }
 0x6df   : > { %v2233_v13 = vsel %vm2208_vm4, %v2200_v40, %v16367_v1  ;;  %16369 = vst [vmem:[#allocation600_spill] sm:$0xff] %v11162_v18  ;;  %16371 = vst [vmem:[#allocation86_spill] sm:$0xff] %v11166_v31  ;;  %v11170_v0 = vsel %vm2241_vm5, %v2210_v36, %v16372_v37  ;;  %3824 = vrot.lane.b32.xlu0 %v5841_v8, %s5976_s18  ;;  %v11176_v24 = vsel %vm2241_vm5, %v2209_v17, %v16374_v19  ;;  %v16376_v40 = vld [vmem:[#allocation172_spill] sm:$0xff]  ;;  %v16380_v31 = vld [vmem:[#allocation175_spill] sm:$0xff]  ;;  %v11190_v37 = vpop.permute.xlu1 %3564 }
 0x6e0   : > { %16373 = vst [vmem:[#allocation87_spill] sm:$0xff] %v11170_v0  ;;  %16375 = vst [vmem:[#allocation89_spill] sm:$0xff] %v11176_v24  ;;  %v11180_v62 = vsel %vm2241_vm5, %v2212_v22, %v16376_v40  ;;  %v11184_v53 = vsel %vm2241_vm5, %v2211_v51, %v16378_v27  ;;  %v11188_v36 = vsel %vm2241_vm5, %v2214_v42, %v16380_v31  ;;  %v16383_v0 = vld [vmem:[#allocation176_spill] sm:$0xff]  ;;  %v16385_v19 = vld [vmem:[#allocation177_spill] sm:$0xff]  ;;  %v11208_v42 = vpop.permute.xlu0 %3562 }
 0x6e1   : > { %16377 = vst [vmem:[#allocation92_spill] sm:$0xff] %v11180_v62  ;;  %16379 = vst [vmem:[#allocation93_spill] sm:$0xff] %v11184_v53  ;;  %v11194_v8 = vsel %vm2241_vm5, %v2213_v47, %v16383_v0  ;;  %v11198_v17 = vsel %vm2241_vm5, %v2216_v9, %v16385_v19  ;;  %v16387_v22 = vld [vmem:[#allocation178_spill] sm:$0xff]  ;;  %v16389_v51 = vld [vmem:[#allocation179_spill] sm:$0xff] }
 0x6e2   : > { %16381 = vst [vmem:[#allocation94_spill] sm:$0xff] %v11188_v36  ;;  %16382 = vst [vmem:[#allocation95_spill] sm:$0xff] %v11190_v37  ;;  %v11202_v40 = vsel %vm2241_vm5, %v2215_v29, %v16387_v22  ;;  %v11206_v27 = vsel %vm2241_vm5, %v2218_v54, %v16389_v51  ;;  %v16392_v31 = vld [vmem:[#allocation180_spill] sm:$0xff]  ;;  %v16394_v47 = vld [vmem:[#allocation181_spill] sm:$0xff] }
 0x6e3   : > { %16384 = vst [vmem:[#allocation96_spill] sm:$0xff] %v11194_v8  ;;  %16386 = vst [vmem:[#allocation97_spill] sm:$0xff] %v11198_v17  ;;  %v11212_v36 = vsel %vm2241_vm5, %v2217_v49, %v16392_v31  ;;  %v11216_v0 = vsel %vm2241_vm5, %v2220_v55, %v16394_v47  ;;  %v16396_v9 = vld [vmem:[#allocation182_spill] sm:$0xff]  ;;  %v16398_v29 = vld [vmem:[#allocation187_spill] sm:$0xff] }
 0x6e4   : > { %16388 = vst [vmem:[#allocation98_spill] sm:$0xff] %v11202_v40  ;;  %16390 = vst [vmem:[#allocation99_spill] sm:$0xff] %v11206_v27  ;;  %v11220_v19 = vsel %vm2241_vm5, %v2219_v16, %v16396_v9  ;;  %v11224_v22 = vsel %vm2241_vm5, %v2226_v52, %v16398_v29  ;;  %v5842_v54 = vld [vmem:[%s6067_s30 + $0x378] sm:$0x3]  ;;  %v16402_v31 = vld [vmem:[#allocation190_spill] sm:$0xff] }
 0x6e5   : > { %16391 = vst [vmem:[#allocation100_spill] sm:$0xff] %v11208_v42  ;;  %16393 = vst [vmem:[#allocation482_spill] sm:$0xff] %v11212_v36  ;;  %3828 = vrot.lane.b32.xlu1 %v5842_v54, %s5976_s18  ;;  %v16400_v51 = vld [vmem:[#allocation188_spill] sm:$0xff]  ;;  %v11234_v55 = vsel %vm2241_vm5, %v2228_v50, %v16402_v31  ;;  %v16404_v16 = vld [vmem:[#allocation191_spill] sm:$0xff] }
 0x6e6   : > { %16395 = vst [vmem:[#allocation101_spill] sm:$0xff] %v11216_v0  ;;  %16397 = vst [vmem:[#allocation102_spill] sm:$0xff] %v11220_v19  ;;  %v11230_v49 = vsel %vm2241_vm5, %v2225_v43, %v16400_v51  ;;  %v11238_v47 = vsel %vm2241_vm5, %v2227_v6, %v16404_v16  ;;  %v16406_v9 = vld [vmem:[#allocation192_spill] sm:$0xff]  ;;  %v16408_v54 = vld [vmem:[#allocation193_spill] sm:$0xff] }
 0x6e7   : > { %16399 = vst [vmem:[#allocation103_spill] sm:$0xff] %v11224_v22  ;;  %16401 = vst [vmem:[#allocation108_spill] sm:$0xff] %v11230_v49  ;;  %v11242_v52 = vsel %vm2241_vm5, %v2230_v32, %v16406_v9  ;;  %v5843_v22 = vld [vmem:[%s6067_s30 + $0x370] sm:$0xff]  ;;  %v11248_v43 = vsel %vm2241_vm5, %v2229_v2, %v16408_v54  ;;  %v16410_v49 = vld [vmem:[#allocation194_spill] sm:$0xff] }
 0x6e8   : > { %16403 = vst [vmem:[#allocation455_spill] sm:$0xff] %v11234_v55  ;;  %16405 = vst [vmem:[#allocation109_spill] sm:$0xff] %v11238_v47  ;;  %3826 = vrot.lane.b32.xlu0 %v5843_v22, %s5976_s18  ;;  %v11252_v50 = vsel %vm2241_vm5, %v2232_v45, %v16410_v49  ;;  %v16412_v55 = vld [vmem:[#allocation195_spill] sm:$0xff]  ;;  %v16414_v32 = vld [vmem:[#allocation196_spill] sm:$0xff]  ;;  %v11262_v22 = vpop.permute.xlu1 %3945 }
 0x6e9   : > { %16407 = vst [vmem:[#allocation110_spill] sm:$0xff] %v11242_v52  ;;  %16409 = vst [vmem:[#allocation111_spill] sm:$0xff] %v11248_v43  ;;  %v11256_v6 = vsel %vm2241_vm5, %v2231_v39, %v16412_v55  ;;  %v11260_v52 = vsel %vm2241_vm5, %v2234_v35, %v16414_v32  ;;  %v16417_v47 = vld [vmem:[#allocation197_spill] sm:$0xff]  ;;  %v5844_v43 = vld [vmem:[%s6067_s30 + $0xd8] sm:$0x3]  ;;  %3963 = vrot.lane.b32.xlu1 %v16292_v11, %s5977_s19 }
 0x6ea   : > { %16411 = vst [vmem:[#allocation112_spill] sm:$0xff] %v11252_v50  ;;  %16413 = vst [vmem:[#allocation113_spill] sm:$0xff] %v11256_v6  ;;  %v11266_v2 = vsel %vm2241_vm5, %v2233_v13, %v16417_v47  ;;  %v16419_v19 = vld [vmem:[#allocation456_spill] sm:$0xff]  ;;  %v5845_v49 = vld [vmem:[%s6067_s30 + $0xc8] sm:$0x3]  ;;  %v11283_v13 = vpop.permute.xlu0 %3905 }
 0x6eb   : > { %16415 = vst [vmem:[#allocation114_spill] sm:$0xff] %v11260_v52  ;;  %16416 = vst [vmem:[#allocation115_spill] sm:$0xff] %v11262_v22  ;;  %v11271_v45 = vsel %vm2142_vm2, %v5844_v43, %v16419_v19  ;;  %v16420_v39 = vld [vmem:[#allocation457_spill] sm:$0xff]  ;;  %v5846_v35 = vld [vmem:[%s6067_s30 + $0xf8] sm:$0x3] }
 0x6ec   : > { %16418 = vst [vmem:[#allocation5_spill] sm:$0xff] %v11266_v2  ;;  %v11276_v6 = vsel %vm2142_vm2, %v5845_v49, %v16420_v39  ;;  %v16421_v52 = vld [vmem:[#allocation460_spill] sm:$0xff]  ;;  %16422 = vst [vmem:[#allocation7_spill] sm:$0xff] %v11283_v13  ;;  %v5847_v2 = vld [vmem:[%s6067_s30 + $0xe8] sm:$0x3]  ;;  %3919 = vrot.lane.b32.xlu0 %v15764_v57, %s5977_s19  ;;  %v11347_v13 = vpop.permute.xlu1 %3568 }
 0x6ed   : > { %v11281_v50 = vsel %vm2142_vm2, %v5846_v35, %v16421_v52  ;;  %v16423_v0 = vld [vmem:[#allocation461_spill] sm:$0xff]  ;;  %v5848_v43 = vld [vmem:[%s6067_s30 + $0x118] sm:$0x3]  ;;  %v16424_v36 = vld [vmem:[#allocation462_spill] sm:$0xff]  ;;  %16435 = vst [vmem:[#allocation9_spill] sm:$0xff] %v11347_v13 }
 0x6ee   : > { %v11288_v19 = vsel %vm2142_vm2, %v5847_v2, %v16423_v0  ;;  %v11293_v49 = vsel %vm2142_vm2, %v5848_v43, %v16424_v36  ;;  %v5849_v39 = vld [vmem:[%s6067_s30 + $0x108] sm:$0x3]  ;;  %v16425_v27 = vld [vmem:[#allocation463_spill] sm:$0xff]  ;;  %v16426_v40 = vld [vmem:[#allocation465_spill] sm:$0xff] }
 0x6ef   : > { %v11298_v52 = vsel %vm2142_vm2, %v5849_v39, %v16425_v27  ;;  %v5850_v35 = vld [vmem:[%s6067_s30 + $0x128] sm:$0x3]  ;;  %v5851_v0 = vld [vmem:[%s6067_s30 + $0x120] sm:$0xff]  ;;  %v5852_v43 = vld [vmem:[%s6067_s30 + $0x138] sm:$0x3] }
 0x6f0   : > { %v11303_v17 = vsel %vm2142_vm2, %v5850_v35, %v16426_v40  ;;  %v16427_v2 = vld [vmem:[#allocation466_spill] sm:$0xff]  ;;  %v16428_v8 = vld [vmem:[#allocation469_spill] sm:$0xff]  ;;  %v5853_v27 = vld [vmem:[%s6067_s30 + $0x130] sm:$0xff]  ;;  %3965 = vrot.lane.b32.xlu0 %v16287_v14, %s5977_s19  ;;  %v11446_v14 = vpop.permute.xlu1 %3701 }
 0x6f1   : > { %v11310_v36 = vsel %vm2142_vm2, %v5851_v0, %v16427_v2  ;;  %v11315_v53 = vsel %vm2142_vm2, %v5852_v43, %v16428_v8  ;;  %v16429_v39 = vld [vmem:[#allocation470_spill] sm:$0xff]  ;;  %v5854_v40 = vld [vmem:[%s6067_s30 + $0x178] sm:$0x3]  ;;  %v16430_v35 = vld [vmem:[#allocation473_spill] sm:$0xff]  ;;  %16475 = vst [vmem:[#allocation140_spill] sm:$0xff] %v11446_v14 }
 0x6f2   : > { %v4041_v62 = vsel %vm2142_vm2, %v5853_v27, %v16429_v39  ;;  %v11323_v24 = vsel %vm2142_vm2, %v5854_v40, %v16430_v35  ;;  %v5855_v11 = vld [vmem:[%s6067_s30 + $0x168] sm:$0x3]  ;;  %v5856_v8 = vld [vmem:[%s6067_s30 + $0x198] sm:$0x3]  ;;  %v16432_v43 = vld [vmem:[#allocation475_spill] sm:$0xff] }
 0x6f3   : > { %v16431_v0 = vld [vmem:[#allocation474_spill] sm:$0xff]  ;;  %v11335_v18 = vsel %vm2142_vm2, %v5856_v8, %v16432_v43  ;;  %v16433_v39 = vld [vmem:[#allocation476_spill] sm:$0xff]  ;;  %v16434_v35 = vld [vmem:[#allocation489_spill] sm:$0xff] }
 0x6f4   : > { %v11330_v2 = vsel %vm2142_vm2, %v5855_v11, %v16431_v0  ;;  %v5857_v27 = vld [vmem:[%s6067_s30 + $0x188] sm:$0x3]  ;;  %v11345_v57 = vsel %vm2142_vm2, %v10871_v30, %v16434_v35  ;;  %v16437_v8 = vld [vmem:[#allocation491_spill] sm:$0xff]  ;;  %v11365_v30 = vld [vmem:[%s6067_s30 + $0x258] sm:$0x3] }
 0x6f5   : > { %v11340_v40 = vsel %vm2142_vm2, %v5857_v27, %v16433_v39  ;;  %v16436_v11 = vld [vmem:[#allocation490_spill] sm:$0xff]  ;;  %v11357_v43 = vsel %vm2142_vm2, %v11154_v3, %v16437_v8  ;;  %v16438_v27 = vld [vmem:[#allocation492_spill] sm:$0xff]  ;;  %16440 = vst [vmem:[#allocation19_spill] sm:$0xff] %v11365_v30  ;;  %v16441_v35 = vld [vmem:[#allocation495_spill] sm:$0xff] }
 0x6f6   : > { %v11352_v0 = vsel %vm2142_vm2, %v10862_v21, %v16436_v11  ;;  %v11362_v39 = vsel %vm2142_vm2, %v11121_v38, %v16438_v27  ;;  %v11370_v13 = vsel %vm2142_vm2, %v11365_v30, %v16441_v35  ;;  %v11372_v21 = vpop.permute.xlu0 %3566  ;;  %v11375_v11 = vld [vmem:[%s6067_s30 + $0x248] sm:$0x3]  ;;  %v16445_v3 = vld [vmem:[#allocation496_spill] sm:$0xff]  ;;  %v16447_v22 = vld [vmem:[#allocation499_spill] sm:$0xff] }
 0x6f7   : > { %16439 = vst [vmem:[#allocation6_spill] sm:$0xff] %v11362_v39  ;;  %16442 = vst [vmem:[#allocation481_spill] sm:$0xff] %v11370_v13  ;;  %v11380_v8 = vsel %vm2142_vm2, %v11375_v11, %v16445_v3  ;;  %v16448_v38 = vld [vmem:[#allocation654_spill] sm:$0xff]  ;;  %v11388_v42 = vld [vmem:[%s6067_s30 + $0x260] sm:$0xff] }
 0x6f8   : > { %16443 = vst [vmem:[#allocation118_spill] sm:$0xff] %v11372_v21  ;;  %16444 = vst [vmem:[#allocation119_spill] sm:$0xff] %v11375_v11  ;;  %v11385_v27 = vsel %vm2142_vm2, %v16448_v38, %v16447_v22  ;;  %v16451_v35 = vld [vmem:[#allocation500_spill] sm:$0xff]  ;;  %v11406_v22 = vsel %vm2142_vm2, %v11401_v41, %v16456_v46  ;;  %v11409_v38 = vld [vmem:[%s6067_s30 + $0x270] sm:$0xff] }
 0x6f9   : > { %16446 = vst [vmem:[#allocation120_spill] sm:$0xff] %v11380_v8  ;;  %16449 = vst [vmem:[#allocation122_spill] sm:$0xff] %v11385_v27  ;;  %v11393_v21 = vsel %vm2142_vm2, %v11388_v42, %v16451_v35  ;;  %v16453_v37 = vld [vmem:[#allocation532_spill] sm:$0xff]  ;;  %v16463_v27 = vld [vmem:[#allocation507_spill] sm:$0xff] }
 0x6fa   : > { %16450 = vst [vmem:[#allocation454_spill] sm:$0xff] %v11388_v42  ;;  %16452 = vst [vmem:[#allocation123_spill] sm:$0xff] %v11393_v21  ;;  %v4081_v26 = vsel %vm2175_vm3, %v10958_v61, %v16453_v37  ;;  %v16454_v3 = vld [vmem:[#allocation604_spill] sm:$0xff]  ;;  %v5863_v42 = vld [vmem:[%s6067_s30 + $0x2a8] sm:$0x3] }
 0x6fb   : > { %3586 = vrot.lane.b32.xlu1 %v16454_v3, %s5974_s10  ;;  %16457 = vst [vmem:[#allocation125_spill] sm:$0xff] %v11406_v22  ;;  %16458 = vst [vmem:[#allocation126_spill] sm:$0xff] %v11409_v38  ;;  %v16459_v30 = vld [vmem:[#allocation504_spill] sm:$0xff]  ;;  %v16461_v61 = vld [vmem:[#allocation506_spill] sm:$0xff] }
 0x6fc   : > { %v11414_v35 = vsel %vm2142_vm2, %v11409_v38, %v16459_v30  ;;  %v11419_v11 = vsel %vm2142_vm2, %v5863_v42, %v16461_v61  ;;  %v16464_v21 = vld [vmem:[#allocation528_spill] sm:$0xff]  ;;  %v16466_v41 = vld [vmem:[#allocation509_spill] sm:$0xff]  ;;  %v16468_v30 = vld [vmem:[#allocation510_spill] sm:$0xff] }
 0x6fd   : > { %16460 = vst [vmem:[#allocation127_spill] sm:$0xff] %v11414_v35  ;;  %16462 = vst [vmem:[#allocation129_spill] sm:$0xff] %v11419_v11  ;;  %v11424_v8 = vsel %vm2142_vm2, %v16464_v21, %v16463_v27  ;;  %v5864_v46 = vld [vmem:[%s6067_s30 + $0x2b8] sm:$0x3]  ;;  %v16469_v38 = vld [vmem:[#allocation531_spill] sm:$0xff] }
 0x6fe   : > { %16465 = vst [vmem:[#allocation130_spill] sm:$0xff] %v11424_v8  ;;  %v11431_v22 = vsel %vm2142_vm2, %v5864_v46, %v16466_v41  ;;  %v11436_v35 = vsel %vm2142_vm2, %v16469_v38, %v16468_v30  ;;  %v5865_v42 = vld [vmem:[%s6067_s30 + $0x2c8] sm:$0x3]  ;;  %v16471_v61 = vld [vmem:[#allocation513_spill] sm:$0xff]  ;;  %v16473_v21 = vld [vmem:[#allocation535_spill] sm:$0xff]  ;;  %v4145_v30 = vsel %vm2208_vm4, %v4081_v26, %v16358_v33 }
 0x6ff   : > { %16467 = vst [vmem:[#allocation136_spill] sm:$0xff] %v11431_v22  ;;  %16470 = vst [vmem:[#allocation137_spill] sm:$0xff] %v11436_v35  ;;  %v11441_v11 = vsel %vm2142_vm2, %v5865_v42, %v16471_v61  ;;  %v16474_v27 = vld [vmem:[#allocation88_spill] sm:$0xff]  ;;  %v16476_v13 = vld [vmem:[#allocation514_spill] sm:$0xff]  ;;  %3921 = vrot.lane.b32.xlu1 %v16151_v63, %s5977_s19  ;;  %v11502_v63 = vsel %vm2175_vm3, %v11281_v50, %v16473_v21 }
 0x700   : > { %16472 = vst [vmem:[#allocation139_spill] sm:$0xff] %v11441_v11  ;;  %v4085_v8 = vsel %vm2175_vm3, %v16474_v27, %v16473_v21  ;;  %v16477_v39 = vld [vmem:[#allocation534_spill] sm:$0xff]  ;;  %v5866_v46 = vld [vmem:[%s6067_s30 + $0x2d8] sm:$0x3]  ;;  %v16478_v22 = vld [vmem:[#allocation517_spill] sm:$0xff]  ;;  %v11463_v27 = vpop.permute.xlu0 %3669 }
 0x701   : > { %v11451_v41 = vsel %vm2142_vm2, %v16477_v39, %v16476_v13  ;;  %v11456_v38 = vsel %vm2142_vm2, %v5866_v46, %v16478_v22  ;;  %v16479_v42 = vld [vmem:[#allocation536_spill] sm:$0xff]  ;;  %16480 = vst [vmem:[#allocation142_spill] sm:$0xff] %v11463_v27  ;;  %v16481_v14 = vld [vmem:[#allocation518_spill] sm:$0xff]  ;;  %v16482_v11 = vld [vmem:[#allocation537_spill] sm:$0xff]  ;;  %v11473_v13 = vsel %vm2175_vm3, %v11271_v45, %v16453_v37  ;;  %v4149_v45 = vsel %vm2208_vm4, %v4085_v8, %v16360_v56 }
 0x702   : > { %v4083_v61 = vsel %vm2175_vm3, %v10968_v20, %v16479_v42  ;;  %v11468_v35 = vsel %vm2142_vm2, %v16482_v11, %v16481_v14  ;;  %16483 = vst [vmem:[#allocation143_spill] sm:$0xff] %v11473_v13  ;;  %v16484_v39 = vld [vmem:[#allocation538_spill] sm:$0xff]  ;;  %v16485_v22 = vld [vmem:[#allocation183_spill] sm:$0xff]  ;;  %v16488_v27 = vld [vmem:[#allocation533_spill] sm:$0xff]  ;;  %v11511_v56 = vsel %vm2241_vm5, %v4145_v30, %v16400_v51  ;;  %v11530_v51 = vsel %vm2175_vm3, %v11288_v19, %v16479_v42 }
 0x703   : > { %v4089_v26 = vsel %vm2175_vm3, %v16485_v22, %v16484_v39  ;;  %v16486_v33 = vld [vmem:[#allocation539_spill] sm:$0xff]  ;;  %v16487_v46 = vld [vmem:[#allocation90_spill] sm:$0xff]  ;;  %v11486_v11 = vsel %vm2175_vm3, %v10963_v25, %v16488_v27  ;;  %v11491_v37 = vsel %vm2175_vm3, %v11276_v6, %v16488_v27  ;;  %v16489_v14 = vld [vmem:[#allocation541_spill] sm:$0xff]  ;;  %v4147_v25 = vsel %vm2208_vm4, %v4083_v61, %v16356_v10 }
 0x704   : > { %v4087_v20 = vsel %vm2175_vm3, %v16487_v46, %v16486_v33  ;;  %v4093_v22 = vsel %vm2175_vm3, %v4041_v62, %v16489_v14  ;;  %v16490_v46 = vld [vmem:[#allocation601_spill] sm:$0xff]  ;;  %v16491_v13 = vld [vmem:[#allocation542_spill] sm:$0xff]  ;;  %v11513_v62 = vpop.permute.xlu1 %3703  ;;  %v4153_v8 = vsel %vm2208_vm4, %v4089_v26, %v16363_v60  ;;  %v16493_v21 = vld [vmem:[#allocation544_spill] sm:$0xff]  ;;  %v11525_v27 = vpop.permute.xlu0 %3671 }
 0x705   : > { %3588 = vrot.lane.b32.xlu0 %v16490_v46, %s5974_s10  ;;  %v4091_v6 = vsel %vm2175_vm3, %v11310_v36, %v16491_v13  ;;  %16492 = vst [vmem:[#allocation144_spill] sm:$0xff] %v11513_v62  ;;  %v4151_v50 = vsel %vm2208_vm4, %v4087_v20, %v16359_v28  ;;  %v4097_v10 = vsel %vm2175_vm3, %v10981_v15, %v16493_v21  ;;  %v16494_v61 = vld [vmem:[#allocation546_spill] sm:$0xff]  ;;  %16495 = vst [vmem:[#allocation145_spill] sm:$0xff] %v11525_v27  ;;  %v16496_v30 = vld [vmem:[#allocation547_spill] sm:$0xff] }
 0x706   : > { %v4101_v36 = vsel %vm2175_vm3, %v10991_v4, %v16494_v61  ;;  %v4157_v60 = vsel %vm2208_vm4, %v4093_v22, %v16365_v48  ;;  %v4099_v20 = vsel %vm2175_vm3, %v10998_v7, %v16496_v30  ;;  %v11539_v15 = vsel %vm2241_vm5, %v4149_v45, %v16404_v16  ;;  %3969 = vrot.lane.b32.xlu1 %v16490_v46, %s5977_s19  ;;  %v16499_v42 = vld [vmem:[#allocation545_spill] sm:$0xff] }
 0x707   : > { %v11546_v4 = vsel %vm2175_vm3, %v11293_v49, %v16484_v39  ;;  %v4088_v48 = vsel %vm2175_vm3, %v11298_v52, %v16486_v33  ;;  %v4155_v28 = vsel %vm2208_vm4, %v4091_v6, %v16361_v58  ;;  %v11555_v7 = vsel %vm2241_vm5, %v4147_v25, %v16398_v29  ;;  %v16503_v26 = vld [vmem:[#allocation549_spill] sm:$0xff]  ;;  %v16508_v25 = vld [vmem:[#allocation554_spill] sm:$0xff] }
 0x708   : > { %v4161_v16 = vsel %vm2208_vm4, %v4097_v10, %v16367_v1  ;;  %v4165_v19 = vsel %vm2208_vm4, %v4101_v36, %v16370_v44  ;;  %v11565_v49 = vsel %vm2241_vm5, %v4153_v8, %v16408_v54  ;;  %v11569_v58 = vsel %vm2241_vm5, %v4151_v50, %v16402_v31  ;;  %v11571_v52 = vpop.permute.xlu1 %3768  ;;  %v16507_v22 = vld [vmem:[#allocation553_spill] sm:$0xff]  ;;  %v16511_v8 = vld [vmem:[#allocation555_spill] sm:$0xff] }
 0x709   : > { %3967 = vrot.lane.b32.xlu0 %v16454_v3, %s5977_s19  ;;  %16497 = vst [vmem:[#allocation146_spill] sm:$0xff] %v11571_v52  ;;  %v4094_v29 = vsel %vm2175_vm3, %v11315_v53, %v16489_v14  ;;  %v4092_v1 = vsel %vm2175_vm3, %v11303_v17, %v16491_v13  ;;  %v4163_v44 = vsel %vm2208_vm4, %v4099_v20, %v16366_v5  ;;  %v11585_v3 = vpop.permute.xlu0 %3766  ;;  %v16512_v50 = vld [vmem:[#allocation219_spill] sm:$0xff]  ;;  %v16518_v20 = vld [vmem:[#allocation557_spill] sm:$0xff] }
 0x70a   : > { %v11583_v54 = vsel %vm2241_vm5, %v4157_v60, %v16412_v55  ;;  %16498 = vst [vmem:[#allocation147_spill] sm:$0xff] %v11585_v3  ;;  %v4098_v31 = vsel %vm2175_vm3, %v11323_v24, %v16493_v21  ;;  %v4095_v53 = vsel %vm2175_vm3, %v10986_v12, %v16499_v42  ;;  %v4096_v17 = vsel %vm2175_vm3, %v11330_v2, %v16499_v42  ;;  %v16500_v55 = vld [vmem:[#allocation605_spill] sm:$0xff]  ;;  %v16501_v2 = vld [vmem:[#allocation199_spill] sm:$0xff]  ;;  %v16521_v42 = vld [vmem:[#allocation558_spill] sm:$0xff] }
 0x70b   : > { %v11598_v5 = vsel %vm2241_vm5, %v4155_v28, %v16406_v9  ;;  %3592 = vrot.lane.b32.xlu1 %v16500_v55, %s5974_s10  ;;  %v4102_v13 = vsel %vm2175_vm3, %v11335_v18, %v16494_v61  ;;  %v4100_v24 = vsel %vm2175_vm3, %v11340_v40, %v16496_v30  ;;  %v11610_v12 = vsel %vm2241_vm5, %v4161_v16, %v16417_v47  ;;  %v16502_v9 = vld [vmem:[#allocation608_spill] sm:$0xff]  ;;  %v16516_v60 = vld [vmem:[#allocation481_spill] sm:$0xff]  ;;  %v16519_v28 = vld [vmem:[#allocation282_spill] sm:$0xff] }
 0x70c   : > { %v11614_v39 = vsel %vm2241_vm5, %v4165_v19, %v16501_v2  ;;  %v11621_v33 = vsel %vm2175_vm3, %v11008_v34, %v16503_v26  ;;  %v16505_v18 = vld [vmem:[#allocation552_spill] sm:$0xff]  ;;  %v11631_v45 = vsel %vm2241_vm5, %v4163_v44, %v16414_v32  ;;  %v11633_v14 = vpop.permute.xlu1 %3808  ;;  %v4111_v46 = vsel %vm2175_vm3, %v11026_v59, %v16507_v22  ;;  %v16513_v59 = vld [vmem:[#allocation6_spill] sm:$0xff]  ;;  %v16539_v27 = vld [vmem:[#allocation565_spill] sm:$0xff] }
 0x70d   : > { %3590 = vrot.lane.b32.xlu0 %v16502_v9, %s5974_s10  ;;  %16504 = vst [vmem:[#allocation148_spill] sm:$0xff] %v11621_v33  ;;  %v4113_v40 = vsel %vm2175_vm3, %v11021_v23, %v16505_v18  ;;  %v4114_v47 = vsel %vm2175_vm3, %v11345_v57, %v16505_v18  ;;  %16506 = vst [vmem:[#allocation149_spill] sm:$0xff] %v11633_v14  ;;  %v4112_v34 = vsel %vm2175_vm3, %v11352_v0, %v16507_v22  ;;  %v16509_v23 = vld [vmem:[#allocation218_spill] sm:$0xff]  ;;  %v11647_v32 = vpop.permute.xlu0 %3806  ;;  %v16514_v61 = vld [vmem:[#allocation556_spill] sm:$0xff] }
 0x70e   : > { %v4117_v6 = vsel %vm2175_vm3, %v16509_v23, %v16508_v25  ;;  %v4118_v57 = vsel %vm2175_vm3, %v11357_v43, %v16508_v25  ;;  %16510 = vst [vmem:[#allocation154_spill] sm:$0xff] %v11647_v32  ;;  %v4115_v21 = vsel %vm2175_vm3, %v16512_v50, %v16511_v8  ;;  %v4116_v10 = vsel %vm2175_vm3, %v16513_v59, %v16511_v8  ;;  %v16515_v0 = vld [vmem:[#allocation255_spill] sm:$0xff]  ;;  %v16517_v43 = vld [vmem:[#allocation486_spill] sm:$0xff]  ;;  %v16520_v19 = vld [vmem:[#allocation120_spill] sm:$0xff] }
 0x70f   : > { %v4121_v36 = vsel %vm2175_vm3, %v16515_v0, %v16514_v61  ;;  %v4122_v30 = vsel %vm2175_vm3, %v16516_v60, %v16514_v61  ;;  %3713 = vrot.lane.b32.xlu1 %v16517_v43, %s5975_s11  ;;  %v4119_v16 = vsel %vm2175_vm3, %v16519_v28, %v16518_v20  ;;  %v4120_v44 = vsel %vm2175_vm3, %v16520_v19, %v16518_v20  ;;  %v16522_v18 = vld [vmem:[#allocation127_spill] sm:$0xff]  ;;  %v16523_v25 = vld [vmem:[#allocation125_spill] sm:$0xff]  ;;  %v16527_v0 = vld [vmem:[#allocation122_spill] sm:$0xff] }
 0x710   : > { %v4125_v22 = vsel %vm2175_vm3, %v16522_v18, %v16521_v42  ;;  %v4126_v23 = vsel %vm2175_vm3, %v16523_v25, %v16521_v42  ;;  %v16524_v8 = vld [vmem:[#allocation459_spill] sm:$0xff]  ;;  %v16528_v43 = vld [vmem:[#allocation560_spill] sm:$0xff]  ;;  %v16529_v20 = vld [vmem:[#allocation137_spill] sm:$0xff]  ;;  %v11689_v42 = vpop.permute.xlu1 %3772 }
 0x711   : > { %3681 = vrot.lane.b32.xlu0 %v16524_v8, %s5975_s11  ;;  %v16525_v50 = vld [vmem:[#allocation559_spill] sm:$0xff]  ;;  %v4129_v28 = vsel %vm2175_vm3, %v16529_v20, %v16528_v43  ;;  %v16530_v19 = vld [vmem:[#allocation136_spill] sm:$0xff]  ;;  %16531 = vst [vmem:[#allocation155_spill] sm:$0xff] %v11689_v42  ;;  %v16532_v25 = vld [vmem:[#allocation561_spill] sm:$0xff]  ;;  %v11703_v20 = vpop.permute.xlu0 %3770 }
 0x712   : > { %v16526_v59 = vld [vmem:[#allocation123_spill] sm:$0xff]  ;;  %v4124_v60 = vsel %vm2175_vm3, %v16527_v0, %v16525_v50  ;;  %v4130_v18 = vsel %vm2175_vm3, %v16530_v19, %v16528_v43  ;;  %v16533_v8 = vld [vmem:[#allocation130_spill] sm:$0xff]  ;;  %v16535_v33 = vld [vmem:[#allocation24_spill] sm:$0xff]  ;;  %16536 = vst [vmem:[#allocation156_spill] sm:$0xff] %v11703_v20 }
 0x713   : > { %v4123_v61 = vsel %vm2175_vm3, %v16526_v59, %v16525_v50  ;;  %v4127_v26 = vsel %vm2175_vm3, %v16533_v8, %v16532_v25  ;;  %v16534_v59 = vld [vmem:[#allocation129_spill] sm:$0xff]  ;;  %v4133_v50 = vsel %vm2175_vm3, %v11468_v35, %v16535_v33  ;;  %v4134_v0 = vsel %vm2175_vm3, %v11456_v38, %v16535_v33  ;;  %v16537_v43 = vld [vmem:[#allocation30_spill] sm:$0xff]  ;;  %v16538_v8 = vld [vmem:[#allocation139_spill] sm:$0xff] }
 0x714   : > { %v4128_v2 = vsel %vm2175_vm3, %v16534_v59, %v16532_v25  ;;  %v4131_v19 = vsel %vm2175_vm3, %v11451_v41, %v16537_v43  ;;  %v4132_v42 = vsel %vm2175_vm3, %v16538_v8, %v16537_v43  ;;  %v4144_v25 = vsel %vm2208_vm4, %v11491_v37, %v16539_v27  ;;  %v16540_v59 = vld [vmem:[#allocation566_spill] sm:$0xff]  ;;  %v16541_v38 = vld [vmem:[#allocation485_spill] sm:$0xff]  ;;  %v16543_v41 = vld [vmem:[#allocation567_spill] sm:$0xff] }
 0x715   : > { %v4143_v35 = vsel %vm2208_vm4, %v11486_v11, %v16540_v59  ;;  %3715 = vrot.lane.b32.xlu1 %v16541_v38, %s5975_s11  ;;  %v16542_v33 = vld [vmem:[#allocation53_spill] sm:$0xff]  ;;  %v16544_v62 = vld [vmem:[#allocation143_spill] sm:$0xff]  ;;  %v16547_v11 = vld [vmem:[#allocation458_spill] sm:$0xff] }
 0x716   : > { %v4148_v20 = vsel %vm2208_vm4, %v11530_v51, %v16542_v33  ;;  %v4146_v32 = vsel %vm2208_vm4, %v16544_v62, %v16543_v41  ;;  %v16545_v43 = vld [vmem:[#allocation45_spill] sm:$0xff]  ;;  %v16546_v14 = vld [vmem:[#allocation43_spill] sm:$0xff]  ;;  %3683 = vrot.lane.b32.xlu0 %v16547_v11, %s5975_s11  ;;  %v16548_v27 = vld [vmem:[#allocation568_spill] sm:$0xff] }
 0x717   : > { %v4152_v8 = vsel %vm2208_vm4, %v4088_v48, %v16545_v43  ;;  %v4150_v37 = vsel %vm2208_vm4, %v11502_v63, %v16546_v14  ;;  %v4156_v59 = vsel %vm2208_vm4, %v4092_v1, %v16548_v27  ;;  %v16549_v38 = vld [vmem:[#allocation569_spill] sm:$0xff]  ;;  %v16550_v33 = vld [vmem:[#allocation570_spill] sm:$0xff]  ;;  %v16551_v41 = vld [vmem:[#allocation571_spill] sm:$0xff]  ;;  %v11741_v43 = vpop.permute.xlu1 %3812 }
 0x718   : > { %v4154_v51 = vsel %vm2208_vm4, %v11546_v4, %v16549_v38  ;;  %v4159_v62 = vsel %vm2208_vm4, %v4095_v53, %v16550_v33  ;;  %v4158_v48 = vsel %vm2208_vm4, %v4094_v29, %v16551_v41  ;;  %16552 = vst [vmem:[#allocation157_spill] sm:$0xff] %v11741_v43  ;;  %v16553_v63 = vld [vmem:[#allocation572_spill] sm:$0xff]  ;;  %v16554_v3 = vld [vmem:[#allocation573_spill] sm:$0xff]  ;;  %v11751_v38 = vpop.permute.xlu0 %3810  ;;  %v16560_v43 = vld [vmem:[#allocation578_spill] sm:$0xff] }
 0x719   : > { %v4162_v14 = vsel %vm2208_vm4, %v4098_v31, %v16553_v63  ;;  %v4160_v11 = vsel %vm2208_vm4, %v4096_v17, %v16554_v3  ;;  %v16555_v52 = vld [vmem:[#allocation333_spill] sm:$0xff]  ;;  %v16556_v27 = vld [vmem:[#allocation340_spill] sm:$0xff]  ;;  %16557 = vst [vmem:[#allocation159_spill] sm:$0xff] %v11751_v38  ;;  %v4178_v31 = vsel %vm2208_vm4, %v4114_v47, %v16560_v43  ;;  %v16561_v63 = vld [vmem:[#allocation579_spill] sm:$0xff] }
 0x71a   : > { %v4166_v1 = vsel %vm2208_vm4, %v4102_v13, %v16555_v52  ;;  %v4164_v4 = vsel %vm2208_vm4, %v4100_v24, %v16556_v27  ;;  %v16558_v53 = vld [vmem:[#allocation576_spill] sm:$0xff]  ;;  %v16559_v29 = vld [vmem:[#allocation577_spill] sm:$0xff]  ;;  %v4177_v3 = vsel %vm2208_vm4, %v4113_v40, %v16561_v63  ;;  %v16564_v38 = vld [vmem:[#allocation582_spill] sm:$0xff] }
 0x71b   : > { %v4176_v33 = vsel %vm2208_vm4, %v4112_v34, %v16558_v53  ;;  %v4175_v41 = vsel %vm2208_vm4, %v4111_v46, %v16559_v29  ;;  %v5867_v17 = vld [vmem:[%s6067_s30 + $0x380] sm:$0xff]  ;;  %v16562_v52 = vld [vmem:[#allocation580_spill] sm:$0xff]  ;;  %v4182_v34 = vsel %vm2208_vm4, %v4118_v57, %v16564_v38  ;;  %v16565_v53 = vld [vmem:[#allocation583_spill] sm:$0xff]  ;;  %v11781_v57 = vpop.permute.xlu1 %3909 }
 0x71c   : > { %3830 = vrot.lane.b32.xlu1 %v5867_v17, %s5976_s18  ;;  %v4180_v13 = vsel %vm2208_vm4, %v4116_v10, %v16562_v52  ;;  %v16563_v24 = vld [vmem:[#allocation581_spill] sm:$0xff]  ;;  %v4181_v46 = vsel %vm2208_vm4, %v4117_v6, %v16565_v53  ;;  %v16566_v47 = vld [vmem:[#allocation119_spill] sm:$0xff]  ;;  %v16568_v29 = vld [vmem:[#allocation586_spill] sm:$0xff]  ;;  %16571 = vst [vmem:[#allocation160_spill] sm:$0xff] %v11781_v57 }
 0x71d   : > { %v4179_v27 = vsel %vm2208_vm4, %v4115_v21, %v16563_v24  ;;  %3782 = vrot.lane.b32.xlu0 %v16566_v47, %s5976_s18  ;;  %v16567_v43 = vld [vmem:[#allocation585_spill] sm:$0xff]  ;;  %v4183_v63 = vsel %vm2208_vm4, %v4119_v16, %v16568_v29  ;;  %v16569_v17 = vld [vmem:[#allocation587_spill] sm:$0xff]  ;;  %v16570_v52 = vld [vmem:[#allocation590_spill] sm:$0xff]  ;;  %v11791_v29 = vpop.permute.xlu0 %3907 }
 0x71e   : > { %v4184_v40 = vsel %vm2208_vm4, %v4120_v44, %v16567_v43  ;;  %v4186_v10 = vsel %vm2208_vm4, %v4122_v30, %v16569_v17  ;;  %v4185_v21 = vsel %vm2208_vm4, %v4121_v36, %v16570_v52  ;;  %v16572_v38 = vld [vmem:[#allocation591_spill] sm:$0xff]  ;;  %v16573_v24 = vld [vmem:[#allocation594_spill] sm:$0xff]  ;;  %16576 = vst [vmem:[#allocation161_spill] sm:$0xff] %v11791_v29 }
 0x71f   : > { %v4188_v6 = vsel %vm2208_vm4, %v4124_v60, %v16572_v38  ;;  %v4187_v53 = vsel %vm2208_vm4, %v4123_v61, %v16573_v24  ;;  %v16574_v47 = vld [vmem:[#allocation595_spill] sm:$0xff]  ;;  %v16575_v43 = vld [vmem:[#allocation598_spill] sm:$0xff] }
 0x720   : > { %v4190_v44 = vsel %vm2208_vm4, %v4126_v23, %v16574_v47  ;;  %v4189_v16 = vsel %vm2208_vm4, %v4125_v22, %v16575_v43  ;;  %v16577_v30 = vld [vmem:[#allocation599_spill] sm:$0xff]  ;;  %v16578_v17 = vld [vmem:[#allocation602_spill] sm:$0xff] }
 0x721   : > { %v4192_v36 = vsel %vm2208_vm4, %v4128_v2, %v16577_v30  ;;  %v4191_v52 = vsel %vm2208_vm4, %v4127_v26, %v16578_v17  ;;  %v16579_v57 = vld [vmem:[#allocation603_spill] sm:$0xff]  ;;  %v16580_v38 = vld [vmem:[#allocation606_spill] sm:$0xff]  ;;  %v16585_v30 = vld [vmem:[#allocation613_spill] sm:$0xff] }
 0x722   : > { %v4194_v60 = vsel %vm2208_vm4, %v4130_v18, %v16579_v57  ;;  %v4193_v61 = vsel %vm2208_vm4, %v4129_v28, %v16580_v38  ;;  %v16581_v24 = vld [vmem:[#allocation19_spill] sm:$0xff]  ;;  %v16583_v47 = vld [vmem:[#allocation610_spill] sm:$0xff]  ;;  %v4197_v26 = vsel %vm2208_vm4, %v4133_v50, %v16585_v30  ;;  %v16587_v17 = vld [vmem:[#allocation624_spill] sm:$0xff]  ;;  %v11825_v50 = vpop.permute.xlu1 %3949 }
 0x723   : > { %3784 = vrot.lane.b32.xlu1 %v16581_v24, %s5976_s18  ;;  %v16582_v23 = vld [vmem:[#allocation607_spill] sm:$0xff]  ;;  %v4195_v43 = vsel %vm2208_vm4, %v4131_v19, %v16583_v47  ;;  %v5868_v18 = vld [vmem:[%s6067_s30 + $0x388] sm:$0x3]  ;;  %v16588_v38 = vld [vmem:[#allocation625_spill] sm:$0xff]  ;;  %16590 = vst [vmem:[#allocation162_spill] sm:$0xff] %v11825_v50 }
 0x724   : > { %v4196_v22 = vsel %vm2208_vm4, %v4132_v42, %v16582_v23  ;;  %v16584_v29 = vld [vmem:[#allocation611_spill] sm:$0xff]  ;;  %3832 = vrot.lane.b32.xlu0 %v5868_v18, %s5976_s18  ;;  %v4207_v42 = vsel %vm2241_vm5, %v4143_v35, %v16587_v17  ;;  %v11821_v19 = vsel %vm2241_vm5, %v4148_v20, %v16588_v38  ;;  %v16592_v47 = vld [vmem:[#allocation628_spill] sm:$0xff]  ;;  %v16593_v30 = vld [vmem:[#allocation630_spill] sm:$0xff] }
 0x725   : > { %v4198_v2 = vsel %vm2208_vm4, %v4134_v0, %v16584_v29  ;;  %v16586_v28 = vld [vmem:[#allocation623_spill] sm:$0xff]  ;;  %v16589_v0 = vld [vmem:[#allocation626_spill] sm:$0xff]  ;;  %v11837_v35 = vsel %vm2241_vm5, %v4156_v59, %v16593_v30  ;;  %v16601_v30 = vld [vmem:[#allocation468_spill] sm:$0xff] }
 0x726   : > { %v11815_v57 = vsel %vm2241_vm5, %v4144_v25, %v16586_v28  ;;  %v4210_v29 = vsel %vm2241_vm5, %v4146_v32, %v16589_v0  ;;  %v16591_v24 = vld [vmem:[#allocation627_spill] sm:$0xff]  ;;  %v11833_v25 = vsel %vm2241_vm5, %v4150_v37, %v16592_v47  ;;  %v11843_v32 = vpop.permute.xlu0 %3947  ;;  %v16596_v28 = vld [vmem:[#allocation632_spill] sm:$0xff]  ;;  %v16598_v37 = vld [vmem:[#allocation634_spill] sm:$0xff] }
 0x727   : > { %v11829_v23 = vsel %vm2241_vm5, %v4152_v8, %v16591_v24  ;;  %v16594_v20 = vld [vmem:[#allocation631_spill] sm:$0xff]  ;;  %16595 = vst [vmem:[#allocation163_spill] sm:$0xff] %v11843_v32  ;;  %v11847_v17 = vsel %vm2241_vm5, %v4159_v62, %v16596_v28  ;;  %v16597_v8 = vld [vmem:[#allocation633_spill] sm:$0xff]  ;;  %v11855_v0 = vsel %vm2241_vm5, %v4162_v14, %v16598_v37  ;;  %v11858_v59 = vld [vmem:[%s6067_s30 + $0x3a8] sm:$0x3] }
 0x728   : > { %v11841_v18 = vsel %vm2241_vm5, %v4154_v51, %v16594_v20  ;;  %v11851_v38 = vsel %vm2241_vm5, %v4158_v48, %v16597_v8  ;;  %16599 = vst [vmem:[#allocation164_spill] sm:$0xff] %v11858_v59  ;;  %v11861_v24 = vrot.slane %v11858_v59, 1  ;;  %v5870_v51 = vld [vmem:[%s6067_s30 + $0x398] sm:$0x3]  ;;  %v16600_v47 = vld [vmem:[#allocation635_spill] sm:$0xff]  ;;  %v11871_v48 = vsel %vm2241_vm5, %v4166_v1, %v16601_v30 }
 0x729   : > { %3836 = vrot.lane.b32.xlu1 %v5870_v51, %s5976_s18  ;;  %v11867_v62 = vsel %vm2241_vm5, %v4160_v11, %v16600_v47  ;;  %v16602_v20 = vld [vmem:[#allocation464_spill] sm:$0xff]  ;;  %v16603_v28 = vld [vmem:[#allocation639_spill] sm:$0xff]  ;;  %v16605_v11 = vld [vmem:[#allocation642_spill] sm:$0xff] }
 0x72a   : > { %v11875_v14 = vsel %vm2241_vm5, %v4164_v4, %v16602_v20  ;;  %v11879_v8 = vsel %vm2241_vm5, %v4176_v33, %v16603_v28  ;;  %v5871_v37 = vld [vmem:[%s6067_s30 + $0x390] sm:$0xff]  ;;  %v16604_v51 = vld [vmem:[#allocation640_spill] sm:$0xff]  ;;  %v11889_v47 = vsel %vm2241_vm5, %v4178_v31, %v16605_v11  ;;  %v11899_v33 = vpop.permute.xlu1 %3572  ;;  %v16609_v28 = vld [vmem:[#allocation645_spill] sm:$0xff] }
 0x72b   : > { %3834 = vrot.lane.b32.xlu0 %v5871_v37, %s5976_s18  ;;  %v11885_v32 = vsel %vm2241_vm5, %v4175_v41, %v16604_v51  ;;  %v16606_v1 = vld [vmem:[#allocation643_spill] sm:$0xff]  ;;  %v16607_v4 = vld [vmem:[#allocation644_spill] sm:$0xff]  ;;  %16608 = vst [vmem:[#allocation166_spill] sm:$0xff] %v11899_v33  ;;  %v11903_v37 = vsel %vm2241_vm5, %v4179_v27, %v16609_v28  ;;  %v16610_v41 = vld [vmem:[#allocation646_spill] sm:$0xff] }
 0x72c   : > { %v11893_v30 = vsel %vm2241_vm5, %v4177_v3, %v16606_v1  ;;  %v11897_v20 = vsel %vm2241_vm5, %v4180_v13, %v16607_v4  ;;  %v11907_v51 = vsel %vm2241_vm5, %v4182_v34, %v16610_v41  ;;  %v16611_v31 = vld [vmem:[#allocation647_spill] sm:$0xff]  ;;  %v16612_v3 = vld [vmem:[#allocation494_spill] sm:$0xff]  ;;  %v11917_v13 = vpop.permute.xlu0 %3570  ;;  %v16614_v4 = vld [vmem:[#allocation648_spill] sm:$0xff] }
 0x72d   : > { %v11911_v11 = vsel %vm2241_vm5, %v4181_v46, %v16611_v31  ;;  %v11915_v1 = vsel %vm2241_vm5, %v4184_v40, %v16612_v3  ;;  %16613 = vst [vmem:[#allocation170_spill] sm:$0xff] %v11917_v13  ;;  %v11921_v33 = vsel %vm2241_vm5, %v4183_v63, %v16614_v4  ;;  %v16615_v27 = vld [vmem:[#allocation498_spill] sm:$0xff]  ;;  %v16616_v34 = vld [vmem:[#allocation493_spill] sm:$0xff]  ;;  %3971 = vrot.lane.b32.xlu1 %v16502_v9, %s5977_s19  ;;  %v16623_v9 = vld [vmem:[#allocation652_spill] sm:$0xff] }
 0x72e   : > { %v11925_v28 = vsel %vm2241_vm5, %v4186_v10, %v16615_v27  ;;  %v11929_v41 = vsel %vm2241_vm5, %v4185_v21, %v16616_v34  ;;  %v16617_v46 = vld [vmem:[#allocation502_spill] sm:$0xff]  ;;  %v16618_v40 = vld [vmem:[#allocation497_spill] sm:$0xff]  ;;  %v16628_v13 = vld [vmem:[#allocation508_spill] sm:$0xff] }
 0x72f   : > { %v11933_v31 = vsel %vm2241_vm5, %v4188_v6, %v16617_v46  ;;  %v11939_v3 = vsel %vm2241_vm5, %v4187_v53, %v16618_v40  ;;  %v16619_v63 = vld [vmem:[#allocation649_spill] sm:$0xff]  ;;  %v16620_v10 = vld [vmem:[#allocation650_spill] sm:$0xff]  ;;  %v11956_v46 = vsel %vm2241_vm5, %v4192_v36, %v16623_v9  ;;  %v16629_v36 = vld [vmem:[#allocation516_spill] sm:$0xff] }
 0x730   : > { %v11943_v4 = vsel %vm2241_vm5, %v4190_v44, %v16619_v63  ;;  %v11947_v27 = vsel %vm2241_vm5, %v4189_v16, %v16620_v10  ;;  %v16621_v21 = vld [vmem:[#allocation661_spill] sm:$0xff]  ;;  %v16625_v44 = vld [vmem:[#allocation512_spill] sm:$0xff]  ;;  %v16626_v16 = vld [vmem:[#allocation663_spill] sm:$0xff]  ;;  %v11977_v9 = vsel %vm2241_vm5, %v4196_v22, %v16629_v36  ;;  %v11986_v50 = vpop.permute.xlu0 %3911 }
 0x731   : > { %v4273_v6 = vsel %vm2274_vm6, %v11511_v56, %v16621_v21  ;;  %v16622_v34 = vld [vmem:[#allocation65_spill] sm:$0xff]  ;;  %v11964_v63 = vsel %vm2241_vm5, %v4194_v60, %v16625_v44  ;;  %v4277_v10 = vsel %vm2274_vm6, %v11539_v15, %v16626_v16  ;;  %v11969_v56 = vpop.permute.xlu1 %3913  ;;  %v16631_v60 = vld [vmem:[#allocation664_spill] sm:$0xff]  ;;  %16632 = vst [vmem:[#allocation172_spill] sm:$0xff] %v11986_v50  ;;  %v11998_v22 = vsel %vm2274_vm6, %v4210_v29, %v16621_v21 }
 0x732   : > { %3923 = vrot.lane.b32.xlu0 %v16622_v34, %s5977_s19  ;;  %v16624_v53 = vld [vmem:[#allocation653_spill] sm:$0xff]  ;;  %16627 = vst [vmem:[#allocation171_spill] sm:$0xff] %v11969_v56  ;;  %v11973_v34 = vsel %vm2241_vm5, %v4193_v61, %v16628_v13  ;;  %v4275_v44 = vsel %vm2274_vm6, %v11555_v7, %v16631_v60  ;;  %v16633_v15 = vld [vmem:[#allocation520_spill] sm:$0xff]  ;;  %v16634_v61 = vld [vmem:[#allocation515_spill] sm:$0xff] }
 0x733   : > { %v11960_v40 = vsel %vm2241_vm5, %v4191_v52, %v16624_v53  ;;  %v16630_v52 = vld [vmem:[#allocation511_spill] sm:$0xff]  ;;  %v11990_v56 = vsel %vm2241_vm5, %v4198_v2, %v16633_v15  ;;  %v11994_v13 = vsel %vm2241_vm5, %v4197_v26, %v16634_v61  ;;  %16635 = vst [vmem:[#allocation173_spill] sm:$0xff] %v11998_v22  ;;  %v16638_v7 = vld [vmem:[#allocation662_spill] sm:$0xff]  ;;  %v16640_v59 = vld [vmem:[#allocation540_spill] sm:$0xff] }
 0x734   : > { %v11981_v53 = vsel %vm2241_vm5, %v4195_v43, %v16630_v52  ;;  %v16636_v43 = vld [vmem:[#allocation257_spill] sm:$0xff]  ;;  %v16637_v52 = vld [vmem:[#allocation612_spill] sm:$0xff]  ;;  %v12006_v50 = vsel %vm2274_vm6, %v4207_v42, %v16638_v7  ;;  %v16639_v2 = vld [vmem:[#allocation259_spill] sm:$0xff]  ;;  %v4281_v26 = vsel %vm2274_vm6, %v11565_v49, %v16640_v59  ;;  %v12021_v21 = vsel %vm2274_vm6, %v11815_v57, %v16638_v7 }
 0x735   : > { %v4337_v36 = vsel %vm2307_vm7, %v4273_v6, %v16636_v43  ;;  %3594 = vrot.lane.b32.xlu1 %v16637_v52, %s5974_s10  ;;  %v4341_v15 = vsel %vm2307_vm7, %v4277_v10, %v16639_v2  ;;  %v16641_v61 = vld [vmem:[#allocation665_spill] sm:$0xff]  ;;  %v16642_v42 = vld [vmem:[#allocation256_spill] sm:$0xff]  ;;  %v16643_v10 = vld [vmem:[#allocation543_spill] sm:$0xff]  ;;  %v12041_v57 = vsel %vm2274_vm6, %v11821_v19, %v16631_v60 }
 0x736   : > { %v4279_v29 = vsel %vm2274_vm6, %v11569_v58, %v16641_v61  ;;  %3973 = vrot.lane.b32.xlu0 %v16500_v55, %s5977_s19  ;;  %v4339_v6 = vsel %vm2307_vm7, %v4275_v44, %v16642_v42  ;;  %v4285_v2 = vsel %vm2274_vm6, %v11583_v54, %v16643_v10  ;;  %v16644_v49 = vld [vmem:[#allocation666_spill] sm:$0xff]  ;;  %v12031_v58 = vpop.permute.xlu1 %3953  ;;  %v12036_v55 = vsel %vm2274_vm6, %v11833_v25, %v16626_v16  ;;  %v16647_v44 = vld [vmem:[#allocation667_spill] sm:$0xff]  ;;  %v16648_v7 = vld [vmem:[#allocation285_spill] sm:$0xff] }
 0x737   : > { %v4283_v43 = vsel %vm2274_vm6, %v11598_v5, %v16644_v49  ;;  %16645 = vst [vmem:[#allocation175_spill] sm:$0xff] %v12031_v58  ;;  %16646 = vst [vmem:[#allocation176_spill] sm:$0xff] %v12036_v55  ;;  %v4289_v54 = vsel %vm2274_vm6, %v11610_v12, %v16647_v44  ;;  %v12048_v42 = vsel %vm15008_vm8, %v4337_v36, %v16648_v7  ;;  %v12050_v5 = vpop.permute.xlu0 %3951  ;;  %v16651_v58 = vld [vmem:[#allocation261_spill] sm:$0xff]  ;;  %v16652_v16 = vld [vmem:[#allocation258_spill] sm:$0xff] }
 0x738   : > { %16649 = vst [vmem:[#allocation177_spill] sm:$0xff] %v12048_v42  ;;  %16650 = vst [vmem:[#allocation178_spill] sm:$0xff] %v12050_v5  ;;  %v4345_v25 = vsel %vm2307_vm7, %v4281_v26, %v16651_v58  ;;  %v4343_v55 = vsel %vm2307_vm7, %v4279_v29, %v16652_v16  ;;  %v16653_v22 = vld [vmem:[#allocation669_spill] sm:$0xff]  ;;  %v16654_v60 = vld [vmem:[#allocation287_spill] sm:$0xff] }
 0x739   : > { %v4293_v19 = vsel %vm2274_vm6, %v11614_v39, %v16653_v22  ;;  %v12061_v12 = vsel %vm15008_vm8, %v4341_v15, %v16654_v60  ;;  %v16656_v36 = vld [vmem:[#allocation63_spill] sm:$0xff]  ;;  %v16658_v42 = vld [vmem:[#allocation260_spill] sm:$0xff]  ;;  %v16659_v58 = vld [vmem:[#allocation670_spill] sm:$0xff] }
 0x73a   : > { %16655 = vst [vmem:[#allocation179_spill] sm:$0xff] %v12061_v12  ;;  %3925 = vrot.lane.b32.xlu1 %v16656_v36, %s5977_s19  ;;  %v16657_v7 = vld [vmem:[#allocation263_spill] sm:$0xff]  ;;  %v4347_v26 = vsel %vm2307_vm7, %v4283_v43, %v16658_v42  ;;  %v4291_v29 = vsel %vm2274_vm6, %v11631_v45, %v16659_v58  ;;  %v16660_v16 = vld [vmem:[#allocation284_spill] sm:$0xff]  ;;  %v16661_v15 = vld [vmem:[#allocation609_spill] sm:$0xff]  ;;  %v12081_v36 = vsel %vm2274_vm6, %v11841_v18, %v16640_v59  ;;  %v12090_v60 = vpop.permute.xlu1 %3576 }
 0x73b   : > { %v4349_v5 = vsel %vm2307_vm7, %v4285_v2, %v16657_v7  ;;  %v12074_v39 = vsel %vm15008_vm8, %v4339_v6, %v16660_v16  ;;  %3596 = vrot.lane.b32.xlu0 %v16661_v15, %s5974_s10  ;;  %v12086_v43 = vsel %vm2274_vm6, %v11829_v23, %v16641_v61  ;;  %v16662_v2 = vld [vmem:[#allocation264_spill] sm:$0xff]  ;;  %16663 = vst [vmem:[#allocation180_spill] sm:$0xff] %v12090_v60  ;;  %v12093_v6 = vld [vmem:[%s6067_s30 + $0x3a0] sm:$0xff]  ;;  %v16665_v42 = vld [vmem:[#allocation286_spill] sm:$0xff] }
 0x73c   : > { %v4353_v45 = vsel %vm2307_vm7, %v4289_v54, %v16662_v2  ;;  %v3499_v16 = vrot.slane %v12093_v6, 1  ;;  %v12099_v7 = vsel %vm2274_vm6, %v11851_v38, %v16643_v10  ;;  %v16664_v18 = vld [vmem:[#allocation265_spill] sm:$0xff]  ;;  %v12105_v23 = vsel %vm15008_vm8, %v4343_v55, %v16665_v42  ;;  %v12111_v2 = vpop.permute.xlu0 %3574  ;;  %v16667_v12 = vld [vmem:[#allocation75_spill] sm:$0xff]  ;;  %v16668_v10 = vld [vmem:[#allocation288_spill] sm:$0xff] }
 0x73d   : > { %v4357_v59 = vsel %vm2307_vm7, %v4293_v19, %v16664_v18  ;;  %v16666_v61 = vld [vmem:[#allocation289_spill] sm:$0xff]  ;;  %v4284_v60 = vsel %vm2274_vm6, %v11837_v35, %v16644_v49  ;;  %v4355_v38 = vsel %vm2307_vm7, %v4291_v29, %v16667_v12  ;;  %v12120_v19 = vsel %vm15008_vm8, %v4347_v26, %v16668_v10  ;;  %v16669_v18 = vld [vmem:[#allocation291_spill] sm:$0xff]  ;;  %v16699_v12 = vld [vmem:[#allocation690_spill] sm:$0xff] }
 0x73e   : > { %v12109_v54 = vsel %vm15008_vm8, %v4345_v25, %v16666_v61  ;;  %v12124_v55 = vsel %vm15008_vm8, %v4349_v5, %v16669_v18  ;;  %3977 = vrot.lane.b32.xlu1 %v16661_v15, %s5977_s19  ;;  %v4290_v25 = vsel %vm2274_vm6, %v11855_v0, %v16647_v44  ;;  %v16670_v61 = vld [vmem:[#allocation668_spill] sm:$0xff]  ;;  %v16671_v5 = vld [vmem:[#allocation294_spill] sm:$0xff]  ;;  %v4294_v29 = vsel %vm2274_vm6, %v11871_v48, %v16653_v22  ;;  %v16676_v15 = vld [vmem:[#allocation675_spill] sm:$0xff] }
 0x73f   : > { %v4287_v35 = vsel %vm2274_vm6, %v11847_v17, %v16670_v61  ;;  %v4288_v49 = vsel %vm2274_vm6, %v11867_v62, %v16670_v61  ;;  %3975 = vrot.lane.b32.xlu0 %v16637_v52, %s5977_s19  ;;  %v12141_v26 = vsel %vm15008_vm8, %v4353_v45, %v16671_v5  ;;  %v4292_v0 = vsel %vm2274_vm6, %v11875_v14, %v16659_v58  ;;  %v12149_v17 = vpop.permute.xlu1 %3705  ;;  %v16674_v44 = vld [vmem:[#allocation298_spill] sm:$0xff]  ;;  %v16677_v14 = vld [vmem:[#allocation676_spill] sm:$0xff]  ;;  %v16694_v10 = vld [vmem:[#allocation685_spill] sm:$0xff] }
 0x740   : > { %16672 = vst [vmem:[#allocation181_spill] sm:$0xff] %v12141_v26  ;;  %16673 = vst [vmem:[#allocation182_spill] sm:$0xff] %v12149_v17  ;;  %v12153_v62 = vsel %vm371_vm0, %v3499_v16, %v11861_v24  ;;  %v12157_v52 = vsel %vm15008_vm8, %v4357_v59, %v16674_v44  ;;  %v4305_v45 = vsel %vm2274_vm6, %v11893_v30, %v16676_v15  ;;  %v12168_v58 = vpop.permute.xlu0 %3673  ;;  %v16678_v16 = vld [vmem:[#allocation293_spill] sm:$0xff]  ;;  %v16710_v26 = vld [vmem:[#allocation695_spill] sm:$0xff] }
 0x741   : > { %16675 = vst [vmem:[#allocation187_spill] sm:$0xff] %v12157_v52  ;;  %v4306_v48 = vsel %vm2274_vm6, %v11889_v47, %v16676_v15  ;;  %v4303_v22 = vsel %vm2274_vm6, %v11885_v32, %v16677_v14  ;;  %v12172_v61 = vsel %vm15008_vm8, %v4355_v38, %v16678_v16  ;;  %v4304_v59 = vsel %vm2274_vm6, %v11879_v8, %v16677_v14  ;;  %v16680_v44 = vld [vmem:[#allocation677_spill] sm:$0xff]  ;;  %v16681_v32 = vld [vmem:[#allocation678_spill] sm:$0xff]  ;;  %v16682_v38 = vld [vmem:[#allocation679_spill] sm:$0xff] }
 0x742   : > { %16679 = vst [vmem:[#allocation188_spill] sm:$0xff] %v12172_v61  ;;  %v12180_v30 = vsel %vm2274_vm6, %v11911_v11, %v16680_v44  ;;  %v4310_v47 = vsel %vm2274_vm6, %v11907_v51, %v16680_v44  ;;  %v4307_v15 = vsel %vm2274_vm6, %v11903_v37, %v16681_v32  ;;  %3600 = vrot.lane.b32.xlu1 %v11861_v24, %s5974_s10  ;;  %v16683_v44 = vld [vmem:[#allocation680_spill] sm:$0xff]  ;;  %v12209_v14 = vld [vmem:[%s6067_s30 + $0x3b0] sm:$0xff]  ;;  %v16702_v61 = vld [vmem:[#allocation173_spill] sm:$0xff] }
 0x743   : > { %v4308_v8 = vsel %vm2274_vm6, %v11897_v20, %v16681_v32  ;;  %v12196_v11 = vsel %vm2274_vm6, %v11929_v41, %v16682_v38  ;;  %v12201_v51 = vsel %vm2274_vm6, %v11925_v28, %v16682_v38  ;;  %v4311_v37 = vsel %vm2274_vm6, %v11921_v33, %v16683_v44  ;;  %3598 = vrot.lane.b32.xlu0 %v12153_v62, %s5974_s10  ;;  %v16684_v41 = vld [vmem:[#allocation681_spill] sm:$0xff]  ;;  %v16685_v33 = vld [vmem:[#allocation682_spill] sm:$0xff]  ;;  %v12227_v5 = vpop.permute.xlu1 %3707  ;;  %v16700_v52 = vld [vmem:[#allocation51_spill] sm:$0xff] }
 0x744   : > { %v4312_v20 = vsel %vm2274_vm6, %v11915_v1, %v16683_v44  ;;  %v12217_v32 = vsel %vm2274_vm6, %v11947_v27, %v16684_v41  ;;  %v12222_v28 = vsel %vm2274_vm6, %v11943_v4, %v16684_v41  ;;  %v4315_v38 = vsel %vm2274_vm6, %v11939_v3, %v16685_v33  ;;  %16686 = vst [vmem:[#allocation190_spill] sm:$0xff] %v12227_v5  ;;  %v16687_v44 = vld [vmem:[#allocation683_spill] sm:$0xff]  ;;  %v16688_v41 = vld [vmem:[#allocation684_spill] sm:$0xff]  ;;  %v12247_v16 = vpop.permute.xlu0 %3675 }
 0x745   : > { %v4316_v1 = vsel %vm2274_vm6, %v11933_v31, %v16685_v33  ;;  %v12235_v27 = vsel %vm2274_vm6, %v11973_v34, %v16687_v44  ;;  %v12240_v4 = vsel %vm2274_vm6, %v11964_v63, %v16687_v44  ;;  %v12245_v3 = vsel %vm2274_vm6, %v11960_v40, %v16688_v41  ;;  %v16689_v33 = vld [vmem:[#allocation28_spill] sm:$0xff]  ;;  %v16692_v44 = vld [vmem:[#allocation641_spill] sm:$0xff]  ;;  %v16709_v5 = vld [vmem:[#allocation59_spill] sm:$0xff] }
 0x746   : > { %v4320_v31 = vsel %vm2274_vm6, %v11956_v46, %v16688_v41  ;;  %v12255_v34 = vsel %vm2274_vm6, %v11994_v13, %v16689_v33  ;;  %v12260_v63 = vsel %vm2274_vm6, %v11990_v56, %v16689_v33  ;;  %v16693_v40 = vrot.slane %v16692_v44, 7  ;;  %v16695_v41 = vld [vmem:[#allocation39_spill] sm:$0xff]  ;;  %v16696_v33 = vld [vmem:[#allocation629_spill] sm:$0xff] }
 0x747   : > { %16690 = vst [vmem:[#allocation191_spill] sm:$0xff] %v12255_v34  ;;  %16691 = vst [vmem:[#allocation192_spill] sm:$0xff] %v12260_v63  ;;  %v3656_v18 = vrot.slane %v12209_v14, 7  ;;  %v12269_v46 = vsel %vm2274_vm6, %v11981_v53, %v16694_v10  ;;  %v12274_v13 = vsel %vm2274_vm6, %v11977_v9, %v16694_v10  ;;  %v12279_v56 = vsel %vm2307_vm7, %v12021_v21, %v16695_v41  ;;  %v16701_v10 = vld [vmem:[#allocation128_spill] sm:$0xff]  ;;  %v16703_v41 = vld [vmem:[#allocation691_spill] sm:$0xff] }
 0x748   : > { %3717 = vrot.lane.b32.xlu1 %v16693_v40, %s5975_s11  ;;  %v16697_v44 = vrot.slane %v16696_v33, 7  ;;  %v16698_v40 = vld [vmem:[#allocation126_spill] sm:$0xff]  ;;  %v12288_v53 = vsel %vm2307_vm7, %v12006_v50, %v16699_v12  ;;  %v12293_v9 = vsel %vm2307_vm7, %v12041_v57, %v16700_v52  ;;  %v12298_v21 = vsel %vm2307_vm7, %v16702_v61, %v16701_v10  ;;  %v4944_v50 = vld [vmem:[%s14461_s1] sm:$0xff]  ;;  %v16705_v12 = vld [vmem:[#allocation692_spill] sm:$0xff]  ;;  %v12327_v63 = vpop.permute.xlu0 %3774 }
 0x749   : > { %v3654_v42 = vrot.slane %v16698_v40, 7  ;;  %v12303_v33 = vsel %vm2307_vm7, %v12086_v43, %v16703_v41  ;;  %v4945_v57 = vld [vmem:[%s14461_s1 + $0x8] sm:$0xff]  ;;  %v16706_v52 = vld [vmem:[#allocation176_spill] sm:$0xff]  ;;  %v16707_v10 = vld [vmem:[#allocation693_spill] sm:$0xff]  ;;  %v12331_v17 = vsel %vm2307_vm7, %v4287_v35, %v16709_v5 }
 0x74a   : > { %3685 = vrot.lane.b32.xlu0 %v16697_v44, %s5975_s11  ;;  %v12305_v44 = vpop.permute.xlu1 %3814  ;;  %v12316_v61 = vsel %vm2307_vm7, %v16706_v52, %v16705_v12  ;;  %v12320_v34 = vsel %vm2307_vm7, %v4284_v60, %v16707_v10  ;;  %v16708_v43 = vld [vmem:[#allocation694_spill] sm:$0xff]  ;;  %v12336_v12 = vsel %vm2307_vm7, %v12099_v7, %v16710_v26  ;;  %v16711_v52 = vld [vmem:[#allocation696_spill] sm:$0xff]  ;;  %v16712_v10 = vld [vmem:[#allocation697_spill] sm:$0xff] }
 0x74b   : > { %16704 = vst [vmem:[#allocation193_spill] sm:$0xff] %v12305_v44  ;;  %v12325_v41 = vsel %vm2307_vm7, %v12081_v36, %v16708_v43  ;;  %v5583_v44 = vpack.c.bf16 %v4945_v57, %v4944_v50  ;;  %v12340_v60 = vsel %vm2307_vm7, %v4290_v25, %v16711_v52  ;;  %v12344_v36 = vsel %vm2307_vm7, %v4288_v49, %v16712_v10  ;;  %v16713_v50 = vld [vmem:[#allocation698_spill] sm:$0xff]  ;;  %v16715_v35 = vld [vmem:[#allocation699_spill] sm:$0xff]  ;;  %v16717_v7 = vld [vmem:[#allocation704_spill] sm:$0xff] }
 0x74c   : > { %3719 = vrot.lane.b32.xlu1 %v3656_v18, %s5975_s11  ;;  %v12349_v57 = vsel %vm2307_vm7, %v4294_v29, %v16713_v50  ;;  %v12353_v5 = vsel %vm2307_vm7, %v4292_v0, %v16715_v35  ;;  %v12357_v26 = vsel %vm2307_vm7, %v4304_v59, %v16717_v7  ;;  %v16718_v25 = vld [vmem:[#allocation705_spill] sm:$0xff]  ;;  %v16719_v43 = vld [vmem:[#allocation706_spill] sm:$0xff]  ;;  %v16720_v29 = vld [vmem:[#allocation707_spill] sm:$0xff]  ;;  %v12390_v7 = vpop.permute.xlu0 %3816 }
 0x74d   : > { %16714 = vst [vmem:[#allocation194_spill] sm:$0xff] %v12349_v57  ;;  %16716 = vst [vmem:[#allocation195_spill] sm:$0xff] %v12353_v5  ;;  %5584 = vmatprep.subr.bf16.mxu0 %v5583_v44  ;;  %v4367_v49 = vsel %vm2307_vm7, %v4303_v22, %v16718_v25  ;;  %v12364_v18 = vsel %vm2307_vm7, %v4306_v48, %v16719_v43  ;;  %v12368_v52 = vsel %vm2307_vm7, %v4305_v45, %v16720_v29  ;;  %v4947_v22 = vld [vmem:[%s14461_s1 + $0x18] sm:$0xff]  ;;  %v16722_v10 = vld [vmem:[#allocation709_spill] sm:$0xff] }
 0x74e   : > { %3687 = vrot.lane.b32.xlu0 %v3654_v42, %s5975_s11  ;;  %v12370_v0 = vpop.permute.xlu1 %3776  ;;  %5613 = vmatprep.subr.bf16.mxu1 %v5583_v44  ;;  %v4946_v42 = vld [vmem:[%s14461_s1 + $0x10] sm:$0xff]  ;;  %v16721_v59 = vld [vmem:[#allocation708_spill] sm:$0xff]  ;;  %v12384_v45 = vsel %vm2307_vm7, %v4307_v15, %v16722_v10  ;;  %v16723_v50 = vld [vmem:[#allocation710_spill] sm:$0xff]  ;;  %16724 = vst [vmem:[#allocation196_spill] sm:$0xff] %v12390_v7 }
 0x74f   : > { %5586 = vmatpush3.bf16.msra.mxu0 %v5583_v44  ;;  %v12380_v48 = vsel %vm2307_vm7, %v4308_v8, %v16721_v59  ;;  %v12388_v35 = vsel %vm2307_vm7, %v4310_v47, %v16723_v50  ;;  %5620 = vmatpush3.bf16.msra.mxu1 %v5583_v44  ;;  %v5587_v25 = vpack.c.bf16 %v4947_v22, %v4946_v42  ;;  %v16725_v43 = vld [vmem:[#allocation711_spill] sm:$0xff]  ;;  %v16726_v5 = vld [vmem:[#allocation712_spill] sm:$0xff]  ;;  %v16727_v59 = vld [vmem:[#allocation713_spill] sm:$0xff] }
 0x750   : > { %v12395_v29 = vsel %vm2307_vm7, %v12180_v30, %v16725_v43  ;;  %v12399_v8 = vsel %vm2307_vm7, %v4312_v20, %v16726_v5  ;;  %v12403_v15 = vsel %vm2307_vm7, %v4311_v37, %v16727_v59  ;;  %v16728_v10 = vld [vmem:[#allocation714_spill] sm:$0xff]  ;;  %v16729_v42 = vld [vmem:[#allocation715_spill] sm:$0xff]  ;;  %v16730_v22 = vld [vmem:[#allocation716_spill] sm:$0xff] }
 0x751   : > { %v12408_v47 = vsel %vm2307_vm7, %v12201_v51, %v16728_v10  ;;  %v5873_v44 = vld [vmem:[%s6067_s30 + $0x268] sm:$0x3]  ;;  %v12415_v30 = vsel %vm2307_vm7, %v12196_v11, %v16729_v42  ;;  %v12419_v20 = vsel %vm2307_vm7, %v4316_v1, %v16730_v22  ;;  %v16731_v5 = vld [vmem:[#allocation717_spill] sm:$0xff]  ;;  %5588 = vmatprep.subr.bf16.mxu0 %v5587_v25  ;;  %v16734_v59 = vld [vmem:[#allocation719_spill] sm:$0xff]  ;;  %5614 = vmatprep.subr.bf16.mxu1 %v5587_v25 }
 0x752   : > { %3788 = vrot.lane.b32.xlu1 %v5873_v44, %s5976_s18  ;;  %v12423_v37 = vsel %vm2307_vm7, %v4315_v38, %v16731_v5  ;;  %v16732_v50 = vld [vmem:[#allocation454_spill] sm:$0xff]  ;;  %v12435_v11 = vsel %vm2307_vm7, %v12217_v32, %v16734_v59  ;;  %v16735_v1 = vld [vmem:[#allocation720_spill] sm:$0xff]  ;;  %v12441_v38 = vpop.permute.xlu1 %3820  ;;  %v4948_v44 = vld [vmem:[%s14461_s1 + $0x20] sm:$0xff] }
 0x753   : > { %3786 = vrot.lane.b32.xlu0 %v16732_v50, %s5976_s18  ;;  %v16733_v51 = vld [vmem:[#allocation718_spill] sm:$0xff]  ;;  %v12439_v10 = vsel %vm2307_vm7, %v4320_v31, %v16735_v1  ;;  %16736 = vst [vmem:[#allocation197_spill] sm:$0xff] %v12441_v38  ;;  %5590 = vmatpush3.bf16.msra.mxu0 %v5587_v25  ;;  %v16737_v42 = vld [vmem:[#allocation721_spill] sm:$0xff]  ;;  %v16739_v5 = vld [vmem:[#allocation723_spill] sm:$0xff] }
 0x754   : > { %v12430_v43 = vsel %vm2307_vm7, %v12222_v28, %v16733_v51  ;;  %v4949_v28 = vld [vmem:[%s14461_s1 + $0x28] sm:$0xff]  ;;  %v12452_v32 = vsel %vm2307_vm7, %v12245_v3, %v16737_v42  ;;  %v12462_v50 = vsel %vm2307_vm7, %v12235_v27, %v16739_v5  ;;  %v12464_v51 = vpop.permute.xlu0 %3818  ;;  %5621 = vmatpush3.bf16.msra.mxu1 %v5587_v25  ;;  %v16741_v1 = vld [vmem:[#allocation724_spill] sm:$0xff]  ;;  %v16743_v3 = vld [vmem:[#allocation725_spill] sm:$0xff] }
 0x755   : > { %v16738_v22 = vld [vmem:[#allocation722_spill] sm:$0xff]  ;;  %16740 = vst [vmem:[#allocation456_spill] sm:$0xff] %v12464_v51  ;;  %v5591_v59 = vpack.c.bf16 %v4949_v28, %v4948_v44  ;;  %v12469_v57 = vsel %vm2307_vm7, %v12274_v13, %v16741_v1  ;;  %v12474_v42 = vsel %vm2307_vm7, %v12269_v46, %v16743_v3  ;;  %v16746_v27 = vld [vmem:[#allocation743_spill] sm:$0xff]  ;;  %v16747_v25 = vld [vmem:[#allocation164_spill] sm:$0xff] }
 0x756   : > { %v12457_v31 = vsel %vm2307_vm7, %v12240_v4, %v16738_v22  ;;  %16742 = vst [vmem:[#allocation457_spill] sm:$0xff] %v12469_v57  ;;  %16744 = vst [vmem:[#allocation460_spill] sm:$0xff] %v12474_v42  ;;  %v16745_v4 = vld [vmem:[#allocation471_spill] sm:$0xff]  ;;  %v4431_v5 = vsel %vm15008_vm8, %v4367_v49, %v16746_v27  ;;  %3840 = vrot.lane.b32.xlu1 %v16747_v25, %s5976_s18  ;;  %v16748_v44 = vld [vmem:[#allocation444_spill] sm:$0xff]  ;;  %v12505_v25 = vpop.permute.xlu1 %3955 }
 0x757   : > { %v4400_v22 = vsel %vm15008_vm8, %v12279_v56, %v16745_v4  ;;  %v4399_v13 = vsel %vm15008_vm8, %v12288_v53, %v16748_v44  ;;  %v16749_v28 = vld [vmem:[#allocation501_spill] sm:$0xff]  ;;  %v16750_v46 = vld [vmem:[#allocation746_spill] sm:$0xff]  ;;  %3838 = vrot.lane.b32.xlu0 %v12093_v6, %s5976_s18  ;;  %5592 = vmatprep.subr.bf16.mxu0 %v5591_v59  ;;  %v16753_v27 = vld [vmem:[#allocation747_spill] sm:$0xff]  ;;  %16754 = vst [vmem:[#allocation461_spill] sm:$0xff] %v12505_v25 }
 0x758   : > { %v12489_v1 = vsel %vm15008_vm8, %v12293_v9, %v16749_v28  ;;  %v4495_v3 = vsel %vm15007_vm9, %v4431_v5, %v16750_v46  ;;  %v16751_v56 = vld [vmem:[#allocation734_spill] sm:$0xff]  ;;  %v16752_v4 = vld [vmem:[#allocation505_spill] sm:$0xff]  ;;  %v4463_v9 = vsel %vm15007_vm9, %v4399_v13, %v16753_v27  ;;  %5615 = vmatprep.subr.bf16.mxu1 %v5591_v59  ;;  %5594 = vmatpush3.bf16.msra.mxu0 %v5591_v59  ;;  %v4950_v6 = vld [vmem:[%s14461_s1 + $0x30] sm:$0xff] }
 0x759   : > { %v4402_v49 = vsel %vm15008_vm8, %v12298_v21, %v16751_v56  ;;  %v12501_v53 = vsel %vm15008_vm8, %v12303_v33, %v16752_v4  ;;  %v4951_v21 = vld [vmem:[%s14461_s1 + $0x38] sm:$0xff]  ;;  %v16755_v5 = vld [vmem:[#allocation735_spill] sm:$0xff]  ;;  %v16757_v28 = vld [vmem:[#allocation737_spill] sm:$0xff]  ;;  %v12528_v4 = vpop.permute.xlu0 %3915  ;;  %5622 = vmatpush3.bf16.msra.mxu1 %v5591_v59 }
 0x75a   : > { %v12516_v33 = vsel %vm15008_vm8, %v12316_v61, %v16755_v5  ;;  %v16756_v44 = vld [vmem:[#allocation736_spill] sm:$0xff]  ;;  %v12526_v56 = vsel %vm15008_vm8, %v12325_v41, %v16757_v28  ;;  %16758 = vst [vmem:[#allocation462_spill] sm:$0xff] %v12528_v4  ;;  %v5595_v57 = vpack.c.bf16 %v4951_v21, %v4950_v6  ;;  %v16759_v42 = vld [vmem:[#allocation350_spill] sm:$0xff]  ;;  %v16760_v61 = vld [vmem:[#allocation355_spill] sm:$0xff] }
 0x75b   : > { %v12521_v13 = vsel %vm15008_vm8, %v12320_v34, %v16756_v44  ;;  %v12533_v25 = vsel %vm15008_vm8, %v12331_v17, %v16759_v42  ;;  %v12538_v5 = vsel %vm15008_vm8, %v12336_v12, %v16760_v61  ;;  %v16761_v34 = vld [vmem:[#allocation745_spill] sm:$0xff]  ;;  %v16762_v41 = vld [vmem:[#allocation375_spill] sm:$0xff]  ;;  %v16763_v59 = vld [vmem:[#allocation124_spill] sm:$0xff]  ;;  %3790 = vrot.lane.b32.xlu0 %v16698_v40, %s5976_s18 }
 0x75c   : > { %v4433_v44 = vsel %vm15008_vm8, %v12368_v52, %v16761_v34  ;;  %v4559_v28 = vsel %vm2406_vm10, %v4495_v3, %v16762_v41  ;;  %3792 = vrot.lane.b32.xlu1 %v16763_v59, %s5976_s18  ;;  %v16764_v6 = vld [vmem:[#allocation738_spill] sm:$0xff]  ;;  %v16766_v12 = vld [vmem:[#allocation748_spill] sm:$0xff]  ;;  %5596 = vmatprep.subr.bf16.mxu0 %v5595_v57  ;;  %v16767_v3 = vld [vmem:[#allocation651_spill] sm:$0xff] }
 0x75d   : > { %v12550_v17 = vsel %vm15008_vm8, %v12340_v60, %v16764_v6  ;;  %v16765_v42 = vld [vmem:[#allocation362_spill] sm:$0xff]  ;;  %v4497_v61 = vsel %vm15007_vm9, %v4433_v44, %v16766_v12  ;;  %v12559_v52 = vld [vmem:[%s6067_s30 + $0x3b8] sm:$0x3]  ;;  %v4432_v34 = vsel %vm15008_vm8, %v12357_v26, %v16767_v3  ;;  %v16769_v6 = vld [vmem:[#allocation749_spill] sm:$0xff]  ;;  %5616 = vmatprep.subr.bf16.mxu1 %v5595_v57  ;;  %5598 = vmatpush3.bf16.msra.mxu0 %v5595_v57 }
 0x75e   : > { %v4527_v21 = vsel %vm2406_vm10, %v4463_v9, %v16765_v42  ;;  %v16768_v59 = vld [vmem:[#allocation744_spill] sm:$0xff]  ;;  %v16770_v41 = vld [vmem:[#allocation177_spill] sm:$0xff]  ;;  %v12570_v42 = vpop.permute.xlu1 %3578  ;;  %v4953_v26 = vld [vmem:[%s14461_s1 + $0x48] sm:$0xff]  ;;  %v4496_v44 = vsel %vm15007_vm9, %v4432_v34, %v16750_v46  ;;  %5623 = vmatpush3.bf16.msra.mxu1 %v5595_v57 }
 0x75f   : > { %v4434_v60 = vsel %vm15008_vm8, %v12364_v18, %v16768_v59  ;;  %v4465_v9 = vsel %vm15007_vm9, %v16770_v41, %v16769_v6  ;;  %16771 = vst [vmem:[#allocation463_spill] sm:$0xff] %v12570_v42  ;;  %v4952_v40 = vld [vmem:[%s14461_s1 + $0x40] sm:$0xff]  ;;  %v16772_v18 = vld [vmem:[#allocation295_spill] sm:$0xff]  ;;  %v4464_v41 = vsel %vm15007_vm9, %v4400_v22, %v16753_v27  ;;  %v12584_v59 = vpop.permute.xlu0 %3957  ;;  %v16774_v7 = vld [vmem:[#allocation374_spill] sm:$0xff]  ;;  %3842 = vrot.lane.b32.xlu0 %v12209_v14, %s5976_s18 }
 0x760   : > { %v4623_v3 = vsel %vm2439_vm11, %v4559_v28, %v16772_v18  ;;  %v5599_v42 = vpack.c.bf16 %v4953_v26, %v4952_v40  ;;  %v16773_v51 = vld [vmem:[#allocation391_spill] sm:$0xff]  ;;  %v4498_v4 = vsel %vm15007_vm9, %v4434_v60, %v16766_v12  ;;  %v4561_v46 = vsel %vm2406_vm10, %v4497_v61, %v16774_v7  ;;  %3844 = vrot.lane.b32.xlu1 %v12559_v52, %s5976_s18  ;;  %v16776_v22 = vld [vmem:[#allocation361_spill] sm:$0xff]  ;;  %v16777_v27 = vld [vmem:[#allocation750_spill] sm:$0xff]  ;;  %s14402_s18 = scalar_lea.hbm %s14463_s3, %s5460_s9 }
 0x761   : > { %v12588_v38 = vsel %vm2439_vm11, %v4527_v21, %v16773_v51  ;;  %v16775_v34 = vld [vmem:[#allocation131_spill] sm:$0xff]  ;;  %v4529_v57 = vsel %vm2406_vm10, %v4465_v9, %v16776_v22  ;;  %v4528_v40 = vsel %vm2406_vm10, %v4464_v41, %v16777_v27  ;;  %v16778_v21 = vld [vmem:[#allocation584_spill] sm:$0xff]  ;;  %v4767_v41 = vrot.slane %v4623_v3, 1  ;;  %v16786_v7 = vld [vmem:[#allocation390_spill] sm:$0xff] }
 0x762   : > { %v4560_v28 = vsel %vm2406_vm10, %v4496_v44, %v16775_v34  ;;  %5600 = vmatprep.subr.bf16.mxu0 %v5599_v42  ;;  %v16779_v12 = vld [vmem:[#allocation739_spill] sm:$0xff]  ;;  %v16781_v34 = vld [vmem:[#allocation588_spill] sm:$0xff]  ;;  %v12615_v22 = vpop.permute.xlu1 %3917  ;;  %5617 = vmatprep.subr.bf16.mxu1 %v5599_v42  ;;  %v4466_v27 = vsel %vm15007_vm9, %v4402_v49, %v16769_v6  ;;  %v4719_v3 = vrot.slane %v12588_v38, 1  ;;  %v12634_v51 = vsel %vm2439_vm11, %v4529_v57, %v16786_v7  ;;  %v16788_v6 = vld [vmem:[#allocation138_spill] sm:$0xff] }
 0x763   : > { %v4624_v26 = vsel %vm2439_vm11, %v4560_v28, %v16778_v21  ;;  %v12609_v61 = vsel %vm15008_vm8, %v12344_v36, %v16779_v12  ;;  %v16780_v60 = vld [vmem:[#allocation751_spill] sm:$0xff]  ;;  %v4592_v9 = vsel %vm2439_vm11, %v4528_v40, %v16781_v34  ;;  %16782 = vst [vmem:[#allocation465_spill] sm:$0xff] %v12615_v22  ;;  %5602 = vmatpush3.bf16.msra.mxu0 %v5599_v42  ;;  %v4955_v36 = vld [vmem:[%s14461_s1 + $0x58] sm:$0xff]  ;;  %v12627_v40 = vpop.permute.xlu0 %3580 }
 0x764   : > { %v4562_v44 = vsel %vm2406_vm10, %v4498_v4, %v16780_v60  ;;  %v4954_v28 = vld [vmem:[%s14461_s1 + $0x50] sm:$0xff]  ;;  %v16783_v4 = vld [vmem:[#allocation433_spill] sm:$0xff]  ;;  %16784 = vst [vmem:[#allocation466_spill] sm:$0xff] %v12627_v40  ;;  %5624 = vmatpush3.bf16.msra.mxu1 %v5599_v42  ;;  %v16785_v60 = vld [vmem:[#allocation300_spill] sm:$0xff]  ;;  %v4768_v49 = vrot.slane %v4624_v26, 1  ;;  %3929 = vrot.lane.b32.xlu1 %v16788_v6, %s5977_s19 }
 0x765   : > { %v4626_v21 = vsel %vm2439_vm11, %v4562_v44, %v16783_v4  ;;  %v5603_v12 = vpack.c.bf16 %v4955_v36, %v4954_v28  ;;  %v4625_v34 = vsel %vm2439_vm11, %v4561_v46, %v16785_v60  ;;  %v16787_v18 = vld [vmem:[#allocation752_spill] sm:$0xff]  ;;  %v4720_v44 = vrot.slane %v4592_v9, 1  ;;  %v16789_v4 = vld [vmem:[#allocation233_spill] sm:$0xff]  ;;  %v16793_v26 = vld [vmem:[#allocation478_spill] sm:$0xff] }
 0x766   : > { %v4530_v22 = vsel %vm2406_vm10, %v4466_v27, %v16787_v18  ;;  %v4435_v38 = vsel %vm15008_vm8, %v12384_v45, %v16789_v4  ;;  %v16790_v42 = vld [vmem:[#allocation436_spill] sm:$0xff]  ;;  %v16792_v36 = vld [vmem:[#allocation141_spill] sm:$0xff]  ;;  %v4771_v18 = vrot.slane %v4626_v21, 1  ;;  %v16794_v27 = vld [vmem:[#allocation451_spill] sm:$0xff]  ;;  %v12659_v4 = vpop.permute.xlu1 %3961  ;;  %v12678_v60 = vsel %vm371_vm0, %v4767_v41, %v4768_v49 }
 0x767   : > { %v12645_v28 = vsel %vm2439_vm11, %v4530_v22, %v16790_v42  ;;  %v16791_v46 = vld [vmem:[#allocation592_spill] sm:$0xff]  ;;  %3927 = vrot.lane.b32.xlu0 %v16792_v36, %s5977_s19  ;;  %5604 = vmatprep.subr.bf16.mxu0 %v5603_v12  ;;  %v4499_v9 = vsel %vm15007_vm9, %v4435_v38, %v16793_v26  ;;  %v4467_v45 = vsel %vm15007_vm9, %v12074_v39, %v16794_v27  ;;  %v16795_v6 = vld [vmem:[#allocation477_spill] sm:$0xff]  ;;  %v4957_v21 = vld [vmem:[%s14461_s1 + $0x68] sm:$0xf]  ;;  %v12670_v39 = vpop.permute.xlu0 %3959  ;;  %v4770_v40 = vrot.slane %v4625_v34, 1 }
 0x768   : > { %v4437_v57 = vsel %vm15008_vm8, %v12395_v29, %v16791_v46  ;;  %16796 = vst [vmem:[#allocation469_spill] sm:$0xff] %v12659_v4  ;;  %5618 = vmatprep.subr.bf16.mxu1 %v5603_v12  ;;  %5606 = vmatpush3.bf16.msra.mxu0 %v5603_v12  ;;  %v4956_v29 = vld [vmem:[%s14461_s1 + $0x60] sm:$0xff]  ;;  %v16797_v38 = vld [vmem:[#allocation450_spill] sm:$0xff]  ;;  %v16798_v42 = vld [vmem:[#allocation179_spill] sm:$0xff]  ;;  %v4722_v4 = vrot.slane %v12634_v51, 1 }
 0x769   : > { %v4501_v22 = vsel %vm15007_vm9, %v4437_v57, %v16795_v6  ;;  %v4469_v46 = vsel %vm15007_vm9, %v16798_v42, %v16797_v38  ;;  %5625 = vmatpush3.bf16.msra.mxu1 %v5603_v12  ;;  %v5607_v57 = vpack.c.bf16 %v4957_v21, %v4956_v29  ;;  %v16799_v36 = vld [vmem:[#allocation230_spill] sm:$0xff]  ;;  %3981 = vrot.lane.b32.xlu1 %v11861_v24, %s5977_s19  ;;  %v4723_v12 = vrot.slane %v12645_v28, 1  ;;  %v16802_v29 = vld [vmem:[#allocation377_spill] sm:$0xff]  ;;  %v16804_v51 = vld [vmem:[#allocation376_spill] sm:$0xff] }
 0x76a   : > { %v4436_v7 = vsel %vm15008_vm8, %v12380_v48, %v16799_v36  ;;  %v4563_v21 = vsel %vm2406_vm10, %v4499_v9, %v16802_v29  ;;  %v16803_v48 = vld [vmem:[#allocation364_spill] sm:$0xff]  ;;  %v12693_v24 = vsel %vm371_vm0, %v4719_v3, %v4720_v44  ;;  %v4565_v41 = vsel %vm2406_vm10, %v4501_v22, %v16804_v51  ;;  %v16805_v34 = vld [vmem:[#allocation363_spill] sm:$0xff]  ;;  %v12702_v9 = vpop.permute.xlu1 %3584  ;;  %v16810_v51 = vld [vmem:[#allocation393_spill] sm:$0xff] }
 0x76b   : > { %v4531_v36 = vsel %vm2406_vm10, %v4467_v45, %v16803_v48  ;;  %3979 = vrot.lane.b32.xlu0 %v12153_v62, %s5977_s19  ;;  %5609 = vmatprep.subr.msk.bf16.mxu0 %vm12681_vm14, %v5607_v57  ;;  %v4533_v49 = vsel %vm2406_vm10, %v4469_v46, %v16805_v34  ;;  %v3893_v28 = vrot.slane %v12559_v52, 1  ;;  %16806 = vst [vmem:[#allocation470_spill] sm:$0xff] %v12702_v9  ;;  %v3892_v45 = vrot.slane %v12209_v14, 1  ;;  %v16807_v62 = vld [vmem:[#allocation589_spill] sm:$0xff]  ;;  %v12717_v22 = vpop.permute.xlu0 %3582  ;;  %v16809_v46 = vld [vmem:[#allocation299_spill] sm:$0xff]  ;;  %v16814_v42 = vld [vmem:[#allocation392_spill] sm:$0xff] }
 0x76c   : > { %5619 = vmatprep.subr.msk.bf16.mxu1 %vm12681_vm14, %v5607_v57  ;;  %5612 = vmatpush3.bf16.msk.msra.mxu0 %vm12681_vm14, %v5607_v57  ;;  %v4438_v3 = vsel %vm15008_vm8, %v12388_v35, %v16807_v62  ;;  %v4500_v44 = vsel %vm15007_vm9, %v4436_v7, %v16793_v26  ;;  %v4468_v52 = vsel %vm15007_vm9, %v12489_v1, %v16794_v27  ;;  %v16811_v26 = vld [vmem:[#allocation753_spill] sm:$0xff]  ;;  %v16812_v27 = vld [vmem:[#allocation240_spill] sm:$0xff]  ;;  %v16817_v62 = vld [vmem:[#allocation754_spill] sm:$0xff] }
 0x76d   : > { %16808 = vst [vmem:[#allocation473_spill] sm:$0xff] %v12717_v22  ;;  %v12720_v14 = vsel %vm371_vm0, %v4770_v40, %v4771_v18  ;;  %5626 = vmatpush3.bf16.msk.msra.mxu1 %vm12681_vm14, %v5607_v57  ;;  %v4627_v29 = vsel %vm2439_vm11, %v4563_v21, %v16809_v46  ;;  %v4595_v35 = vsel %vm2439_vm11, %v4531_v36, %v16810_v51  ;;  %v16813_v40 = vld [vmem:[#allocation304_spill] sm:$0xff]  ;;  %v16815_v36 = vld [vmem:[#allocation757_spill] sm:$0xff]  ;;  %v16830_v51 = vld [vmem:[#allocation366_spill] sm:$0xff]  ;;  %vm4911_vm14 = vcmask 523264  }
 0x76e   : > { %v4502_v7 = vsel %vm15007_vm9, %v4438_v3, %v16795_v6  ;;  %v4564_v1 = vsel %vm2406_vm10, %v4500_v44, %v16811_v26  ;;  %3933 = vrot.lane.b32.xlu1 %v16812_v27, %s5977_s19  ;;  %v4629_v18 = vsel %vm2439_vm11, %v4565_v41, %v16813_v40  ;;  %v4470_v57 = vsel %vm15007_vm9, %v12516_v33, %v16797_v38  ;;  %v16816_v6 = vld [vmem:[#allocation243_spill] sm:$0xff]  ;;  %v16819_v41 = vld [vmem:[#allocation760_spill] sm:$0xff]  ;;  %v12752_v33 = vpop.permute.xlu1 %3709  ;;  %v16821_v27 = vld [vmem:[#allocation762_spill] sm:$0xff] }
 0x76f   : > { %v4597_v21 = vsel %vm2439_vm11, %v4533_v49, %v16814_v42  ;;  %v4628_v34 = vsel %vm2439_vm11, %v4564_v1, %v16815_v36  ;;  %3931 = vrot.lane.b32.xlu0 %v16816_v6, %s5977_s19  ;;  %v4532_v3 = vsel %vm2406_vm10, %v4468_v52, %v16817_v62  ;;  %v16818_v44 = vld [vmem:[#allocation755_spill] sm:$0xff]  ;;  %v4439_v26 = vsel %vm15008_vm8, %v12403_v15, %v16819_v41  ;;  %v16820_v49 = vld [vmem:[#allocation756_spill] sm:$0xff]  ;;  %v12765_v6 = vpop.permute.xlu0 %3677  ;;  %v16824_v62 = vld [vmem:[#allocation758_spill] sm:$0xff] }
 0x770   : > { %v4566_v46 = vsel %vm2406_vm10, %v4502_v7, %v16818_v44  ;;  %v3894_v38 = vsel %vm371_vm0, %v3892_v45, %v3893_v28  ;;  %v4534_v1 = vsel %vm2406_vm10, %v4470_v57, %v16820_v49  ;;  %v4441_v40 = vsel %vm15008_vm8, %v12415_v30, %v16821_v27  ;;  %v16822_v42 = vld [vmem:[#allocation763_spill] sm:$0xff]  ;;  %v16823_v36 = vld [vmem:[#allocation48_spill] sm:$0xff]  ;;  %v16826_v41 = vld [vmem:[#allocation57_spill] sm:$0xff] }
 0x771   : > { %v4503_v52 = vsel %vm15007_vm9, %v4439_v26, %v16822_v42  ;;  %v4471_v7 = vsel %vm15007_vm9, %v12105_v23, %v16823_v36  ;;  %v4774_v15 = vrot.slane %v4628_v34, 1  ;;  %v4596_v45 = vsel %vm2439_vm11, %v4532_v3, %v16824_v62  ;;  %v16825_v44 = vld [vmem:[#allocation56_spill] sm:$0xff]  ;;  %v16828_v27 = vld [vmem:[#allocation761_spill] sm:$0xff]  ;;  %v16829_v62 = vld [vmem:[#allocation379_spill] sm:$0xff] }
 0x772   : > { %v4505_v57 = vsel %vm15007_vm9, %v4441_v40, %v16825_v44  ;;  %v4473_v30 = vsel %vm15007_vm9, %v12109_v54, %v16826_v41  ;;  %3985 = vrot.lane.b32.xlu1 %v3893_v28, %s5977_s19  ;;  %v16827_v26 = vld [vmem:[#allocation596_spill] sm:$0xff]  ;;  %v4598_v23 = vsel %vm2439_vm11, %v4534_v1, %v16828_v27  ;;  %v4724_v34 = vsel %vm371_vm0, %v4722_v4, %v4723_v12  ;;  %v12785_v54 = vpop.permute.xlu1 %3711  ;;  %v16832_v1 = vld [vmem:[#allocation365_spill] sm:$0xff]  ;;  %v16833_v12 = vld [vmem:[#allocation759_spill] sm:$0xff] }
 0x773   : > { %v4630_v49 = vsel %vm2439_vm11, %v4566_v46, %v16827_v26  ;;  %3983 = vrot.lane.b32.xlu0 %v3894_v38, %s5977_s19  ;;  %v4773_v3 = vrot.slane %v4627_v29, 1  ;;  %v4567_v40 = vsel %vm2406_vm10, %v4503_v52, %v16829_v62  ;;  %v4535_v48 = vsel %vm2406_vm10, %v4471_v7, %v16830_v51  ;;  %v16831_v46 = vld [vmem:[#allocation378_spill] sm:$0xff]  ;;  %v12791_v27 = vpop.permute.xlu0 %3679  ;;  %s5984_s19 = smov 64   ;;  %v16834_v7 = vld [vmem:[#allocation404_spill] sm:$0xff] }
 0x774   : > { %v4725_v28 = vrot.slane %v4595_v35, 1  ;;  %v4776_v22 = vrot.slane %v4629_v18, 1  ;;  %v4726_v9 = vrot.slane %v4596_v45, 1  ;;  %v4569_v26 = vsel %vm2406_vm10, %v4505_v57, %v16831_v46  ;;  %v16835_v57 = vld [vmem:[#allocation395_spill] sm:$0xff]  ;;  %v16841_v62 = vld [vmem:[#allocation84_spill] sm:$0xff]  ;;  %v16842_v46 = vld [vmem:[#allocation85_spill] sm:$0xff] }
 0x775   : > { %v4537_v38 = vsel %vm2406_vm10, %v4473_v30, %v16832_v1  ;;  %v4728_v4 = vrot.slane %v4597_v21, 1  ;;  %v4440_v29 = vsel %vm15008_vm8, %v12399_v8, %v16833_v12  ;;  %v4777_v52 = vrot.slane %v4630_v49, 1  ;;  %v16837_v30 = vld [vmem:[#allocation394_spill] sm:$0xff]  ;;  %v16838_v49 = vld [vmem:[#allocation81_spill] sm:$0xff] }
 0x776   : > { %v4729_v51 = vrot.slane %v4598_v23, 1  ;;  %4847 = vrot.lane.b32.xlu1 %v12678_v60, %s5984_s19  ;;  %v4775_v35 = vsel %vm371_vm0, %v4773_v3, %v4774_v15  ;;  %v4504_v18 = vsel %vm15007_vm9, %v4440_v29, %v16822_v42  ;;  %v4631_v45 = vsel %vm2439_vm11, %v4567_v40, %v16834_v7  ;;  %v16836_v60 = vld [vmem:[#allocation303_spill] sm:$0xff]  ;;  %v16839_v3 = vld [vmem:[#allocation597_spill] sm:$0xff] }
 0x777   : > { %v4472_v21 = vsel %vm15007_vm9, %v12501_v53, %v16823_v36  ;;  %v12808_v8 = vsel %vm2439_vm11, %v4535_v48, %v16835_v57  ;;  %4815 = vrot.lane.b32.xlu0 %v12693_v24, %s5984_s19  ;;  %v12814_v15 = vsel %vm2439_vm11, %v4569_v26, %v16836_v60  ;;  %v12818_v42 = vsel %vm2439_vm11, %v4537_v38, %v16837_v30  ;;  %v12824_v36 = vpop.permute.xlu1 %3822  ;;  %v16840_v48 = vld [vmem:[#allocation593_spill] sm:$0xff]  ;;  %v12835_v1 = vpop.permute.xlu0 %3778  ;;  %v16844_v57 = vld [vmem:[#allocation83_spill] sm:$0xff] }
 0x778   : > { %v4568_v23 = vsel %vm2406_vm10, %v4504_v18, %v16838_v49  ;;  %v4536_v53 = vsel %vm2406_vm10, %v4472_v21, %v16839_v3  ;;  %v4442_v24 = vsel %vm15008_vm8, %v12408_v47, %v16840_v48  ;;  %v4727_v38 = vsel %vm371_vm0, %v4725_v28, %v4726_v9  ;;  %v16843_v28 = vld [vmem:[#allocation82_spill] sm:$0xff]  ;;  %v16849_v49 = vld [vmem:[#allocation140_spill] sm:$0xff] }
 0x779   : > { %v4632_v40 = vsel %vm2439_vm11, %v4568_v23, %v16841_v62  ;;  %v12833_v26 = vsel %vm2439_vm11, %v4536_v53, %v16842_v46  ;;  %v4506_v12 = vsel %vm15007_vm9, %v4442_v24, %v16825_v44  ;;  %v4778_v29 = vsel %vm371_vm0, %v4776_v22, %v4777_v52  ;;  %v16850_v53 = vld [vmem:[#allocation142_spill] sm:$0xff]  ;;  %v16852_v62 = vld [vmem:[#allocation147_spill] sm:$0xff]  ;;  %v16853_v46 = vld [vmem:[#allocation149_spill] sm:$0xff] }
 0x77a   : > { %4849 = vrot.lane.b32.xlu1 %v12720_v14, %s5984_s19  ;;  %v4730_v47 = vsel %vm371_vm0, %v4728_v4, %v4729_v51  ;;  %v4779_v18 = vrot.slane %v4631_v45, 1  ;;  %v4474_v7 = vsel %vm15007_vm9, %v12526_v56, %v16826_v41  ;;  %v4731_v21 = vrot.slane %v12808_v8, 1  ;;  %v16845_v56 = vld [vmem:[#allocation95_spill] sm:$0xff]  ;;  %v16851_v48 = vld [vmem:[#allocation146_spill] sm:$0xff] }
 0x77b   : > { %4817 = vrot.lane.b32.xlu0 %v4724_v34, %s5984_s19  ;;  %v4782_v9 = vrot.slane %v12814_v15, 1  ;;  %v4734_v44 = vrot.slane %v12818_v42, 1  ;;  %v4570_v14 = vsel %vm2406_vm10, %v4506_v12, %v16843_v28  ;;  %v4538_v22 = vsel %vm2406_vm10, %v4474_v7, %v16844_v57  ;;  %v12856_v51 = vpop.permute.xlu1 %3780  ;;  %v16846_v34 = vld [vmem:[#allocation100_spill] sm:$0xff]  ;;  %v16847_v8 = vld [vmem:[#allocation115_spill] sm:$0xff]  ;;  %v12868_v42 = vpop.permute.xlu0 %3824  ;;  %v16854_v12 = vld [vmem:[#allocation154_spill] sm:$0xff] }
 0x77c   : > { %v4780_v4 = vrot.slane %v4632_v40, 1  ;;  %v4732_v52 = vrot.slane %v12833_v26, 1  ;;  %v4444_v41 = vsel %vm15008_vm8, %v12419_v20, %v16845_v56  ;;  %v4443_v45 = vsel %vm15008_vm8, %v12423_v37, %v16846_v34  ;;  %v16848_v15 = vld [vmem:[#allocation7_spill] sm:$0xff] }
 0x77d   : > { %v4634_v60 = vsel %vm2439_vm11, %v4570_v14, %v16847_v8  ;;  %v4602_v30 = vsel %vm2439_vm11, %v4538_v22, %v16848_v15  ;;  %v4507_v23 = vsel %vm15007_vm9, %v4443_v45, %v16849_v49  ;;  %v4508_v3 = vsel %vm15007_vm9, %v4444_v41, %v16849_v49  ;;  %v16857_v14 = vld [vmem:[#allocation162_spill] sm:$0xff]  ;;  %v16858_v22 = vld [vmem:[#allocation163_spill] sm:$0xff]  ;;  %v16859_v8 = vld [vmem:[#allocation9_spill] sm:$0xff] }
 0x77e   : > { %v4475_v20 = vsel %vm15007_vm9, %v12120_v19, %v16850_v53  ;;  %v4476_v37 = vsel %vm15007_vm9, %v12521_v13, %v16850_v53  ;;  %4851 = vrot.lane.b32.xlu1 %v4775_v35, %s5984_s19  ;;  %v4572_v26 = vsel %vm2406_vm10, %v4508_v3, %v16853_v46  ;;  %v4571_v7 = vsel %vm2406_vm10, %v4507_v23, %v16854_v12  ;;  %v16855_v19 = vld [vmem:[#allocation160_spill] sm:$0xff]  ;;  %v16856_v13 = vld [vmem:[#allocation161_spill] sm:$0xff]  ;;  %v16860_v23 = vld [vmem:[#allocation118_spill] sm:$0xff] }
 0x77f   : > { %v4540_v24 = vsel %vm2406_vm10, %v4476_v37, %v16851_v48  ;;  %v4539_v40 = vsel %vm2406_vm10, %v4475_v20, %v16852_v62  ;;  %4819 = vrot.lane.b32.xlu0 %v4727_v38, %s5984_s19  ;;  %v4636_v57 = vsel %vm2439_vm11, %v4572_v26, %v16857_v14  ;;  %v4635_v56 = vsel %vm2439_vm11, %v4571_v7, %v16858_v22  ;;  %v12898_v41 = vpop.permute.xlu1 %3828  ;;  %v12903_v15 = vpop.permute.xlu0 %3826  ;;  %v16861_v53 = vld [vmem:[#allocation144_spill] sm:$0xff]  ;;  %v16862_v37 = vld [vmem:[#allocation145_spill] sm:$0xff]  ;;  %v16867_v7 = vld [vmem:[#allocation171_spill] sm:$0xff] }
 0x780   : > { %v4604_v28 = vsel %vm2439_vm11, %v4540_v24, %v16855_v19  ;;  %v4603_v35 = vsel %vm2439_vm11, %v4539_v40, %v16856_v13  ;;  %v4783_v34 = vrot.slane %v4634_v60, 1  ;;  %v4735_v45 = vrot.slane %v4602_v30, 1  ;;  %v16863_v24 = vld [vmem:[#allocation155_spill] sm:$0xff]  ;;  %v16864_v40 = vld [vmem:[#allocation156_spill] sm:$0xff]  ;;  %v16865_v46 = vld [vmem:[#allocation157_spill] sm:$0xff] }
 0x781   : > { %v4446_v38 = vsel %vm15008_vm8, %v12430_v43, %v16859_v8  ;;  %v4781_v49 = vsel %vm371_vm0, %v4779_v18, %v4780_v4  ;;  %v4445_v3 = vsel %vm15008_vm8, %v12435_v11, %v16860_v23  ;;  %v4477_v60 = vsel %vm15007_vm9, %v12124_v55, %v16862_v37  ;;  %v16868_v19 = vld [vmem:[#allocation172_spill] sm:$0xff]  ;;  %v16869_v13 = vld [vmem:[#allocation175_spill] sm:$0xff]  ;;  %v16871_v23 = vld [vmem:[#allocation166_spill] sm:$0xff] }
 0x782   : > { %v4510_v20 = vsel %vm15007_vm9, %v4446_v38, %v16861_v53  ;;  %v4478_v30 = vsel %vm15007_vm9, %v12538_v5, %v16862_v37  ;;  %4853 = vrot.lane.b32.xlu1 %v4778_v29, %s5984_s19  ;;  %v4738_v43 = vrot.slane %v4604_v28, 1  ;;  %v4737_v48 = vrot.slane %v4603_v35, 1  ;;  %v16866_v29 = vld [vmem:[#allocation159_spill] sm:$0xff]  ;;  %v16872_v37 = vld [vmem:[#allocation170_spill] sm:$0xff] }
 0x783   : > { %v4786_v18 = vrot.slane %v4636_v57, 1  ;;  %v4785_v4 = vrot.slane %v4635_v56, 1  ;;  %4821 = vrot.lane.b32.xlu0 %v4730_v47, %s5984_s19  ;;  %v4509_v11 = vsel %vm15007_vm9, %v4445_v3, %v16861_v53  ;;  %v4542_v62 = vsel %vm2406_vm10, %v4478_v30, %v16863_v24  ;;  %v12927_v26 = vpop.permute.xlu1 %3963  ;;  %v12941_v14 = vpop.permute.xlu0 %3919  ;;  %v16870_v57 = vld [vmem:[#allocation178_spill] sm:$0xff]  ;;  %v16874_v30 = vld [vmem:[#allocation181_spill] sm:$0xff] }
 0x784   : > { %v4541_v55 = vsel %vm2406_vm10, %v4477_v60, %v16864_v40  ;;  %v4574_v5 = vsel %vm2406_vm10, %v4510_v20, %v16865_v46  ;;  %v4573_v12 = vsel %vm2406_vm10, %v4509_v11, %v16866_v29  ;;  %v12933_v47 = vsel %vm2439_vm11, %v4542_v62, %v16867_v7  ;;  %v16876_v11 = vld [vmem:[#allocation368_spill] sm:$0xff] }
 0x785   : > { %v12937_v28 = vsel %vm2439_vm11, %v4541_v55, %v16868_v19  ;;  %v4638_v35 = vsel %vm2439_vm11, %v4574_v5, %v16869_v13  ;;  %v4637_v22 = vsel %vm2439_vm11, %v4573_v12, %v16870_v57  ;;  %v4733_v56 = vsel %vm371_vm0, %v4731_v21, %v4732_v52  ;;  %v16879_v5 = vld [vmem:[#allocation196_spill] sm:$0xff]  ;;  %v16880_v12 = vld [vmem:[#allocation462_spill] sm:$0xff]  ;;  %v16883_v13 = vld [vmem:[#allocation465_spill] sm:$0xff] }
 0x786   : > { %4855 = vrot.lane.b32.xlu1 %v4781_v49, %s5984_s19  ;;  %v4784_v8 = vsel %vm371_vm0, %v4782_v9, %v4783_v34  ;;  %v4736_v38 = vsel %vm371_vm0, %v4734_v44, %v4735_v45  ;;  %v4448_v3 = vsel %vm15008_vm8, %v12439_v10, %v16871_v23  ;;  %v4479_v53 = vsel %vm15007_vm9, %v12533_v25, %v12168_v58  ;;  %v16873_v45 = vld [vmem:[#allocation180_spill] sm:$0xff]  ;;  %v16884_v57 = vld [vmem:[#allocation399_spill] sm:$0xff] }
 0x787   : > { %4823 = vrot.lane.b32.xlu0 %v4733_v56, %s5984_s19  ;;  %v4787_v20 = vsel %vm371_vm0, %v4785_v4, %v4786_v18  ;;  %v4739_v49 = vsel %vm371_vm0, %v4737_v48, %v4738_v43  ;;  %v4447_v21 = vsel %vm15008_vm8, %v12452_v32, %v16872_v37  ;;  %v4741_v9 = vrot.slane %v12933_v47, 1  ;;  %v12963_v10 = vpop.permute.xlu1 %3586  ;;  %v12974_v43 = vpop.permute.xlu0 %3965  ;;  %v16875_v48 = vld [vmem:[#allocation182_spill] sm:$0xff]  ;;  %v16885_v56 = vld [vmem:[#allocation193_spill] sm:$0xff] }
 0x788   : > { %v4740_v44 = vrot.slane %v12937_v28, 1  ;;  %v4789_v52 = vrot.slane %v4638_v35, 1  ;;  %v4788_v34 = vrot.slane %v4637_v22, 1  ;;  %v4450_v25 = vsel %vm15008_vm8, %v12457_v31, %v16873_v45 }
 0x789   : > { %v4449_v60 = vsel %vm15008_vm8, %v12462_v50, %v12111_v2  ;;  %v4481_v32 = vsel %vm15007_vm9, %v16874_v30, %v12247_v16  ;;  %v4511_v18 = vsel %vm15007_vm9, %v4447_v21, %v16875_v48  ;;  %v4512_v4 = vsel %vm15007_vm9, %v4448_v3, %v16875_v48  ;;  %v16877_v2 = vld [vmem:[#allocation190_spill] sm:$0xff]  ;;  %v16892_v48 = vld [vmem:[#allocation191_spill] sm:$0xff] }
 0x78a   : > { %v4480_v31 = vsel %vm15007_vm9, %v12609_v61, %v12168_v58  ;;  %v4543_v24 = vsel %vm2406_vm10, %v4479_v53, %v16876_v11  ;;  %4857 = vrot.lane.b32.xlu1 %v4784_v8, %s5984_s19  ;;  %v4513_v50 = vsel %vm15007_vm9, %v4449_v60, %v16877_v2  ;;  %v4514_v62 = vsel %vm15007_vm9, %v4450_v25, %v16877_v2  ;;  %v16878_v58 = vld [vmem:[#allocation367_spill] sm:$0xff]  ;;  %v16888_v53 = vld [vmem:[#allocation192_spill] sm:$0xff]  ;;  %v16889_v21 = vld [vmem:[#allocation398_spill] sm:$0xff] }
 0x78b   : > { %v4482_v40 = vsel %vm15007_vm9, %v12550_v17, %v12247_v16  ;;  %v4544_v55 = vsel %vm2406_vm10, %v4480_v31, %v12327_v63  ;;  %4825 = vrot.lane.b32.xlu0 %v4736_v38, %s5984_s19  ;;  %v4545_v61 = vsel %vm2406_vm10, %v4481_v32, %v16878_v58  ;;  %v4576_v29 = vsel %vm2406_vm10, %v4512_v4, %v16879_v5  ;;  %v13004_v47 = vpop.permute.xlu1 %3921  ;;  %v16881_v16 = vld [vmem:[#allocation197_spill] sm:$0xff]  ;;  %v16882_v63 = vld [vmem:[#allocation456_spill] sm:$0xff]  ;;  %v13014_v35 = vpop.permute.xlu0 %3588  ;;  %v16891_v32 = vld [vmem:[#allocation727_spill] sm:$0xff] }
 0x78c   : > { %v4546_v46 = vsel %vm2406_vm10, %v4482_v40, %v12370_v0  ;;  %v4608_v7 = vsel %vm2439_vm11, %v4544_v55, %v16880_v12  ;;  %v4578_v17 = vsel %vm2406_vm10, %v4514_v62, %v16881_v16  ;;  %v4577_v19 = vsel %vm2406_vm10, %v4513_v50, %v16882_v63  ;;  %v16886_v38 = vld [vmem:[#allocation469_spill] sm:$0xff]  ;;  %v16893_v50 = vld [vmem:[#allocation188_spill] sm:$0xff]  ;;  %v16898_v16 = vld [vmem:[#allocation463_spill] sm:$0xff] }
 0x78d   : > { %v4640_v28 = vsel %vm2439_vm11, %v4576_v29, %v12584_v59  ;;  %v4610_v0 = vsel %vm2439_vm11, %v4546_v46, %v16883_v13  ;;  %v4607_v22 = vsel %vm2439_vm11, %v4543_v24, %v16884_v57  ;;  %v4575_v8 = vsel %vm2406_vm10, %v4511_v18, %v16885_v56  ;;  %v16887_v59 = vld [vmem:[#allocation726_spill] sm:$0xff]  ;;  %v16890_v25 = vld [vmem:[#allocation461_spill] sm:$0xff] }
 0x78e   : > { %v4642_v23 = vsel %vm2439_vm11, %v4578_v17, %v16886_v38  ;;  %v4641_v3 = vsel %vm2439_vm11, %v4577_v19, %v12670_v39  ;;  %4859 = vrot.lane.b32.xlu1 %v4787_v20, %s5984_s19  ;;  %v4390_v37 = vsel %vm2307_vm7, %v16888_v53, %v16887_v59  ;;  %v4609_v45 = vsel %vm2439_vm11, %v4545_v61, %v16889_v21  ;;  %v16894_v61 = vld [vmem:[#allocation66_spill] sm:$0xff]  ;;  %v16899_v17 = vld [vmem:[#allocation460_spill] sm:$0xff] }
 0x78f   : > { %v4639_v60 = vsel %vm2439_vm11, %v4575_v8, %v16890_v25  ;;  %v4744_v30 = vrot.slane %v4608_v7, 1  ;;  %4827 = vrot.lane.b32.xlu0 %v4739_v49, %s5984_s19  ;;  %v4389_v18 = vsel %vm2307_vm7, %v16892_v48, %v16891_v32  ;;  %v4792_v39 = vrot.slane %v4640_v28, 1  ;;  %v3970_v20 = vpop.permute.xlu1 %3969  ;;  %v3968_v40 = vpop.permute.xlu0 %3967  ;;  %v16895_v46 = vld [vmem:[#allocation194_spill] sm:$0xff]  ;;  %v16901_v28 = vld [vmem:[#allocation457_spill] sm:$0xff]  ;;  %v16981_v21 = vld [vmem:[#allocation740_spill] sm:$0xff] }
 0x790   : > { %v4747_v4 = vrot.slane %v4610_v0, 1  ;;  %v4790_v31 = vsel %vm371_vm0, %v4788_v34, %v4789_v52  ;;  %v4795_v24 = vrot.slane %v4642_v23, 1  ;;  %v4794_v2 = vrot.slane %v4641_v3, 1  ;;  %v16896_v7 = vld [vmem:[#allocation418_spill] sm:$0xff]  ;;  %v16897_v52 = vld [vmem:[#allocation195_spill] sm:$0xff] }
 0x791   : > { %v4483_v62 = vsel %vm15007_vm9, %v16893_v50, %v12765_v6  ;;  %v4743_v55 = vrot.slane %v4607_v22, 1  ;;  %v4422_v49 = vsel %vm15008_vm8, %v16895_v46, %v16894_v61  ;;  %v4791_v5 = vrot.slane %v4639_v60, 1  ;;  %v16900_v19 = vld [vmem:[#allocation466_spill] sm:$0xff] }
 0x792   : > { %4861 = vrot.lane.b32.xlu1 %v4790_v31, %s5984_s19  ;;  %v4742_v29 = vsel %vm371_vm0, %v4740_v44, %v4741_v9  ;;  %v4746_v12 = vrot.slane %v4609_v45, 1  ;;  %v4420_v34 = vsel %vm15008_vm8, %v16897_v52, %v16896_v7  ;;  %v4451_v63 = vsel %vm15008_vm8, %v16899_v17, %v16898_v16  ;;  %v16902_v44 = vld [vmem:[#allocation370_spill] sm:$0xff]  ;;  %v16915_v16 = vld [vmem:[#allocation87_spill] sm:$0xff] }
 0x793   : > { %v4452_v13 = vsel %vm15008_vm8, %v16901_v28, %v16900_v19  ;;  %4829 = vrot.lane.b32.xlu0 %v4742_v29, %s5984_s19  ;;  %v4745_v0 = vsel %vm371_vm0, %v4743_v55, %v4744_v30  ;;  %v4547_v22 = vsel %vm2406_vm10, %v4483_v62, %v16902_v44  ;;  %v13060_v56 = vpop.permute.xlu1 %3592  ;;  %v4793_v8 = vsel %vm371_vm0, %v4791_v5, %v4792_v39  ;;  %v16903_v23 = vld [vmem:[#allocation470_spill] sm:$0xff]  ;;  %v13070_v45 = vpop.permute.xlu0 %3590  ;;  %v16904_v30 = vld [vmem:[#allocation187_spill] sm:$0xff]  ;;  %v16906_v39 = vld [vmem:[#allocation401_spill] sm:$0xff] }
 0x794   : > { %v4516_v9 = vsel %vm15007_vm9, %v4452_v13, %v12752_v33  ;;  %v4748_v38 = vsel %vm371_vm0, %v4746_v12, %v4747_v4  ;;  %v4454_v3 = vsel %vm15008_vm8, %v4390_v37, %v16903_v23  ;;  %v4484_v59 = vsel %vm15007_vm9, %v4420_v34, %v12765_v6  ;;  %v16909_v5 = vld [vmem:[#allocation600_spill] sm:$0xff]  ;;  %v16910_v29 = vld [vmem:[#allocation165_spill] sm:$0xff]  ;;  %v16913_v52 = vld [vmem:[#allocation86_spill] sm:$0xff] }
 0x795   : > { %v4580_v53 = vsel %vm2406_vm10, %v4516_v9, %v12868_v42  ;;  %v4796_v25 = vsel %vm371_vm0, %v4794_v2, %v4795_v24  ;;  %v4515_v60 = vsel %vm15007_vm9, %v4451_v63, %v12752_v33  ;;  %v4485_v32 = vsel %vm15007_vm9, %v16904_v30, %v12791_v27  ;;  %v16905_v42 = vld [vmem:[#allocation473_spill] sm:$0xff]  ;;  %v16914_v34 = vld [vmem:[#allocation204_spill] sm:$0xff] }
 0x796   : > { %v4548_v37 = vsel %vm2406_vm10, %v4484_v59, %v12835_v1  ;;  %v4644_v6 = vsel %vm2439_vm11, %v4580_v53, %v12974_v43  ;;  %4863 = vrot.lane.b32.xlu1 %v4793_v8, %s5984_s19  ;;  %v4453_v48 = vsel %vm15008_vm8, %v4389_v18, %v16905_v42  ;;  %v4611_v4 = vsel %vm2439_vm11, %v4547_v22, %v16906_v39  ;;  %v16916_v63 = vld [vmem:[#allocation205_spill] sm:$0xff]  ;;  %v16920_v59 = vld [vmem:[#allocation92_spill] sm:$0xff] }
 0x797   : > { %v4579_v33 = vsel %vm2406_vm10, %v4515_v60, %v12824_v36  ;;  %v4612_v31 = vsel %vm2439_vm11, %v4548_v37, %v12941_v14  ;;  %4831 = vrot.lane.b32.xlu0 %v4745_v0, %s5984_s19  ;;  %v4517_v1 = vsel %vm15007_vm9, %v4453_v48, %v12785_v54  ;;  %v4518_v43 = vsel %vm15007_vm9, %v4454_v3, %v12785_v54  ;;  %v13100_v2 = vpop.permute.xlu1 %3713  ;;  %v16907_v36 = vld [vmem:[#allocation369_spill] sm:$0xff]  ;;  %v13108_v61 = vpop.permute.xlu0 %3681  ;;  %v16919_v3 = vld [vmem:[#allocation206_spill] sm:$0xff]  ;;  %v16923_v42 = vld [vmem:[#allocation208_spill] sm:$0xff] }
 0x798   : > { %v4486_v18 = vsel %vm15007_vm9, %v4422_v49, %v12791_v27  ;;  %v4643_v24 = vsel %vm2439_vm11, %v4579_v33, %v12927_v26  ;;  %v4549_v50 = vsel %vm2406_vm10, %v4485_v32, %v16907_v36  ;;  %v4582_v14 = vsel %vm2406_vm10, %v4518_v43, %v12898_v41  ;;  %v16908_v49 = vld [vmem:[#allocation198_spill] sm:$0xff]  ;;  %v16917_v19 = vld [vmem:[#allocation89_spill] sm:$0xff]  ;;  %v16921_v32 = vld [vmem:[#allocation207_spill] sm:$0xff] }
 0x799   : > { %v4581_v62 = vsel %vm2406_vm10, %v4517_v1, %v12903_v15  ;;  %v4798_v55 = vrot.slane %v4644_v6, 1  ;;  %v4550_v54 = vsel %vm2406_vm10, %v4486_v18, %v12856_v51  ;;  %v4750_v27 = vrot.slane %v4612_v31, 1  ;;  %v16911_v15 = vld [vmem:[#allocation148_spill] sm:$0xff]  ;;  %v16922_v37 = vld [vmem:[#allocation93_spill] sm:$0xff]  ;;  %v16924_v48 = vld [vmem:[#allocation94_spill] sm:$0xff] }
 0x79a   : > { %v4646_v26 = vsel %vm2439_vm11, %v4582_v14, %v3970_v20  ;;  %v4645_v46 = vsel %vm2439_vm11, %v4581_v62, %v3968_v40  ;;  %4865 = vrot.lane.b32.xlu1 %v4796_v25, %s5984_s19  ;;  %v13118_v41 = vsel %vm2241_vm5, %v16909_v5, %v16908_v49  ;;  %v4167_v12 = vsel %vm2208_vm4, %v16911_v15, %v16910_v29  ;;  %v16912_v20 = vld [vmem:[#allocation199_spill] sm:$0xff]  ;;  %v16925_v33 = vld [vmem:[#allocation548_spill] sm:$0xff]  ;;  %v16930_v62 = vld [vmem:[#allocation210_spill] sm:$0xff] }
 0x79b   : > { %v4797_v7 = vrot.slane %v4643_v24, 1  ;;  %v4614_v51 = vsel %vm2439_vm11, %v4550_v54, %v13004_v47  ;;  %4833 = vrot.lane.b32.xlu0 %v4748_v38, %s5984_s19  ;;  %v13129_v40 = vsel %vm2241_vm5, %v16913_v52, %v16912_v20  ;;  %v13134_v17 = vsel %vm2274_vm6, %v16915_v16, %v16914_v34  ;;  %v13141_v0 = vpop.permute.xlu1 %3715  ;;  %v16918_v47 = vld [vmem:[#allocation400_spill] sm:$0xff]  ;;  %v13145_v38 = vpop.permute.xlu0 %3683  ;;  %v16928_v24 = vld [vmem:[#allocation209_spill] sm:$0xff]  ;;  %v16935_v15 = vld [vmem:[#allocation99_spill] sm:$0xff] }
 0x79c   : > { %v13139_v28 = vsel %vm2274_vm6, %v16917_v19, %v16916_v63  ;;  %v4749_v13 = vrot.slane %v4611_v4, 1  ;;  %v4613_v9 = vsel %vm2439_vm11, %v4549_v50, %v16918_v47  ;;  %v4801_v22 = vrot.slane %v4646_v26, 1  ;;  %v16926_v31 = vld [vmem:[#allocation80_spill] sm:$0xff]  ;;  %v16933_v26 = vld [vmem:[#allocation98_spill] sm:$0xff]  ;;  %v16939_v34 = vld [vmem:[#allocation101_spill] sm:$0xff] }
 0x79d   : > { %v4800_v8 = vrot.slane %v4645_v46, 1  ;;  %v4799_v23 = vsel %vm371_vm0, %v4797_v7, %v4798_v55  ;;  %v13151_v53 = vsel %vm2274_vm6, %v16920_v59, %v16919_v3  ;;  %v4231_v25 = vsel %vm2241_vm5, %v4167_v12, %v16908_v49  ;;  %v16927_v43 = vld [vmem:[#allocation672_spill] sm:$0xff]  ;;  %v16931_v55 = vld [vmem:[#allocation97_spill] sm:$0xff]  ;;  %v16938_v52 = vld [vmem:[#allocation214_spill] sm:$0xff] }
 0x79e   : > { %v4753_v60 = vrot.slane %v4614_v51, 1  ;;  %v4751_v30 = vsel %vm371_vm0, %v4749_v13, %v4750_v27  ;;  %4867 = vrot.lane.b32.xlu1 %v4799_v23, %s5984_s19  ;;  %v13160_v6 = vsel %vm2274_vm6, %v16922_v37, %v16921_v32  ;;  %v13165_v4 = vsel %vm2274_vm6, %v16924_v48, %v16923_v42  ;;  %v16929_v50 = vld [vmem:[#allocation96_spill] sm:$0xff]  ;;  %v16932_v27 = vld [vmem:[#allocation211_spill] sm:$0xff]  ;;  %v16936_v7 = vld [vmem:[#allocation213_spill] sm:$0xff] }
 0x79f   : > { %v4105_v1 = vsel %vm2175_vm3, %v16926_v31, %v16925_v33  ;;  %v4295_v18 = vsel %vm2274_vm6, %v4231_v25, %v16927_v43  ;;  %4835 = vrot.lane.b32.xlu0 %v4751_v30, %s5984_s19  ;;  %v13176_v14 = vsel %vm2274_vm6, %v16929_v50, %v16928_v24  ;;  %v13181_v54 = vsel %vm2274_vm6, %v16931_v55, %v16930_v62  ;;  %v13188_v5 = vpop.permute.xlu1 %3830  ;;  %v16934_v29 = vld [vmem:[#allocation212_spill] sm:$0xff]  ;;  %v16937_v51 = vld [vmem:[#allocation482_spill] sm:$0xff]  ;;  %v13205_v63 = vpop.permute.xlu0 %3782  ;;  %v16940_v13 = vld [vmem:[#allocation215_spill] sm:$0xff] }
 0x7a0   : > { %v13186_v46 = vsel %vm2274_vm6, %v16933_v26, %v16932_v27  ;;  %v4752_v49 = vrot.slane %v4613_v9, 1  ;;  %v13193_v12 = vsel %vm2274_vm6, %v16935_v15, %v16934_v29  ;;  %v13198_v20 = vsel %vm2274_vm6, %v16937_v51, %v16936_v7  ;;  %v16941_v9 = vld [vmem:[#allocation102_spill] sm:$0xff]  ;;  %v16942_v3 = vld [vmem:[#allocation168_spill] sm:$0xff]  ;;  %v16943_v25 = vld [vmem:[#allocation77_spill] sm:$0xff] }
 0x7a1   : > { %v13203_v16 = vsel %vm2274_vm6, %v16939_v34, %v16938_v52  ;;  %v4802_v19 = vsel %vm371_vm0, %v4800_v8, %v4801_v22  ;;  %v13211_v23 = vsel %vm2274_vm6, %v16941_v9, %v16940_v13  ;;  %v4169_v59 = vsel %vm2208_vm4, %v4105_v1, %v16942_v3  ;;  %v16944_v37 = vld [vmem:[#allocation220_spill] sm:$0xff]  ;;  %v16945_v42 = vld [vmem:[#allocation103_spill] sm:$0xff]  ;;  %v16946_v8 = vld [vmem:[#allocation222_spill] sm:$0xff] }
 0x7a2   : > { %v4359_v30 = vsel %vm2307_vm7, %v4295_v18, %v16943_v25  ;;  %v4754_v32 = vsel %vm371_vm0, %v4752_v49, %v4753_v60  ;;  %4869 = vrot.lane.b32.xlu1 %v4802_v19, %s5984_s19  ;;  %v13222_v22 = vsel %vm2274_vm6, %v16945_v42, %v16944_v37  ;;  %v16947_v48 = vld [vmem:[#allocation108_spill] sm:$0xff]  ;;  %v16948_v24 = vld [vmem:[#allocation23_spill] sm:$0xff]  ;;  %v16951_v62 = vld [vmem:[#allocation109_spill] sm:$0xff] }
 0x7a3   : > { %v13227_v31 = vsel %vm2274_vm6, %v16947_v48, %v16946_v8  ;;  %v16949_v1 = vld [vmem:[#allocation455_spill] sm:$0xff]  ;;  %4837 = vrot.lane.b32.xlu0 %v4754_v32, %s5984_s19  ;;  %v16952_v55 = vld [vmem:[#allocation224_spill] sm:$0xff]  ;;  %v16953_v27 = vld [vmem:[#allocation110_spill] sm:$0xff]  ;;  %v13258_v9 = vpop.permute.xlu1 %3784 }
 0x7a4   : > { %v13232_v50 = vsel %vm2274_vm6, %v16949_v1, %v16948_v24  ;;  %v16950_v18 = vld [vmem:[#allocation223_spill] sm:$0xff]  ;;  %v13243_v26 = vsel %vm2274_vm6, %v16953_v27, %v16952_v55  ;;  %v16954_v49 = vld [vmem:[#allocation225_spill] sm:$0xff]  ;;  %v16956_v7 = vld [vmem:[#allocation226_spill] sm:$0xff]  ;;  %v3833_v55 = vpop.permute.xlu0 %3832 }
 0x7a5   : > { %v13237_v60 = vsel %vm2274_vm6, %v16951_v62, %v16950_v18  ;;  %v16955_v29 = vld [vmem:[#allocation111_spill] sm:$0xff]  ;;  %v16957_v51 = vld [vmem:[#allocation112_spill] sm:$0xff]  ;;  %v5875_v3 = vld [vmem:[%s6067_s30 + $0x1a8] sm:$0x3] }
 0x7a6   : > { %v13248_v15 = vsel %vm2274_vm6, %v16955_v29, %v16954_v49  ;;  %v13253_v52 = vsel %vm2274_vm6, %v16957_v51, %v16956_v7  ;;  %v5874_v34 = vld [vmem:[%s6067_s30 + $0x1b8] sm:$0x3]  ;;  %v16958_v19 = vld [vmem:[#allocation479_spill] sm:$0xff]  ;;  %v5876_v42 = vld [vmem:[%s6067_s30 + $0x2e8] sm:$0x3] }
 0x7a7   : > { %v4048_v13 = vsel %vm2142_vm2, %v5874_v34, %v16958_v19  ;;  %v16959_v32 = vld [vmem:[#allocation480_spill] sm:$0xff]  ;;  %v16960_v8 = vld [vmem:[#allocation521_spill] sm:$0xff]  ;;  %v16963_v49 = vld [vmem:[#allocation522_spill] sm:$0xff]  ;;  %v13297_v39 = vpop.permute.xlu1 %3836 }
 0x7a8   : > { %v4047_v37 = vsel %vm2142_vm2, %v5875_v3, %v16959_v32  ;;  %v4072_v48 = vsel %vm2142_vm2, %v5876_v42, %v16960_v8  ;;  %v16961_v24 = vld [vmem:[#allocation201_spill] sm:$0xff]  ;;  %v16965_v34 = vld [vmem:[#allocation671_spill] sm:$0xff]  ;;  %v5878_v32 = vld [vmem:[%s6067_s30 + $0x2f8] sm:$0x3] }
 0x7a9   : > { %v4233_v1 = vsel %vm2241_vm5, %v4169_v59, %v16961_v24  ;;  %v16962_v18 = vld [vmem:[#allocation297_spill] sm:$0xff]  ;;  %v16966_v42 = vld [vmem:[#allocation523_spill] sm:$0xff]  ;;  %v16970_v47 = vld [vmem:[#allocation562_spill] sm:$0xff] }
 0x7aa   : > { %v4423_v62 = vsel %vm15008_vm8, %v4359_v30, %v16962_v18  ;;  %v5877_v27 = vld [vmem:[%s6067_s30 + $0x2e0] sm:$0xff]  ;;  %v4297_v19 = vsel %vm2274_vm6, %v4233_v1, %v16965_v34  ;;  %v4074_v59 = vsel %vm2142_vm2, %v5878_v32, %v16966_v42  ;;  %v5879_v8 = vld [vmem:[%s6067_s30 + $0x2f0] sm:$0xff]  ;;  %v16967_v30 = vld [vmem:[#allocation524_spill] sm:$0xff]  ;;  %v4136_v36 = vsel %vm2175_vm3, %v4072_v48, %v16970_v47 }
 0x7ab   : > { %v4071_v29 = vsel %vm2142_vm2, %v5877_v27, %v16963_v49  ;;  %v16964_v7 = vld [vmem:[#allocation549_spill] sm:$0xff]  ;;  %v4487_v3 = vsel %vm15007_vm9, %v4423_v62, %v13108_v61  ;;  %v4073_v24 = vsel %vm2142_vm2, %v5879_v8, %v16967_v30  ;;  %v4106_v27 = vsel %vm2175_vm3, %v4048_v13, %v16925_v33  ;;  %v16971_v32 = vld [vmem:[#allocation636_spill] sm:$0xff]  ;;  %v16972_v8 = vld [vmem:[#allocation615_spill] sm:$0xff] }
 0x7ac   : > { %v4104_v51 = vsel %vm2175_vm3, %v4047_v37, %v16964_v7  ;;  %v16968_v49 = vld [vmem:[#allocation337_spill] sm:$0xff]  ;;  %v16969_v7 = vld [vmem:[#allocation26_spill] sm:$0xff]  ;;  %v4135_v62 = vsel %vm2175_vm3, %v4071_v29, %v16970_v47  ;;  %v16973_v13 = vld [vmem:[#allocation267_spill] sm:$0xff] }
 0x7ad   : > { %v4168_v37 = vsel %vm2208_vm4, %v4104_v51, %v16968_v49  ;;  %v4137_v1 = vsel %vm2175_vm3, %v4073_v24, %v16969_v7  ;;  %v4199_v33 = vsel %vm2208_vm4, %v4135_v62, %v16972_v8  ;;  %v4361_v51 = vsel %vm2307_vm7, %v4297_v19, %v16973_v13  ;;  %v16974_v24 = vld [vmem:[#allocation372_spill] sm:$0xff]  ;;  %v13307_v49 = vpop.permute.xlu0 %3834  ;;  %v16975_v48 = vld [vmem:[#allocation614_spill] sm:$0xff]  ;;  %v16977_v8 = vld [vmem:[#allocation701_spill] sm:$0xff] }
 0x7ae   : > { %v4232_v42 = vsel %vm2241_vm5, %v4168_v37, %v16971_v32  ;;  %v4551_v29 = vsel %vm2406_vm10, %v4487_v3, %v16974_v24  ;;  %v4138_v47 = vsel %vm2175_vm3, %v4074_v59, %v16969_v7  ;;  %v4200_v37 = vsel %vm2208_vm4, %v4136_v36, %v16975_v48  ;;  %v16976_v32 = vld [vmem:[#allocation655_spill] sm:$0xff]  ;;  %v16978_v13 = vld [vmem:[#allocation334_spill] sm:$0xff]  ;;  %v16982_v7 = vld [vmem:[#allocation729_spill] sm:$0xff] }
 0x7af   : > { %v4296_v30 = vsel %vm2274_vm6, %v4232_v42, %v16927_v43  ;;  %v4263_v62 = vsel %vm2241_vm5, %v4199_v33, %v16976_v32  ;;  %v4170_v43 = vsel %vm2208_vm4, %v4106_v27, %v16978_v13  ;;  %v16979_v42 = vld [vmem:[#allocation519_spill] sm:$0xff]  ;;  %v16984_v32 = vld [vmem:[#allocation302_spill] sm:$0xff]  ;;  %v16986_v13 = vld [vmem:[#allocation728_spill] sm:$0xff] }
 0x7b0   : > { %v4360_v19 = vsel %vm2307_vm7, %v4296_v30, %v16977_v8  ;;  %v4264_v3 = vsel %vm2241_vm5, %v4200_v37, %v16979_v42  ;;  %v16980_v24 = vld [vmem:[#allocation687_spill] sm:$0xff]  ;;  %v4425_v27 = vsel %vm15008_vm8, %v4361_v51, %v16984_v32  ;;  %v3972_v8 = vpop.permute.xlu1 %3971 }
 0x7b1   : > { %v4327_v44 = vsel %vm2274_vm6, %v4263_v62, %v16980_v24  ;;  %v4424_v59 = vsel %vm15008_vm8, %v4360_v19, %v16981_v21  ;;  %v16983_v48 = vld [vmem:[#allocation403_spill] sm:$0xff]  ;;  %v4328_v37 = vsel %vm2274_vm6, %v4264_v3, %v16980_v24  ;;  %v4489_v21 = vsel %vm15007_vm9, %v4425_v27, %v13145_v38 }
 0x7b2   : > { %v4391_v36 = vsel %vm2307_vm7, %v4327_v44, %v16982_v7  ;;  %v4488_v33 = vsel %vm15007_vm9, %v4424_v59, %v13108_v61  ;;  %v4615_v30 = vsel %vm2439_vm11, %v4551_v29, %v16983_v48  ;;  %v3924_v61 = vpop.permute.xlu0 %3923  ;;  %v16985_v19 = vld [vmem:[#allocation467_spill] sm:$0xff]  ;;  %v4392_v51 = vsel %vm2307_vm7, %v4328_v37, %v16986_v13  ;;  %v16988_v37 = vld [vmem:[#allocation616_spill] sm:$0xff] }
 0x7b3   : > { %v4455_v62 = vsel %vm15008_vm8, %v4391_v36, %v12963_v10  ;;  %v4552_v44 = vsel %vm2406_vm10, %v4488_v33, %v13205_v63  ;;  %v4234_v29 = vsel %vm2241_vm5, %v4170_v43, %v16985_v19  ;;  %v4456_v10 = vsel %vm15008_vm8, %v4392_v51, %v13014_v35  ;;  %v16987_v36 = vld [vmem:[#allocation371_spill] sm:$0xff]  ;;  %v16991_v19 = vld [vmem:[#allocation525_spill] sm:$0xff] }
 0x7b4   : > { %v4519_v42 = vsel %vm15007_vm9, %v4455_v62, %v13100_v2  ;;  %v4616_v24 = vsel %vm2439_vm11, %v4552_v44, %v3924_v61  ;;  %v4755_v3 = vrot.slane %v4615_v30, 1  ;;  %v4298_v7 = vsel %vm2274_vm6, %v4234_v29, %v16965_v34  ;;  %v13359_v27 = vpop.permute.xlu1 %3594  ;;  %v16989_v30 = vld [vmem:[#allocation700_spill] sm:$0xff]  ;;  %v16990_v61 = vld [vmem:[#allocation617_spill] sm:$0xff] }
 0x7b5   : > { %v4583_v59 = vsel %vm2406_vm10, %v4519_v42, %v13188_v5  ;;  %v4756_v63 = vrot.slane %v4616_v24, 1  ;;  %v4520_v43 = vsel %vm15007_vm9, %v4456_v10, %v13100_v2  ;;  %v4553_v33 = vsel %vm2406_vm10, %v4489_v21, %v16987_v36  ;;  %v16994_v10 = vld [vmem:[#allocation227_spill] sm:$0xff] }
 0x7b6   : > { %v4647_v32 = vsel %vm2439_vm11, %v4583_v59, %v3972_v8  ;;  %v4202_v35 = vsel %vm2208_vm4, %v4138_v47, %v16988_v37  ;;  %v4362_v5 = vsel %vm2307_vm7, %v4298_v7, %v16989_v30  ;;  %v4584_v62 = vsel %vm2406_vm10, %v4520_v43, %v3833_v55  ;;  %v3974_v44 = vpop.permute.xlu0 %3973  ;;  %v16992_v8 = vld [vmem:[#allocation620_spill] sm:$0xff]  ;;  %v16993_v55 = vld [vmem:[#allocation402_spill] sm:$0xff] }
 0x7b7   : > { %v4757_v34 = vsel %vm371_vm0, %v4755_v3, %v4756_v63  ;;  %v4201_v2 = vsel %vm2208_vm4, %v4137_v1, %v16990_v61  ;;  %v4266_v21 = vsel %vm2241_vm5, %v4202_v35, %v16991_v19  ;;  %v4426_v29 = vsel %vm15008_vm8, %v4362_v5, %v16992_v8  ;;  %v16995_v1 = vld [vmem:[#allocation113_spill] sm:$0xff]  ;;  %v16996_v59 = vld [vmem:[#allocation656_spill] sm:$0xff]  ;;  %v16997_v7 = vld [vmem:[#allocation686_spill] sm:$0xff] }
 0x7b8   : > { %v4648_v13 = vsel %vm2439_vm11, %v4584_v62, %v3974_v44  ;;  %4839 = vrot.lane.b32.xlu0 %v4757_v34, %s5984_s19  ;;  %v4490_v47 = vsel %vm15007_vm9, %v4426_v29, %v13145_v38  ;;  %v4617_v51 = vsel %vm2439_vm11, %v4553_v33, %v16993_v55  ;;  %v4803_v42 = vrot.slane %v4647_v32, 1  ;;  %v3926_v35 = vpop.permute.xlu1 %3925  ;;  %v16998_v33 = vld [vmem:[#allocation730_spill] sm:$0xff]  ;;  %v16999_v44 = vld [vmem:[#allocation731_spill] sm:$0xff]  ;;  %v17000_v19 = vld [vmem:[#allocation228_spill] sm:$0xff] }
 0x7b9   : > { %v4804_v24 = vrot.slane %v4648_v13, 1  ;;  %v2297_v3 = vsel %vm2274_vm6, %v16995_v1, %v16994_v10  ;;  %v4265_v63 = vsel %vm2241_vm5, %v4201_v2, %v16996_v59  ;;  %v4330_v43 = vsel %vm2274_vm6, %v4266_v21, %v16997_v7  ;;  %v17001_v21 = vld [vmem:[#allocation114_spill] sm:$0xff]  ;;  %v17002_v29 = vld [vmem:[#allocation229_spill] sm:$0xff]  ;;  %v17004_v10 = vld [vmem:[#allocation231_spill] sm:$0xff] }
 0x7ba   : > { %v4554_v37 = vsel %vm2406_vm10, %v4490_v47, %v13258_v9  ;;  %v4329_v38 = vsel %vm2274_vm6, %v4265_v63, %v16997_v7  ;;  %v4394_v32 = vsel %vm2307_vm7, %v4330_v43, %v16998_v33  ;;  %v13393_v5 = vpop.permute.xlu0 %3596  ;;  %v4758_v9 = vrot.slane %v4617_v51, 1  ;;  %v17003_v13 = vld [vmem:[#allocation5_spill] sm:$0xff]  ;;  %v17005_v7 = vld [vmem:[#allocation232_spill] sm:$0xff]  ;;  %v17006_v43 = vld [vmem:[#allocation238_spill] sm:$0xff] }
 0x7bb   : > { %v4618_v30 = vsel %vm2439_vm11, %v4554_v37, %v3926_v35  ;;  %v4805_v62 = vsel %vm371_vm0, %v4803_v42, %v4804_v24  ;;  %v4393_v34 = vsel %vm2307_vm7, %v4329_v38, %v16999_v44  ;;  %v4458_v61 = vsel %vm15008_vm8, %v4394_v32, %v13060_v56  ;;  %v17008_v33 = vld [vmem:[#allocation241_spill] sm:$0xff] }
 0x7bc   : > { %v4759_v2 = vrot.slane %v4618_v30, 1  ;;  %4871 = vrot.lane.b32.xlu1 %v4805_v62, %s5984_s19  ;;  %v2300_v8 = vsel %vm2274_vm6, %v17001_v21, %v17000_v19  ;;  %v2299_v47 = vsel %vm2274_vm6, %v17003_v13, %v17002_v29  ;;  %v4457_v42 = vsel %vm15008_vm8, %v4393_v34, %v13070_v45  ;;  %v3978_v59 = vpop.permute.xlu1 %3977  ;;  %v17010_v62 = vld [vmem:[#allocation244_spill] sm:$0xff]  ;;  %v17011_v34 = vld [vmem:[#allocation245_spill] sm:$0xff] }
 0x7bd   : > { %v4522_v24 = vsel %vm15007_vm9, %v4458_v61, %v13141_v0  ;;  %v2302_v56 = vsel %vm2274_vm6, %v13118_v41, %v17004_v10  ;;  %v4521_v51 = vsel %vm15007_vm9, %v4457_v42, %v13141_v0  ;;  %v2301_v45 = vsel %vm2274_vm6, %v13129_v40, %v17005_v7  ;;  %v17014_v21 = vld [vmem:[#allocation248_spill] sm:$0xff]  ;;  %v17015_v29 = vld [vmem:[#allocation249_spill] sm:$0xff] }
 0x7be   : > { %v4586_v1 = vsel %vm2406_vm10, %v4522_v24, %v13297_v39  ;;  %v4760_v63 = vsel %vm371_vm0, %v4758_v9, %v4759_v2  ;;  %v2309_v37 = vsel %vm2307_vm7, %v13134_v17, %v17006_v43  ;;  %v4585_v41 = vsel %vm2406_vm10, %v4521_v51, %v13307_v49  ;;  %v3976_v0 = vpop.permute.xlu0 %3975  ;;  %v17007_v39 = vld [vmem:[#allocation239_spill] sm:$0xff]  ;;  %v17009_v17 = vld [vmem:[#allocation242_spill] sm:$0xff]  ;;  %v17018_v10 = vld [vmem:[#allocation256_spill] sm:$0xff] }
 0x7bf   : > { %v4650_v35 = vsel %vm2439_vm11, %v4586_v1, %v3978_v59  ;;  %4841 = vrot.lane.b32.xlu0 %v4760_v63, %s5984_s19  ;;  %v2308_v38 = vsel %vm2307_vm7, %v13139_v28, %v17007_v39  ;;  %v2311_v40 = vsel %vm2307_vm7, %v13151_v53, %v17008_v33  ;;  %v4649_v30 = vsel %vm2439_vm11, %v4585_v41, %v3976_v0  ;;  %v17012_v9 = vld [vmem:[#allocation246_spill] sm:$0xff]  ;;  %v17013_v2 = vld [vmem:[#allocation247_spill] sm:$0xff]  ;;  %v17019_v1 = vld [vmem:[#allocation257_spill] sm:$0xff] }
 0x7c0   : > { %v4807_v32 = vrot.slane %v4650_v35, 1  ;;  %v2310_v49 = vsel %vm2307_vm7, %v13160_v6, %v17009_v17  ;;  %v2313_v44 = vsel %vm2307_vm7, %v13165_v4, %v17010_v62  ;;  %v2312_v61 = vsel %vm2307_vm7, %v13176_v14, %v17011_v34  ;;  %v13457_v13 = vpop.permute.xlu1 %3600  ;;  %v17016_v14 = vld [vmem:[#allocation250_spill] sm:$0xff]  ;;  %v17017_v24 = vld [vmem:[#allocation251_spill] sm:$0xff]  ;;  %v17022_v7 = vld [vmem:[#allocation260_spill] sm:$0xff] }
 0x7c1   : > { %v4806_v28 = vrot.slane %v4649_v30, 1  ;;  %v2315_v53 = vsel %vm2307_vm7, %v13181_v54, %v17012_v9  ;;  %v2314_v19 = vsel %vm2307_vm7, %v13186_v46, %v17013_v2  ;;  %v2317_v6 = vsel %vm2307_vm7, %v13193_v12, %v17014_v21  ;;  %v17020_v59 = vld [vmem:[#allocation258_spill] sm:$0xff]  ;;  %v17021_v63 = vld [vmem:[#allocation259_spill] sm:$0xff]  ;;  %v17023_v43 = vld [vmem:[#allocation261_spill] sm:$0xff] }
 0x7c2   : > { %v2316_v4 = vsel %vm2307_vm7, %v13198_v20, %v17015_v29  ;;  %v2319_v42 = vsel %vm2307_vm7, %v13203_v16, %v17016_v14  ;;  %v2318_v54 = vsel %vm2307_vm7, %v13211_v23, %v17017_v24  ;;  %v2325_v46 = vsel %vm2307_vm7, %v13222_v22, %v17018_v10  ;;  %v13468_v51 = vpop.permute.xlu0 %3598  ;;  %v17024_v35 = vld [vmem:[#allocation262_spill] sm:$0xff]  ;;  %v17025_v0 = vld [vmem:[#allocation263_spill] sm:$0xff]  ;;  %v17027_v33 = vld [vmem:[#allocation264_spill] sm:$0xff] }
 0x7c3   : > { %v4808_v12 = vsel %vm371_vm0, %v4806_v28, %v4807_v32  ;;  %v2324_v20 = vsel %vm2307_vm7, %v13227_v31, %v17019_v1  ;;  %v2327_v16 = vsel %vm2307_vm7, %v13232_v50, %v17020_v59  ;;  %v2326_v23 = vsel %vm2307_vm7, %v13237_v60, %v17021_v63  ;;  %v17026_v39 = vld [vmem:[#allocation75_spill] sm:$0xff]  ;;  %v17028_v30 = vld [vmem:[#allocation265_spill] sm:$0xff]  ;;  %v17032_v9 = vld [vmem:[#allocation272_spill] sm:$0xff] }
 0x7c4   : > { %v2329_v22 = vsel %vm2307_vm7, %v13243_v26, %v17022_v7  ;;  %4873 = vrot.lane.b32.xlu1 %v4808_v12, %s5984_s19  ;;  %v2328_v41 = vsel %vm2307_vm7, %v13248_v15, %v17023_v43  ;;  %v2331_v31 = vsel %vm2307_vm7, %v13253_v52, %v17024_v35  ;;  %v2330_v50 = vsel %vm2307_vm7, %v2297_v3, %v17025_v0  ;;  %v17029_v15 = vld [vmem:[#allocation49_spill] sm:$0xff]  ;;  %v13502_v34 = vpop.permute.xlu1 %3717  ;;  %v17030_v52 = vld [vmem:[#allocation270_spill] sm:$0xff]  ;;  %v17031_v28 = vld [vmem:[#allocation271_spill] sm:$0xff] }
 0x7c5   : > { %v2333_v60 = vsel %vm2307_vm7, %v2300_v8, %v17026_v39  ;;  %v2332_v32 = vsel %vm2307_vm7, %v2299_v47, %v17027_v33  ;;  %v2335_v26 = vsel %vm2307_vm7, %v2302_v56, %v16943_v25  ;;  %v2334_v17 = vsel %vm2307_vm7, %v2301_v45, %v17028_v30  ;;  %v17033_v2 = vld [vmem:[#allocation273_spill] sm:$0xff]  ;;  %v17034_v45 = vld [vmem:[#allocation274_spill] sm:$0xff]  ;;  %v17036_v14 = vld [vmem:[#allocation276_spill] sm:$0xff] }
 0x7c6   : > { %v2342_v62 = vsel %vm15008_vm8, %v2309_v37, %v17029_v15  ;;  %v2341_v3 = vsel %vm15008_vm8, %v2308_v38, %v17030_v52  ;;  %v2344_v8 = vsel %vm15008_vm8, %v2311_v40, %v17031_v28  ;;  %v2343_v47 = vsel %vm15008_vm8, %v2310_v49, %v17032_v9  ;;  %v13512_v56 = vpop.permute.xlu0 %3685  ;;  %v17035_v37 = vld [vmem:[#allocation275_spill] sm:$0xff]  ;;  %v17037_v24 = vld [vmem:[#allocation277_spill] sm:$0xff]  ;;  %v17038_v10 = vld [vmem:[#allocation278_spill] sm:$0xff] }
 0x7c7   : > { %v2346_v25 = vsel %vm15008_vm8, %v2313_v44, %v17033_v2  ;;  %v2345_v21 = vsel %vm15008_vm8, %v2312_v61, %v17034_v45  ;;  %v2348_v29 = vsel %vm15008_vm8, %v2315_v53, %v17035_v37  ;;  %v2347_v38 = vsel %vm15008_vm8, %v2314_v19, %v17036_v14  ;;  %v17039_v12 = vld [vmem:[#allocation279_spill] sm:$0xff]  ;;  %v17040_v1 = vld [vmem:[#allocation280_spill] sm:$0xff]  ;;  %v17042_v7 = vld [vmem:[#allocation285_spill] sm:$0xff] }
 0x7c8   : > { %v2350_v40 = vsel %vm15008_vm8, %v2317_v6, %v17037_v24  ;;  %v2349_v49 = vsel %vm15008_vm8, %v2316_v4, %v17038_v10  ;;  %v2352_v44 = vsel %vm15008_vm8, %v2319_v42, %v17039_v12  ;;  %v2351_v59 = vsel %vm15008_vm8, %v2318_v54, %v17040_v1  ;;  %v17041_v63 = vld [vmem:[#allocation284_spill] sm:$0xff]  ;;  %v17043_v43 = vld [vmem:[#allocation286_spill] sm:$0xff]  ;;  %v17044_v35 = vld [vmem:[#allocation287_spill] sm:$0xff]  ;;  %v13538_v39 = vpop.permute.xlu1 %3719 }
 0x7c9   : > { %v2358_v61 = vsel %vm15008_vm8, %v2325_v46, %v17041_v63  ;;  %v2357_v53 = vsel %vm15008_vm8, %v2324_v20, %v17042_v7  ;;  %v2360_v19 = vsel %vm15008_vm8, %v2327_v16, %v17043_v43  ;;  %v2359_v6 = vsel %vm15008_vm8, %v2326_v23, %v17044_v35  ;;  %v17045_v0 = vld [vmem:[#allocation288_spill] sm:$0xff]  ;;  %v17046_v42 = vld [vmem:[#allocation289_spill] sm:$0xff]  ;;  %v17047_v33 = vld [vmem:[#allocation290_spill] sm:$0xff] }
 0x7ca   : > { %v2362_v4 = vsel %vm15008_vm8, %v2329_v22, %v17045_v0  ;;  %v2361_v54 = vsel %vm15008_vm8, %v2328_v41, %v17046_v42  ;;  %v2364_v46 = vsel %vm15008_vm8, %v2331_v31, %v17047_v33  ;;  %v17048_v30 = vld [vmem:[#allocation291_spill] sm:$0xff]  ;;  %v17049_v15 = vld [vmem:[#allocation293_spill] sm:$0xff]  ;;  %v13548_v52 = vpop.permute.xlu0 %3687  ;;  %v17050_v23 = vld [vmem:[#allocation294_spill] sm:$0xff]  ;;  %v2368_v22 = vsel %vm15008_vm8, %v2335_v26, %v16962_v18 }
 0x7cb   : > { %v2363_v20 = vsel %vm15008_vm8, %v2330_v50, %v17048_v30  ;;  %v2366_v16 = vsel %vm15008_vm8, %v2333_v60, %v17049_v15  ;;  %v2365_v28 = vsel %vm15008_vm8, %v2332_v32, %v17050_v23  ;;  %v17051_v9 = vld [vmem:[#allocation298_spill] sm:$0xff]  ;;  %v17052_v2 = vld [vmem:[#allocation307_spill] sm:$0xff]  ;;  %v17053_v45 = vld [vmem:[#allocation308_spill] sm:$0xff] }
 0x7cc   : > { %v2367_v41 = vsel %vm15008_vm8, %v2334_v17, %v17051_v9  ;;  %v2375_v31 = vsel %vm15007_vm9, %v2342_v62, %v17052_v2  ;;  %v2374_v50 = vsel %vm15007_vm9, %v2341_v3, %v17053_v45  ;;  %v17054_v37 = vld [vmem:[#allocation309_spill] sm:$0xff]  ;;  %v17055_v14 = vld [vmem:[#allocation310_spill] sm:$0xff]  ;;  %v17056_v24 = vld [vmem:[#allocation311_spill] sm:$0xff]  ;;  %v13588_v1 = vpop.permute.xlu1 %3788 }
 0x7cd   : > { %v13562_v60 = vsel %vm15007_vm9, %v2344_v8, %v17054_v37  ;;  %v13566_v32 = vsel %vm15007_vm9, %v2343_v47, %v17055_v14  ;;  %v13570_v18 = vsel %vm15007_vm9, %v2346_v25, %v17056_v24  ;;  %v17057_v26 = vld [vmem:[#allocation312_spill] sm:$0xff]  ;;  %v17058_v62 = vld [vmem:[#allocation313_spill] sm:$0xff]  ;;  %v17059_v3 = vld [vmem:[#allocation314_spill] sm:$0xff] }
 0x7ce   : > { %v13574_v17 = vsel %vm15007_vm9, %v2345_v21, %v17057_v26  ;;  %v13578_v10 = vsel %vm15007_vm9, %v2348_v29, %v17058_v62  ;;  %v13582_v8 = vsel %vm15007_vm9, %v2347_v38, %v17059_v3  ;;  %v17060_v12 = vld [vmem:[#allocation14_spill] sm:$0xff]  ;;  %v17061_v25 = vld [vmem:[#allocation15_spill] sm:$0xff]  ;;  %v17064_v29 = vld [vmem:[#allocation316_spill] sm:$0xff]  ;;  %v13605_v0 = vpop.permute.xlu0 %3786 }
 0x7cf   : > { %v13586_v47 = vsel %vm15007_vm9, %v2350_v40, %v17060_v12  ;;  %v13592_v63 = vsel %vm15007_vm9, %v2349_v49, %v17061_v25  ;;  %v17062_v21 = vld [vmem:[#allocation315_spill] sm:$0xff]  ;;  %v13600_v43 = vsel %vm15007_vm9, %v2351_v59, %v17064_v29  ;;  %v5880_v38 = vld [vmem:[%s6067_s30 + $0x1c0] sm:$0xff]  ;;  %v17066_v35 = vld [vmem:[#allocation484_spill] sm:$0xff] }
 0x7d0   : > { %v13596_v7 = vsel %vm15007_vm9, %v2352_v44, %v17062_v21  ;;  %17065 = vst [vmem:[#allocation475_spill] sm:$0xff] %v13600_v43  ;;  %v4049_v40 = vsel %vm2142_vm2, %v5880_v38, %v17066_v35  ;;  %v17067_v42 = vld [vmem:[#allocation321_spill] sm:$0xff]  ;;  %v17068_v49 = vld [vmem:[#allocation322_spill] sm:$0xff]  ;;  %v17069_v15 = vld [vmem:[#allocation323_spill] sm:$0xff]  ;;  %v13646_v21 = vpop.permute.xlu1 %3840 }
 0x7d1   : > { %17063 = vst [vmem:[#allocation474_spill] sm:$0xff] %v13596_v7  ;;  %v2391_v33 = vsel %vm15007_vm9, %v2358_v61, %v17067_v42  ;;  %v2390_v30 = vsel %vm15007_vm9, %v2357_v53, %v17068_v49  ;;  %v13613_v44 = vsel %vm15007_vm9, %v2360_v19, %v17069_v15  ;;  %v17070_v23 = vld [vmem:[#allocation551_spill] sm:$0xff]  ;;  %v17071_v9 = vld [vmem:[#allocation324_spill] sm:$0xff]  ;;  %v17072_v45 = vld [vmem:[#allocation325_spill] sm:$0xff] }
 0x7d2   : > { %v4107_v59 = vsel %vm2175_vm3, %v4049_v40, %v17070_v23  ;;  %v2392_v2 = vsel %vm15007_vm9, %v2359_v6, %v17071_v9  ;;  %v13621_v37 = vsel %vm15007_vm9, %v2362_v4, %v17072_v45  ;;  %v17073_v14 = vld [vmem:[#allocation326_spill] sm:$0xff]  ;;  %v17074_v24 = vld [vmem:[#allocation327_spill] sm:$0xff]  ;;  %v17075_v19 = vld [vmem:[#allocation328_spill] sm:$0xff]  ;;  %v13660_v42 = vpop.permute.xlu0 %3838 }
 0x7d3   : > { %v13625_v61 = vsel %vm15007_vm9, %v2361_v54, %v17073_v14  ;;  %v13629_v53 = vsel %vm15007_vm9, %v2364_v46, %v17074_v24  ;;  %v13633_v26 = vsel %vm15007_vm9, %v2363_v20, %v17075_v19  ;;  %v17076_v62 = vld [vmem:[#allocation329_spill] sm:$0xff]  ;;  %v17077_v6 = vld [vmem:[#allocation330_spill] sm:$0xff]  ;;  %v5881_v12 = vld [vmem:[%s6067_s30 + $0x1d0] sm:$0xff]  ;;  %v13672_v19 = vsel %vm2406_vm10, %v2392_v2, %v16876_v11 }
 0x7d4   : > { %v13637_v3 = vsel %vm15007_vm9, %v2366_v16, %v17076_v62  ;;  %v13641_v4 = vsel %vm15007_vm9, %v2365_v28, %v17077_v6  ;;  %v17078_v25 = vld [vmem:[#allocation488_spill] sm:$0xff]  ;;  %v17079_v46 = vld [vmem:[#allocation331_spill] sm:$0xff]  ;;  %v17082_v16 = vld [vmem:[#allocation550_spill] sm:$0xff] }
 0x7d5   : > { %v4051_v54 = vsel %vm2142_vm2, %v5881_v12, %v17078_v25  ;;  %v13650_v29 = vsel %vm15007_vm9, %v2368_v22, %v17079_v46  ;;  %v17081_v20 = vld [vmem:[#allocation332_spill] sm:$0xff]  ;;  %v17083_v28 = vld [vmem:[#allocation167_spill] sm:$0xff]  ;;  %v17084_v49 = vld [vmem:[#allocation345_spill] sm:$0xff] }
 0x7d6   : > { %17080 = vst [vmem:[#allocation476_spill] sm:$0xff] %v13650_v29  ;;  %v13654_v38 = vsel %vm15007_vm9, %v2367_v41, %v17081_v20  ;;  %v4109_v35 = vsel %vm2175_vm3, %v4051_v54, %v17082_v16  ;;  %v4171_v40 = vsel %vm2208_vm4, %v4107_v59, %v17083_v28  ;;  %v2408_v15 = vsel %vm2406_vm10, %v2375_v31, %v17084_v49  ;;  %v17085_v9 = vld [vmem:[#allocation348_spill] sm:$0xff]  ;;  %v17087_v14 = vld [vmem:[#allocation73_spill] sm:$0xff]  ;;  %v5882_v11 = vld [vmem:[%s6067_s30 + $0x1c8] sm:$0x3]  ;;  %v13697_v49 = vpop.permute.xlu1 %3792 }
 0x7d7   : > { %v2407_v22 = vsel %vm2406_vm10, %v2374_v50, %v17085_v9  ;;  %v17086_v45 = vld [vmem:[#allocation72_spill] sm:$0xff]  ;;  %v2423_v24 = vsel %vm2406_vm10, %v2390_v30, %v17087_v14  ;;  %v17089_v6 = vld [vmem:[#allocation381_spill] sm:$0xff]  ;;  %v17092_v2 = vld [vmem:[#allocation483_spill] sm:$0xff] }
 0x7d8   : > { %v2424_v41 = vsel %vm2406_vm10, %v2391_v33, %v17086_v45  ;;  %v17088_v59 = vld [vmem:[#allocation380_spill] sm:$0xff]  ;;  %v13680_v31 = vsel %vm2439_vm11, %v2407_v22, %v17089_v6  ;;  %v17091_v33 = vld [vmem:[#allocation397_spill] sm:$0xff]  ;;  %v4050_v25 = vsel %vm2142_vm2, %v5882_v11, %v17092_v2  ;;  %v17095_v9 = vld [vmem:[#allocation487_spill] sm:$0xff] }
 0x7d9   : > { %v13676_v62 = vsel %vm2439_vm11, %v2408_v15, %v17088_v59  ;;  %v17090_v50 = vld [vmem:[#allocation396_spill] sm:$0xff]  ;;  %v13688_v30 = vsel %vm2439_vm11, %v2423_v24, %v17091_v33  ;;  %v17093_v54 = vld [vmem:[#allocation169_spill] sm:$0xff]  ;;  %v5884_v45 = vld [vmem:[%s6067_s30 + $0x308] sm:$0x3]  ;;  %v4108_v24 = vsel %vm2175_vm3, %v4050_v25, %v17070_v23 }
 0x7da   : > { %v13684_v12 = vsel %vm2439_vm11, %v2424_v41, %v17090_v50  ;;  %v4173_v46 = vsel %vm2208_vm4, %v4109_v35, %v17093_v54  ;;  %v17094_v20 = vld [vmem:[#allocation200_spill] sm:$0xff]  ;;  %v17096_v41 = vld [vmem:[#allocation526_spill] sm:$0xff]  ;;  %v13709_v35 = vpop.permute.xlu0 %3790  ;;  %v5885_v50 = vld [vmem:[%s6067_s30 + $0x300] sm:$0xff] }
 0x7db   : > { %v4235_v28 = vsel %vm2241_vm5, %v4171_v40, %v17094_v20  ;;  %v5883_v15 = vld [vmem:[%s6067_s30 + $0x1d8] sm:$0x3]  ;;  %v4076_v14 = vsel %vm2142_vm2, %v5884_v45, %v17096_v41  ;;  %v17097_v59 = vld [vmem:[#allocation674_spill] sm:$0xff]  ;;  %v17098_v40 = vld [vmem:[#allocation527_spill] sm:$0xff] }
 0x7dc   : > { %v4052_v22 = vsel %vm2142_vm2, %v5883_v15, %v17095_v9  ;;  %v4299_v6 = vsel %vm2274_vm6, %v4235_v28, %v17097_v59  ;;  %v4075_v33 = vsel %vm2142_vm2, %v5885_v50, %v17098_v40  ;;  %v5886_v11 = vld [vmem:[%s6067_s30 + $0x318] sm:$0x3]  ;;  %v17099_v2 = vld [vmem:[#allocation529_spill] sm:$0xff]  ;;  %v5887_v20 = vld [vmem:[%s6067_s30 + $0x310] sm:$0xff]  ;;  %s175_s30 = sand.u32 1, %s5950_s13  }
 0x7dd   : > { %v4078_v54 = vsel %vm2142_vm2, %v5886_v11, %v17099_v2  ;;  %v17100_v15 = vld [vmem:[#allocation530_spill] sm:$0xff]  ;;  %v17101_v45 = vld [vmem:[#allocation575_spill] sm:$0xff]  ;;  %v4110_v25 = vsel %vm2175_vm3, %v4052_v22, %v17082_v16  ;;  %v17105_v2 = vld [vmem:[#allocation564_spill] sm:$0xff]  ;;  %v13738_v22 = vpop.permute.xlu1 %3844  ;;  %s5419_s4 = sshll.u32 %s175_s30, 8  ;;  %s14413_s15 = scalar_lea.sflag [#allocation3], %s175_s30 }
 0x7de   : > { %v4077_v9 = vsel %vm2142_vm2, %v5887_v20, %v17100_v15  ;;  %v4172_v23 = vsel %vm2208_vm4, %v4108_v24, %v17101_v45  ;;  %v17102_v28 = vld [vmem:[#allocation563_spill] sm:$0xff]  ;;  %v17103_v7 = vld [vmem:[#allocation638_spill] sm:$0xff]  ;;  %v4140_v20 = vsel %vm2175_vm3, %v4076_v14, %v17105_v2  ;;  %vm17136_vm2 = vcmask 424960   ;;  %s14307_s8 = scalar_lea.vmem [#allocation2], %s5419_s4 }
 0x7df   : > { %v4141_v41 = vsel %vm2175_vm3, %v4077_v9, %v17102_v28  ;;  %v4236_v50 = vsel %vm2241_vm5, %v4172_v23, %v17103_v7  ;;  %v17104_v40 = vld [vmem:[#allocation203_spill] sm:$0xff]  ;;  %v4142_v11 = vsel %vm2175_vm3, %v4078_v54, %v17102_v28  ;;  %v17106_v15 = vld [vmem:[#allocation266_spill] sm:$0xff]  ;;  %v4139_v7 = vsel %vm2175_vm3, %v4075_v33, %v17105_v2  ;;  %v13748_v28 = vpop.permute.xlu0 %3842  ;;  %vm17138_vm15 = vmmov %vm17136_vm2  ;;  %s5339_s10 = sshll.u32 %s14307_s8, 4  ;;  %s14405_s10 = int_to_ptr.vmem [resolvable:$true] %s5339_s10 }
 0x7e0   : > { %v4237_v29 = vsel %vm2241_vm5, %v4173_v46, %v17104_v40  ;;  %v4300_v24 = vsel %vm2274_vm6, %v4236_v50, %v17097_v59  ;;  %v4363_v16 = vsel %vm2307_vm7, %v4299_v6, %v17106_v15  ;;  %v17107_v9 = vld [vmem:[#allocation574_spill] sm:$0xff]  ;;  %v17109_v23 = vld [vmem:[#allocation703_spill] sm:$0xff]  ;;  %v17111_v6 = vld [vmem:[#allocation621_spill] sm:$0xff]  ;;  %s5888_s23 = scalar_lea.vmem %s14405_s10, 4096  ;;  %p5895_p1 = scmp.lt.s32.totalorder %s14405_s10, %s5893_s27 }
 0x7e1   : > { %v4174_v46 = vsel %vm2208_vm4, %v4110_v25, %v17107_v9  ;;  %v17108_v45 = vld [vmem:[#allocation618_spill] sm:$0xff]  ;;  %v4364_v14 = vsel %vm2307_vm7, %v4300_v24, %v17109_v23  ;;  %v17110_v59 = vld [vmem:[#allocation619_spill] sm:$0xff]  ;;  %v4206_v40 = vsel %vm2208_vm4, %v4142_v11, %v17111_v6  ;;  %v17114_v9 = vld [vmem:[#allocation657_spill] sm:$0xff]  ;;  %p5889_p12 = scmp.ne.s32.totalorder %s14405_s10, %s5888_s23  ;;  %p5896_p2 = scmp.lt.s32.totalorder %s5894_s28, %s5888_s23 }
 0x7e2   : > { %v4204_v54 = vsel %vm2208_vm4, %v4140_v20, %v17108_v45  ;;  %v4203_v50 = vsel %vm2208_vm4, %v4139_v7, %v17110_v59  ;;  %v17112_v15 = vld [vmem:[#allocation622_spill] sm:$0xff]  ;;  %v17116_v23 = vld [vmem:[#allocation301_spill] sm:$0xff] }
 0x7e3   : > { %v4205_v33 = vsel %vm2208_vm4, %v4141_v41, %v17112_v15  ;;  %v17113_v2 = vld [vmem:[#allocation742_spill] sm:$0xff]  ;;  %v4268_v20 = vsel %vm2241_vm5, %v4204_v54, %v17114_v9  ;;  %v4427_v43 = vsel %vm15008_vm8, %v4363_v16, %v17116_v23  ;;  %v17117_v59 = vld [vmem:[#allocation673_spill] sm:$0xff]  ;;  %v3930_v15 = vpop.permute.xlu1 %3929  ;;  %v17119_v16 = vld [vmem:[#allocation732_spill] sm:$0xff]  ;;  %v3928_v9 = vpop.permute.xlu0 %3927  ;;  %p5890_p13 = pnand %p5889_p12, %p6047_p4  ;;  %p5897_p3 = por %p5896_p2, %p5895_p1 }
 0x7e4   : > { %v4428_v25 = vsel %vm15008_vm8, %v4364_v14, %v17113_v2  ;;  %v17115_v45 = vld [vmem:[#allocation658_spill] sm:$0xff]  ;;  %v4301_v11 = vsel %vm2274_vm6, %v4237_v29, %v17117_v59  ;;  %v17118_v6 = vld [vmem:[#allocation689_spill] sm:$0xff]  ;;  %v4491_v14 = vsel %vm15007_vm9, %v4427_v43, %v13512_v56 }
 0x7e5   : > { %v4267_v24 = vsel %vm2241_vm5, %v4203_v50, %v17115_v45  ;;  %v4492_v7 = vsel %vm15007_vm9, %v4428_v25, %v13512_v56  ;;  %v4332_v41 = vsel %vm2274_vm6, %v4268_v20, %v17118_v6  ;;  %v4555_v25 = vsel %vm2406_vm10, %v4491_v14, %v13605_v0  ;;  %v17120_v20 = vld [vmem:[#allocation733_spill] sm:$0xff]  ;;  %p5891_p0 = pneg %p5890_p13 }
 0x7e6   : > { %v4556_v54 = vsel %vm2406_vm10, %v4492_v7, %v13588_v1  ;;  %v4331_v50 = vsel %vm2274_vm6, %v4267_v24, %v17118_v6  ;;  %v4396_v2 = vsel %vm2307_vm7, %v4332_v41, %v17119_v16  ;;  %v4619_v43 = vsel %vm2439_vm11, %v4555_v25, %v3928_v9  ;;  %v17121_v23 = vld [vmem:[#allocation637_spill] sm:$0xff] }
 0x7e7   : > { %v4620_v29 = vsel %vm2439_vm11, %v4556_v54, %v3930_v15  ;;  %v4395_v45 = vsel %vm2307_vm7, %v4331_v50, %v17120_v20  ;;  %v4460_v56 = vsel %vm15008_vm8, %v4396_v2, %v13393_v5  ;;  %v4238_v24 = vsel %vm2241_vm5, %v4174_v46, %v17121_v23  ;;  %v17122_v14 = vld [vmem:[#allocation269_spill] sm:$0xff]  ;;  %v3982_v46 = vpop.permute.xlu1 %3981  ;;  %v17123_v50 = vld [vmem:[#allocation702_spill] sm:$0xff]  ;;  %v3980_v25 = vpop.permute.xlu0 %3979  ;;  %p5898_p5 = pnand %p5897_p3, %p5891_p0 }
 0x7e8   : > { %v4762_v1 = vrot.slane %v4620_v29, 1  ;;  %v4459_v7 = vsel %vm15008_vm8, %v4395_v45, %v13359_v27  ;;  %v4524_v0 = vsel %vm15007_vm9, %v4460_v56, %v13502_v34  ;;  %v4761_v6 = vrot.slane %v4619_v43, 1  ;;  %v17124_v29 = vld [vmem:[#allocation659_spill] sm:$0xff]  ;;  %v17125_v9 = vld [vmem:[#allocation741_spill] sm:$0xff]  ;;  %v17126_v45 = vld [vmem:[#allocation660_spill] sm:$0xff] }
 0x7e9   : > { %v4302_v41 = vsel %vm2274_vm6, %v4238_v24, %v17117_v59  ;;  %v4365_v54 = vsel %vm2307_vm7, %v4301_v11, %v17122_v14  ;;  %v4523_v5 = vsel %vm15007_vm9, %v4459_v7, %v13502_v34  ;;  %v4588_v15 = vsel %vm2406_vm10, %v4524_v0, %v13646_v21  ;;  %v17128_v24 = vld [vmem:[#allocation688_spill] sm:$0xff] }
 0x7ea   : > { %v4366_v27 = vsel %vm2307_vm7, %v4302_v41, %v17123_v50  ;;  %v4587_v16 = vsel %vm2406_vm10, %v4523_v5, %v13660_v42  ;;  %v4652_v2 = vsel %vm2439_vm11, %v4588_v15, %v3982_v46  ;;  %v4763_v59 = vsel %vm371_vm0, %v4761_v6, %v4762_v1  ;;  %v17127_v42 = vld [vmem:[#allocation306_spill] sm:$0xff]  ;;  %v17129_v41 = vld [vmem:[#allocation472_spill] sm:$0xff]  ;;  %v17130_v50 = vld [vmem:[#allocation445_spill] sm:$0xff] }
 0x7eb   : > { %v4270_v11 = vsel %vm2241_vm5, %v4206_v40, %v17124_v29  ;;  %v4430_v34 = vsel %vm15008_vm8, %v4366_v27, %v17125_v9  ;;  %v4810_v20 = vrot.slane %v4652_v2, 1  ;;  %v4651_v21 = vsel %vm2439_vm11, %v4587_v16, %v3980_v25  ;;  %4843 = vrot.lane.b32.xlu0 %v4763_v59, %s5984_s19  ;;  %v3932_v15 = vpop.permute.xlu0 %3931  ;;  %v17131_v2 = vld [vmem:[#allocation406_spill] sm:$0xff] }
 0x7ec   : > { %v4269_v56 = vsel %vm2241_vm5, %v4205_v33, %v17126_v45  ;;  %v4429_v43 = vsel %vm15008_vm8, %v4365_v54, %v17127_v42  ;;  %v4494_v1 = vsel %vm15007_vm9, %v4430_v34, %v13548_v52  ;;  %v4809_v23 = vrot.slane %v4651_v21, 1  ;;  %v3934_v33 = vpop.permute.xlu1 %3933  ;;  %v17133_v9 = vld [vmem:[#allocation62_spill] sm:$0xff]  ;;  %v17134_v45 = vld [vmem:[#allocation116_spill] sm:$0xff] }
 0x7ed   : > { %v4333_v40 = vsel %vm2274_vm6, %v4269_v56, %v17128_v24  ;;  %v4334_v7 = vsel %vm2274_vm6, %v4270_v11, %v17128_v24  ;;  %v4493_v0 = vsel %vm15007_vm9, %v4429_v43, %v13548_v52  ;;  %v4558_v6 = vsel %vm2406_vm10, %v4494_v1, %v13697_v49  ;;  %v17132_v11 = vld [vmem:[#allocation25_spill] sm:$0xff]  ;;  %v17135_v1 = vld [vmem:[#allocation134_spill] sm:$0xff] }
 0x7ee   : > { %v4398_v14 = vsel %vm2307_vm7, %v4334_v7, %v17129_v41  ;;  %v4557_v54 = vsel %vm2406_vm10, %v4493_v0, %v13709_v35  ;;  %v4622_v5 = vsel %vm2439_vm11, %v4558_v6, %v3934_v33  ;;  %v4811_v46 = vsel %vm371_vm0, %v4809_v23, %v4810_v20  ;;  %v17139_v7 = vld [vmem:[#allocation117_spill] sm:$0xff] }
 0x7ef   : > { %v4397_v27 = vsel %vm2307_vm7, %v4333_v40, %v17130_v50  ;;  %v4462_v52 = vsel %vm15008_vm8, %v4398_v14, %v13457_v13  ;;  %v4765_v16 = vrot.slane %v4622_v5, 1  ;;  %v4621_v49 = vsel %vm2439_vm11, %v4557_v54, %v3932_v15  ;;  %4875 = vrot.lane.b32.xlu1 %v4811_v46, %s5984_s19  ;;  %v3984_v43 = vpop.permute.xlu0 %3983  ;;  %v17141_v6 = vld [vmem:[#allocation405_spill] sm:$0xff]  ;;  %v17145_v15 = vld [vmem:[#allocation434_spill] sm:$0xff] }
 0x7f0   : > { %v2473_v35 = vsel %vm2472_vm12, %v13680_v31, %v17131_v2  ;;  %v4461_v25 = vsel %vm15008_vm8, %v4397_v27, %v13468_v51  ;;  %v4526_v59 = vsel %vm15007_vm9, %v4462_v52, %v13538_v39  ;;  %v4764_v29 = vrot.slane %v4621_v49, 1  ;;  %v3986_v21 = vpop.permute.xlu1 %3985  ;;  %v17142_v41 = vld [vmem:[#allocation121_spill] sm:$0xff]  ;;  %v17147_v27 = vld [vmem:[#allocation252_spill] sm:$0xff] }
 0x7f1   : > { %v2489_v13 = vsel %vm2472_vm12, %v13688_v30, %v17132_v11  ;;  %v2506_v34 = vsel %vm2505_vm13, %v2473_v35, %v17133_v9  ;;  %v4525_v20 = vsel %vm15007_vm9, %v4461_v25, %v13538_v39  ;;  %v4590_v31 = vsel %vm2406_vm10, %v4526_v59, %v13738_v22  ;;  %v17137_v22 = vld [vmem:[#allocation158_spill] sm:$0xff]  ;;  %v17143_v54 = vld [vmem:[#allocation305_spill] sm:$0xff]  ;;  %v17150_v25 = vld [vmem:[#allocation67_spill] sm:$0xff] }
 0x7f2   : > { %v2522_v51 = vsel %vm2505_vm13, %v2489_v13, %v17134_v45  ;;  %v4589_v56 = vsel %vm2406_vm10, %v4525_v20, %v13748_v28  ;;  %v4654_v42 = vsel %vm2439_vm11, %v4590_v31, %v3986_v21  ;;  %v4766_v30 = vsel %vm371_vm0, %v4764_v29, %v4765_v16  ;;  %v17148_v16 = vld [vmem:[#allocation54_spill] sm:$0xff]  ;;  %v17151_v59 = vld [vmem:[#allocation107_spill] sm:$0xff]  ;;  %v17154_v20 = vld [vmem:[#allocation320_spill] sm:$0xff] }
 0x7f3   : > { %v2555_v23 = vsel %vm17136_vm2, %v2522_v51, %v17135_v1  ;;  %v4813_v24 = vrot.slane %v4654_v42, 1  ;;  %v4653_v39 = vsel %vm2439_vm11, %v4589_v56, %v3984_v43  ;;  %4845 = vrot.lane.b32.xlu0 %v4766_v30, %s5984_s19  ;;  %v2539_v40 = vsel %vm17138_vm15, %v2506_v34, %v17137_v22  ;;  %vm17144_vm2 = vmmov %vm17140_vm1  ;;  %v4816_v2 = vpop.permute.xlu0 %4815  ;;  %v17153_v13 = vld [vmem:[#allocation354_spill] sm:$0xff]  ;;  %v17156_v21 = vld [vmem:[#allocation21_spill] sm:$0xff] }
 0x7f4   : > { %v2588_v28 = vsel %vm17140_vm1, %v2555_v23, %v17139_v7  ;;  %v4812_v0 = vrot.slane %v4653_v39, 1  ;;  %vm4965_vm9 = vcmask 883712   ;;  %v2474_v33 = vsel %vm2472_vm12, %v13676_v62, %v17141_v6  ;;  %v4848_v50 = vpop.permute.xlu1 %4847  ;;  %v17158_v51 = vld [vmem:[#allocation383_spill] sm:$0xff]  ;;  %v17159_v42 = vld [vmem:[#allocation38_spill] sm:$0xff]  ;;  %v17161_v1 = vld [vmem:[#allocation432_spill] sm:$0xff] }
 0x7f5   : > { %v2490_v14 = vsel %vm2472_vm12, %v13684_v12, %v17142_v41  ;;  %v2572_v5 = vsel %vm17144_vm2, %v2539_v40, %v17143_v54  ;;  %vm17146_vm8 = vcmask 490496   ;;  %v2507_v12 = vsel %vm2505_vm13, %v2474_v33, %v17150_v25  ;;  %v17160_v30 = vld [vmem:[#allocation55_spill] sm:$0xff]  ;;  %v17162_v23 = vld [vmem:[#allocation408_spill] sm:$0xff]  ;;  %v17163_v39 = vld [vmem:[#allocation189_spill] sm:$0xff] }
 0x7f6   : > { %v2621_v46 = vsel %vm17146_vm8, %v2588_v28, %v17145_v15  ;;  %v2523_v52 = vsel %vm2505_vm13, %v2490_v14, %v17147_v27  ;;  %vm17149_vm15 = vmmov %vm17146_vm8  ;;  %v4814_v62 = vsel %vm371_vm0, %v4812_v0, %v4813_v24  ;;  %vm17152_vm1 = vcmask 424960   ;;  %v17164_v40 = vld [vmem:[#allocation52_spill] sm:$0xff]  ;;  %v17166_v33 = vld [vmem:[#allocation417_spill] sm:$0xff] }
 0x7f7   : > { %v2605_v49 = vsel %vm17149_vm15, %v2572_v5, %v17148_v16  ;;  %v4928_v35 = vsel %vm4911_vm14, %v2621_v46, %v4848_v50  ;;  %v2556_v29 = vsel %vm17152_vm1, %v2523_v52, %v17151_v59  ;;  %4877 = vrot.lane.b32.xlu1 %v4814_v62, %s5984_s19  ;;  %v2409_v9 = vsel %vm2406_vm10, %v13566_v32, %v17153_v13  ;;  %vm17155_vm0 = vmmov %vm17152_vm1  ;;  %v4818_v0 = vpop.permute.xlu0 %4817  ;;  %v17167_v14 = vld [vmem:[#allocation47_spill] sm:$0xff]  ;;  %v17169_v50 = vld [vmem:[#allocation398_spill] sm:$0xff] }
 0x7f8   : > { %v4912_v11 = vsel %vm4911_vm14, %v2605_v49, %v4816_v2  ;;  %5559 = vmatprep.mubr.msk.f32.mxu1 %vm4965_vm9, %v4928_v35  ;;  %v2458_v34 = vsel %vm2439_vm11, %v13672_v19, %v16884_v57  ;;  %v2540_v31 = vsel %vm17155_vm0, %v2507_v12, %v17154_v20  ;;  %vm17157_vm8 = vmmov %vm17144_vm2  ;;  %v2442_v56 = vsel %vm2439_vm11, %v2409_v9, %v17158_v51  ;;  %v4850_v19 = vpop.permute.xlu1 %4849  ;;  %v17168_v15 = vld [vmem:[#allocation351_spill] sm:$0xff]  ;;  %v17170_v52 = vld [vmem:[#allocation74_spill] sm:$0xff] }
 0x7f9   : > { %v2589_v45 = vsel %vm17157_vm8, %v2556_v29, %v17156_v21  ;;  %5535 = vmatprep.mubr.msk.f32.mxu0 %vm4965_vm9, %v4912_v11  ;;  %v2491_v43 = vsel %vm2472_vm12, %v2458_v34, %v17159_v42  ;;  %v2573_v32 = vsel %vm17144_vm2, %v2540_v31, %v17160_v30  ;;  %v2475_v24 = vsel %vm2472_vm12, %v2442_v56, %v17162_v23  ;;  %vm17165_vm1 = vmmov %vm17149_vm15  ;;  %v17173_v49 = vld [vmem:[#allocation382_spill] sm:$0xff]  ;;  %v17177_v12 = vld [vmem:[#allocation437_spill] sm:$0xff] }
 0x7fa   : > { %v2622_v57 = vsel %vm17149_vm15, %v2589_v45, %v17161_v1  ;;  %v2524_v22 = vsel %vm2505_vm13, %v2491_v43, %v17163_v39  ;;  %v2606_v7 = vsel %vm17165_vm1, %v2573_v32, %v17164_v40  ;;  %v2426_v6 = vsel %vm2406_vm10, %v13613_v44, %v16878_v58  ;;  %vm17171_vm8 = vmmov %vm17155_vm0  ;;  %v17172_v44 = vld [vmem:[#allocation27_spill] sm:$0xff]  ;;  %v17174_v62 = vld [vmem:[#allocation34_spill] sm:$0xff] }
 0x7fb   : > { %v4929_v28 = vsel %vm4911_vm14, %v2622_v57, %v4850_v19  ;;  %v2508_v41 = vsel %vm2505_vm13, %v2475_v24, %v17166_v33  ;;  %v2557_v54 = vsel %vm17155_vm0, %v2524_v22, %v17167_v14  ;;  %v4913_v5 = vsel %vm4911_vm14, %v2606_v7, %v4818_v0  ;;  %v17175_v25 = vld [vmem:[#allocation342_spill] sm:$0xff]  ;;  %vm17176_vm15 = vmmov %vm17144_vm2  ;;  %v17178_v11 = vld [vmem:[#allocation407_spill] sm:$0xff]  ;;  %v4820_v45 = vpop.permute.xlu0 %4819 }
 0x7fc   : > { %5560 = vmatmul.mubr.msk.f32.vlgmr.msra.gmra.mrb[0].mxu1 %vm4965_vm9, %v4929_v28  ;;  %v2410_v46 = vsel %vm2406_vm10, %v13562_v60, %v17168_v15  ;;  %v2459_v27 = vsel %vm2439_vm11, %v2426_v6, %v17169_v50  ;;  %v2541_v58 = vsel %vm17171_vm8, %v2508_v41, %v17170_v52  ;;  %v2590_v16 = vsel %vm17144_vm2, %v2557_v54, %v17172_v44  ;;  %v4852_v29 = vpop.permute.xlu1 %4851  ;;  %v17179_v9 = vld [vmem:[#allocation152_spill] sm:$0xff]  ;;  %vm17181_vm0 = vmmov %vm17165_vm1  ;;  %v17182_v51 = vld [vmem:[#allocation370_spill] sm:$0xff] }
 0x7fd   : > { %5536 = vmatmul.mubr.msk.f32.vlgmr.msra.gmra.mrb[0].mxu0 %vm4965_vm9, %v4913_v5  ;;  %v2443_v2 = vsel %vm2439_vm11, %v2410_v46, %v17173_v49  ;;  %v2492_v35 = vsel %vm2472_vm12, %v2459_v27, %v17174_v62  ;;  %v2574_v60 = vsel %vm17176_vm15, %v2541_v58, %v17175_v25  ;;  %v2623_v59 = vsel %vm17165_vm1, %v2590_v16, %v17177_v12  ;;  %v17180_v20 = vld [vmem:[#allocation428_spill] sm:$0xff]  ;;  %v17183_v42 = vld [vmem:[#allocation346_spill] sm:$0xff]  ;;  %v17184_v30 = vld [vmem:[#allocation235_spill] sm:$0xff] }
 0x7fe   : > { %v2476_v13 = vsel %vm2472_vm12, %v2443_v2, %v17178_v11  ;;  %v2525_v34 = vsel %vm2505_vm13, %v2492_v35, %v17179_v9  ;;  %v2607_v31 = vsel %vm17181_vm0, %v2574_v60, %v17180_v20  ;;  %v4930_v21 = vsel %vm4911_vm14, %v2623_v59, %v4852_v29  ;;  %v17185_v57 = vld [vmem:[#allocation358_spill] sm:$0xff]  ;;  %v17186_v23 = vld [vmem:[#allocation401_spill] sm:$0xff]  ;;  %v17187_v39 = vld [vmem:[#allocation71_spill] sm:$0xff] }
 0x7ff   : > { %v2427_v56 = vsel %vm2406_vm10, %v13625_v61, %v17182_v51  ;;  %v2509_v43 = vsel %vm2505_vm13, %v2476_v13, %v17183_v42  ;;  %v2558_v32 = vsel %vm17171_vm8, %v2525_v34, %v17184_v30  ;;  %v4914_v1 = vsel %vm4911_vm14, %v2607_v31, %v4820_v45  ;;  %5562 = vmatprep.mubr.msk.f32.mxu1 %vm4965_vm9, %v4930_v21  ;;  %vm17188_vm2 = vmmov %vm17171_vm8  ;;  %v17189_v22 = vld [vmem:[#allocation221_spill] sm:$0xff]  ;;  %v17191_v0 = vld [vmem:[#allocation46_spill] sm:$0xff]  ;;  %v4822_v44 = vpop.permute.xlu0 %4821 }
 0x800   : > { %v2411_v19 = vsel %vm2406_vm10, %v13574_v17, %v17185_v57  ;;  %v2460_v24 = vsel %vm2439_vm11, %v2427_v56, %v17186_v23  ;;  %v2542_v61 = vsel %vm17188_vm2, %v2509_v43, %v17187_v39  ;;  %v2591_v40 = vsel %vm17176_vm15, %v2558_v32, %v17189_v22  ;;  %5538 = vmatprep.mubr.msk.f32.mxu0 %vm4965_vm9, %v4914_v1  ;;  %v17190_v7 = vld [vmem:[#allocation385_spill] sm:$0xff]  ;;  %v17192_v33 = vld [vmem:[#allocation339_spill] sm:$0xff]  ;;  %vm17193_vm1 = vmmov %vm17176_vm15  ;;  %v4854_v54 = vpop.permute.xlu1 %4853 }
 0x801   : > { %v2444_v28 = vsel %vm2439_vm11, %v2411_v19, %v17190_v7  ;;  %v2493_v6 = vsel %vm2472_vm12, %v2460_v24, %v17191_v0  ;;  %v2575_v17 = vsel %vm17193_vm1, %v2542_v61, %v17192_v33  ;;  %v17194_v41 = vld [vmem:[#allocation435_spill] sm:$0xff]  ;;  %v17195_v5 = vld [vmem:[#allocation410_spill] sm:$0xff]  ;;  %v17196_v46 = vld [vmem:[#allocation185_spill] sm:$0xff] }
 0x802   : > { %v2624_v14 = vsel %vm17181_vm0, %v2591_v40, %v17194_v41  ;;  %v2477_v15 = vsel %vm2472_vm12, %v2444_v28, %v17195_v5  ;;  %v2526_v50 = vsel %vm2505_vm13, %v2493_v6, %v17196_v46  ;;  %v17197_v27 = vld [vmem:[#allocation61_spill] sm:$0xff]  ;;  %vm17198_vm8 = vmmov %vm17181_vm0  ;;  %v17200_v2 = vld [vmem:[#allocation420_spill] sm:$0xff] }
 0x803   : > { %v2608_v52 = vsel %vm17198_vm8, %v2575_v17, %v17197_v27  ;;  %v4931_v58 = vsel %vm4911_vm14, %v2624_v14, %v4854_v54  ;;  %v17199_v16 = vld [vmem:[#allocation369_spill] sm:$0xff]  ;;  %v2510_v62 = vsel %vm2505_vm13, %v2477_v15, %v17200_v2  ;;  %v17201_v35 = vld [vmem:[#allocation78_spill] sm:$0xff]  ;;  %v17202_v12 = vld [vmem:[#allocation356_spill] sm:$0xff]  ;;  %v4824_v39 = vpop.permute.xlu0 %4823 }
 0x804   : > { %v2428_v49 = vsel %vm2406_vm10, %v13621_v37, %v17199_v16  ;;  %v2559_v25 = vsel %vm17188_vm2, %v2526_v50, %v17201_v35  ;;  %v4915_v60 = vsel %vm4911_vm14, %v2608_v52, %v4822_v44  ;;  %5563 = vmatmul.mubr.msk.f32.gmra.mrb[2].mxu1 %vm4965_vm9, %v4931_v58  ;;  %v2412_v59 = vsel %vm2406_vm10, %v13570_v18, %v17202_v12  ;;  %v17203_v29 = vld [vmem:[#allocation400_spill] sm:$0xff]  ;;  %vm17205_vm15 = vmmov %vm17188_vm2  ;;  %v17206_v9 = vld [vmem:[#allocation31_spill] sm:$0xff]  ;;  %v4856_v43 = vpop.permute.xlu1 %4855 }
 0x805   : > { %v2461_v11 = vsel %vm2439_vm11, %v2428_v49, %v17203_v29  ;;  %v17204_v13 = vld [vmem:[#allocation40_spill] sm:$0xff]  ;;  %v2592_v34 = vsel %vm17193_vm1, %v2559_v25, %v17206_v9  ;;  %5539 = vmatmul.mubr.msk.f32.gmra.mrb[2].mxu0 %vm4965_vm9, %v4915_v60  ;;  %v17209_v51 = vld [vmem:[#allocation79_spill] sm:$0xff]  ;;  %vm17210_vm0 = vmmov %vm17193_vm1 }
 0x806   : > { %v2543_v37 = vsel %vm17205_vm15, %v2510_v62, %v17204_v13  ;;  %v17207_v20 = vld [vmem:[#allocation384_spill] sm:$0xff]  ;;  %v17211_v56 = vld [vmem:[#allocation439_spill] sm:$0xff]  ;;  %v17212_v30 = vld [vmem:[#allocation409_spill] sm:$0xff] }
 0x807   : > { %v2445_v31 = vsel %vm2439_vm11, %v2412_v59, %v17207_v20  ;;  %v17208_v21 = vld [vmem:[#allocation32_spill] sm:$0xff]  ;;  %v2576_v18 = vsel %vm17210_vm0, %v2543_v37, %v17209_v51  ;;  %v2625_v42 = vsel %vm17198_vm8, %v2592_v34, %v17211_v56  ;;  %v17213_v1 = vld [vmem:[#allocation153_spill] sm:$0xff]  ;;  %v17214_v19 = vld [vmem:[#allocation430_spill] sm:$0xff]  ;;  %v4826_v12 = vpop.permute.xlu0 %4825  ;;  %v2430_v59 = vsel %vm2406_vm10, %v13629_v53, %v16987_v36 }
 0x808   : > { %v2494_v45 = vsel %vm2472_vm12, %v2461_v11, %v17208_v21  ;;  %v2478_v32 = vsel %vm2472_vm12, %v2445_v31, %v17212_v30  ;;  %vm17215_vm2 = vmmov %vm17198_vm8  ;;  %v4932_v24 = vsel %vm4911_vm14, %v2625_v42, %v4856_v43  ;;  %v17216_v61 = vld [vmem:[#allocation372_spill] sm:$0xff]  ;;  %v17217_v40 = vld [vmem:[#allocation419_spill] sm:$0xff]  ;;  %v4858_v44 = vpop.permute.xlu1 %4857  ;;  %v2463_v31 = vsel %vm2439_vm11, %v2430_v59, %v16993_v55 }
 0x809   : > { %v2527_v57 = vsel %vm2505_vm13, %v2494_v45, %v17213_v1  ;;  %v2609_v23 = vsel %vm17215_vm2, %v2576_v18, %v17214_v19  ;;  %v2429_v22 = vsel %vm2406_vm10, %v13633_v26, %v17216_v61  ;;  %v2511_v7 = vsel %vm2505_vm13, %v2478_v32, %v17217_v40  ;;  %v17218_v28 = vld [vmem:[#allocation135_spill] sm:$0xff]  ;;  %5565 = vmatprep.mubr.msk.f32.mxu1 %vm4965_vm9, %v4932_v24  ;;  %v17219_v33 = vld [vmem:[#allocation360_spill] sm:$0xff]  ;;  %vm17221_vm1 = vmmov %vm17205_vm15 }
 0x80a   : > { %v2560_v0 = vsel %vm17205_vm15, %v2527_v57, %v17218_v28  ;;  %v4916_v6 = vsel %vm4911_vm14, %v2609_v23, %v4824_v39  ;;  %v2413_v17 = vsel %vm2406_vm10, %v13582_v8, %v17219_v33  ;;  %v2462_v41 = vsel %vm2439_vm11, %v2429_v22, %v16983_v48  ;;  %v17220_v14 = vld [vmem:[#allocation76_spill] sm:$0xff]  ;;  %v17222_v54 = vld [vmem:[#allocation29_spill] sm:$0xff]  ;;  %v17223_v15 = vld [vmem:[#allocation387_spill] sm:$0xff] }
 0x80b   : > { %v2544_v26 = vsel %vm17221_vm1, %v2511_v7, %v17220_v14  ;;  %v2593_v5 = vsel %vm17210_vm0, %v2560_v0, %v17222_v54  ;;  %5541 = vmatprep.mubr.msk.f32.mxu0 %vm4965_vm9, %v4916_v6  ;;  %v2446_v46 = vsel %vm2439_vm11, %v2413_v17, %v17223_v15  ;;  %v17224_v50 = vld [vmem:[#allocation44_spill] sm:$0xff]  ;;  %v17225_v52 = vld [vmem:[#allocation174_spill] sm:$0xff]  ;;  %vm17226_vm8 = vmmov %vm17210_vm0  ;;  %v4828_v22 = vpop.permute.xlu0 %4827 }
 0x80c   : > { %v2495_v27 = vsel %vm2472_vm12, %v2462_v41, %v17224_v50  ;;  %v2577_v8 = vsel %vm17226_vm8, %v2544_v26, %v17225_v52  ;;  %v17227_v58 = vld [vmem:[#allocation438_spill] sm:$0xff]  ;;  %v17228_v16 = vld [vmem:[#allocation412_spill] sm:$0xff]  ;;  %v17230_v35 = vld [vmem:[#allocation429_spill] sm:$0xff]  ;;  %v4860_v32 = vpop.permute.xlu1 %4859 }
 0x80d   : > { %v2626_v48 = vsel %vm17215_vm2, %v2593_v5, %v17227_v58  ;;  %v2479_v49 = vsel %vm2472_vm12, %v2446_v46, %v17228_v16  ;;  %v17229_v2 = vld [vmem:[#allocation186_spill] sm:$0xff]  ;;  %vm17231_vm15 = vmmov %vm17215_vm2  ;;  %v17233_v13 = vld [vmem:[#allocation335_spill] sm:$0xff] }
 0x80e   : > { %v2528_v62 = vsel %vm2505_vm13, %v2495_v27, %v17229_v2  ;;  %v2610_v25 = vsel %vm17231_vm15, %v2577_v8, %v17230_v35  ;;  %v4933_v60 = vsel %vm4911_vm14, %v2626_v48, %v4858_v44  ;;  %v17232_v29 = vld [vmem:[#allocation422_spill] sm:$0xff]  ;;  %v17234_v34 = vld [vmem:[#allocation359_spill] sm:$0xff]  ;;  %v17235_v21 = vld [vmem:[#allocation105_spill] sm:$0xff] }
 0x80f   : > { %v2512_v11 = vsel %vm2505_vm13, %v2479_v49, %v17232_v29  ;;  %v2561_v37 = vsel %vm17221_vm1, %v2528_v62, %v17233_v13  ;;  %v4917_v9 = vsel %vm4911_vm14, %v2610_v25, %v4826_v12  ;;  %5566 = vmatmul.mubr.msk.f32.gmra.mrb[4].mxu1 %vm4965_vm9, %v4933_v60  ;;  %v2414_v20 = vsel %vm2406_vm10, %v13578_v10, %v17234_v34  ;;  %vm17236_vm0 = vmmov %vm17221_vm1  ;;  %v17237_v53 = vld [vmem:[#allocation35_spill] sm:$0xff]  ;;  %v17238_v51 = vld [vmem:[#allocation386_spill] sm:$0xff]  ;;  %v4830_v59 = vpop.permute.xlu0 %4829 }
 0x810   : > { %v2545_v36 = vsel %vm17236_vm0, %v2512_v11, %v17235_v21  ;;  %v2594_v45 = vsel %vm17226_vm8, %v2561_v37, %v17237_v53  ;;  %5542 = vmatmul.mubr.msk.f32.gmra.mrb[4].mxu0 %vm4965_vm9, %v4917_v9  ;;  %v2447_v18 = vsel %vm2439_vm11, %v2414_v20, %v17238_v51  ;;  %v17239_v56 = vld [vmem:[#allocation36_spill] sm:$0xff]  ;;  %vm17241_vm2 = vmmov %vm17226_vm8  ;;  %v17242_v30 = vld [vmem:[#allocation441_spill] sm:$0xff]  ;;  %v4862_v16 = vpop.permute.xlu1 %4861 }
 0x811   : > { %v2496_v42 = vsel %vm2472_vm12, %v2463_v31, %v17239_v56  ;;  %v17240_v43 = vld [vmem:[#allocation424_spill] sm:$0xff]  ;;  %v2627_v55 = vsel %vm17231_vm15, %v2594_v45, %v17242_v30  ;;  %v17243_v1 = vld [vmem:[#allocation411_spill] sm:$0xff]  ;;  %v17244_v19 = vld [vmem:[#allocation317_spill] sm:$0xff] }
 0x812   : > { %v2578_v10 = vsel %vm17241_vm2, %v2545_v36, %v17240_v43  ;;  %v2480_v57 = vsel %vm2472_vm12, %v2447_v18, %v17243_v1  ;;  %v2529_v23 = vsel %vm2505_vm13, %v2496_v42, %v17244_v19  ;;  %v17245_v24 = vld [vmem:[#allocation431_spill] sm:$0xff]  ;;  %vm17246_vm1 = vmmov %vm17231_vm15  ;;  %v4934_v61 = vsel %vm4911_vm14, %v2627_v55, %v4860_v32  ;;  %v17247_v40 = vld [vmem:[#allocation373_spill] sm:$0xff] }
 0x813   : > { %v2611_v39 = vsel %vm17246_vm1, %v2578_v10, %v17245_v24  ;;  %v2431_v7 = vsel %vm2406_vm10, %v13641_v4, %v17247_v40  ;;  %v17248_v28 = vld [vmem:[#allocation421_spill] sm:$0xff]  ;;  %v17249_v6 = vld [vmem:[#allocation202_spill] sm:$0xff]  ;;  %5568 = vmatprep.mubr.msk.f32.mxu1 %vm4965_vm9, %v4934_v61  ;;  %v17251_v26 = vld [vmem:[#allocation292_spill] sm:$0xff]  ;;  %v4832_v40 = vpop.permute.xlu0 %4831 }
 0x814   : > { %v2513_v0 = vsel %vm2505_vm13, %v2480_v57, %v17248_v28  ;;  %v2562_v33 = vsel %vm17236_vm0, %v2529_v23, %v17249_v6  ;;  %v4918_v17 = vsel %vm4911_vm14, %v2611_v39, %v4828_v22  ;;  %v17250_v41 = vld [vmem:[#allocation69_spill] sm:$0xff]  ;;  %v2464_v54 = vsel %vm2439_vm11, %v2431_v7, %v17251_v26  ;;  %v17252_v5 = vld [vmem:[#allocation104_spill] sm:$0xff]  ;;  %vm17253_vm8 = vmmov %vm17236_vm0  ;;  %v4864_v1 = vpop.permute.xlu1 %4863 }
 0x815   : > { %v2415_v14 = vsel %vm2406_vm10, %v13592_v63, %v17250_v41  ;;  %v2546_v4 = vsel %vm17253_vm8, %v2513_v0, %v17252_v5  ;;  %v17254_v15 = vld [vmem:[#allocation33_spill] sm:$0xff]  ;;  %5544 = vmatprep.mubr.msk.f32.mxu0 %vm4965_vm9, %v4918_v17  ;;  %v17256_v52 = vld [vmem:[#allocation416_spill] sm:$0xff]  ;;  %v17257_v58 = vld [vmem:[#allocation423_spill] sm:$0xff] }
 0x816   : > { %v2595_v46 = vsel %vm17241_vm2, %v2562_v33, %v17254_v15  ;;  %v17255_v50 = vld [vmem:[#allocation389_spill] sm:$0xff]  ;;  %v2497_v8 = vsel %vm2472_vm12, %v2464_v54, %v17256_v52  ;;  %vm17258_vm15 = vmmov %vm17241_vm2  ;;  %v17259_v48 = vld [vmem:[#allocation440_spill] sm:$0xff] }
 0x817   : > { %v2448_v27 = vsel %vm2439_vm11, %v2415_v14, %v17255_v50  ;;  %v2579_v63 = vsel %vm17258_vm15, %v2546_v4, %v17257_v58  ;;  %v2628_v44 = vsel %vm17246_vm1, %v2595_v46, %v17259_v48  ;;  %v17260_v49 = vld [vmem:[#allocation414_spill] sm:$0xff]  ;;  %v17262_v25 = vld [vmem:[#allocation341_spill] sm:$0xff]  ;;  %vm17263_vm0 = vmmov %vm17246_vm1 }
 0x818   : > { %v2481_v2 = vsel %vm2472_vm12, %v2448_v27, %v17260_v49  ;;  %v17261_v62 = vld [vmem:[#allocation70_spill] sm:$0xff]  ;;  %v2612_v60 = vsel %vm17263_vm0, %v2579_v63, %v17262_v25  ;;  %v4935_v12 = vsel %vm4911_vm14, %v2628_v44, %v4862_v16  ;;  %v17266_v9 = vld [vmem:[#allocation336_spill] sm:$0xff]  ;;  %v17269_v45 = vld [vmem:[#allocation41_spill] sm:$0xff]  ;;  %v4866_v49 = vpop.permute.xlu1 %4865 }
 0x819   : > { %v2530_v35 = vsel %vm2505_vm13, %v2497_v8, %v17261_v62  ;;  %v17264_v29 = vld [vmem:[#allocation42_spill] sm:$0xff]  ;;  %v4919_v20 = vsel %vm4911_vm14, %v2612_v60, %v4830_v59  ;;  %5569 = vmatmul.mubr.msk.f32.gmra.mrb[6].mxu1 %vm4965_vm9, %v4935_v12  ;;  %v17267_v31 = vld [vmem:[#allocation68_spill] sm:$0xff]  ;;  %vm17270_vm2 = vmmov %vm17253_vm8 }
 0x81a   : > { %v2432_v11 = vsel %vm2406_vm10, %v13637_v3, %v17264_v29  ;;  %v17265_v13 = vld [vmem:[#allocation150_spill] sm:$0xff]  ;;  %v2563_v34 = vsel %vm17253_vm8, %v2530_v35, %v17266_v9  ;;  %v2416_v21 = vsel %vm2406_vm10, %v13586_v47, %v17267_v31  ;;  %v17268_v36 = vld [vmem:[#allocation296_spill] sm:$0xff]  ;;  %v17271_v51 = vld [vmem:[#allocation425_spill] sm:$0xff]  ;;  %5545 = vmatmul.mubr.msk.f32.gmra.mrb[6].mxu0 %vm4965_vm9, %v4919_v20  ;;  %v4834_v29 = vpop.permute.xlu0 %4833 }
 0x81b   : > { %v2514_v37 = vsel %vm2505_vm13, %v2481_v2, %v17265_v13  ;;  %v2465_v53 = vsel %vm2439_vm11, %v2432_v11, %v17268_v36  ;;  %v2596_v18 = vsel %vm17258_vm15, %v2563_v34, %v17271_v51  ;;  %v17272_v56 = vld [vmem:[#allocation388_spill] sm:$0xff]  ;;  %v17274_v30 = vld [vmem:[#allocation13_spill] sm:$0xff]  ;;  %vm17275_vm1 = vmmov %vm17258_vm15 }
 0x81c   : > { %v2547_v3 = vsel %vm17270_vm2, %v2514_v37, %v17269_v45  ;;  %v2449_v42 = vsel %vm2439_vm11, %v2416_v21, %v17272_v56  ;;  %v17273_v43 = vld [vmem:[#allocation60_spill] sm:$0xff]  ;;  %v17276_v55 = vld [vmem:[#allocation443_spill] sm:$0xff]  ;;  %v17277_v57 = vld [vmem:[#allocation413_spill] sm:$0xff] }
 0x81d   : > { %v2498_v10 = vsel %vm2472_vm12, %v2465_v53, %v17273_v43  ;;  %v2580_v47 = vsel %vm17275_vm1, %v2547_v3, %v17274_v30  ;;  %v2629_v32 = vsel %vm17263_vm0, %v2596_v18, %v17276_v55  ;;  %v2482_v19 = vsel %vm2472_vm12, %v2449_v42, %v17277_v57  ;;  %v17278_v23 = vld [vmem:[#allocation254_spill] sm:$0xff]  ;;  %v17279_v39 = vld [vmem:[#allocation343_spill] sm:$0xff]  ;;  %vm17280_vm8 = vmmov %vm17263_vm0 }
 0x81e   : > { %v2531_v24 = vsel %vm2505_vm13, %v2498_v10, %v17278_v23  ;;  %v2613_v61 = vsel %vm17280_vm8, %v2580_v47, %v17279_v39  ;;  %v4936_v22 = vsel %vm4911_vm14, %v2629_v32, %v4864_v1  ;;  %v17281_v7 = vld [vmem:[#allocation375_spill] sm:$0xff]  ;;  %v17283_v33 = vld [vmem:[#allocation236_spill] sm:$0xff]  ;;  %v17284_v14 = vld [vmem:[#allocation362_spill] sm:$0xff]  ;;  %v4868_v23 = vpop.permute.xlu1 %4867 }
 0x81f   : > { %v2433_v28 = vsel %vm2406_vm10, %v13654_v38, %v17281_v7  ;;  %v17282_v0 = vld [vmem:[#allocation11_spill] sm:$0xff]  ;;  %v2564_v17 = vsel %vm17270_vm2, %v2531_v24, %v17283_v33  ;;  %v4920_v41 = vsel %vm4911_vm14, %v2613_v61, %v4832_v40  ;;  %5571 = vmatprep.mubr.msk.f32.mxu1 %vm4965_vm9, %v4936_v22  ;;  %v17287_v15 = vld [vmem:[#allocation132_spill] sm:$0xff]  ;;  %vm17288_vm15 = vmmov %vm17270_vm2 }
 0x820   : > { %v2515_v6 = vsel %vm2505_vm13, %v2482_v19, %v17282_v0  ;;  %v17285_v26 = vld [vmem:[#allocation475_spill] sm:$0xff]  ;;  %v17289_v46 = vld [vmem:[#allocation37_spill] sm:$0xff]  ;;  %5547 = vmatprep.mubr.msk.f32.mxu0 %vm4965_vm9, %v4920_v41  ;;  %v17291_v8 = vld [vmem:[#allocation58_spill] sm:$0xff]  ;;  %v4836_v0 = vpop.permute.xlu0 %4835 }
 0x821   : > { %v2417_v54 = vsel %vm2406_vm10, %v17285_v26, %v17284_v14  ;;  %v17286_v5 = vld [vmem:[#allocation295_spill] sm:$0xff]  ;;  %v2548_v38 = vsel %vm17288_vm15, %v2515_v6, %v17287_v15  ;;  %v2597_v50 = vsel %vm17275_vm1, %v2564_v17, %v17289_v46  ;;  %v17292_v63 = vld [vmem:[#allocation12_spill] sm:$0xff]  ;;  %vm17293_vm0 = vmmov %vm17275_vm1 }
 0x822   : > { %v2466_v4 = vsel %vm2439_vm11, %v2433_v28, %v17286_v5  ;;  %v17290_v27 = vld [vmem:[#allocation391_spill] sm:$0xff]  ;;  %v2581_v48 = vsel %vm17293_vm0, %v2548_v38, %v17292_v63  ;;  %v17294_v44 = vld [vmem:[#allocation442_spill] sm:$0xff]  ;;  %vm17298_vm2 = vmmov %vm17280_vm8 }
 0x823   : > { %v2450_v52 = vsel %vm2439_vm11, %v2417_v54, %v17290_v27  ;;  %v2499_v58 = vsel %vm2472_vm12, %v2466_v4, %v17291_v8  ;;  %v2630_v16 = vsel %vm17280_vm8, %v2597_v50, %v17294_v44  ;;  %v17295_v2 = vld [vmem:[#allocation415_spill] sm:$0xff]  ;;  %v17297_v60 = vld [vmem:[#allocation338_spill] sm:$0xff]  ;;  %v17300_v13 = vld [vmem:[#allocation476_spill] sm:$0xff]  ;;  %v4870_v27 = vpop.permute.xlu1 %4869 }
 0x824   : > { %v2483_v62 = vsel %vm2472_vm12, %v2450_v52, %v17295_v2  ;;  %v17296_v35 = vld [vmem:[#allocation319_spill] sm:$0xff]  ;;  %v2614_v12 = vsel %vm17298_vm2, %v2581_v48, %v17297_v60  ;;  %v4937_v59 = vsel %vm4911_vm14, %v2630_v16, %v4866_v49  ;;  %v17299_v11 = vld [vmem:[#allocation374_spill] sm:$0xff]  ;;  %v17302_v20 = vld [vmem:[#allocation268_spill] sm:$0xff]  ;;  %v4838_v63 = vpop.permute.xlu0 %4837 }
 0x825   : > { %v2532_v25 = vsel %vm2505_vm13, %v2499_v58, %v17296_v35  ;;  %v2434_v37 = vsel %vm2406_vm10, %v17300_v13, %v17299_v11  ;;  %v17301_v9 = vld [vmem:[#allocation91_spill] sm:$0xff]  ;;  %v4921_v21 = vsel %vm4911_vm14, %v2614_v12, %v4834_v29  ;;  %5572 = vmatmul.mubr.msk.f32.gmra.mrb[8].mxu1 %vm4965_vm9, %v4937_v59  ;;  %v17303_v36 = vld [vmem:[#allocation361_spill] sm:$0xff]  ;;  %v17304_v53 = vld [vmem:[#allocation474_spill] sm:$0xff] }
 0x826   : > { %v2516_v34 = vsel %vm2505_vm13, %v2483_v62, %v17301_v9  ;;  %v2565_v31 = vsel %vm17288_vm15, %v2532_v25, %v17302_v20  ;;  %v2418_v45 = vsel %vm2406_vm10, %v17304_v53, %v17303_v36  ;;  %v17305_v3 = vld [vmem:[#allocation300_spill] sm:$0xff]  ;;  %v17306_v18 = vld [vmem:[#allocation106_spill] sm:$0xff]  ;;  %vm17307_vm1 = vmmov %vm17288_vm15  ;;  %5548 = vmatmul.mubr.msk.f32.gmra.mrb[8].mxu0 %vm4965_vm9, %v4921_v21 }
 0x827   : > { %v2467_v51 = vsel %vm2439_vm11, %v2434_v37, %v17305_v3  ;;  %v2549_v56 = vsel %vm17307_vm1, %v2516_v34, %v17306_v18  ;;  %v17308_v42 = vld [vmem:[#allocation427_spill] sm:$0xff]  ;;  %v17309_v10 = vld [vmem:[#allocation390_spill] sm:$0xff]  ;;  %v17310_v47 = vld [vmem:[#allocation64_spill] sm:$0xff] }
 0x828   : > { %v2598_v43 = vsel %vm17293_vm0, %v2565_v31, %v17308_v42  ;;  %v2451_v30 = vsel %vm2439_vm11, %v2418_v45, %v17309_v10  ;;  %v2500_v55 = vsel %vm2472_vm12, %v2467_v51, %v17310_v47  ;;  %v17311_v32 = vld [vmem:[#allocation17_spill] sm:$0xff]  ;;  %vm17312_vm8 = vmmov %vm17293_vm0  ;;  %v17313_v57 = vld [vmem:[#allocation447_spill] sm:$0xff] }
 0x829   : > { %v2582_v1 = vsel %vm17312_vm8, %v2549_v56, %v17311_v32  ;;  %v2631_v19 = vsel %vm17298_vm2, %v2598_v43, %v17313_v57  ;;  %v17314_v24 = vld [vmem:[#allocation18_spill] sm:$0xff]  ;;  %v17315_v61 = vld [vmem:[#allocation283_spill] sm:$0xff]  ;;  %v17316_v40 = vld [vmem:[#allocation352_spill] sm:$0xff] }
 0x82a   : > { %v2484_v39 = vsel %vm2472_vm12, %v2451_v30, %v17314_v24  ;;  %v2533_v22 = vsel %vm2505_vm13, %v2500_v55, %v17315_v61  ;;  %vm17317_vm15 = vmmov %vm17298_vm2  ;;  %v4938_v28 = vsel %vm4911_vm14, %v2631_v19, %v4868_v23  ;;  %v17318_v6 = vld [vmem:[#allocation216_spill] sm:$0xff]  ;;  %v17319_v17 = vld [vmem:[#allocation237_spill] sm:$0xff]  ;;  %v4840_v30 = vpop.permute.xlu0 %4839 }
 0x82b   : > { %v2615_v7 = vsel %vm17317_vm15, %v2582_v1, %v17316_v40  ;;  %v2517_v33 = vsel %vm2505_vm13, %v2484_v39, %v17318_v6  ;;  %v2566_v41 = vsel %vm17307_vm1, %v2533_v22, %v17319_v17  ;;  %5574 = vmatprep.mubr.msk.f32.mxu1 %vm4965_vm9, %v4938_v28  ;;  %v17320_v26 = vld [vmem:[#allocation133_spill] sm:$0xff]  ;;  %vm17321_vm0 = vmmov %vm17307_vm1  ;;  %v17322_v5 = vld [vmem:[#allocation426_spill] sm:$0xff] }
 0x82c   : > { %v4922_v14 = vsel %vm4911_vm14, %v2615_v7, %v4836_v0  ;;  %v2550_v54 = vsel %vm17321_vm0, %v2517_v33, %v17320_v26  ;;  %v2599_v4 = vsel %vm17312_vm8, %v2566_v41, %v17322_v5  ;;  %v17323_v15 = vld [vmem:[#allocation16_spill] sm:$0xff]  ;;  %vm17324_vm2 = vmmov %vm17312_vm8  ;;  %v17325_v46 = vld [vmem:[#allocation446_spill] sm:$0xff]  ;;  %vm17335_vm0 = vcmask 228352  }
 0x82d   : > { %5550 = vmatprep.mubr.msk.f32.mxu0 %vm4965_vm9, %v4922_v14  ;;  %v2583_v38 = vsel %vm17324_vm2, %v2550_v54, %v17323_v15  ;;  %v2632_v50 = vsel %vm17317_vm15, %v2599_v4, %v17325_v46  ;;  %v17326_v52 = vld [vmem:[#allocation347_spill] sm:$0xff]  ;;  %vm17327_vm1 = vmmov %vm17317_vm15  ;;  %v17328_v44 = vld [vmem:[#allocation8_spill] sm:$0xff]  ;;  %vm17337_vm8 = vcmask 261120  }
 0x82e   : > { %v2616_v8 = vsel %vm17327_vm1, %v2583_v38, %v17326_v52  ;;  %v4939_v58 = vsel %vm4911_vm14, %v2632_v50, %v4870_v27  ;;  %v17329_v16 = vld [vmem:[#allocation50_spill] sm:$0xff]  ;;  %v17330_v2 = vld [vmem:[#allocation151_spill] sm:$0xff]  ;;  %v17331_v35 = vld [vmem:[#allocation184_spill] sm:$0xff]  ;;  %v4872_v55 = vpop.permute.xlu1 %4871 }
 0x82f   : > { %v4923_v48 = vsel %vm4911_vm14, %v2616_v8, %v4838_v63  ;;  %5575 = vmatmul.mubr.msk.f32.gmra.mrb[10].mxu1 %vm4965_vm9, %v4939_v58  ;;  %v2188_v49 = vsel %vm2175_vm3, %v17329_v16, %v17328_v44  ;;  %v17332_v60 = vld [vmem:[#allocation217_spill] sm:$0xff]  ;;  %v17336_v37 = vld [vmem:[#allocation318_spill] sm:$0xff]  ;;  %v17338_v34 = vld [vmem:[#allocation364_spill] sm:$0xff] }
 0x830   : > { %5551 = vmatmul.mubr.msk.f32.gmra.mrb[10].mxu0 %vm4965_vm9, %v4923_v48  ;;  %v2221_v62 = vsel %vm2208_vm4, %v2188_v49, %v17330_v2  ;;  %v17333_v59 = vld [vmem:[#allocation253_spill] sm:$0xff]  ;;  %v17340_v36 = vld [vmem:[#allocation22_spill] sm:$0xff]  ;;  %vm17343_vm4 = vcmask 424960   ;;  %v17344_v56 = vld [vmem:[#allocation20_spill] sm:$0xff] }
 0x831   : > { %v2254_v25 = vsel %vm2241_vm5, %v2221_v62, %v17331_v35  ;;  %v17334_v11 = vld [vmem:[#allocation281_spill] sm:$0xff]  ;;  %v17341_v45 = vld [vmem:[#allocation10_spill] sm:$0xff]  ;;  %vm17345_vm5 = vmmov %vm17324_vm2  ;;  %v4842_v57 = vpop.permute.xlu0 %4841 }
 0x832   : > { %v2287_v12 = vsel %vm2274_vm6, %v2254_v25, %v17332_v60  ;;  %v17339_v31 = vld [vmem:[#allocation393_spill] sm:$0xff]  ;;  %v17342_v51 = vld [vmem:[#allocation234_spill] sm:$0xff]  ;;  %vm17347_vm6 = vmmov %vm17327_vm1 }
 0x833   : > { %v2320_v29 = vsel %vm2307_vm7, %v2287_v12, %v17333_v59  ;;  %v17346_v43 = vld [vmem:[#allocation349_spill] sm:$0xff]  ;;  %v17349_v19 = vld [vmem:[#allocation344_spill] sm:$0xff] }
 0x834   : > { %v2353_v13 = vsel %vm17335_vm0, %v2320_v29, %v17334_v11  ;;  %v17348_v32 = vld [vmem:[#allocation449_spill] sm:$0xff]  ;;  %v4925_v23 = vsel %vm4911_vm14, %v17349_v19, %v4842_v57  ;;  %v17350_v39 = vld [vmem:[#allocation448_spill] sm:$0xff] }
 0x835   : > { %v2386_v9 = vsel %vm17337_vm8, %v2353_v13, %v17336_v37  ;;  %v4940_v1 = vsel %vm4911_vm14, %v17348_v32, %v4872_v55  ;;  %v17351_v40 = vld [vmem:[#allocation357_spill] sm:$0xff]  ;;  %v17354_v26 = vld [vmem:[#allocation452_spill] sm:$0xff] }
 0x836   : > { %v2419_v20 = vsel %vm2406_vm10, %v2386_v9, %v17338_v34  ;;  %5577 = vmatprep.mubr.msk.f32.mxu1 %vm4965_vm9, %v4940_v1  ;;  %v4874_v24 = vpop.permute.xlu1 %4873  ;;  %v17352_v0 = vld [vmem:[#allocation453_spill] sm:$0xff] }
 0x837   : > { %v2452_v21 = vsel %vm2439_vm11, %v2419_v20, %v17339_v31  ;;  %v4941_v61 = vsel %vm4911_vm14, %v17350_v39, %v4874_v24  ;;  %v17353_v17 = vld [vmem:[#allocation353_spill] sm:$0xff] }
 0x838   : > { %v2485_v53 = vsel %vm2472_vm12, %v2452_v21, %v17340_v36  ;;  %5578 = vmatmul.mubr.msk.f32.gmra.mrb[12].mxu1 %vm4965_vm9, %v4941_v61  ;;  %v14302_v5 = vld [vmem:[%s14462_s2] ss:$0 sm:$0xff] }
 0x839   : > { %v2518_v3 = vsel %vm2505_vm13, %v2485_v53, %v17341_v45 }
 0x83a   : > { %v2551_v18 = vsel %vm17343_vm4, %v2518_v3, %v17342_v51 }
 0x83b   : > { %v2584_v42 = vsel %vm17345_vm5, %v2551_v18, %v17344_v56 }
 0x83c   : > { %v2617_v10 = vsel %vm17347_vm6, %v2584_v42, %v17346_v43 }
 0x83d   : > { %v4924_v47 = vsel %vm4911_vm14, %v2617_v10, %v4840_v30 }
 0x83e   : > { %5553 = vmatprep.mubr.msk.f32.mxu0 %vm4965_vm9, %v4924_v47 }
 0x83f   : > { %5554 = vmatmul.mubr.msk.f32.gmra.mrb[12].mxu0 %vm4965_vm9, %v4925_v23 }
 0x85d   : > { %v4844_v22 = vpop.permute.xlu0 %4843 }
 0x85e   : > { %v4926_v7 = vsel %vm4911_vm14, %v17351_v40, %v4844_v22 }
 0x85f   : > { %5556 = vmatprep.mubr.msk.f32.mxu0 %vm4965_vm9, %v4926_v7 }
 0x861   : > { %v4876_v28 = vpop.permute.xlu1 %4875 }
 0x862   : > { %v4942_v6 = vsel %vm4911_vm14, %v17352_v0, %v4876_v28 }
 0x863   : > { %5580 = vmatprep.mubr.msk.f32.mxu1 %vm4965_vm9, %v4942_v6 }
 0x865   : > { %v4846_v33 = vpop.permute.xlu0 %4845 }
 0x866   : > { %v4927_v41 = vsel %vm4911_vm14, %v17353_v17, %v4846_v33 }
 0x867   : > { %5557 = vmatmul.mubr.msk.f32.gmra.mrb[14].mxu0 %vm4965_vm9, %v4927_v41 }
 0x869   : > { %v4878_v14 = vpop.permute.xlu1 %4877 }
 0x86a   : > { %v4943_v54 = vsel %vm4911_vm14, %v17354_v26, %v4878_v14 }
 0x86b   : > { %5581 = vmatmul.mubr.msk.f32.gmra.mrb[14].mxu1 %vm4965_vm9, %v4943_v54 }
 0x8cf   : > { %v5561_v4 = vpop.f32.mrb[0].mxu1 }
 0x8d0   : > { %v5537_v15 = vpop.f32.mrb[0].mxu0  ;;  %v5218_v38 = vadd.f32 %v5561_v4, %v14302_v5  ;;  %v5212_v46 = vpop.f32.mrb[1].mxu1 }
 0x8d1   : > { %v5138_v50 = vadd.f32 %v5537_v15, %v14302_v5  ;;  %v5132_v27 = vpop.f32.mrb[1].mxu0  ;;  %v5213_v52 = vadd.f32 %v14302_v5, %v5212_v46 }
 0x8d2   : > { %5308 = vst.msk [vmem:[%s14307_s8 + $0x88] sm:$0xff] %vm2175_vm3, %v5218_v38  ;;  %v5133_v8 = vadd.f32 %v14302_v5, %v5132_v27 }
 0x8d3   : > { %5292 = vst.msk [vmem:[%s14307_s8 + $0x8] sm:$0xff] %vm2175_vm3, %v5138_v50  ;;  %5307 = vst.msk [vmem:[%s14307_s8 + $0x80] sm:$0xff] %vm2175_vm3, %v5213_v52 }
 0x8d4   : > { %5291 = vst.msk [vmem:[%s14307_s8] sm:$0xff] %vm2175_vm3, %v5133_v8 }
 0x8d7   : > { %v5564_v58 = vpop.f32.mrb[2].mxu1 }
 0x8d8   : > { %v5540_v63 = vpop.f32.mrb[2].mxu0  ;;  %v5228_v48 = vadd.f32 %v5564_v58, %v14302_v5  ;;  %v5222_v44 = vpop.f32.mrb[3].mxu1 }
 0x8d9   : > { %v5148_v16 = vadd.f32 %v5540_v63, %v14302_v5  ;;  %v5142_v49 = vpop.f32.mrb[3].mxu0  ;;  %v5223_v2 = vadd.f32 %v14302_v5, %v5222_v44 }
 0x8da   : > { %5310 = vst.msk [vmem:[%s14307_s8 + $0x98] sm:$0xff] %vm2175_vm3, %v5228_v48  ;;  %v5143_v62 = vadd.f32 %v14302_v5, %v5142_v49 }
 0x8db   : > { %5294 = vst.msk [vmem:[%s14307_s8 + $0x18] sm:$0xff] %vm2175_vm3, %v5148_v16  ;;  %5309 = vst.msk [vmem:[%s14307_s8 + $0x90] sm:$0xff] %vm2175_vm3, %v5223_v2 }
 0x8dc   : > { %5293 = vst.msk [vmem:[%s14307_s8 + $0x10] sm:$0xff] %vm2175_vm3, %v5143_v62 }
 0x8e2   : > { %v5567_v35 = vpop.f32.mrb[4].mxu1 }
 0x8e3   : > { %v5543_v25 = vpop.f32.mrb[4].mxu0  ;;  %v5238_v60 = vadd.f32 %v5567_v35, %v14302_v5  ;;  %v5232_v12 = vpop.f32.mrb[5].mxu1 }
 0x8e4   : > { %v5158_v59 = vadd.f32 %v5543_v25, %v14302_v5  ;;  %v5152_v29 = vpop.f32.mrb[5].mxu0  ;;  %v5233_v11 = vadd.f32 %v14302_v5, %v5232_v12 }
 0x8e5   : > { %5312 = vst.msk [vmem:[%s14307_s8 + $0xa8] sm:$0xff] %vm2175_vm3, %v5238_v60  ;;  %v5153_v13 = vadd.f32 %v14302_v5, %v5152_v29 }
 0x8e6   : > { %5296 = vst.msk [vmem:[%s14307_s8 + $0x28] sm:$0xff] %vm2175_vm3, %v5158_v59  ;;  %5311 = vst.msk [vmem:[%s14307_s8 + $0xa0] sm:$0xff] %vm2175_vm3, %v5233_v11 }
 0x8e7   : > { %5295 = vst.msk [vmem:[%s14307_s8 + $0x20] sm:$0xff] %vm2175_vm3, %v5153_v13 }
 0x8ec   : > { %v5570_v37 = vpop.f32.mrb[6].mxu1 }
 0x8ed   : > { %v5546_v9 = vpop.f32.mrb[6].mxu0  ;;  %v5248_v34 = vadd.f32 %v5570_v37, %v14302_v5  ;;  %v5242_v20 = vpop.f32.mrb[7].mxu1 }
 0x8ee   : > { %v5168_v31 = vadd.f32 %v5546_v9, %v14302_v5  ;;  %v5162_v21 = vpop.f32.mrb[7].mxu0  ;;  %v5243_v36 = vadd.f32 %v14302_v5, %v5242_v20 }
 0x8ef   : > { %5314 = vst.msk [vmem:[%s14307_s8 + $0xb8] sm:$0xff] %vm2175_vm3, %v5248_v34  ;;  %v5163_v53 = vadd.f32 %v14302_v5, %v5162_v21 }
 0x8f0   : > { %5298 = vst.msk [vmem:[%s14307_s8 + $0x38] sm:$0xff] %vm2175_vm3, %v5168_v31  ;;  %5313 = vst.msk [vmem:[%s14307_s8 + $0xb0] sm:$0xff] %vm2175_vm3, %v5243_v36 }
 0x8f1   : > { %5297 = vst.msk [vmem:[%s14307_s8 + $0x30] sm:$0xff] %vm2175_vm3, %v5163_v53 }
 0x8f8   : > { %v5573_v45 = vpop.f32.mrb[8].mxu1 }
 0x8f9   : > { %v5549_v3 = vpop.f32.mrb[8].mxu0  ;;  %v5258_v51 = vadd.f32 %v5573_v45, %v14302_v5  ;;  %v5252_v18 = vpop.f32.mrb[9].mxu1 }
 0x8fa   : > { %v5178_v56 = vadd.f32 %v5549_v3, %v14302_v5  ;;  %v5172_v42 = vpop.f32.mrb[9].mxu0  ;;  %v5253_v43 = vadd.f32 %v14302_v5, %v5252_v18 }
 0x8fb   : > { %5316 = vst.msk [vmem:[%s14307_s8 + $0xc8] sm:$0xff] %vm2175_vm3, %v5258_v51  ;;  %v5173_v10 = vadd.f32 %v14302_v5, %v5172_v42 }
 0x8fc   : > { %5300 = vst.msk [vmem:[%s14307_s8 + $0x48] sm:$0xff] %vm2175_vm3, %v5178_v56  ;;  %5315 = vst.msk [vmem:[%s14307_s8 + $0xc0] sm:$0xff] %vm2175_vm3, %v5253_v43 }
 0x8fd   : > { %5299 = vst.msk [vmem:[%s14307_s8 + $0x40] sm:$0xff] %vm2175_vm3, %v5173_v10 }
 0x902   : > { %v5576_v30 = vpop.f32.mrb[10].mxu1 }
 0x903   : > { %v5552_v47 = vpop.f32.mrb[10].mxu0  ;;  %v5268_v55 = vadd.f32 %v5576_v30, %v14302_v5  ;;  %v5262_v32 = vpop.f32.mrb[11].mxu1 }
 0x904   : > { %v5188_v1 = vadd.f32 %v5552_v47, %v14302_v5  ;;  %v5182_v57 = vpop.f32.mrb[11].mxu0  ;;  %v5263_v19 = vadd.f32 %v14302_v5, %v5262_v32 }
 0x905   : > { %5318 = vst.msk [vmem:[%s14307_s8 + $0xd8] sm:$0xff] %vm2175_vm3, %v5268_v55  ;;  %v5183_v23 = vadd.f32 %v14302_v5, %v5182_v57 }
 0x906   : > { %5302 = vst.msk [vmem:[%s14307_s8 + $0x58] sm:$0xff] %vm2175_vm3, %v5188_v1  ;;  %5317 = vst.msk [vmem:[%s14307_s8 + $0xd0] sm:$0xff] %vm2175_vm3, %v5263_v19 }
 0x907   : > { %5301 = vst.msk [vmem:[%s14307_s8 + $0x50] sm:$0xff] %vm2175_vm3, %v5183_v23 }
 0x90b   : > { %v5579_v40 = vpop.f32.mrb[12].mxu1 }
 0x90c   : > { %v5278_v7 = vadd.f32 %v5579_v40, %v14302_v5  ;;  %v5272_v28 = vpop.f32.mrb[13].mxu1 }
 0x90d   : > { %v5273_v0 = vadd.f32 %v14302_v5, %v5272_v28 }
 0x90e   : > { %5320 = vst.msk [vmem:[%s14307_s8 + $0xe8] sm:$0xff] %vm2175_vm3, %v5278_v7 }
 0x90f   : > { %5319 = vst.msk [vmem:[%s14307_s8 + $0xe0] sm:$0xff] %vm2175_vm3, %v5273_v0 }
 0x912   : > { %v5555_v24 = vpop.f32.mrb[12].mxu0 }
 0x913   : > { %v5198_v39 = vadd.f32 %v5555_v24, %v14302_v5  ;;  %v5192_v61 = vpop.f32.mrb[13].mxu0 }
 0x914   : > { %v5193_v22 = vadd.f32 %v14302_v5, %v5192_v61 }
 0x915   : > { %5304 = vst.msk [vmem:[%s14307_s8 + $0x68] sm:$0xff] %vm2175_vm3, %v5198_v39 }
 0x916   : > { %5303 = vst.msk [vmem:[%s14307_s8 + $0x60] sm:$0xff] %vm2175_vm3, %v5193_v22 }
 0x93a   : > { %v5558_v6 = vpop.f32.mrb[14].mxu0 }
 0x93b   : > { %v5208_v33 = vadd.f32 %v5558_v6, %v14302_v5  ;;  %v5202_v17 = vpop.f32.mrb[15].mxu0 }
 0x93c   : > { %v5203_v41 = vadd.f32 %v14302_v5, %v5202_v17 }
 0x93d   : > { %5306 = vst.msk [vmem:[%s14307_s8 + $0x78] sm:$0xff] %vm2175_vm3, %v5208_v33 }
 0x93e   : > { %5305 = vst.msk [vmem:[%s14307_s8 + $0x70] sm:$0xff] %vm2175_vm3, %v5203_v41  ;;  %v5582_v14 = vpop.f32.mrb[14].mxu1 }
 0x93f   : > { %v5288_v26 = vadd.f32 %v5582_v14, %v14302_v5  ;;  %v5282_v54 = vpop.f32.mrb[15].mxu1 }
 0x940   : > { %v5283_v4 = vadd.f32 %v14302_v5, %v5282_v54 }
 0x941   : > { %5322 = vst.msk [vmem:[%s14307_s8 + $0xf8] sm:$0xff] %vm2175_vm3, %v5288_v26 }
 0x942   : > { %5321 = vst.msk [vmem:[%s14307_s8 + $0xf0] sm:$0xff] %vm2175_vm3, %v5283_v4 }
 0x943   : > { %5901 = shalt.err (!%p5898_p5)
}
 0x944   : > { %s5902_s29 = scalar_lea.hbm %s14402_s18, 4096  ;;  %s5906_s4 = scalar_lea.hbm %s14463_s3, 8192 }
 0x945   : > { %p5903_p6 = scmp.ne.s32.totalorder %s14402_s18, %s5902_s29  ;;  %p5907_p10 = scmp.lt.u32.totalorder %s14402_s18, %s14463_s3 }
 0x946   : > { %p5908_p11 = scmp.lt.u32.totalorder %s5906_s4, %s5902_s29  ;;  %p5910_p13 = scmp.lt.u32.totalorder %s5902_s29, %s14402_s18 }
 0x947   : > { %p5904_p7 = pnand %p5903_p6, %p6047_p4 }
 0x948   : > { %p5909_p12 = por %p5908_p11, %p5907_p10 }
 0x949   : > { %p5905_p9 = pneg %p5904_p7 }
 0x94a   : > { %p5911_p0 = por %p5910_p13, %p5909_p12 }
 0x94c   : > { %p5912_p1 = pnand %p5911_p0, %p5905_p9 }
 0x94e   : > { %5915 = shalt.err (!%p5912_p1)
}
 0x94f   : > { %s5986_s8 = smov 128  }
 0x950   : > { %5628 = dma.vmem_to_hbm [thread:$0]  (%p6047_p4), %s14405_s10, 4096, %s14402_s18, %s14413_s15, %s5986_s8, %s5986_s8, %s5969_s5  }
 0x951 PF: > { %p5634_p2 = scmp.ge.s32.totalorder %s5966_s17, 2  ;;  %s5354_s9 = sand.u32 1, %s5946_s12  }
 0x952   : > { %s5355_s11 = scalar_lea.sflag [#allocation3], %s5354_s9 }
 0x953   : > { %p5631_p3 = pnand %p5634_p2, %p6054_p8 }
 0x955   : > { %5941 = dma.done.wait (!%p5631_p3), %s5355_s11, 4096  }
 0x956   : > { %5943 = vsyncadd (!%p5631_p3), %s5355_s11, 4294963200  ;;  %s16_s17 = sadd.s32 1, %s5966_s17   ;;  %s17355_s12 = smov %s5950_s13 }
 0x957   : > { %p13_p5 = scmp.ge.s32.totalorder %s16_s17, 4   ;;  %s17356_s13 = smov %s5954_s14 }
 0x958   : > { %s17357_s14 = smov %s6060_s25  ;;  %s17358_s15 = smov %s5962_s16 }
 0x959   : > { %s17359_s16 = smov %s17361_s20  ;;  %15 = sbr.rel (!%p13_p5) target bundleno = 4 (0x4), region = 68 }
 0x960   :  { %5360 = vsyncpa [#allocation3], 1 }
 0x961   :  { %5362 = vsyncpa [#allocation3 + $0x1], 1 }

</bundles_post_ra>
